<compile_context>
chip_gen: v7x
topology: tpu7x:2x2x1
jax: 0.10.0
libtpu: 0.0.40
codegen_flags: <defaults>
</compile_context>

<pallas_src>
import jax
import jax.numpy as jnp
from jax.experimental import pallas as pl
from jax.experimental.pallas import tpu as pltpu

BN_EPS = 1e-5


def _round_up(x, m):
    return (x + m - 1) // m * m


# --------------------------------------------------------------------------
# Kernel
# --------------------------------------------------------------------------
def make_cross_dense_kernel(meta, off):
    n_cat = meta["n_cat"]
    C = meta["C"]
    n_lin = meta["n_lin"]
    cross_depth = meta["cross_depth"]

    def kernel(x_cat_ref, x_cont_ref, slab_ref, out_ref):
        tb = x_cat_ref.shape[0]

        def blk(name):
            r0, r = off[name]
            # Full 128-lane-wide row slice: no sub-lane column slicing of the slab.
            return slab_ref[pl.ds(r0, r), :]

        idx_g = x_cat_ref[...].astype(jnp.float32)   # (TB, n_cat) globalized ids (< 2^24: exact)
        x_cont = x_cont_ref[...]                     # (TB, n_cont) f32

        # ---- multi-hot in ONE compare pass --------------------------------
        # target[b, p] = globalized id of lane p's own categorical column.
        target = jnp.dot(idx_g, blk("sel").astype(jnp.float32),
                         preferred_element_type=jnp.float32)           # (TB, C)
        lane_idx = jax.lax.broadcasted_iota(jnp.int32, (tb, C), 1).astype(jnp.float32)
        oh = (jnp.abs(lane_idx - target) < 0.5).astype(jnp.float32).astype(jnp.bfloat16)

        # x = [emb(x_cat) | BN(x_cont)] with no lane-axis concat:
        #   emb lands in cols [0, n_emb), folded BN affine in cols [n_emb, d); rest 0.
        x = (jnp.dot(oh, blk("emb"), preferred_element_type=jnp.float32)
             + jnp.dot(x_cont.astype(jnp.bfloat16), blk("bn_proj"),
                       preferred_element_type=jnp.float32)
             + blk("bn_shift").astype(jnp.float32))                    # (TB, C) f32

        # ---- deep tower: dropout(relu(Linear(.))); dropout = identity (eval) ----
        x_dnn = x
        for li in range(n_lin):
            h = jnp.dot(x_dnn.astype(jnp.bfloat16), blk(f"w{li}"),
                        preferred_element_type=jnp.float32)
            x_dnn = jnp.maximum(h + blk(f"b{li}").astype(jnp.float32), 0.0)

        # ---- cross network: xl = x0 * (xl . w_i) + b_i + xl ----
        # TODO(synk): PyTorch's bias2 is (d,1) added to (B,d), which only
        # broadcasts when B == d; it is applied here (and in the reference) as a
        # (1,d) row broadcast (exact for the zero-initialized bias).
        wc = blk("cross_w").astype(jnp.float32)
        cb = blk("cross_b").astype(jnp.float32)
        x0 = x
        xl = x
        for i in range(cross_depth):
            s = jnp.sum(xl * wc[i:i + 1], axis=-1, keepdims=True)      # (TB, 1)
            xl = x0 * s + cb[i:i + 1] + xl

        # ---- head: split matmul (no concat) + 2-way log_softmax ----
        logits_full = (jnp.dot(x_dnn.astype(jnp.bfloat16), blk("out_w_dnn"),
                               preferred_element_type=jnp.float32)
                       + jnp.dot(xl.astype(jnp.bfloat16), blk("out_w_cross"),
                                 preferred_element_type=jnp.float32)
                       + blk("out_b").astype(jnp.float32))             # (TB, C); cols >= 2 are 0
        logits = logits_full[:, :2]
        m = jnp.max(logits, axis=-1, keepdims=True)
        lse = jnp.log(jnp.sum(jnp.exp(logits - m), axis=-1, keepdims=True)) + m
        out_ref[...] = (logits - lse).astype(out_ref.dtype)

    return kernel


# --------------------------------------------------------------------------
# Host-side parameter packing (layout plumbing, done once)
# --------------------------------------------------------------------------
def pack_forward_params(params, bn_eps=BN_EPS, lane=128):
    embs = params["embs"]
    cat_sizes = [int(t.shape[0]) for t in embs]
    emb_dims = [int(t.shape[1]) for t in embs]
    n_cat = len(embs)
    n_emb = sum(emb_dims)
    n_cont = int(params["bn_gamma"].shape[1])
    d = n_emb + n_cont
    sum_c = sum(cat_sizes)
    szs = [int(w.shape[0]) for w in params["lin_w"]]
    n_lin = len(szs)
    cross_depth = int(params["cross_w"].shape[0])

    # f32 lane indices / global ids are only exact below 2^24 total vocab rows.
    assert sum_c < (1 << 24), "use the HBM-gather embedding path for this vocab"

    # One lane width for every block so the kernel never column-slices the slab.
    C = _round_up(max([sum_c, d, 2] + szs), lane)

    cat_offsets, acc = [], 0
    for c in cat_sizes:
        cat_offsets.append(acc)
        acc += c

    def fullw(m):            # zero-pad columns to the slab lane width
        m = jnp.asarray(m, jnp.float32)
        return jnp.pad(m, ((0, 0), (0, C - m.shape[1])))

    def pad_rows_to(m, rows):
        return jnp.pad(m, ((0, rows - m.shape[0]), (0, 0)))

    mats = {}                # name -> (array with C cols, rows sliced by kernel)

    # Segment selector: sel[j, p] = 1 iff lane p belongs to categorical column j.
    sel = jnp.zeros((n_cat, C), jnp.float32)
    for j, (o, c) in enumerate(zip(cat_offsets, cat_sizes)):
        sel = sel.at[j, o:o + c].set(1.0)
    mats["sel"] = (sel, n_cat)

    # Block-diagonal embedding table; K padded to C (multi-hot lane width).
    E = jnp.zeros((C, C), jnp.float32)
    r0, c0 = 0, 0
    for t in embs:
        c, s = t.shape
        E = E.at[r0:r0 + c, c0:c0 + s].set(jnp.asarray(t, jnp.float32))
        r0 += c
        c0 += s
    mats["emb"] = (E, C)

    # Eval-mode BatchNorm1d folded into an affine map into columns [n_emb, d).
    scale = params["bn_gamma"][0] * jax.lax.rsqrt(params["bn_var"][0] + bn_eps)
    shift = params["bn_beta"][0] - params["bn_mean"][0] * scale
    P = jnp.zeros((n_cont, C), jnp.float32)
    P = P.at[jnp.arange(n_cont), n_emb + jnp.arange(n_cont)].set(scale)
    mats["bn_proj"] = (P, n_cont)
    mats["bn_shift"] = (jnp.zeros((1, C), jnp.float32).at[0, n_emb:d].set(shift), 1)

    # Deep tower: weights pre-transposed to (in, out), K padded to C.
    for li, (w, b) in enumerate(zip(params["lin_w"], params["lin_b"])):
        wt = pad_rows_to(fullw(jnp.asarray(w, jnp.float32).T), C)      # (C, C)
        mats[f"w{li}"] = (wt, C)
        mats[f"b{li}"] = (fullw(jnp.asarray(b, jnp.float32).reshape(1, -1)), 1)

    mats["cross_w"] = (fullw(params["cross_w"]), _round_up(cross_depth, 8))
    mats["cross_b"] = (fullw(params["cross_b"]), _round_up(cross_depth, 8))

    szs_last = szs[-1]
    wo = jnp.asarray(params["out_w"], jnp.float32)                     # (2, szs_last + d)
    mats["out_w_dnn"] = (pad_rows_to(fullw(wo[:, :szs_last].T), C), C)
    mats["out_w_cross"] = (pad_rows_to(fullw(wo[:, szs_last:].T), C), C)
    mats["out_b"] = (fullw(jnp.asarray(params["out_b"], jnp.float32).reshape(1, -1)), 1)

    # Pack into ONE sublane-aligned bf16 slab -> a single resident broadcast DMA.
    off, blocks, row = {}, [], 0
    for name, (m, use_rows) in mats.items():
        rp = _round_up(m.shape[0], 8)
        off[name] = (row, use_rows)
        blocks.append(pad_rows_to(m, rp))
        row += rp
    slab = jnp.concatenate(blocks, axis=0).astype(jnp.bfloat16)        # (rows, C) bf16

    meta = dict(n_cat=n_cat, cat_sizes=cat_sizes, cat_offsets=cat_offsets,
                sum_c=sum_c, n_cont=n_cont, d=d, C=C, n_lin=n_lin,
                cross_depth=cross_depth)
    return dict(slab=slab, off=off, meta=meta)


# --------------------------------------------------------------------------
# Forward pass
# --------------------------------------------------------------------------
def cross_dense_forward(x_cat, x_cont, packed, tb=512):
    """Entire forward in one pallas_call; batch tiled TB rows per grid step.

    tb: multiple of 256 on v6e/v7x (MXU M dim), 128 on v5e.  After raising TB,
    keep grid steps >= 2x the number of TensorCores (v7x) so both TCs stay busy.
    """
    meta, off, slab = packed["meta"], packed["off"], packed["slab"]
    B = x_cat.shape[0]
    n_cat, n_cont, C = meta["n_cat"], meta["n_cont"], meta["C"]
    n_lin, cross_depth = meta["n_lin"], meta["cross_depth"]

    # Clamp ids to the valid vocab range and fold per-column vocab offsets
    # host-side so the kernel sees "globalized" row ids (one tiny XLA op).
    sizes = jnp.asarray(meta["cat_sizes"], jnp.int32).reshape(1, n_cat)
    offs = jnp.asarray(meta["cat_offsets"], jnp.int32).reshape(1, n_cat)
    x_cat_g = jnp.clip(x_cat.astype(jnp.int32), 0, sizes - 1) + offs
    x_cont = x_cont.astype(jnp.float32)

    b_pad = _round_up(max(B, 1), tb)
    if b_pad != B:
        x_cat_g = jnp.pad(x_cat_g, ((0, b_pad - B), (0, 0)))   # padded rows -> valid id 0
        x_cont = jnp.pad(x_cont, ((0, b_pad - B), (0, 0)))
    grid = (b_pad // tb,)

    kernel = make_cross_dense_kernel(meta, off)

    # Advisory cost estimate (padded matmul shapes) for the XLA scheduler.
    flops_per_row = 2 * C * (n_cat + C + n_cont + n_lin * C + 2 * C) + 4 * cross_depth * C
    slab_bytes = int(slab.size) * int(slab.dtype.itemsize)
    cost = pl.CostEstimate(
        flops=int(flops_per_row) * int(b_pad),
        transcendentals=3 * int(b_pad),
        bytes_accessed=slab_bytes + int(x_cat_g.size) * 4
                       + int(x_cont.size) * 4 + int(b_pad) * 2 * 4)

    # Explicit VMEM budget: slab (x2 worst case) + activation tiles + headroom,
    # clamped well under the 64 MiB physical VMEM of v7x.
    vmem_budget = int(min(56 << 20,
                          max(16 << 20, 2 * slab_bytes + 16 * tb * C * 4 + (8 << 20))))

    def run(single_buffer_slab):
        slab_kwargs = {}
        if single_buffer_slab:
            # Resident weights: constant block index -> no re-DMA; pin to ONE
            # VMEM buffer instead of the default double buffer (halves slab VMEM).
            slab_kwargs = dict(pipeline_mode=pl.Buffered(1))
        return pl.pallas_call(
            kernel,
            out_shape=jax.ShapeDtypeStruct((b_pad, 2), jnp.float32),
            grid=grid,
            in_specs=[
                pl.BlockSpec((tb, n_cat), lambda i: (i, 0)),    # globalized ids
                pl.BlockSpec((tb, n_cont), lambda i: (i, 0)),   # continuous feats
                pl.BlockSpec(slab.shape, lambda i: (0, 0), **slab_kwargs),
            ],
            out_specs=pl.BlockSpec((tb, 2), lambda i: (i, 0)),
            compiler_params=pltpu.CompilerParams(
                dimension_semantics=("parallel",),              # v7x: both TensorCores
                vmem_limit_bytes=vmem_budget),
            cost_estimate=cost,
        )(x_cat_g, x_cont, slab)

    try:
        out = jax.block_until_ready(run(True))
    except Exception:
        # TODO(synk): pipeline_mode=pl.Buffered(1) unsupported on this jax
        # version; fall back to the default double-buffered resident slab.
        out = run(False)
    return out[:B]


# --------------------------------------------------------------------------
# Parameter init (mirrors the PyTorch module's init) and pure-JAX reference
# --------------------------------------------------------------------------
def init_params(key, emb_szs, n_cont, szs, cross_depth):
    keys = iter(jax.random.split(key, 64))
    embs = []
    for c, s in emb_szs:
        sc = 2.0 / (s + 1)                                    # emb_init
        embs.append(jax.random.uniform(next(keys), (c, s), jnp.float32, -sc, sc))
    n_emb = sum(s for _, s in emb_szs)
    d = n_emb + n_cont
    dims = [d] + list(szs)

    lin_w, lin_b = [], []
    for i in range(len(dims) - 1):
        fan_in, fan_out = dims[i], dims[i + 1]
        std = (2.0 / fan_in) ** 0.5                           # kaiming_normal
        lin_w.append(std * jax.random.normal(next(keys), (fan_out, fan_in), jnp.float32))
        bound = 1.0 / fan_in ** 0.5
        lin_b.append(jax.random.uniform(next(keys), (1, fan_out), jnp.float32, -bound, bound))

    bound = 1.0 / d ** 0.5
    cross_w = jnp.stack([jax.random.uniform(next(keys), (d,), jnp.float32, -bound, bound)
                         for _ in range(cross_depth)])        # (depth, d)
    cross_b = jnp.zeros((cross_depth, d), jnp.float32)        # bias2 init: zeros

    head_in = d + dims[-1]
    bound = 1.0 / head_in ** 0.5
    out_w = jax.random.uniform(next(keys), (2, head_in), jnp.float32, -bound, bound)
    out_b = jax.random.uniform(next(keys), (1, 2), jnp.float32, -bound, bound)

    return dict(
        embs=embs, lin_w=lin_w, lin_b=lin_b,
        cross_w=cross_w, cross_b=cross_b, out_w=out_w, out_b=out_b,
        bn_gamma=jnp.ones((1, n_cont), jnp.float32),
        bn_beta=jnp.zeros((1, n_cont), jnp.float32),
        bn_mean=jnp.zeros((1, n_cont), jnp.float32),
        bn_var=jnp.ones((1, n_cont), jnp.float32),
    )


def reference_forward(x_cat, x_cont, params):
    """Pure-JAX (f32) reference of the same forward pass."""
    x_emb = jnp.concatenate(
        [tbl[x_cat[:, j]] for j, tbl in enumerate(params["embs"])], axis=1)
    x2 = ((x_cont - params["bn_mean"]) / jnp.sqrt(params["bn_var"] + BN_EPS)
          * params["bn_gamma"] + params["bn_beta"])
    x = jnp.concatenate([x_emb, x2], axis=1)
    x_dnn = x
    for w, b in zip(params["lin_w"], params["lin_b"]):
        x_dnn = jnp.maximum(x_dnn @ w.T + b, 0.0)
    x0 = xl = x
    for i in range(params["cross_w"].shape[0]):
        s = xl @ params["cross_w"][i]
        xl = x0 * s[:, None] + params["cross_b"][i][None, :] + xl
    logits = jnp.concatenate([x_dnn, xl], axis=1) @ params["out_w"].T + params["out_b"]
    return jax.nn.log_softmax(logits, axis=1)


if __name__ == "__main__":
    key = jax.random.PRNGKey(0)
    k_params, k_cat, k_cont = jax.random.split(key, 3)

    # Small synthetic configuration.
    emb_szs = [(10, 4), (8, 3), (6, 5)]      # n_emb = 12
    n_cont = 4                               # d = n_emb + n_cont = 16
    szs = [32, 16]                           # deep tower widths
    cross_depth = 6
    B = 8

    params = init_params(k_params, emb_szs, n_cont, szs, cross_depth)
    packed = pack_forward_params(params)     # one-time host-side layout plumbing

    cat_cols = []
    kk = jax.random.split(k_cat, len(emb_szs))
    for j, (c, _) in enumerate(emb_szs):
        cat_cols.append(jax.random.randint(kk[j], (B,), 0, c, dtype=jnp.int32))
    x_cat = jnp.stack(cat_cols, axis=1)                       # (B, 3) int32
    x_cont = jax.random.normal(k_cont, (B, n_cont), jnp.float32)

    out = cross_dense_forward(x_cat, x_cont, packed, tb=256)
    out = jax.block_until_ready(out)

    ref = reference_forward(x_cat, x_cont, params)
    assert out.shape == (B, 2)
    # bf16 weight/activation storage -> compare to the f32 reference with a
    # correspondingly relaxed tolerance; also sanity-check the softmax rows.
    assert jnp.all(jnp.isfinite(out))
    assert jnp.allclose(jnp.sum(jnp.exp(out), axis=1), 1.0, atol=1e-3)
    assert jnp.allclose(out, ref, atol=5e-2, rtol=5e-2), (out, ref)

    print("KERNEL_OK")
</pallas_src>

<mosaic_0001>
module attributes {stable_mosaic.version = 11 : i64} {
  func.func @kernel(%arg0: i32, %arg1: memref<256x3xi32, #tpu.memory_space<vmem>>, %arg2: memref<256x4xf32, #tpu.memory_space<vmem>>, %arg3: memref<704x128xbf16, #tpu.memory_space<vmem>>, %arg4: memref<256x2xf32, #tpu.memory_space<vmem>>) attributes {dimension_semantics = [#tpu.dimension_semantics<parallel>], iteration_bounds = array<i64: 1>, scalar_prefetch = 0 : i64, scratch_operands = 0 : i64, tpu.core_type = #tpu.core_type<tc>, window_params = [{transform_indices = @transform_0, window_bounds = array<i64: 256, 3>}, {transform_indices = @transform_1, window_bounds = array<i64: 256, 4>}, {pipeline_mode = #tpu.pipeline_mode<synchronous>, transform_indices = @transform_2, window_bounds = array<i64: 704, 128>}, {transform_indices = @transform_3, window_bounds = array<i64: 256, 2>}]} {
    %c0 = arith.constant 0 : index
    %c0_0 = arith.constant 0 : index
    %0 = vector.load %arg1[%c0, %c0_0] : memref<256x3xi32, #tpu.memory_space<vmem>>, vector<256x3xi32>
    %1 = arith.sitofp %0 : vector<256x3xi32> to vector<256x3xf32>
    %c0_1 = arith.constant 0 : index
    %c0_2 = arith.constant 0 : index
    %2 = vector.load %arg2[%c0_1, %c0_2] : memref<256x4xf32, #tpu.memory_space<vmem>>, vector<256x4xf32>
    %c0_3 = arith.constant 0 : index
    %c0_4 = arith.constant 0 : index
    %3 = vector.load %arg3[%c0_3, %c0_4] : memref<704x128xbf16, #tpu.memory_space<vmem>>, vector<3x128xbf16>
    %4 = arith.extf %3 : vector<3x128xbf16> to vector<3x128xf32>
    %cst = arith.constant dense<0.000000e+00> : vector<256x128xf32>
    %5 = tpu.matmul %1, %4, %cst {dimension_numbers = #tpu.dot_dimension_numbers<[1], [0], [0], [1], [0, 0, 1, 1], [], []>} : vector<256x3xf32>, vector<3x128xf32>, vector<256x128xf32> -> vector<256x128xf32>
    %6 = tpu.iota {dimensions = array<i32: 1>} : vector<256x128xi32>
    %7 = arith.sitofp %6 : vector<256x128xi32> to vector<256x128xf32>
    %8 = arith.subf %7, %5 : vector<256x128xf32>
    %9 = math.absf %8 : vector<256x128xf32>
    %cst_5 = arith.constant 5.000000e-01 : f32
    %10 = vector.broadcast %cst_5 : f32 to vector<256x128xf32>
    %11 = arith.cmpf olt, %9, %10 : vector<256x128xf32>
    %12 = arith.extui %11 : vector<256x128xi1> to vector<256x128xi32>
    %13 = arith.sitofp %12 : vector<256x128xi32> to vector<256x128xf32>
    %14 = arith.truncf %13 : vector<256x128xf32> to vector<256x128xbf16>
    %c8 = arith.constant 8 : index
    %c0_6 = arith.constant 0 : index
    %15 = vector.load %arg3[%c8, %c0_6] : memref<704x128xbf16, #tpu.memory_space<vmem>>, vector<128x128xbf16>
    %cst_7 = arith.constant dense<0.000000e+00> : vector<256x128xf32>
    %16 = tpu.matmul %14, %15, %cst_7 {dimension_numbers = #tpu.dot_dimension_numbers<[1], [0], [0], [1], [0, 0, 1, 1], [], []>} : vector<256x128xbf16>, vector<128x128xbf16>, vector<256x128xf32> -> vector<256x128xf32>
    %17 = arith.truncf %2 : vector<256x4xf32> to vector<256x4xbf16>
    %c136 = arith.constant 136 : index
    %c0_8 = arith.constant 0 : index
    %18 = vector.load %arg3[%c136, %c0_8] : memref<704x128xbf16, #tpu.memory_space<vmem>>, vector<4x128xbf16>
    %cst_9 = arith.constant dense<0.000000e+00> : vector<256x128xf32>
    %19 = tpu.matmul %17, %18, %cst_9 {dimension_numbers = #tpu.dot_dimension_numbers<[1], [0], [0], [1], [0, 0, 1, 1], [], []>} : vector<256x4xbf16>, vector<4x128xbf16>, vector<256x128xf32> -> vector<256x128xf32>
    %20 = arith.addf %16, %19 : vector<256x128xf32>
    %c144 = arith.constant 144 : index
    %c0_10 = arith.constant 0 : index
    %21 = vector.load %arg3[%c144, %c0_10] : memref<704x128xbf16, #tpu.memory_space<vmem>>, vector<1x128xbf16>
    %22 = arith.extf %21 : vector<1x128xbf16> to vector<1x128xf32>
    %23 = vector.broadcast %22 : vector<1x128xf32> to vector<256x128xf32>
    %24 = arith.addf %20, %23 : vector<256x128xf32>
    %25 = arith.truncf %24 : vector<256x128xf32> to vector<256x128xbf16>
    %c152 = arith.constant 152 : index
    %c0_11 = arith.constant 0 : index
    %26 = vector.load %arg3[%c152, %c0_11] : memref<704x128xbf16, #tpu.memory_space<vmem>>, vector<128x128xbf16>
    %cst_12 = arith.constant dense<0.000000e+00> : vector<256x128xf32>
    %27 = tpu.matmul %25, %26, %cst_12 {dimension_numbers = #tpu.dot_dimension_numbers<[1], [0], [0], [1], [0, 0, 1, 1], [], []>} : vector<256x128xbf16>, vector<128x128xbf16>, vector<256x128xf32> -> vector<256x128xf32>
    %c280 = arith.constant 280 : index
    %c0_13 = arith.constant 0 : index
    %28 = vector.load %arg3[%c280, %c0_13] : memref<704x128xbf16, #tpu.memory_space<vmem>>, vector<1x128xbf16>
    %29 = arith.extf %28 : vector<1x128xbf16> to vector<1x128xf32>
    %30 = vector.broadcast %29 : vector<1x128xf32> to vector<256x128xf32>
    %31 = arith.addf %27, %30 : vector<256x128xf32>
    %cst_14 = arith.constant 0.000000e+00 : f32
    %32 = vector.broadcast %cst_14 : f32 to vector<256x128xf32>
    %33 = arith.maximumf %31, %32 : vector<256x128xf32>
    %34 = arith.truncf %33 : vector<256x128xf32> to vector<256x128xbf16>
    %c288 = arith.constant 288 : index
    %c0_15 = arith.constant 0 : index
    %35 = vector.load %arg3[%c288, %c0_15] : memref<704x128xbf16, #tpu.memory_space<vmem>>, vector<128x128xbf16>
    %cst_16 = arith.constant dense<0.000000e+00> : vector<256x128xf32>
    %36 = tpu.matmul %34, %35, %cst_16 {dimension_numbers = #tpu.dot_dimension_numbers<[1], [0], [0], [1], [0, 0, 1, 1], [], []>} : vector<256x128xbf16>, vector<128x128xbf16>, vector<256x128xf32> -> vector<256x128xf32>
    %c416 = arith.constant 416 : index
    %c0_17 = arith.constant 0 : index
    %37 = vector.load %arg3[%c416, %c0_17] : memref<704x128xbf16, #tpu.memory_space<vmem>>, vector<1x128xbf16>
    %38 = arith.extf %37 : vector<1x128xbf16> to vector<1x128xf32>
    %39 = vector.broadcast %38 : vector<1x128xf32> to vector<256x128xf32>
    %40 = arith.addf %36, %39 : vector<256x128xf32>
    %cst_18 = arith.constant 0.000000e+00 : f32
    %41 = vector.broadcast %cst_18 : f32 to vector<256x128xf32>
    %42 = arith.maximumf %40, %41 : vector<256x128xf32>
    %c424 = arith.constant 424 : index
    %c0_19 = arith.constant 0 : index
    %43 = vector.load %arg3[%c424, %c0_19] : memref<704x128xbf16, #tpu.memory_space<vmem>>, vector<8x128xbf16>
    %44 = arith.extf %43 : vector<8x128xbf16> to vector<8x128xf32>
    %c432 = arith.constant 432 : index
    %c0_20 = arith.constant 0 : index
    %45 = vector.load %arg3[%c432, %c0_20] : memref<704x128xbf16, #tpu.memory_space<vmem>>, vector<8x128xbf16>
    %46 = arith.extf %45 : vector<8x128xbf16> to vector<8x128xf32>
    %47 = vector.extract_strided_slice %44 {offsets = [0, 0], sizes = [1, 128], strides = [1, 1]} : vector<8x128xf32> to vector<1x128xf32>
    %48 = vector.broadcast %47 : vector<1x128xf32> to vector<256x128xf32>
    %49 = arith.mulf %24, %48 : vector<256x128xf32>
    %cst_21 = arith.constant dense<0.000000e+00> : vector<256xf32>
    %50 = vector.multi_reduction <add>, %49, %cst_21 [1] : vector<256x128xf32> to vector<256xf32>
    %51 = vector.shape_cast %50 : vector<256xf32> to vector<256x1xf32>
    %52 = vector.broadcast %51 : vector<256x1xf32> to vector<256x128xf32>
    %53 = arith.mulf %24, %52 : vector<256x128xf32>
    %54 = vector.extract_strided_slice %46 {offsets = [0, 0], sizes = [1, 128], strides = [1, 1]} : vector<8x128xf32> to vector<1x128xf32>
    %55 = vector.broadcast %54 : vector<1x128xf32> to vector<256x128xf32>
    %56 = arith.addf %53, %55 : vector<256x128xf32>
    %57 = arith.addf %56, %24 : vector<256x128xf32>
    %58 = vector.extract_strided_slice %44 {offsets = [1, 0], sizes = [1, 128], strides = [1, 1]} : vector<8x128xf32> to vector<1x128xf32>
    %59 = vector.broadcast %58 : vector<1x128xf32> to vector<256x128xf32>
    %60 = arith.mulf %57, %59 : vector<256x128xf32>
    %cst_22 = arith.constant dense<0.000000e+00> : vector<256xf32>
    %61 = vector.multi_reduction <add>, %60, %cst_22 [1] : vector<256x128xf32> to vector<256xf32>
    %62 = vector.shape_cast %61 : vector<256xf32> to vector<256x1xf32>
    %63 = vector.broadcast %62 : vector<256x1xf32> to vector<256x128xf32>
    %64 = arith.mulf %24, %63 : vector<256x128xf32>
    %65 = vector.extract_strided_slice %46 {offsets = [1, 0], sizes = [1, 128], strides = [1, 1]} : vector<8x128xf32> to vector<1x128xf32>
    %66 = vector.broadcast %65 : vector<1x128xf32> to vector<256x128xf32>
    %67 = arith.addf %64, %66 : vector<256x128xf32>
    %68 = arith.addf %67, %57 : vector<256x128xf32>
    %69 = vector.extract_strided_slice %44 {offsets = [2, 0], sizes = [1, 128], strides = [1, 1]} : vector<8x128xf32> to vector<1x128xf32>
    %70 = vector.broadcast %69 : vector<1x128xf32> to vector<256x128xf32>
    %71 = arith.mulf %68, %70 : vector<256x128xf32>
    %cst_23 = arith.constant dense<0.000000e+00> : vector<256xf32>
    %72 = vector.multi_reduction <add>, %71, %cst_23 [1] : vector<256x128xf32> to vector<256xf32>
    %73 = vector.shape_cast %72 : vector<256xf32> to vector<256x1xf32>
    %74 = vector.broadcast %73 : vector<256x1xf32> to vector<256x128xf32>
    %75 = arith.mulf %24, %74 : vector<256x128xf32>
    %76 = vector.extract_strided_slice %46 {offsets = [2, 0], sizes = [1, 128], strides = [1, 1]} : vector<8x128xf32> to vector<1x128xf32>
    %77 = vector.broadcast %76 : vector<1x128xf32> to vector<256x128xf32>
    %78 = arith.addf %75, %77 : vector<256x128xf32>
    %79 = arith.addf %78, %68 : vector<256x128xf32>
    %80 = vector.extract_strided_slice %44 {offsets = [3, 0], sizes = [1, 128], strides = [1, 1]} : vector<8x128xf32> to vector<1x128xf32>
    %81 = vector.broadcast %80 : vector<1x128xf32> to vector<256x128xf32>
    %82 = arith.mulf %79, %81 : vector<256x128xf32>
    %cst_24 = arith.constant dense<0.000000e+00> : vector<256xf32>
    %83 = vector.multi_reduction <add>, %82, %cst_24 [1] : vector<256x128xf32> to vector<256xf32>
    %84 = vector.shape_cast %83 : vector<256xf32> to vector<256x1xf32>
    %85 = vector.broadcast %84 : vector<256x1xf32> to vector<256x128xf32>
    %86 = arith.mulf %24, %85 : vector<256x128xf32>
    %87 = vector.extract_strided_slice %46 {offsets = [3, 0], sizes = [1, 128], strides = [1, 1]} : vector<8x128xf32> to vector<1x128xf32>
    %88 = vector.broadcast %87 : vector<1x128xf32> to vector<256x128xf32>
    %89 = arith.addf %86, %88 : vector<256x128xf32>
    %90 = arith.addf %89, %79 : vector<256x128xf32>
    %91 = vector.extract_strided_slice %44 {offsets = [4, 0], sizes = [1, 128], strides = [1, 1]} : vector<8x128xf32> to vector<1x128xf32>
    %92 = vector.broadcast %91 : vector<1x128xf32> to vector<256x128xf32>
    %93 = arith.mulf %90, %92 : vector<256x128xf32>
    %cst_25 = arith.constant dense<0.000000e+00> : vector<256xf32>
    %94 = vector.multi_reduction <add>, %93, %cst_25 [1] : vector<256x128xf32> to vector<256xf32>
    %95 = vector.shape_cast %94 : vector<256xf32> to vector<256x1xf32>
    %96 = vector.broadcast %95 : vector<256x1xf32> to vector<256x128xf32>
    %97 = arith.mulf %24, %96 : vector<256x128xf32>
    %98 = vector.extract_strided_slice %46 {offsets = [4, 0], sizes = [1, 128], strides = [1, 1]} : vector<8x128xf32> to vector<1x128xf32>
    %99 = vector.broadcast %98 : vector<1x128xf32> to vector<256x128xf32>
    %100 = arith.addf %97, %99 : vector<256x128xf32>
    %101 = arith.addf %100, %90 : vector<256x128xf32>
    %102 = vector.extract_strided_slice %44 {offsets = [5, 0], sizes = [1, 128], strides = [1, 1]} : vector<8x128xf32> to vector<1x128xf32>
    %103 = vector.broadcast %102 : vector<1x128xf32> to vector<256x128xf32>
    %104 = arith.mulf %101, %103 : vector<256x128xf32>
    %cst_26 = arith.constant dense<0.000000e+00> : vector<256xf32>
    %105 = vector.multi_reduction <add>, %104, %cst_26 [1] : vector<256x128xf32> to vector<256xf32>
    %106 = vector.shape_cast %105 : vector<256xf32> to vector<256x1xf32>
    %107 = vector.broadcast %106 : vector<256x1xf32> to vector<256x128xf32>
    %108 = arith.mulf %24, %107 : vector<256x128xf32>
    %109 = vector.extract_strided_slice %46 {offsets = [5, 0], sizes = [1, 128], strides = [1, 1]} : vector<8x128xf32> to vector<1x128xf32>
    %110 = vector.broadcast %109 : vector<1x128xf32> to vector<256x128xf32>
    %111 = arith.addf %108, %110 : vector<256x128xf32>
    %112 = arith.addf %111, %101 : vector<256x128xf32>
    %113 = arith.truncf %42 : vector<256x128xf32> to vector<256x128xbf16>
    %c440 = arith.constant 440 : index
    %c0_27 = arith.constant 0 : index
    %114 = vector.load %arg3[%c440, %c0_27] : memref<704x128xbf16, #tpu.memory_space<vmem>>, vector<128x128xbf16>
    %cst_28 = arith.constant dense<0.000000e+00> : vector<256x128xf32>
    %115 = tpu.matmul %113, %114, %cst_28 {dimension_numbers = #tpu.dot_dimension_numbers<[1], [0], [0], [1], [0, 0, 1, 1], [], []>} : vector<256x128xbf16>, vector<128x128xbf16>, vector<256x128xf32> -> vector<256x128xf32>
    %116 = arith.truncf %112 : vector<256x128xf32> to vector<256x128xbf16>
    %c568 = arith.constant 568 : index
    %c0_29 = arith.constant 0 : index
    %117 = vector.load %arg3[%c568, %c0_29] : memref<704x128xbf16, #tpu.memory_space<vmem>>, vector<128x128xbf16>
    %cst_30 = arith.constant dense<0.000000e+00> : vector<256x128xf32>
    %118 = tpu.matmul %116, %117, %cst_30 {dimension_numbers = #tpu.dot_dimension_numbers<[1], [0], [0], [1], [0, 0, 1, 1], [], []>} : vector<256x128xbf16>, vector<128x128xbf16>, vector<256x128xf32> -> vector<256x128xf32>
    %119 = arith.addf %115, %118 : vector<256x128xf32>
    %c696 = arith.constant 696 : index
    %c0_31 = arith.constant 0 : index
    %120 = vector.load %arg3[%c696, %c0_31] : memref<704x128xbf16, #tpu.memory_space<vmem>>, vector<1x128xbf16>
    %121 = arith.extf %120 : vector<1x128xbf16> to vector<1x128xf32>
    %122 = vector.broadcast %121 : vector<1x128xf32> to vector<256x128xf32>
    %123 = arith.addf %119, %122 : vector<256x128xf32>
    %124 = vector.extract_strided_slice %123 {offsets = [0, 0], sizes = [256, 2], strides = [1, 1]} : vector<256x128xf32> to vector<256x2xf32>
    %cst_32 = arith.constant dense<0xFF800000> : vector<256xf32>
    %125 = vector.multi_reduction <maximumf>, %124, %cst_32 [1] : vector<256x2xf32> to vector<256xf32>
    %126 = vector.shape_cast %125 : vector<256xf32> to vector<256x1xf32>
    %127 = vector.broadcast %126 : vector<256x1xf32> to vector<256x2xf32>
    %128 = arith.subf %124, %127 : vector<256x2xf32>
    %129 = math.exp %128 : vector<256x2xf32>
    %cst_33 = arith.constant dense<0.000000e+00> : vector<256xf32>
    %130 = vector.multi_reduction <add>, %129, %cst_33 [1] : vector<256x2xf32> to vector<256xf32>
    %131 = vector.shape_cast %130 : vector<256xf32> to vector<256x1xf32>
    %132 = math.log %131 : vector<256x1xf32>
    %133 = arith.addf %132, %126 : vector<256x1xf32>
    %134 = vector.broadcast %133 : vector<256x1xf32> to vector<256x2xf32>
    %135 = arith.subf %124, %134 : vector<256x2xf32>
    %c0_34 = arith.constant 0 : index
    %c0_35 = arith.constant 0 : index
    %136 = vector.load %arg4[%c0_34, %c0_35] : memref<256x2xf32, #tpu.memory_space<vmem>>, vector<256x2xf32>
    tpu.vector_store %arg4[%c0_34, %c0_35], %135 {strides = array<i32>} : memref<256x2xf32, #tpu.memory_space<vmem>>, vector<256x2xf32>,
    return
  }
  func.func @transform_0(%arg0: i32) -> (i32, i32) {
    %c0_i32 = arith.constant 0 : i32
    %c0_i32_0 = arith.constant 0 : i32
    return %arg0, %c0_i32 : i32, i32
  }
  func.func @transform_1(%arg0: i32) -> (i32, i32) {
    %c0_i32 = arith.constant 0 : i32
    %c0_i32_0 = arith.constant 0 : i32
    return %arg0, %c0_i32 : i32, i32
  }
  func.func @transform_2(%arg0: i32) -> (i32, i32) {
    %c0_i32 = arith.constant 0 : i32
    %c0_i32_0 = arith.constant 0 : i32
    %c0_i32_1 = arith.constant 0 : i32
    return %c0_i32, %c0_i32_0 : i32, i32
  }
  func.func @transform_3(%arg0: i32) -> (i32, i32) {
    %c0_i32 = arith.constant 0 : i32
    %c0_i32_0 = arith.constant 0 : i32
    return %arg0, %c0_i32 : i32, i32
  }
}

module attributes {stable_mosaic.version = 11 : i64} {
  func.func @kernel(%arg0: i32, %arg1: memref<256x3xi32, #tpu.memory_space<vmem>>, %arg2: memref<256x4xf32, #tpu.memory_space<vmem>>, %arg3: memref<704x128xbf16, #tpu.memory_space<vmem>>, %arg4: memref<256x2xf32, #tpu.memory_space<vmem>>) attributes {dimension_semantics = [#tpu.dimension_semantics<parallel>], iteration_bounds = array<i64: 1>, scalar_prefetch = 0 : i64, scratch_operands = 0 : i64, tpu.core_type = #tpu.core_type<tc>, window_params = [{transform_indices = @transform_0, window_bounds = array<i64: 256, 3>}, {transform_indices = @transform_1, window_bounds = array<i64: 256, 4>}, {pipeline_mode = #tpu.pipeline_mode<synchronous>, transform_indices = @transform_2, window_bounds = array<i64: 704, 128>}, {transform_indices = @transform_3, window_bounds = array<i64: 256, 2>}]} {
    %c0 = arith.constant 0 : index
    %c0_0 = arith.constant 0 : index
    %0 = vector.load %arg1[%c0, %c0_0] : memref<256x3xi32, #tpu.memory_space<vmem>>, vector<256x3xi32>
    %1 = arith.sitofp %0 : vector<256x3xi32> to vector<256x3xf32>
    %c0_1 = arith.constant 0 : index
    %c0_2 = arith.constant 0 : index
    %2 = vector.load %arg2[%c0_1, %c0_2] : memref<256x4xf32, #tpu.memory_space<vmem>>, vector<256x4xf32>
    %c0_3 = arith.constant 0 : index
    %c0_4 = arith.constant 0 : index
    %3 = vector.load %arg3[%c0_3, %c0_4] : memref<704x128xbf16, #tpu.memory_space<vmem>>, vector<3x128xbf16>
    %4 = arith.extf %3 : vector<3x128xbf16> to vector<3x128xf32>
    %cst = arith.constant dense<0.000000e+00> : vector<256x128xf32>
    %5 = tpu.matmul %1, %4, %cst {dimension_numbers = #tpu.dot_dimension_numbers<[1], [0], [0], [1], [0, 0, 1, 1], [], []>} : vector<256x3xf32>, vector<3x128xf32>, vector<256x128xf32> -> vector<256x128xf32>
    %6 = tpu.iota {dimensions = array<i32: 1>} : vector<256x128xi32>
    %7 = arith.sitofp %6 : vector<256x128xi32> to vector<256x128xf32>
    %8 = arith.subf %7, %5 : vector<256x128xf32>
    %9 = math.absf %8 : vector<256x128xf32>
    %cst_5 = arith.constant 5.000000e-01 : f32
    %10 = vector.broadcast %cst_5 : f32 to vector<256x128xf32>
    %11 = arith.cmpf olt, %9, %10 : vector<256x128xf32>
    %12 = arith.extui %11 : vector<256x128xi1> to vector<256x128xi32>
    %13 = arith.sitofp %12 : vector<256x128xi32> to vector<256x128xf32>
    %14 = arith.truncf %13 : vector<256x128xf32> to vector<256x128xbf16>
    %c8 = arith.constant 8 : index
    %c0_6 = arith.constant 0 : index
    %15 = vector.load %arg3[%c8, %c0_6] : memref<704x128xbf16, #tpu.memory_space<vmem>>, vector<128x128xbf16>
    %cst_7 = arith.constant dense<0.000000e+00> : vector<256x128xf32>
    %16 = tpu.matmul %14, %15, %cst_7 {dimension_numbers = #tpu.dot_dimension_numbers<[1], [0], [0], [1], [0, 0, 1, 1], [], []>} : vector<256x128xbf16>, vector<128x128xbf16>, vector<256x128xf32> -> vector<256x128xf32>
    %17 = arith.truncf %2 : vector<256x4xf32> to vector<256x4xbf16>
    %c136 = arith.constant 136 : index
    %c0_8 = arith.constant 0 : index
    %18 = vector.load %arg3[%c136, %c0_8] : memref<704x128xbf16, #tpu.memory_space<vmem>>, vector<4x128xbf16>
    %cst_9 = arith.constant dense<0.000000e+00> : vector<256x128xf32>
    %19 = tpu.matmul %17, %18, %cst_9 {dimension_numbers = #tpu.dot_dimension_numbers<[1], [0], [0], [1], [0, 0, 1, 1], [], []>} : vector<256x4xbf16>, vector<4x128xbf16>, vector<256x128xf32> -> vector<256x128xf32>
    %20 = arith.addf %16, %19 : vector<256x128xf32>
    %c144 = arith.constant 144 : index
    %c0_10 = arith.constant 0 : index
    %21 = vector.load %arg3[%c144, %c0_10] : memref<704x128xbf16, #tpu.memory_space<vmem>>, vector<1x128xbf16>
    %22 = arith.extf %21 : vector<1x128xbf16> to vector<1x128xf32>
    %23 = vector.broadcast %22 : vector<1x128xf32> to vector<256x128xf32>
    %24 = arith.addf %20, %23 : vector<256x128xf32>
    %25 = arith.truncf %24 : vector<256x128xf32> to vector<256x128xbf16>
    %c152 = arith.constant 152 : index
    %c0_11 = arith.constant 0 : index
    %26 = vector.load %arg3[%c152, %c0_11] : memref<704x128xbf16, #tpu.memory_space<vmem>>, vector<128x128xbf16>
    %cst_12 = arith.constant dense<0.000000e+00> : vector<256x128xf32>
    %27 = tpu.matmul %25, %26, %cst_12 {dimension_numbers = #tpu.dot_dimension_numbers<[1], [0], [0], [1], [0, 0, 1, 1], [], []>} : vector<256x128xbf16>, vector<128x128xbf16>, vector<256x128xf32> -> vector<256x128xf32>
    %c280 = arith.constant 280 : index
    %c0_13 = arith.constant 0 : index
    %28 = vector.load %arg3[%c280, %c0_13] : memref<704x128xbf16, #tpu.memory_space<vmem>>, vector<1x128xbf16>
    %29 = arith.extf %28 : vector<1x128xbf16> to vector<1x128xf32>
    %30 = vector.broadcast %29 : vector<1x128xf32> to vector<256x128xf32>
    %31 = arith.addf %27, %30 : vector<256x128xf32>
    %cst_14 = arith.constant 0.000000e+00 : f32
    %32 = vector.broadcast %cst_14 : f32 to vector<256x128xf32>
    %33 = arith.maximumf %31, %32 : vector<256x128xf32>
    %34 = arith.truncf %33 : vector<256x128xf32> to vector<256x128xbf16>
    %c288 = arith.constant 288 : index
    %c0_15 = arith.constant 0 : index
    %35 = vector.load %arg3[%c288, %c0_15] : memref<704x128xbf16, #tpu.memory_space<vmem>>, vector<128x128xbf16>
    %cst_16 = arith.constant dense<0.000000e+00> : vector<256x128xf32>
    %36 = tpu.matmul %34, %35, %cst_16 {dimension_numbers = #tpu.dot_dimension_numbers<[1], [0], [0], [1], [0, 0, 1, 1], [], []>} : vector<256x128xbf16>, vector<128x128xbf16>, vector<256x128xf32> -> vector<256x128xf32>
    %c416 = arith.constant 416 : index
    %c0_17 = arith.constant 0 : index
    %37 = vector.load %arg3[%c416, %c0_17] : memref<704x128xbf16, #tpu.memory_space<vmem>>, vector<1x128xbf16>
    %38 = arith.extf %37 : vector<1x128xbf16> to vector<1x128xf32>
    %39 = vector.broadcast %38 : vector<1x128xf32> to vector<256x128xf32>
    %40 = arith.addf %36, %39 : vector<256x128xf32>
    %cst_18 = arith.constant 0.000000e+00 : f32
    %41 = vector.broadcast %cst_18 : f32 to vector<256x128xf32>
    %42 = arith.maximumf %40, %41 : vector<256x128xf32>
    %c424 = arith.constant 424 : index
    %c0_19 = arith.constant 0 : index
    %43 = vector.load %arg3[%c424, %c0_19] : memref<704x128xbf16, #tpu.memory_space<vmem>>, vector<8x128xbf16>
    %44 = arith.extf %43 : vector<8x128xbf16> to vector<8x128xf32>
    %c432 = arith.constant 432 : index
    %c0_20 = arith.constant 0 : index
    %45 = vector.load %arg3[%c432, %c0_20] : memref<704x128xbf16, #tpu.memory_space<vmem>>, vector<8x128xbf16>
    %46 = arith.extf %45 : vector<8x128xbf16> to vector<8x128xf32>
    %47 = vector.extract_strided_slice %44 {offsets = [0, 0], sizes = [1, 128], strides = [1, 1]} : vector<8x128xf32> to vector<1x128xf32>
    %48 = vector.broadcast %47 : vector<1x128xf32> to vector<256x128xf32>
    %49 = arith.mulf %24, %48 : vector<256x128xf32>
    %cst_21 = arith.constant dense<0.000000e+00> : vector<256xf32>
    %50 = vector.multi_reduction <add>, %49, %cst_21 [1] : vector<256x128xf32> to vector<256xf32>
    %51 = vector.shape_cast %50 : vector<256xf32> to vector<256x1xf32>
    %52 = vector.broadcast %51 : vector<256x1xf32> to vector<256x128xf32>
    %53 = arith.mulf %24, %52 : vector<256x128xf32>
    %54 = vector.extract_strided_slice %46 {offsets = [0, 0], sizes = [1, 128], strides = [1, 1]} : vector<8x128xf32> to vector<1x128xf32>
    %55 = vector.broadcast %54 : vector<1x128xf32> to vector<256x128xf32>
    %56 = arith.addf %53, %55 : vector<256x128xf32>
    %57 = arith.addf %56, %24 : vector<256x128xf32>
    %58 = vector.extract_strided_slice %44 {offsets = [1, 0], sizes = [1, 128], strides = [1, 1]} : vector<8x128xf32> to vector<1x128xf32>
    %59 = vector.broadcast %58 : vector<1x128xf32> to vector<256x128xf32>
    %60 = arith.mulf %57, %59 : vector<256x128xf32>
    %cst_22 = arith.constant dense<0.000000e+00> : vector<256xf32>
    %61 = vector.multi_reduction <add>, %60, %cst_22 [1] : vector<256x128xf32> to vector<256xf32>
    %62 = vector.shape_cast %61 : vector<256xf32> to vector<256x1xf32>
    %63 = vector.broadcast %62 : vector<256x1xf32> to vector<256x128xf32>
    %64 = arith.mulf %24, %63 : vector<256x128xf32>
    %65 = vector.extract_strided_slice %46 {offsets = [1, 0], sizes = [1, 128], strides = [1, 1]} : vector<8x128xf32> to vector<1x128xf32>
    %66 = vector.broadcast %65 : vector<1x128xf32> to vector<256x128xf32>
    %67 = arith.addf %64, %66 : vector<256x128xf32>
    %68 = arith.addf %67, %57 : vector<256x128xf32>
    %69 = vector.extract_strided_slice %44 {offsets = [2, 0], sizes = [1, 128], strides = [1, 1]} : vector<8x128xf32> to vector<1x128xf32>
    %70 = vector.broadcast %69 : vector<1x128xf32> to vector<256x128xf32>
    %71 = arith.mulf %68, %70 : vector<256x128xf32>
    %cst_23 = arith.constant dense<0.000000e+00> : vector<256xf32>
    %72 = vector.multi_reduction <add>, %71, %cst_23 [1] : vector<256x128xf32> to vector<256xf32>
    %73 = vector.shape_cast %72 : vector<256xf32> to vector<256x1xf32>
    %74 = vector.broadcast %73 : vector<256x1xf32> to vector<256x128xf32>
    %75 = arith.mulf %24, %74 : vector<256x128xf32>
    %76 = vector.extract_strided_slice %46 {offsets = [2, 0], sizes = [1, 128], strides = [1, 1]} : vector<8x128xf32> to vector<1x128xf32>
    %77 = vector.broadcast %76 : vector<1x128xf32> to vector<256x128xf32>
    %78 = arith.addf %75, %77 : vector<256x128xf32>
    %79 = arith.addf %78, %68 : vector<256x128xf32>
    %80 = vector.extract_strided_slice %44 {offsets = [3, 0], sizes = [1, 128], strides = [1, 1]} : vector<8x128xf32> to vector<1x128xf32>
    %81 = vector.broadcast %80 : vector<1x128xf32> to vector<256x128xf32>
    %82 = arith.mulf %79, %81 : vector<256x128xf32>
    %cst_24 = arith.constant dense<0.000000e+00> : vector<256xf32>
    %83 = vector.multi_reduction <add>, %82, %cst_24 [1] : vector<256x128xf32> to vector<256xf32>
    %84 = vector.shape_cast %83 : vector<256xf32> to vector<256x1xf32>
    %85 = vector.broadcast %84 : vector<256x1xf32> to vector<256x128xf32>
    %86 = arith.mulf %24, %85 : vector<256x128xf32>
    %87 = vector.extract_strided_slice %46 {offsets = [3, 0], sizes = [1, 128], strides = [1, 1]} : vector<8x128xf32> to vector<1x128xf32>
    %88 = vector.broadcast %87 : vector<1x128xf32> to vector<256x128xf32>
    %89 = arith.addf %86, %88 : vector<256x128xf32>
    %90 = arith.addf %89, %79 : vector<256x128xf32>
    %91 = vector.extract_strided_slice %44 {offsets = [4, 0], sizes = [1, 128], strides = [1, 1]} : vector<8x128xf32> to vector<1x128xf32>
    %92 = vector.broadcast %91 : vector<1x128xf32> to vector<256x128xf32>
    %93 = arith.mulf %90, %92 : vector<256x128xf32>
    %cst_25 = arith.constant dense<0.000000e+00> : vector<256xf32>
    %94 = vector.multi_reduction <add>, %93, %cst_25 [1] : vector<256x128xf32> to vector<256xf32>
    %95 = vector.shape_cast %94 : vector<256xf32> to vector<256x1xf32>
    %96 = vector.broadcast %95 : vector<256x1xf32> to vector<256x128xf32>
    %97 = arith.mulf %24, %96 : vector<256x128xf32>
    %98 = vector.extract_strided_slice %46 {offsets = [4, 0], sizes = [1, 128], strides = [1, 1]} : vector<8x128xf32> to vector<1x128xf32>
    %99 = vector.broadcast %98 : vector<1x128xf32> to vector<256x128xf32>
    %100 = arith.addf %97, %99 : vector<256x128xf32>
    %101 = arith.addf %100, %90 : vector<256x128xf32>
    %102 = vector.extract_strided_slice %44 {offsets = [5, 0], sizes = [1, 128], strides = [1, 1]} : vector<8x128xf32> to vector<1x128xf32>
    %103 = vector.broadcast %102 : vector<1x128xf32> to vector<256x128xf32>
    %104 = arith.mulf %101, %103 : vector<256x128xf32>
    %cst_26 = arith.constant dense<0.000000e+00> : vector<256xf32>
    %105 = vector.multi_reduction <add>, %104, %cst_26 [1] : vector<256x128xf32> to vector<256xf32>
    %106 = vector.shape_cast %105 : vector<256xf32> to vector<256x1xf32>
    %107 = vector.broadcast %106 : vector<256x1xf32> to vector<256x128xf32>
    %108 = arith.mulf %24, %107 : vector<256x128xf32>
    %109 = vector.extract_strided_slice %46 {offsets = [5, 0], sizes = [1, 128], strides = [1, 1]} : vector<8x128xf32> to vector<1x128xf32>
    %110 = vector.broadcast %109 : vector<1x128xf32> to vector<256x128xf32>
    %111 = arith.addf %108, %110 : vector<256x128xf32>
    %112 = arith.addf %111, %101 : vector<256x128xf32>
    %113 = arith.truncf %42 : vector<256x128xf32> to vector<256x128xbf16>
    %c440 = arith.constant 440 : index
    %c0_27 = arith.constant 0 : index
    %114 = vector.load %arg3[%c440, %c0_27] : memref<704x128xbf16, #tpu.memory_space<vmem>>, vector<128x128xbf16>
    %cst_28 = arith.constant dense<0.000000e+00> : vector<256x128xf32>
    %115 = tpu.matmul %113, %114, %cst_28 {dimension_numbers = #tpu.dot_dimension_numbers<[1], [0], [0], [1], [0, 0, 1, 1], [], []>} : vector<256x128xbf16>, vector<128x128xbf16>, vector<256x128xf32> -> vector<256x128xf32>
    %116 = arith.truncf %112 : vector<256x128xf32> to vector<256x128xbf16>
    %c568 = arith.constant 568 : index
    %c0_29 = arith.constant 0 : index
    %117 = vector.load %arg3[%c568, %c0_29] : memref<704x128xbf16, #tpu.memory_space<vmem>>, vector<128x128xbf16>
    %cst_30 = arith.constant dense<0.000000e+00> : vector<256x128xf32>
    %118 = tpu.matmul %116, %117, %cst_30 {dimension_numbers = #tpu.dot_dimension_numbers<[1], [0], [0], [1], [0, 0, 1, 1], [], []>} : vector<256x128xbf16>, vector<128x128xbf16>, vector<256x128xf32> -> vector<256x128xf32>
    %119 = arith.addf %115, %118 : vector<256x128xf32>
    %c696 = arith.constant 696 : index
    %c0_31 = arith.constant 0 : index
    %120 = vector.load %arg3[%c696, %c0_31] : memref<704x128xbf16, #tpu.memory_space<vmem>>, vector<1x128xbf16>
    %121 = arith.extf %120 : vector<1x128xbf16> to vector<1x128xf32>
    %122 = vector.broadcast %121 : vector<1x128xf32> to vector<256x128xf32>
    %123 = arith.addf %119, %122 : vector<256x128xf32>
    %124 = vector.extract_strided_slice %123 {offsets = [0, 0], sizes = [256, 2], strides = [1, 1]} : vector<256x128xf32> to vector<256x2xf32>
    %cst_32 = arith.constant dense<0xFF800000> : vector<256xf32>
    %125 = vector.multi_reduction <maximumf>, %124, %cst_32 [1] : vector<256x2xf32> to vector<256xf32>
    %126 = vector.shape_cast %125 : vector<256xf32> to vector<256x1xf32>
    %127 = vector.broadcast %126 : vector<256x1xf32> to vector<256x2xf32>
    %128 = arith.subf %124, %127 : vector<256x2xf32>
    %129 = math.exp %128 : vector<256x2xf32>
    %cst_33 = arith.constant dense<0.000000e+00> : vector<256xf32>
    %130 = vector.multi_reduction <add>, %129, %cst_33 [1] : vector<256x2xf32> to vector<256xf32>
    %131 = vector.shape_cast %130 : vector<256xf32> to vector<256x1xf32>
    %132 = math.log %131 : vector<256x1xf32>
    %133 = arith.addf %132, %126 : vector<256x1xf32>
    %134 = vector.broadcast %133 : vector<256x1xf32> to vector<256x2xf32>
    %135 = arith.subf %124, %134 : vector<256x2xf32>
    %c0_34 = arith.constant 0 : index
    %c0_35 = arith.constant 0 : index
    %136 = vector.load %arg4[%c0_34, %c0_35] : memref<256x2xf32, #tpu.memory_space<vmem>>, vector<256x2xf32>
    tpu.vector_store %arg4[%c0_34, %c0_35], %135 {strides = array<i32>} : memref<256x2xf32, #tpu.memory_space<vmem>>, vector<256x2xf32>,
    return
  }
  func.func @transform_0(%arg0: i32) -> (i32, i32) {
    %c0_i32 = arith.constant 0 : i32
    %c0_i32_0 = arith.constant 0 : i32
    return %arg0, %c0_i32 : i32, i32
  }
  func.func @transform_1(%arg0: i32) -> (i32, i32) {
    %c0_i32 = arith.constant 0 : i32
    %c0_i32_0 = arith.constant 0 : i32
    return %arg0, %c0_i32 : i32, i32
  }
  func.func @transform_2(%arg0: i32) -> (i32, i32) {
    %c0_i32 = arith.constant 0 : i32
    %c0_i32_0 = arith.constant 0 : i32
    %c0_i32_1 = arith.constant 0 : i32
    return %c0_i32, %c0_i32_0 : i32, i32
  }
  func.func @transform_3(%arg0: i32) -> (i32, i32) {
    %c0_i32 = arith.constant 0 : i32
    %c0_i32_0 = arith.constant 0 : i32
    return %arg0, %c0_i32 : i32, i32
  }
}

</mosaic_0001>

<bundles_post_ra>
// kernel: tpu_custom_call.1
= control target key start
LH: loop header
LB: loop body
LE: loop exit
PB: predicated region body
PF: predicated region fallthrough
CT: control target
= control target key end

     0   :  { %vm210_vm0 = vcmask 1042432   ;;  %vm113_vm1 = vcmask 23552   ;;  %vm700_vm2 = vcmask 1041408   ;;  %vm651_vm3 = vcmask 31744   ;;  %s7327_s2 = inlined_call_operand.vmem [shape: bf16[704,128], index: 2, kind: input, shape index: {}]   ;;  %s7328_s0 = inlined_call_operand.vmem [shape: s32[256,3], index: 0, kind: input, shape index: {}]   ;;  %s7329_s1 = inlined_call_operand.vmem [shape: f32[256,4], index: 1, kind: input, shape index: {}]   ;;  %s7330_s3 = inlined_call_operand.vmem [shape: f32[256,2], index: 3, kind: output, shape index: {}]  }
   0x1   :  { %v111_v0 = vld [vmem:[%s7327_s2] sm:$0x3]  ;;  %v16_v2 = vld [vmem:[%s7328_s0 + $0x8] sm:$0xff]  ;;  %v17_v6 = vld [vmem:[%s7328_s0 + $0x10] sm:$0xff] }
   0x2   :  { %v15_v1 = vld [vmem:[%s7328_s0] sm:$0xff]  ;;  %v112_v3 = vunpack.c.l.bf16 %v111_v0  ;;  %v48_v5 = vcvt.s32.f32 %v16_v2  ;;  %v49_v7 = vcvt.s32.f32 %v17_v6  ;;  %v18_v8 = vld [vmem:[%s7328_s0 + $0x18] sm:$0xff]  ;;  %v20_v12 = vld [vmem:[%s7328_s0 + $0x28] sm:$0xff] }
   0x3   :  { %v47_v4 = vcvt.s32.f32 %v15_v1  ;;  %v19_v9 = vld [vmem:[%s7328_s0 + $0x20] sm:$0xff]  ;;  %v50_v10 = vcvt.s32.f32 %v18_v8  ;;  %v21_v13 = vld [vmem:[%s7328_s0 + $0x30] sm:$0xff]  ;;  %v52_v14 = vcvt.s32.f32 %v20_v12  ;;  %v22_v16 = vld [vmem:[%s7328_s0 + $0x38] sm:$0xff] }
   0x4   :  { %4170 = vmatprep.subr.msk.mxu0 %vm210_vm0, %v112_v3  ;;  %v51_v11 = vcvt.s32.f32 %v19_v9  ;;  %v53_v15 = vcvt.s32.f32 %v21_v13  ;;  %v23_v17 = vld [vmem:[%s7328_s0 + $0x40] sm:$0xff]  ;;  %v96_v20 = vld [vmem:[%s7329_s1 + $0x88] sm:$0xff]  ;;  %v54_v25 = vcvt.s32.f32 %v22_v16  ;;  %v25_v26 = vld [vmem:[%s7328_s0 + $0x50] sm:$0xff] }
   0x5   :  { %4172 = vmatprep.mubr.msk.f32.mxu0 %vm113_vm1, %v47_v4  ;;  %4171 = vmatpush3.msk.msra.mxu0 %vm210_vm0, %v112_v3  ;;  %v650_v18 = vld [vmem:[%s7327_s2 + $0x44] sm:$0x3]  ;;  %v24_v21 = vld [vmem:[%s7328_s0 + $0x48] sm:$0xff]  ;;  %v97_v27 = vld [vmem:[%s7329_s1 + $0x90] sm:$0xff]  ;;  %v55_v29 = vcvt.s32.f32 %v23_v17  ;;  %v57_v38 = vcvt.s32.f32 %v25_v26 }
   0x6   :  { %4173 = vmatmul.mubr.msk.f32.vlgmr.msra.gmra.mrb[0].mxu0 %vm113_vm1, %v48_v5  ;;  %v95_v19 = vld [vmem:[%s7329_s1 + $0x80] sm:$0xff]  ;;  %4560 = vmatprep.subr.msk.bf16.mxu0 %vm700_vm2, %v650_v18  ;;  %v702_v22 = vsel %vm700_vm2, %v650_v18, 0  ;;  %v98_v28 = vld [vmem:[%s7329_s1 + $0x98] sm:$0xff]  ;;  %v4564_v31 = vld [vmem:[%s7327_s2 + $0xc] sm:$0xff]   ;;  %v56_v36 = vcvt.s32.f32 %v24_v21 }
   0x7   :  { %4175 = vmatprep.mubr.msk.f32.mxu0 %vm113_vm1, %v49_v7  ;;  %4561 = vmatprep.subr.msk.bf16.mxu1 %vm700_vm2, %v650_v18  ;;  %v642_v23 = vpack.c.bf16 %v96_v20, %v95_v19  ;;  %v4563_v24 = vld [vmem:[%s7327_s2 + $0x4] sm:$0xff]   ;;  %v643_v30 = vpack.c.bf16 %v98_v28, %v97_v27  ;;  %v101_v35 = vld [vmem:[%s7329_s1 + $0xb0] sm:$0xff]  ;;  %v102_v37 = vld [vmem:[%s7329_s1 + $0xb8] sm:$0xff] }
   0x8   :  { %4495 = vmatpush3.bf16.msra.mxu1 %v702_v22  ;;  %4221 = vmatpush3.bf16.msra.mxu0 %v702_v22  ;;  %v99_v32 = vld [vmem:[%s7329_s1 + $0xa0] sm:$0xff]  ;;  %v100_v33 = vld [vmem:[%s7329_s1 + $0xa8] sm:$0xff]  ;;  %v26_v39 = vld [vmem:[%s7328_s0 + $0x58] sm:$0xff]  ;;  %v645_v44 = vpack.c.bf16 %v102_v37, %v101_v35 }
   0x9   :  { %4238 = vmatprep.mubr.msk.bf16.mxu1 %vm651_vm3, %v642_v23  ;;  %4254 = vmatprep.subr.bf16.mxu1 %v4563_v24  ;;  %v644_v34 = vpack.c.bf16 %v100_v33, %v99_v32  ;;  %v4565_v40 = vld [vmem:[%s7327_s2 + $0x14] sm:$0xff]   ;;  %v27_v41 = vld [vmem:[%s7328_s0 + $0x60] sm:$0xff]  ;;  %v28_v43 = vld [vmem:[%s7328_s0 + $0x68] sm:$0xff]  ;;  %v58_v46 = vcvt.s32.f32 %v26_v39 }
   0xa   :  { %4176 = vmatmul.mubr.msk.f32.gmra.mrb[2].mxu0 %vm113_vm1, %v50_v10  ;;  %v103_v42 = vld [vmem:[%s7329_s1 + $0xc0] sm:$0xff]  ;;  %v104_v45 = vld [vmem:[%s7329_s1 + $0xc8] sm:$0xff]  ;;  %v29_v47 = vld [vmem:[%s7328_s0 + $0x70] sm:$0xff]  ;;  %v59_v49 = vcvt.s32.f32 %v27_v41  ;;  %v60_v55 = vcvt.s32.f32 %v28_v43 }
   0xb   :  { %4178 = vmatprep.mubr.msk.f32.mxu0 %vm113_vm1, %v51_v11  ;;  %4239 = vmatmul.mubr.msk.bf16.vlgmr.msra.gmra.mrb[0].mxu1 %vm651_vm3, %v643_v30  ;;  %v4566_v48 = vld [vmem:[%s7327_s2 + $0x1c] sm:$0xff]   ;;  %v646_v50 = vpack.c.bf16 %v104_v45, %v103_v42  ;;  %v105_v51 = vld [vmem:[%s7329_s1 + $0xd0] sm:$0xff]  ;;  %v4567_v54 = vld [vmem:[%s7327_s2 + $0x24] sm:$0xff]   ;;  %v61_v57 = vcvt.s32.f32 %v29_v47 }
   0xc   :  { %4255 = vmatpush3.bf16.msra.mxu1 %v4563_v24  ;;  %4242 = vmatprep.mubr.msk.bf16.mxu1 %vm651_vm3, %v644_v34  ;;  %v106_v52 = vld [vmem:[%s7329_s1 + $0xd8] sm:$0xff]  ;;  %v31_v56 = vld [vmem:[%s7328_s0 + $0x80] sm:$0xff]  ;;  %v32_v58 = vld [vmem:[%s7328_s0 + $0x88] sm:$0xff] }
   0xd   :  { %4256 = vmatprep.subr.bf16.mxu1 %v4564_v31  ;;  %v30_v53 = vld [vmem:[%s7328_s0 + $0x78] sm:$0xff]  ;;  %v647_v59 = vpack.c.bf16 %v106_v52, %v105_v51  ;;  %v4568_v60 = vld [vmem:[%s7327_s2 + $0x2c] sm:$0xff]   ;;  %v63_v63 = vcvt.s32.f32 %v31_v56  ;;  %v64_v1 = vcvt.s32.f32 %v32_v58  ;;  %v35_v2 = vld [vmem:[%s7328_s0 + $0xa0] sm:$0xff] }
   0xe   :  { %4179 = vmatmul.mubr.msk.f32.gmra.mrb[4].mxu0 %vm113_vm1, %v52_v14  ;;  %v62_v61 = vcvt.s32.f32 %v30_v53  ;;  %v33_v62 = vld [vmem:[%s7328_s0 + $0x90] sm:$0xff]  ;;  %v34_v0 = vld [vmem:[%s7328_s0 + $0x98] sm:$0xff]  ;;  %v36_v4 = vld [vmem:[%s7328_s0 + $0xa8] sm:$0xff]  ;;  %v67_v7 = vcvt.s32.f32 %v35_v2  ;;  %v439_v2 = vlaneseq }
   0xf   :  { %4181 = vmatprep.mubr.msk.f32.mxu0 %vm113_vm1, %v53_v15  ;;  %v65_v3 = vcvt.s32.f32 %v33_v62  ;;  %v66_v5 = vcvt.s32.f32 %v34_v0  ;;  %v37_v6 = vld [vmem:[%s7328_s0 + $0xb0] sm:$0xff]  ;;  %v38_v8 = vld [vmem:[%s7328_s0 + $0xb8] sm:$0xff]  ;;  %v68_v9 = vcvt.s32.f32 %v36_v4  ;;  %v39_v10 = vld [vmem:[%s7328_s0 + $0xc0] sm:$0xff] }
  0x10   :  { %4257 = vmatpush3.bf16.msra.mxu1 %v4564_v31  ;;  %v69_v11 = vcvt.s32.f32 %v37_v6  ;;  %v70_v12 = vcvt.s32.f32 %v38_v8  ;;  %v71_v13 = vcvt.s32.f32 %v39_v10  ;;  %v40_v14 = vld [vmem:[%s7328_s0 + $0xc8] sm:$0xff]  ;;  %v41_v15 = vld [vmem:[%s7328_s0 + $0xd0] sm:$0xff]  ;;  %v42_v18 = vld [vmem:[%s7328_s0 + $0xd8] sm:$0xff] }
  0x11   :  { %4258 = vmatprep.subr.bf16.mxu1 %v4565_v40  ;;  %v72_v16 = vcvt.s32.f32 %v40_v14  ;;  %v73_v17 = vcvt.s32.f32 %v41_v15  ;;  %v43_v19 = vld [vmem:[%s7328_s0 + $0xe0] sm:$0xff]  ;;  %v74_v20 = vcvt.s32.f32 %v42_v18  ;;  %v44_v22 = vld [vmem:[%s7328_s0 + $0xe8] sm:$0xff]  ;;  %v45_v23 = vld [vmem:[%s7328_s0 + $0xf0] sm:$0xff] }
  0x12   :  { %4182 = vmatmul.mubr.msk.f32.gmra.mrb[6].mxu0 %vm113_vm1, %v54_v25  ;;  %v75_v21 = vcvt.s32.f32 %v43_v19  ;;  %v76_v24 = vcvt.s32.f32 %v44_v22  ;;  %v77_v25 = vcvt.s32.f32 %v45_v23  ;;  %v46_v26 = vld [vmem:[%s7328_s0 + $0xf8] sm:$0xff]  ;;  %v107_v28 = vld [vmem:[%s7329_s1 + $0xe0] sm:$0xff]  ;;  %v109_v31 = vld [vmem:[%s7329_s1 + $0xf0] sm:$0xff] }
  0x13   :  { %4184 = vmatprep.mubr.msk.f32.mxu0 %vm113_vm1, %v55_v29  ;;  %4243 = vmatmul.mubr.msk.bf16.gmra.mrb[4].mxu1 %vm651_vm3, %v645_v44  ;;  %v78_v27 = vcvt.s32.f32 %v46_v26  ;;  %v108_v29 = vld [vmem:[%s7329_s1 + $0xe8] sm:$0xff]  ;;  %v110_v32 = vld [vmem:[%s7329_s1 + $0xf8] sm:$0xff]  ;;  %v79_v35 = vld [vmem:[%s7329_s1] sm:$0xff] }
  0x14   :  { %4259 = vmatpush3.bf16.msra.mxu1 %v4565_v40  ;;  %4246 = vmatprep.mubr.msk.bf16.mxu1 %vm651_vm3, %v646_v50  ;;  %v648_v30 = vpack.c.bf16 %v108_v29, %v107_v28  ;;  %v4569_v33 = vld [vmem:[%s7327_s2 + $0x34] sm:$0xff]   ;;  %v649_v34 = vpack.c.bf16 %v110_v32, %v109_v31  ;;  %v4570_v37 = vld [vmem:[%s7327_s2 + $0x3c] sm:$0xff]   ;;  %v84_v43 = vld [vmem:[%s7329_s1 + $0x28] sm:$0xff] }
  0x15   :  { %4260 = vmatprep.subr.bf16.mxu1 %v4566_v48  ;;  %v81_v39 = vld [vmem:[%s7329_s1 + $0x10] sm:$0xff]  ;;  %v82_v40 = vld [vmem:[%s7329_s1 + $0x18] sm:$0xff]  ;;  %v83_v42 = vld [vmem:[%s7329_s1 + $0x20] sm:$0xff] }
  0x16   :  { %4185 = vmatmul.mubr.msk.f32.gmra.mrb[8].mxu0 %vm113_vm1, %v56_v36  ;;  %v80_v36 = vld [vmem:[%s7329_s1 + $0x8] sm:$0xff]  ;;  %v635_v41 = vpack.c.bf16 %v82_v40, %v81_v39  ;;  %v636_v44 = vpack.c.bf16 %v84_v43, %v83_v42  ;;  %v85_v45 = vld [vmem:[%s7329_s1 + $0x30] sm:$0xff]  ;;  %v90_v52 = vld [vmem:[%s7329_s1 + $0x58] sm:$0xff] }
  0x17   :  { %4187 = vmatprep.mubr.msk.f32.mxu0 %vm113_vm1, %v57_v38  ;;  %v634_v38 = vpack.c.bf16 %v80_v36, %v79_v35  ;;  %v89_v51 = vld [vmem:[%s7329_s1 + $0x50] sm:$0xff]  ;;  %v94_v58 = vld [vmem:[%s7329_s1 + $0x78] sm:$0xff] }
  0x18   :  { %4261 = vmatpush3.bf16.msra.mxu1 %v4566_v48  ;;  %v87_v48 = vld [vmem:[%s7329_s1 + $0x40] sm:$0xff]  ;;  %v639_v53 = vpack.c.bf16 %v90_v52, %v89_v51  ;;  %v4575_v0 = vld [vmem:[%s7327_s2 + $0x6c] sm:$0xff]  }
  0x19   :  { %4262 = vmatprep.subr.bf16.mxu1 %v4567_v54  ;;  %v4573_v62 = vld [vmem:[%s7327_s2 + $0x5c] sm:$0xff]  }
  0x1a   :  { %4188 = vmatmul.mubr.msk.f32.gmra.mrb[10].mxu0 %vm113_vm1, %v58_v46  ;;  %v86_v46 = vld [vmem:[%s7329_s1 + $0x38] sm:$0xff] }
  0x1b   :  { %4190 = vmatprep.mubr.msk.f32.mxu0 %vm113_vm1, %v59_v49  ;;  %4247 = vmatmul.mubr.msk.bf16.gmra.mrb[8].mxu1 %vm651_vm3, %v647_v59  ;;  %v637_v47 = vpack.c.bf16 %v86_v46, %v85_v45  ;;  %v88_v49 = vld [vmem:[%s7329_s1 + $0x48] sm:$0xff] }
  0x1c   :  { %4263 = vmatpush3.bf16.msra.mxu1 %v4567_v54  ;;  %4250 = vmatprep.mubr.msk.bf16.mxu1 %vm651_vm3, %v648_v30  ;;  %v638_v50 = vpack.c.bf16 %v88_v49, %v87_v48  ;;  %v91_v54 = vld [vmem:[%s7329_s1 + $0x60] sm:$0xff] }
  0x1d   :  { %4264 = vmatprep.subr.bf16.mxu1 %v4568_v60 }
  0x1e   :  { %4191 = vmatmul.mubr.msk.f32.gmra.mrb[12].mxu0 %vm113_vm1, %v60_v55  ;;  %v92_v55 = vld [vmem:[%s7329_s1 + $0x68] sm:$0xff] }
  0x1f   :  { %4193 = vmatprep.mubr.msk.f32.mxu0 %vm113_vm1, %v61_v57  ;;  %v640_v56 = vpack.c.bf16 %v92_v55, %v91_v54  ;;  %v93_v57 = vld [vmem:[%s7329_s1 + $0x70] sm:$0xff] }
  0x20   :  { %4265 = vmatpush3.bf16.msra.mxu1 %v4568_v60  ;;  %v641_v59 = vpack.c.bf16 %v94_v58, %v93_v57  ;;  %v4571_v60 = vld [vmem:[%s7327_s2 + $0x4c] sm:$0xff]  }
  0x21   :  { %4266 = vmatprep.subr.bf16.mxu1 %v4569_v33  ;;  %4302 = vmatprep.subr.bf16.mxu0 %v4571_v60 }
  0x22   :  { %4194 = vmatmul.mubr.msk.f32.gmra.mrb[14].mxu0 %vm113_vm1, %v62_v61  ;;  %v4572_v61 = vld [vmem:[%s7327_s2 + $0x54] sm:$0xff]  }
  0x23   :  { %4196 = vmatprep.mubr.msk.f32.mxu0 %vm113_vm1, %v63_v63  ;;  %4251 = vmatmul.mubr.msk.bf16.gmra.mrb[12].mxu1 %vm651_vm3, %v649_v34  ;;  %v4574_v63 = vld [vmem:[%s7327_s2 + $0x64] sm:$0xff]  }
  0x24   :  { %4267 = vmatpush3.bf16.msra.mxu1 %v4569_v33 }
  0x25   :  { %4268 = vmatprep.subr.bf16.mxu1 %v4570_v37 }
  0x26   :  { %4197 = vmatmul.mubr.msk.f32.gmra.mrb[16].mxu0 %vm113_vm1, %v64_v1  ;;  %v4576_v1 = vld [vmem:[%s7327_s2 + $0x74] sm:$0xff]  }
  0x27   :  { %4199 = vmatprep.mubr.msk.f32.mxu0 %vm113_vm1, %v65_v3  ;;  %v440_v3 = vand.u32 127, %v439_v2 }
  0x28   :  { %4269 = vmatpush3.bf16.msra.mxu1 %v4570_v37 }
  0x29   :  { %v5041_v4 = vcvt.s32.f32 %v440_v3 }
  0x2a   :  { %4200 = vmatmul.mubr.msk.f32.gmra.mrb[18].mxu0 %vm113_vm1, %v66_v5 }
  0x2b   :  { %4202 = vmatprep.mubr.msk.f32.mxu0 %vm113_vm1, %v67_v7 }
  0x2e   :  { %4203 = vmatmul.mubr.msk.f32.gmra.mrb[20].mxu0 %vm113_vm1, %v68_v9 }
  0x2f   :  { %4205 = vmatprep.mubr.msk.f32.mxu0 %vm113_vm1, %v69_v11 }
  0x32   :  { %4206 = vmatmul.mubr.msk.f32.gmra.mrb[22].mxu0 %vm113_vm1, %v70_v12 }
  0x33   :  { %4208 = vmatprep.mubr.msk.f32.mxu0 %vm113_vm1, %v71_v13 }
  0x36   :  { %4209 = vmatmul.mubr.msk.f32.gmra.mrb[24].mxu0 %vm113_vm1, %v72_v16 }
  0x37   :  { %4211 = vmatprep.mubr.msk.f32.mxu0 %vm113_vm1, %v73_v17  ;;  %v4731_v17 = vmov 1.0|1.0  }
  0x3a   :  { %4212 = vmatmul.mubr.msk.f32.gmra.mrb[26].mxu0 %vm113_vm1, %v74_v20 }
  0x3b   :  { %4214 = vmatprep.mubr.msk.f32.mxu0 %vm113_vm1, %v75_v21 }
  0x3e   :  { %4215 = vmatmul.mubr.msk.f32.gmra.mrb[28].mxu0 %vm113_vm1, %v76_v24 }
  0x3f   :  { %4217 = vmatprep.mubr.msk.f32.mxu0 %vm113_vm1, %v77_v25 }
  0x42   :  { %4218 = vmatmul.mubr.msk.f32.gmra.mrb[30].mxu0 %vm113_vm1, %v78_v27 }
  0x43   :  { %4222 = vmatprep.mubr.msk.bf16.mxu0 %vm651_vm3, %v634_v38 }
  0x46   :  { %4223 = vmatmul.mubr.msk.bf16.vlgmr.msra.gmra.mrb[32].mxu0 %vm651_vm3, %v635_v41 }
  0x47   :  { %4226 = vmatprep.mubr.msk.bf16.mxu0 %vm651_vm3, %v636_v44  ;;  %4303 = vmatpush3.bf16.msra.mxu0 %v4571_v60 }
  0x48   :  { %4304 = vmatprep.subr.bf16.mxu0 %v4572_v61 }
  0x4b   :  { %4305 = vmatpush3.bf16.msra.mxu0 %v4572_v61 }
  0x4c   :  { %4306 = vmatprep.subr.bf16.mxu0 %v4573_v62 }
  0x4e   :  { %4227 = vmatmul.mubr.msk.bf16.gmra.mrb[36].mxu0 %vm651_vm3, %v637_v47 }
  0x4f   :  { %4230 = vmatprep.mubr.msk.bf16.mxu0 %vm651_vm3, %v638_v50  ;;  %4307 = vmatpush3.bf16.msra.mxu0 %v4573_v62 }
  0x50   :  { %4308 = vmatprep.subr.bf16.mxu0 %v4574_v63 }
  0x53   :  { %4309 = vmatpush3.bf16.msra.mxu0 %v4574_v63 }
  0x54   :  { %4310 = vmatprep.subr.bf16.mxu0 %v4575_v0 }
  0x56   :  { %4231 = vmatmul.mubr.msk.bf16.gmra.mrb[40].mxu0 %vm651_vm3, %v639_v53 }
  0x57   :  { %4234 = vmatprep.mubr.msk.bf16.mxu0 %vm651_vm3, %v640_v56  ;;  %4311 = vmatpush3.bf16.msra.mxu0 %v4575_v0 }
  0x58   :  { %4312 = vmatprep.subr.bf16.mxu0 %v4576_v1 }
  0x5b   :  { %4313 = vmatpush3.bf16.msra.mxu0 %v4576_v1 }
  0x5e   :  { %4235 = vmatmul.mubr.msk.bf16.gmra.mrb[44].mxu0 %vm651_vm3, %v641_v59 }
  0xd9   :  { %v4174_v5 = vpop.f32.mrb[0].mxu0 }
  0xda   :  { %v443_v6 = vsub.f32 %v5041_v4, %v4174_v5  ;;  %v280_v7 = vpop.f32.mrb[1].mxu0 }
  0xdb   :  { %v442_v8 = vsub.f32 %v5041_v4, %v280_v7 }
  0xdc   :  { %v475_v9 = vand.u32 2147483647, %v443_v6 }
  0xdd   :  { %v474_v10 = vand.u32 2147483647, %v442_v8  ;;  %v4177_v11 = vpop.f32.mrb[2].mxu0 }
  0xde   :  { %vm507_vm4 = vcmp.lt.f32.partialorder %v475_v9, 0.5  ;;  %v445_v12 = vsub.f32 %v5041_v4, %v4177_v11  ;;  %v290_v13 = vpop.f32.mrb[3].mxu0 }
  0xdf   :  { %vm506_vm5 = vcmp.lt.f32.partialorder %v474_v10, 0.5  ;;  %v444_v14 = vsub.f32 %v5041_v4, %v290_v13 }
  0xe0   :  { %vm3936_vm6 = vmpackc.low %vm507_vm4, %vm506_vm5  ;;  %v477_v15 = vand.u32 2147483647, %v445_v12 }
  0xe1   :  { %v476_v16 = vand.u32 2147483647, %v444_v14  ;;  %4270 = vmatprep.mubr.msk.bf16.mxu1 %vm3936_vm6, %v4731_v17  ;;  %v4180_v18 = vpop.f32.mrb[4].mxu0 }
  0xe2   :  { %vm509_vm7 = vcmp.lt.f32.partialorder %v477_v15, 0.5  ;;  %v447_v19 = vsub.f32 %v5041_v4, %v4180_v18  ;;  %v300_v20 = vpop.f32.mrb[5].mxu0 }
  0xe3   :  { %vm508_vm8 = vcmp.lt.f32.partialorder %v476_v16, 0.5  ;;  %v446_v21 = vsub.f32 %v5041_v4, %v300_v20 }
  0xe4   :  { %vm3938_vm9 = vmpackc.low %vm509_vm7, %vm508_vm8  ;;  %v479_v22 = vand.u32 2147483647, %v447_v19 }
  0xe5   :  { %v478_v23 = vand.u32 2147483647, %v446_v21  ;;  %v4183_v24 = vpop.f32.mrb[6].mxu0  ;;  %4271 = vmatmul.mubr.msk.bf16.vlgmr.msra.gmra.mrb[16].mxu1 %vm3938_vm9, %v4731_v17 }
  0xe6   :  { %vm511_vm10 = vcmp.lt.f32.partialorder %v479_v22, 0.5  ;;  %v449_v25 = vsub.f32 %v5041_v4, %v4183_v24  ;;  %v310_v26 = vpop.f32.mrb[7].mxu0 }
  0xe7   :  { %vm510_vm11 = vcmp.lt.f32.partialorder %v478_v23, 0.5  ;;  %v448_v27 = vsub.f32 %v5041_v4, %v310_v26 }
  0xe8   :  { %vm3940_vm12 = vmpackc.low %vm511_vm10, %vm510_vm11  ;;  %v481_v28 = vand.u32 2147483647, %v449_v25 }
  0xe9   :  { %v480_v29 = vand.u32 2147483647, %v448_v27  ;;  %v4186_v30 = vpop.f32.mrb[8].mxu0  ;;  %4274 = vmatprep.mubr.msk.bf16.mxu1 %vm3940_vm12, %v4731_v17 }
  0xea   :  { %vm513_vm13 = vcmp.lt.f32.partialorder %v481_v28, 0.5  ;;  %v451_v31 = vsub.f32 %v5041_v4, %v4186_v30  ;;  %v320_v32 = vpop.f32.mrb[9].mxu0 }
  0xeb   :  { %vm512_vm14 = vcmp.lt.f32.partialorder %v480_v29, 0.5  ;;  %v450_v33 = vsub.f32 %v5041_v4, %v320_v32 }
  0xec   :  { %vm3942_vm15 = vmpackc.low %vm513_vm13, %vm512_vm14  ;;  %v483_v34 = vand.u32 2147483647, %v451_v31 }
  0xed   :  { %v482_v35 = vand.u32 2147483647, %v450_v33  ;;  %v4189_v36 = vpop.f32.mrb[10].mxu0  ;;  %4275 = vmatmul.mubr.msk.bf16.gmra.mrb[20].mxu1 %vm3942_vm15, %v4731_v17 }
  0xee   :  { %vm515_vm0 = vcmp.lt.f32.partialorder %v483_v34, 0.5  ;;  %v453_v37 = vsub.f32 %v5041_v4, %v4189_v36  ;;  %v330_v38 = vpop.f32.mrb[11].mxu0 }
  0xef   :  { %vm514_vm1 = vcmp.lt.f32.partialorder %v482_v35, 0.5  ;;  %v452_v39 = vsub.f32 %v5041_v4, %v330_v38 }
  0xf0   :  { %vm3944_vm2 = vmpackc.low %vm515_vm0, %vm514_vm1  ;;  %v485_v40 = vand.u32 2147483647, %v453_v37 }
  0xf1   :  { %v484_v41 = vand.u32 2147483647, %v452_v39  ;;  %v4192_v42 = vpop.f32.mrb[12].mxu0  ;;  %4278 = vmatprep.mubr.msk.bf16.mxu1 %vm3944_vm2, %v4731_v17 }
  0xf2   :  { %vm517_vm3 = vcmp.lt.f32.partialorder %v485_v40, 0.5  ;;  %v455_v43 = vsub.f32 %v5041_v4, %v4192_v42  ;;  %v340_v44 = vpop.f32.mrb[13].mxu0 }
  0xf3   :  { %vm516_vm4 = vcmp.lt.f32.partialorder %v484_v41, 0.5  ;;  %v454_v45 = vsub.f32 %v5041_v4, %v340_v44 }
  0xf4   :  { %vm3946_vm5 = vmpackc.low %vm517_vm3, %vm516_vm4  ;;  %v487_v46 = vand.u32 2147483647, %v455_v43 }
  0xf5   :  { %v486_v47 = vand.u32 2147483647, %v454_v45  ;;  %v4195_v48 = vpop.f32.mrb[14].mxu0  ;;  %4279 = vmatmul.mubr.msk.bf16.gmra.mrb[24].mxu1 %vm3946_vm5, %v4731_v17  ;;  %v4577_v45 = vld [vmem:[%s7327_s2 + $0x7c] sm:$0xff]  }
  0xf6   :  { %vm519_vm6 = vcmp.lt.f32.partialorder %v487_v46, 0.5  ;;  %v457_v49 = vsub.f32 %v5041_v4, %v4195_v48  ;;  %v350_v50 = vpop.f32.mrb[15].mxu0  ;;  %4314 = vmatprep.subr.bf16.mxu0 %v4577_v45 }
  0xf7   :  { %vm518_vm7 = vcmp.lt.f32.partialorder %v486_v47, 0.5  ;;  %v456_v51 = vsub.f32 %v5041_v4, %v350_v50  ;;  %4315 = vmatpush3.bf16.msra.mxu0 %v4577_v45 }
  0xf8   :  { %vm3948_vm8 = vmpackc.low %vm519_vm6, %vm518_vm7  ;;  %v489_v52 = vand.u32 2147483647, %v457_v49 }
  0xf9   :  { %v488_v53 = vand.u32 2147483647, %v456_v51  ;;  %4282 = vmatprep.mubr.msk.bf16.mxu1 %vm3948_vm8, %v4731_v17  ;;  %v4198_v54 = vpop.f32.mrb[16].mxu0 }
  0xfa   :  { %vm521_vm9 = vcmp.lt.f32.partialorder %v489_v52, 0.5  ;;  %v459_v55 = vsub.f32 %v5041_v4, %v4198_v54  ;;  %v360_v56 = vpop.f32.mrb[17].mxu0 }
  0xfb   :  { %vm520_vm10 = vcmp.lt.f32.partialorder %v488_v53, 0.5  ;;  %v458_v57 = vsub.f32 %v5041_v4, %v360_v56 }
  0xfc   :  { %vm3950_vm11 = vmpackc.low %vm521_vm9, %vm520_vm10  ;;  %v491_v58 = vand.u32 2147483647, %v459_v55 }
  0xfd   :  { %v490_v59 = vand.u32 2147483647, %v458_v57  ;;  %v4201_v60 = vpop.f32.mrb[18].mxu0  ;;  %4283 = vmatmul.mubr.msk.bf16.gmra.mrb[28].mxu1 %vm3950_vm11, %v4731_v17  ;;  %v5110_v57 = vshrl.u32 %v439_v2, 7 }
  0xfe   :  { %vm523_vm12 = vcmp.lt.f32.partialorder %v491_v58, 0.5  ;;  %v461_v61 = vsub.f32 %v5041_v4, %v4201_v60  ;;  %v370_v62 = vpop.f32.mrb[19].mxu0  ;;  %v1074_v58 = vld [vmem:[%s7327_s2 + $0x48] sm:$0x1] }
  0xff   :  { %vm522_vm13 = vcmp.lt.f32.partialorder %v490_v59, 0.5  ;;  %v460_v63 = vsub.f32 %v5041_v4, %v370_v62  ;;  %v5118_v59 = vld [vmem:[%s7327_s2 + $0xd4] sm:$0xff]   ;;  %v1075_v60 = vunpack.c.l.bf16 %v1074_v58 }
 0x100   :  { %vm3952_vm14 = vmpackc.low %vm523_vm12, %vm522_vm13  ;;  %v493_v0 = vand.u32 2147483647, %v461_v61  ;;  %v5121_v61 = vsub.s32 0, %v5110_v57  ;;  %v5124_v62 = vunpack.c.l.bf16 %v5118_v59 }
 0x101   :  { %v492_v1 = vand.u32 2147483647, %v460_v63  ;;  %v4204_v3 = vpop.f32.mrb[20].mxu0  ;;  %4286 = vmatprep.mubr.msk.bf16.mxu1 %vm3952_vm14, %v4731_v17 }
 0x102   :  { %vm525_vm15 = vcmp.lt.f32.partialorder %v493_v0, 0.5  ;;  %v463_v5 = vsub.f32 %v5041_v4, %v4204_v3  ;;  %v380_v6 = vpop.f32.mrb[21].mxu0  ;;  %7457 = vst [vmem:[#allocation2_spill] sm:$0xff] %v5121_v61  ;;  %7458 = vst [vmem:[#allocation3_spill] sm:$0xff] %v5124_v62  ;;  %v5127_v63 = vrot.slane %v1075_v60, %v5121_v61  ;;  %v5131_v3 = vrot.slane %v5124_v62, %v5121_v61 }
 0x103   :  { %vm524_vm0 = vcmp.lt.f32.partialorder %v492_v1, 0.5  ;;  %v462_v7 = vsub.f32 %v5041_v4, %v380_v6 }
 0x104   :  { %vm3954_vm1 = vmpackc.low %vm525_vm15, %vm524_vm0  ;;  %v495_v8 = vand.u32 2147483647, %v463_v5 }
 0x105   :  { %v494_v9 = vand.u32 2147483647, %v462_v7  ;;  %v4207_v10 = vpop.f32.mrb[22].mxu0  ;;  %4287 = vmatmul.mubr.msk.bf16.gmra.mrb[0].mxu1 %vm3954_vm1, %v4731_v17 }
 0x106   :  { %vm527_vm2 = vcmp.lt.f32.partialorder %v495_v8, 0.5  ;;  %v465_v11 = vsub.f32 %v5041_v4, %v4207_v10  ;;  %v390_v12 = vpop.f32.mrb[23].mxu0 }
 0x107   :  { %vm526_vm3 = vcmp.lt.f32.partialorder %v494_v9, 0.5  ;;  %v464_v13 = vsub.f32 %v5041_v4, %v390_v12 }
 0x108   :  { %vm3956_vm4 = vmpackc.low %vm527_vm2, %vm526_vm3  ;;  %v497_v14 = vand.u32 2147483647, %v465_v11 }
 0x109   :  { %v496_v15 = vand.u32 2147483647, %v464_v13  ;;  %v4210_v16 = vpop.f32.mrb[24].mxu0  ;;  %4290 = vmatprep.mubr.msk.bf16.mxu1 %vm3956_vm4, %v4731_v17  ;;  %vm3394_vm4 = vcmask 15360  }
 0x10a   :  { %vm529_vm5 = vcmp.lt.f32.partialorder %v497_v14, 0.5  ;;  %v467_v18 = vsub.f32 %v5041_v4, %v4210_v16  ;;  %v400_v19 = vpop.f32.mrb[25].mxu0 }
 0x10b   :  { %vm528_vm6 = vcmp.lt.f32.partialorder %v496_v15, 0.5  ;;  %v466_v20 = vsub.f32 %v5041_v4, %v400_v19 }
 0x10c   :  { %vm3958_vm7 = vmpackc.low %vm529_vm5, %vm528_vm6  ;;  %v499_v21 = vand.u32 2147483647, %v467_v18 }
 0x10d   :  { %v498_v22 = vand.u32 2147483647, %v466_v20  ;;  %v4213_v23 = vpop.f32.mrb[26].mxu0  ;;  %4291 = vmatmul.mubr.msk.bf16.gmra.mrb[4].mxu1 %vm3958_vm7, %v4731_v17 }
 0x10e   :  { %vm531_vm8 = vcmp.lt.f32.partialorder %v499_v21, 0.5  ;;  %v469_v24 = vsub.f32 %v5041_v4, %v4213_v23  ;;  %v410_v25 = vpop.f32.mrb[27].mxu0 }
 0x10f   :  { %vm530_vm9 = vcmp.lt.f32.partialorder %v498_v22, 0.5  ;;  %v468_v26 = vsub.f32 %v5041_v4, %v410_v25 }
 0x110   :  { %vm3960_vm10 = vmpackc.low %vm531_vm8, %vm530_vm9  ;;  %v501_v27 = vand.u32 2147483647, %v469_v24 }
 0x111   :  { %v500_v28 = vand.u32 2147483647, %v468_v26  ;;  %v4216_v29 = vpop.f32.mrb[28].mxu0  ;;  %4294 = vmatprep.mubr.msk.bf16.mxu1 %vm3960_vm10, %v4731_v17 }
 0x112   :  { %vm533_vm11 = vcmp.lt.f32.partialorder %v501_v27, 0.5  ;;  %v471_v30 = vsub.f32 %v5041_v4, %v4216_v29  ;;  %v420_v31 = vpop.f32.mrb[29].mxu0 }
 0x113   :  { %vm532_vm12 = vcmp.lt.f32.partialorder %v500_v28, 0.5  ;;  %v470_v32 = vsub.f32 %v5041_v4, %v420_v31 }
 0x114   :  { %vm3962_vm13 = vmpackc.low %vm533_vm11, %vm532_vm12  ;;  %v503_v33 = vand.u32 2147483647, %v471_v30 }
 0x115   :  { %v502_v34 = vand.u32 2147483647, %v470_v32  ;;  %v4219_v35 = vpop.f32.mrb[30].mxu0  ;;  %4295 = vmatmul.mubr.msk.bf16.gmra.mrb[8].mxu1 %vm3962_vm13, %v4731_v17 }
 0x116   :  { %vm535_vm14 = vcmp.lt.f32.partialorder %v503_v33, 0.5  ;;  %v473_v36 = vsub.f32 %v5041_v4, %v4219_v35  ;;  %v430_v37 = vpop.f32.mrb[31].mxu0 }
 0x117   :  { %vm534_vm15 = vcmp.lt.f32.partialorder %v502_v34, 0.5  ;;  %v472_v38 = vsub.f32 %v5041_v4, %v430_v37  ;;  %v4578_v4 = vld [vmem:[%s7327_s2 + $0x84] sm:$0xff]  }
 0x118   :  { %vm3964_vm0 = vmpackc.low %vm535_vm14, %vm534_vm15  ;;  %v505_v39 = vand.u32 2147483647, %v473_v36  ;;  %4316 = vmatprep.subr.bf16.mxu0 %v4578_v4 }
 0x119   :  { %v504_v40 = vand.u32 2147483647, %v472_v38  ;;  %4298 = vmatprep.mubr.msk.bf16.mxu1 %vm3964_vm0, %v4731_v17  ;;  %v4224_v41 = vpop.f32.mrb[32].mxu0  ;;  %4317 = vmatpush3.bf16.msra.mxu0 %v4578_v4 }
 0x11a   :  { %vm537_vm1 = vcmp.lt.f32.partialorder %v505_v39, 0.5  ;;  %v738_v42 = vpop.f32.mrb[33].mxu0 }
 0x11b   :  { %vm536_vm2 = vcmp.lt.f32.partialorder %v504_v40, 0.5  ;;  %v4225_v43 = vpop.f32.mrb[34].mxu0 }
 0x11c   :  { %vm3966_vm3 = vmpackc.low %vm537_vm1, %vm536_vm2  ;;  %v741_v44 = vpop.f32.mrb[35].mxu0 }
 0x11d   :  { %4299 = vmatmul.mubr.msk.bf16.gmra.mrb[12].mxu1 %vm3966_vm3, %v4731_v17 }
 0x121   :  { %v4228_v46 = vpop.f32.mrb[36].mxu0 }
 0x122   :  { %v754_v47 = vpop.f32.mrb[37].mxu0 }
 0x123   :  { %v4229_v48 = vpop.f32.mrb[38].mxu0 }
 0x124   :  { %v757_v17 = vpop.f32.mrb[39].mxu0 }
 0x129   :  { %v4232_v49 = vpop.f32.mrb[40].mxu0 }
 0x12a   :  { %v770_v50 = vpop.f32.mrb[41].mxu0 }
 0x12b   :  { %v5097_v51 = vpop.f32.mrb[42].mxu0 }
 0x12c   :  { %v5099_v52 = vpop.f32.mrb[43].mxu0 }
 0x131   :  { %v5101_v53 = vpop.f32.mrb[44].mxu0 }
 0x132   :  { %v5103_v54 = vpop.f32.mrb[45].mxu0 }
 0x133   :  { %v5105_v55 = vpop.f32.mrb[46].mxu0 }
 0x134   :  { %v5107_v56 = vpop.f32.mrb[47].mxu0 }
 0x1b8   :  { %v4272_v2 = vpop.f32.mrb[16].mxu1 }
 0x1b9   :  { %v956_v0 = vadd.f32 %v4272_v2, %v4224_v41  ;;  %v947_v1 = vpop.f32.mrb[17].mxu1 }
 0x1ba   :  { %v948_v5 = vadd.f32 %v947_v1, %v738_v42  ;;  %v4273_v6 = vpop.f32.mrb[18].mxu1 }
 0x1bb   :  { %v5134_v7 = vadd.f32 %v5127_v63, %v956_v0  ;;  %v959_v8 = vadd.f32 %v4273_v6, %v4225_v43  ;;  %v950_v9 = vpop.f32.mrb[19].mxu1 }
 0x1bc   :  { %v5137_v10 = vadd.f32 %v5127_v63, %v948_v5  ;;  %v951_v11 = vadd.f32 %v950_v9, %v741_v44 }
 0x1bd   :  { %7459 = vst [vmem:[#allocation4_spill] sm:$0xff] %v5134_v7  ;;  %v5140_v12 = vadd.f32 %v5127_v63, %v959_v8  ;;  %v1680_v13 = vmul.f32 %v5131_v3, %v5134_v7 }
 0x1be   :  { %7460 = vst [vmem:[#allocation5_spill] sm:$0xff] %v5137_v10  ;;  %v5145_v14 = vadd.f32 %v5127_v63, %v951_v11  ;;  %v1678_v15 = vmul.f32 %v5131_v3, %v5137_v10 }
 0x1bf   :  { %7461 = vst [vmem:[#allocation6_spill] sm:$0xff] %v5140_v12  ;;  %1714 = vadd.xlane.f32.xlu1 %v1680_v13  ;;  %v1681_v21 = vmul.f32 %v5131_v3, %v5140_v12  ;;  %v1113_v22 = vpack.c.bf16 %v5140_v12, %v5134_v7 }
 0x1c0   :  { %7462 = vst [vmem:[#allocation7_spill] sm:$0xff] %v5145_v14  ;;  %v4276_v16 = vpop.f32.mrb[20].mxu1  ;;  %1710 = vadd.xlane.f32.xlu0 %v1678_v15  ;;  %v1112_v18 = vpack.c.bf16 %v5145_v14, %v5137_v10  ;;  %v1679_v25 = vmul.f32 %v5131_v3, %v5145_v14 }
 0x1c1   :  { %v972_v19 = vadd.f32 %v4276_v16, %v4228_v46  ;;  %v963_v20 = vpop.f32.mrb[21].mxu1 }
 0x1c2   :  { %v964_v23 = vadd.f32 %v963_v20, %v754_v47  ;;  %v4277_v24 = vpop.f32.mrb[22].mxu1  ;;  %4318 = vmatprep.mubr.bf16.mxu0 %v1112_v18 }
 0x1c3   :  { %v975_v26 = vadd.f32 %v4277_v24, %v4229_v48  ;;  %v966_v27 = vpop.f32.mrb[23].mxu1  ;;  %1716 = vadd.xlane.f32.xlu1 %v1681_v21  ;;  %4319 = vmatmul.mubr.bf16.vlgmr.msra.gmra.mrb[48].mxu0 %v1113_v22  ;;  %v5161_v30 = vadd.f32 %v5127_v63, %v972_v19 }
 0x1c4   :  { %v5158_v28 = vadd.f32 %v5127_v63, %v964_v23  ;;  %v967_v29 = vadd.f32 %v966_v27, %v757_v17  ;;  %1712 = vadd.xlane.f32.xlu0 %v1679_v25 }
 0x1c5   :  { %v5164_v31 = vadd.f32 %v5127_v63, %v975_v26  ;;  %v1684_v42 = vmul.f32 %v5131_v3, %v5161_v30 }
 0x1c6   :  { %7463 = vst [vmem:[#allocation8_spill] sm:$0xff] %v5158_v28  ;;  %v5167_v32 = vadd.f32 %v5127_v63, %v967_v29  ;;  %v1682_v33 = vmul.f32 %v5131_v3, %v5158_v28 }
 0x1c7   :  { %v1115_v39 = vpack.c.bf16 %v5164_v31, %v5161_v30  ;;  %v1685_v46 = vmul.f32 %v5131_v3, %v5164_v31 }
 0x1c8   :  { %v4280_v34 = vpop.f32.mrb[24].mxu1  ;;  %1718 = vadd.xlane.f32.xlu0 %v1682_v33  ;;  %v1683_v35 = vmul.f32 %v5131_v3, %v5167_v32  ;;  %v1114_v36 = vpack.c.bf16 %v5167_v32, %v5158_v28 }
 0x1c9   :  { %v988_v37 = vadd.f32 %v4280_v34, %v4232_v49  ;;  %v979_v38 = vpop.f32.mrb[25].mxu1 }
 0x1ca   :  { %v980_v40 = vadd.f32 %v979_v38, %v770_v50  ;;  %v4281_v41 = vpop.f32.mrb[26].mxu1  ;;  %1720 = vadd.xlane.f32.xlu1 %v1683_v35  ;;  %4322 = vmatprep.mubr.bf16.mxu0 %v1114_v36 }
 0x1cb   :  { %v991_v43 = vadd.f32 %v4281_v41, %v5097_v51  ;;  %v982_v44 = vpop.f32.mrb[27].mxu1  ;;  %4323 = vmatmul.mubr.bf16.gmra.mrb[52].mxu0 %v1115_v39  ;;  %v5187_v47 = vadd.f32 %v5127_v63, %v988_v37 }
 0x1cc   :  { %v5181_v45 = vadd.f32 %v5127_v63, %v980_v40  ;;  %v983_v4 = vadd.f32 %v982_v44, %v5099_v52  ;;  %1722 = vadd.xlane.f32.xlu0 %v1684_v42 }
 0x1cd   :  { %v5190_v48 = vadd.f32 %v5127_v63, %v991_v43  ;;  %v1688_v5 = vmul.f32 %v5131_v3, %v5187_v47 }
 0x1ce   :  { %v5193_v17 = vadd.f32 %v5127_v63, %v983_v4  ;;  %1724 = vadd.xlane.f32.xlu1 %v1685_v46  ;;  %v1686_v49 = vmul.f32 %v5131_v3, %v5181_v45 }
 0x1cf   :  { %v1117_v2 = vpack.c.bf16 %v5190_v48, %v5187_v47  ;;  %v1689_v11 = vmul.f32 %v5131_v3, %v5190_v48 }
 0x1d0   :  { %v4284_v50 = vpop.f32.mrb[28].mxu1  ;;  %1726 = vadd.xlane.f32.xlu0 %v1686_v49  ;;  %v1687_v51 = vmul.f32 %v5131_v3, %v5193_v17  ;;  %v1116_v52 = vpack.c.bf16 %v5193_v17, %v5181_v45 }
 0x1d1   :  { %v1004_v58 = vadd.f32 %v4284_v50, %v5101_v53  ;;  %v995_v60 = vpop.f32.mrb[29].mxu1 }
 0x1d2   :  { %v996_v0 = vadd.f32 %v995_v60, %v5103_v54  ;;  %v4285_v1 = vpop.f32.mrb[30].mxu1  ;;  %1728 = vadd.xlane.f32.xlu1 %v1687_v51  ;;  %4326 = vmatprep.mubr.bf16.mxu0 %v1116_v52 }
 0x1d3   :  { %v1007_v6 = vadd.f32 %v4285_v1, %v5105_v55  ;;  %v998_v8 = vpop.f32.mrb[31].mxu1  ;;  %4327 = vmatmul.mubr.bf16.gmra.mrb[56].mxu0 %v1117_v2  ;;  %v5215_v54 = vadd.f32 %v5127_v63, %v1004_v58 }
 0x1d4   :  { %v5209_v9 = vadd.f32 %v5127_v63, %v996_v0  ;;  %v999_v53 = vadd.f32 %v998_v8, %v5107_v56  ;;  %1730 = vadd.xlane.f32.xlu0 %v1688_v5 }
 0x1d5   :  { %v5218_v13 = vadd.f32 %v5127_v63, %v1007_v6  ;;  %v1692_v23 = vmul.f32 %v5131_v3, %v5215_v54 }
 0x1d6   :  { %v5221_v15 = vadd.f32 %v5127_v63, %v999_v53  ;;  %1732 = vadd.xlane.f32.xlu1 %v1689_v11  ;;  %v1690_v55 = vmul.f32 %v5131_v3, %v5209_v9 }
 0x1d7   :  { %7464 = vst [vmem:[#allocation9_spill] sm:$0xff] %v5218_v13  ;;  %v1119_v20 = vpack.c.bf16 %v5218_v13, %v5215_v54  ;;  %v1693_v26 = vmul.f32 %v5131_v3, %v5218_v13 }
 0x1d8   :  { %7465 = vst [vmem:[#allocation10_spill] sm:$0xff] %v5221_v15  ;;  %v4288_v16 = vpop.f32.mrb[0].mxu1  ;;  %1734 = vadd.xlane.f32.xlu0 %v1690_v55  ;;  %v1691_v56 = vmul.f32 %v5131_v3, %v5221_v15  ;;  %v1118_v18 = vpack.c.bf16 %v5221_v15, %v5209_v9 }
 0x1d9   :  { %v1011_v19 = vpop.f32.mrb[1].mxu1  ;;  %v5245_v29 = vadd.f32 %v4288_v16, %v5127_v63 }
 0x1da   :  { %v5232_v21 = vadd.f32 %v5127_v63, %v1011_v19  ;;  %v4289_v22 = vpop.f32.mrb[2].mxu1  ;;  %1736 = vadd.xlane.f32.xlu1 %v1691_v56  ;;  %4330 = vmatprep.mubr.bf16.mxu0 %v1118_v18 }
 0x1db   :  { %v1014_v24 = vpop.f32.mrb[3].mxu1  ;;  %4331 = vmatmul.mubr.bf16.gmra.mrb[60].mxu0 %v1119_v20  ;;  %v5242_v27 = vadd.f32 %v4289_v22, %v5127_v63  ;;  %7469 = vst [vmem:[#allocation14_spill] sm:$0xff] %v5245_v29  ;;  %v1696_v41 = vmul.f32 %v5131_v3, %v5245_v29 }
 0x1dc   :  { %7466 = vst [vmem:[#allocation11_spill] sm:$0xff] %v5232_v21  ;;  %v5237_v25 = vadd.f32 %v5127_v63, %v1014_v24  ;;  %1738 = vadd.xlane.f32.xlu0 %v1692_v23  ;;  %v1694_v33 = vmul.f32 %v5131_v3, %v5232_v21 }
 0x1dd   :  { %7468 = vst [vmem:[#allocation13_spill] sm:$0xff] %v5242_v27  ;;  %v1121_v38 = vpack.c.bf16 %v5242_v27, %v5245_v29  ;;  %v1697_v44 = vmul.f32 %v5131_v3, %v5242_v27 }
 0x1de   :  { %7467 = vst [vmem:[#allocation12_spill] sm:$0xff] %v5237_v25  ;;  %1740 = vadd.xlane.f32.xlu1 %v1693_v26  ;;  %v1120_v34 = vpack.c.bf16 %v5237_v25, %v5232_v21  ;;  %v1695_v36 = vmul.f32 %v5131_v3, %v5237_v25 }
 0x1e0   :  { %v4292_v35 = vpop.f32.mrb[4].mxu1  ;;  %1742 = vadd.xlane.f32.xlu0 %v1694_v33  ;;  %4334 = vmatprep.mubr.bf16.mxu0 %v1120_v34 }
 0x1e1   :  { %v1027_v37 = vpop.f32.mrb[5].mxu1  ;;  %v5269_v46 = vadd.f32 %v4292_v35, %v5127_v63 }
 0x1e2   :  { %v5256_v39 = vadd.f32 %v5127_v63, %v1027_v37  ;;  %v4293_v40 = vpop.f32.mrb[6].mxu1  ;;  %1744 = vadd.xlane.f32.xlu1 %v1695_v36 }
 0x1e3   :  { %v1030_v42 = vpop.f32.mrb[7].mxu1  ;;  %4335 = vmatmul.mubr.bf16.gmra.mrb[64].mxu0 %v1121_v38  ;;  %v5266_v4 = vadd.f32 %v4293_v40, %v5127_v63  ;;  %7473 = vst [vmem:[#allocation18_spill] sm:$0xff] %v5269_v46  ;;  %v1700_v1 = vmul.f32 %v5131_v3, %v5269_v46 }
 0x1e4   :  { %7470 = vst [vmem:[#allocation15_spill] sm:$0xff] %v5256_v39  ;;  %v5261_v43 = vadd.f32 %v5127_v63, %v1030_v42  ;;  %1746 = vadd.xlane.f32.xlu0 %v1696_v41  ;;  %v1698_v49 = vmul.f32 %v5131_v3, %v5256_v39 }
 0x1e5   :  { %7472 = vst [vmem:[#allocation17_spill] sm:$0xff] %v5266_v4  ;;  %v1123_v60 = vpack.c.bf16 %v5266_v4, %v5269_v46  ;;  %v1701_v8 = vmul.f32 %v5131_v3, %v5266_v4 }
 0x1e6   :  { %7471 = vst [vmem:[#allocation16_spill] sm:$0xff] %v5261_v43  ;;  %1748 = vadd.xlane.f32.xlu1 %v1697_v44  ;;  %v1122_v50 = vpack.c.bf16 %v5261_v43, %v5256_v39  ;;  %v1699_v52 = vmul.f32 %v5131_v3, %v5261_v43  ;;  %v4579_v44 = vld [vmem:[%s7327_s2 + $0x90] sm:$0xff]  }
 0x1e7   :  { %4350 = vmatprep.subr.bf16.mxu0 %v4579_v44 }
 0x1e8   :  { %v4296_v51 = vpop.f32.mrb[8].mxu1  ;;  %1750 = vadd.xlane.f32.xlu0 %v1698_v49  ;;  %4338 = vmatprep.mubr.bf16.mxu0 %v1122_v50  ;;  %v4580_v49 = vld [vmem:[%s7327_s2 + $0x98] sm:$0xff]   ;;  %v4581_v50 = vld [vmem:[%s7327_s2 + $0xa0] sm:$0xff]  }
 0x1e9   :  { %v1043_v58 = vpop.f32.mrb[9].mxu1  ;;  %v5293_v11 = vadd.f32 %v4296_v51, %v5127_v63  ;;  %4351 = vmatpush3.bf16.msra.mxu0 %v4579_v44  ;;  %v4583_v51 = vld [vmem:[%s7327_s2 + $0xb0] sm:$0xff]  }
 0x1ea   :  { %v5280_v2 = vadd.f32 %v5127_v63, %v1043_v58  ;;  %v4297_v0 = vpop.f32.mrb[10].mxu1  ;;  %1752 = vadd.xlane.f32.xlu1 %v1699_v52  ;;  %4352 = vmatprep.subr.bf16.mxu0 %v4580_v49  ;;  %v4584_v52 = vld [vmem:[%s7327_s2 + $0xb8] sm:$0xff]   ;;  %v4585_v58 = vld [vmem:[%s7327_s2 + $0xc0] sm:$0xff]  }
 0x1eb   :  { %v1046_v5 = vpop.f32.mrb[11].mxu1  ;;  %4339 = vmatmul.mubr.bf16.gmra.mrb[68].mxu0 %v1123_v60  ;;  %v5290_v53 = vadd.f32 %v4297_v0, %v5127_v63  ;;  %7477 = vst [vmem:[#allocation22_spill] sm:$0xff] %v5293_v11  ;;  %v1704_v24 = vmul.f32 %v5131_v3, %v5293_v11  ;;  %v4586_v60 = vld [vmem:[%s7327_s2 + $0xc8] sm:$0xff]   ;;  %v5356_v0 = vunpack.c.h.bf16 %v5118_v59 }
 0x1ec   :  { %7474 = vst [vmem:[#allocation19_spill] sm:$0xff] %v5280_v2  ;;  %v5285_v6 = vadd.f32 %v5127_v63, %v1046_v5  ;;  %1754 = vadd.xlane.f32.xlu0 %v1700_v1  ;;  %v1702_v55 = vmul.f32 %v5131_v3, %v5280_v2 }
 0x1ed   :  { %7476 = vst [vmem:[#allocation21_spill] sm:$0xff] %v5290_v53  ;;  %v1125_v20 = vpack.c.bf16 %v5290_v53, %v5293_v11  ;;  %v1705_v34 = vmul.f32 %v5131_v3, %v5290_v53  ;;  %4353 = vmatpush3.bf16.msra.mxu0 %v4580_v49  ;;  %7482 = vst [vmem:[#allocation27_spill] sm:$0xff] %v5356_v0  ;;  %v5360_v1 = vrot.slane %v5356_v0, %v5121_v61 }
 0x1ee   :  { %7475 = vst [vmem:[#allocation20_spill] sm:$0xff] %v5285_v6  ;;  %1756 = vadd.xlane.f32.xlu1 %v1701_v8  ;;  %v1124_v16 = vpack.c.bf16 %v5285_v6, %v5280_v2  ;;  %v1703_v18 = vmul.f32 %v5131_v3, %v5285_v6  ;;  %4354 = vmatprep.subr.bf16.mxu0 %v4581_v50  ;;  %v7331_v8 = vsub.s32 1, %v5110_v57 }
 0x1f0   :  { %1758 = vadd.xlane.f32.xlu0 %v1702_v55  ;;  %v4300_v56 = vpop.f32.mrb[12].mxu1  ;;  %4342 = vmatprep.mubr.bf16.mxu0 %v1124_v16  ;;  %v5370_v59 = vrot.slane %v5124_v62, %v7331_v8 }
 0x1f1   :  { %v1059_v19 = vpop.f32.mrb[13].mxu1  ;;  %v5317_v36 = vadd.f32 %v4300_v56, %v5127_v63  ;;  %4355 = vmatpush3.bf16.msra.mxu0 %v4581_v50 }
 0x1f2   :  { %v5304_v22 = vadd.f32 %v5127_v63, %v1059_v19  ;;  %1760 = vadd.xlane.f32.xlu1 %v1703_v18  ;;  %v4301_v23 = vpop.f32.mrb[14].mxu1 }
 0x1f3   :  { %v1062_v26 = vpop.f32.mrb[15].mxu1  ;;  %4343 = vmatmul.mubr.bf16.gmra.mrb[72].mxu0 %v1125_v20  ;;  %v5314_v35 = vadd.f32 %v4301_v23, %v5127_v63  ;;  %7481 = vst [vmem:[#allocation26_spill] sm:$0xff] %v5317_v36 }
 0x1f4   :  { %7478 = vst [vmem:[#allocation23_spill] sm:$0xff] %v5304_v22  ;;  %v5309_v33 = vadd.f32 %v5127_v63, %v1062_v26  ;;  %1762 = vadd.xlane.f32.xlu0 %v1704_v24  ;;  %v1706_v37 = vmul.f32 %v5131_v3, %v5304_v22  ;;  %v1708_v63 = vmul.f32 %v5131_v3, %v5317_v36 }
 0x1f5   :  { %7480 = vst [vmem:[#allocation25_spill] sm:$0xff] %v5314_v35  ;;  %v1127_v41 = vpack.c.bf16 %v5314_v35, %v5317_v36  ;;  %v1709_v42 = vmul.f32 %v5131_v3, %v5314_v35 }
 0x1f6   :  { %7479 = vst [vmem:[#allocation24_spill] sm:$0xff] %v5309_v33  ;;  %1764 = vadd.xlane.f32.xlu1 %v1705_v34  ;;  %v1126_v38 = vpack.c.bf16 %v5309_v33, %v5304_v22  ;;  %v1707_v40 = vmul.f32 %v5131_v3, %v5309_v33  ;;  %v4582_v3 = vld [vmem:[%s7327_s2 + $0xa8] sm:$0xff]  }
 0x1f7   :  { %4356 = vmatprep.subr.bf16.mxu0 %v4582_v3 }
 0x1f8   :  { %1766 = vadd.xlane.f32.xlu0 %v1706_v37  ;;  %4346 = vmatprep.mubr.bf16.mxu0 %v1126_v38 }
 0x1f9   :  { %4357 = vmatpush3.bf16.msra.mxu0 %v4582_v3 }
 0x1fa   :  { %1768 = vadd.xlane.f32.xlu1 %v1707_v40  ;;  %4358 = vmatprep.subr.bf16.mxu0 %v4583_v51 }
 0x1fb   :  { %4347 = vmatmul.mubr.bf16.gmra.mrb[76].mxu0 %v1127_v41 }
 0x1fc   :  { %1770 = vadd.xlane.f32.xlu0 %v1708_v63 }
 0x1fd   :  { %4359 = vmatpush3.bf16.msra.mxu0 %v4583_v51 }
 0x1fe   :  { %1772 = vadd.xlane.f32.xlu1 %v1709_v42  ;;  %4360 = vmatprep.subr.bf16.mxu0 %v4584_v52 }
 0x201   :  { %4361 = vmatpush3.bf16.msra.mxu0 %v4584_v52 }
 0x202   :  { %4362 = vmatprep.subr.bf16.mxu0 %v4585_v58 }
 0x205   :  { %4363 = vmatpush3.bf16.msra.mxu0 %v4585_v58 }
 0x206   :  { %4364 = vmatprep.subr.bf16.mxu0 %v4586_v60 }
 0x209   :  { %4365 = vmatpush3.bf16.msra.mxu0 %v4586_v60 }
 0x24c   :  { %v1715_v5 = vpop.xlane.xlu1 %1714 }
 0x24d   :  { %v1776_v55 = vmul.f32 %v1715_v5, %v5134_v7  ;;  %v1711_v16 = vpop.xlane.xlu0 %1710 }
 0x24e   :  { %v1774_v56 = vmul.f32 %v1711_v16, %v5137_v10 }
 0x24f   :  { %v1812_v18 = vadd.f32 %v5360_v1, %v1776_v55 }
 0x250   :  { %v1810_v19 = vadd.f32 %v5360_v1, %v1774_v56  ;;  %v1717_v20 = vpop.xlane.xlu1 %1716 }
 0x251   :  { %v1777_v23 = vmul.f32 %v1717_v20, %v5140_v12  ;;  %v1713_v24 = vpop.xlane.xlu0 %1712  ;;  %v5382_v41 = vadd.f32 %v1812_v18, %v5134_v7 }
 0x252   :  { %v1775_v26 = vmul.f32 %v1713_v24, %v5145_v14  ;;  %v5375_v34 = vadd.f32 %v1810_v19, %v5137_v10 }
 0x253   :  { %v1813_v37 = vadd.f32 %v5360_v1, %v1777_v23  ;;  %v1880_v52 = vmul.f32 %v5370_v59, %v5382_v41 }
 0x254   :  { %v1811_v38 = vadd.f32 %v5360_v1, %v1775_v26  ;;  %v1878_v40 = vmul.f32 %v5370_v59, %v5375_v34 }
 0x255   :  { %v1719_v63 = vpop.xlane.xlu0 %1718  ;;  %v5389_v50 = vadd.f32 %v1813_v37, %v5140_v12 }
 0x256   :  { %v1778_v42 = vmul.f32 %v1719_v63, %v5158_v28  ;;  %1910 = vadd.xlane.f32.xlu0 %v1878_v40  ;;  %v5386_v44 = vadd.f32 %v1811_v38, %v5145_v14 }
 0x257   :  { %v1721_v49 = vpop.xlane.xlu1 %1720  ;;  %v1881_v18 = vmul.f32 %v5370_v59, %v5389_v50 }
 0x258   :  { %v1814_v3 = vadd.f32 %v5360_v1, %v1778_v42  ;;  %v1779_v51 = vmul.f32 %v1721_v49, %v5167_v32  ;;  %v1879_v58 = vmul.f32 %v5370_v59, %v5386_v44 }
 0x259   :  { %v1723_v60 = vpop.xlane.xlu0 %1722 }
 0x25a   :  { %v1815_v5 = vadd.f32 %v5360_v1, %v1779_v51  ;;  %v1780_v55 = vmul.f32 %v1723_v60, %v5161_v30  ;;  %1914 = vadd.xlane.f32.xlu0 %v1880_v52  ;;  %1912 = vadd.xlane.f32.xlu1 %v1879_v58  ;;  %v5400_v16 = vadd.f32 %v1814_v3, %v5158_v28 }
 0x25b   :  { %v1725_v56 = vpop.xlane.xlu1 %1724 }
 0x25c   :  { %v1816_v19 = vadd.f32 %v5360_v1, %v1780_v55  ;;  %v1781_v20 = vmul.f32 %v1725_v56, %v5164_v31  ;;  %v1882_v23 = vmul.f32 %v5370_v59, %v5400_v16  ;;  %v5409_v24 = vadd.f32 %v1815_v5, %v5167_v32 }
 0x25d   :  { %v1727_v26 = vpop.xlane.xlu0 %1726 }
 0x25e   :  { %v1817_v37 = vadd.f32 %v5360_v1, %v1781_v20  ;;  %v1782_v38 = vmul.f32 %v1727_v26, %v5181_v45  ;;  %1918 = vadd.xlane.f32.xlu0 %v1882_v23  ;;  %1916 = vadd.xlane.f32.xlu1 %v1881_v18  ;;  %v5414_v40 = vadd.f32 %v1816_v19, %v5161_v30 }
 0x25f   :  { %v1729_v63 = vpop.xlane.xlu1 %1728  ;;  %v1883_v42 = vmul.f32 %v5370_v59, %v5409_v24 }
 0x260   :  { %v1818_v49 = vadd.f32 %v5360_v1, %v1782_v38  ;;  %v1783_v3 = vmul.f32 %v1729_v63, %v5193_v17  ;;  %v1884_v51 = vmul.f32 %v5370_v59, %v5414_v40  ;;  %v5423_v52 = vadd.f32 %v1817_v37, %v5164_v31 }
 0x261   :  { %v1731_v58 = vpop.xlane.xlu0 %1730 }
 0x262   :  { %v1819_v60 = vadd.f32 %v5360_v1, %v1783_v3  ;;  %v1784_v5 = vmul.f32 %v1731_v58, %v5187_v47  ;;  %1922 = vadd.xlane.f32.xlu0 %v1884_v51  ;;  %1920 = vadd.xlane.f32.xlu1 %v1883_v42  ;;  %v5428_v55 = vadd.f32 %v1818_v49, %v5181_v45 }
 0x263   :  { %v1733_v56 = vpop.xlane.xlu1 %1732  ;;  %v1885_v18 = vmul.f32 %v5370_v59, %v5423_v52 }
 0x264   :  { %v1820_v19 = vadd.f32 %v5360_v1, %v1784_v5  ;;  %v1785_v20 = vmul.f32 %v1733_v56, %v5190_v48  ;;  %v1886_v23 = vmul.f32 %v5370_v59, %v5428_v55  ;;  %v5437_v26 = vadd.f32 %v1819_v60, %v5193_v17 }
 0x265   :  { %v1735_v37 = vpop.xlane.xlu0 %1734 }
 0x266   :  { %v1821_v38 = vadd.f32 %v5360_v1, %v1785_v20  ;;  %v1786_v63 = vmul.f32 %v1735_v37, %v5209_v9  ;;  %1926 = vadd.xlane.f32.xlu0 %v1886_v23  ;;  %1924 = vadd.xlane.f32.xlu1 %v1885_v18  ;;  %v5442_v42 = vadd.f32 %v1820_v19, %v5187_v47 }
 0x267   :  { %v1737_v49 = vpop.xlane.xlu1 %1736  ;;  %v1887_v3 = vmul.f32 %v5370_v59, %v5437_v26 }
 0x268   :  { %v1822_v51 = vadd.f32 %v5360_v1, %v1786_v63  ;;  %v1787_v58 = vmul.f32 %v1737_v49, %v5221_v15  ;;  %v1888_v60 = vmul.f32 %v5370_v59, %v5442_v42  ;;  %v5451_v5 = vadd.f32 %v1821_v38, %v5190_v48 }
 0x269   :  { %v1739_v56 = vpop.xlane.xlu0 %1738 }
 0x26a   :  { %7483 = vst [vmem:[#allocation28_spill] sm:$0xff] %v5451_v5  ;;  %v1823_v18 = vadd.f32 %v5360_v1, %v1787_v58  ;;  %v1788_v19 = vmul.f32 %v1739_v56, %v5215_v54  ;;  %1930 = vadd.xlane.f32.xlu0 %v1888_v60  ;;  %1928 = vadd.xlane.f32.xlu1 %v1887_v3 }
 0x26b   :  { %v5456_v20 = vadd.f32 %v1822_v51, %v5209_v9  ;;  %v1741_v23 = vpop.xlane.xlu1 %1740  ;;  %v1889_v37 = vmul.f32 %v5370_v59, %v5451_v5 }
 0x26c   :  { %v1824_v63 = vadd.f32 %v5360_v1, %v1788_v19  ;;  %v1789_v49 = vmul.f32 %v1741_v23, %v5218_v13  ;;  %v5465_v58 = vadd.f32 %v1823_v18, %v5221_v15 }
 0x26d   :  { %v1890_v38 = vmul.f32 %v5370_v59, %v5456_v20  ;;  %v1743_v56 = vpop.xlane.xlu0 %1742 }
 0x26e   :  { %7484 = vst [vmem:[#allocation29_spill] sm:$0xff] %v5465_v58  ;;  %v1825_v3 = vadd.f32 %v5360_v1, %v1789_v49  ;;  %v1790_v51 = vmul.f32 %v1743_v56, %v5232_v21  ;;  %1932 = vadd.xlane.f32.xlu1 %v1889_v37  ;;  %v5470_v60 = vadd.f32 %v1824_v63, %v5215_v54 }
 0x26f   :  { %1934 = vadd.xlane.f32.xlu0 %v1890_v38  ;;  %v1745_v8 = vpop.xlane.xlu1 %1744  ;;  %v1891_v19 = vmul.f32 %v5370_v59, %v5465_v58 }
 0x270   :  { %7485 = vst [vmem:[#allocation30_spill] sm:$0xff] %v5470_v60  ;;  %v1826_v23 = vadd.f32 %v5360_v1, %v1790_v51  ;;  %v1791_v5 = vmul.f32 %v1745_v8, %v5237_v25  ;;  %v1892_v18 = vmul.f32 %v5370_v59, %v5470_v60  ;;  %v5479_v49 = vadd.f32 %v1825_v3, %v5218_v13 }
 0x271   :  { %v1747_v56 = vpop.xlane.xlu0 %1746 }
 0x272   :  { %7486 = vst [vmem:[#allocation31_spill] sm:$0xff] %v5479_v49  ;;  %v1827_v37 = vadd.f32 %v5360_v1, %v1791_v5  ;;  %v1792_v63 = vmul.f32 %v1747_v56, %v5245_v29  ;;  %1936 = vadd.xlane.f32.xlu1 %v1891_v19  ;;  %v5484_v38 = vadd.f32 %v1826_v23, %v5232_v21 }
 0x273   :  { %1938 = vadd.xlane.f32.xlu0 %v1892_v18  ;;  %v1749_v58 = vpop.xlane.xlu1 %1748  ;;  %v1893_v8 = vmul.f32 %v5370_v59, %v5479_v49 }
 0x274   :  { %7487 = vst [vmem:[#allocation32_spill] sm:$0xff] %v5484_v38  ;;  %v1828_v51 = vadd.f32 %v5360_v1, %v1792_v63  ;;  %v1793_v60 = vmul.f32 %v1749_v58, %v5242_v27  ;;  %v1894_v3 = vmul.f32 %v5370_v59, %v5484_v38  ;;  %v5493_v5 = vadd.f32 %v1827_v37, %v5237_v25 }
 0x275   :  { %v1751_v56 = vpop.xlane.xlu0 %1750 }
 0x276   :  { %7488 = vst [vmem:[#allocation33_spill] sm:$0xff] %v5493_v5  ;;  %v1829_v19 = vadd.f32 %v5360_v1, %v1793_v60  ;;  %v1794_v23 = vmul.f32 %v1751_v56, %v5256_v39  ;;  %1940 = vadd.xlane.f32.xlu1 %v1893_v8  ;;  %v5498_v18 = vadd.f32 %v1828_v51, %v5245_v29 }
 0x277   :  { %1942 = vadd.xlane.f32.xlu0 %v1894_v3  ;;  %v1753_v49 = vpop.xlane.xlu1 %1752  ;;  %v1895_v58 = vmul.f32 %v5370_v59, %v5493_v5 }
 0x278   :  { %7489 = vst [vmem:[#allocation34_spill] sm:$0xff] %v5498_v18  ;;  %v1830_v63 = vadd.f32 %v5360_v1, %v1794_v23  ;;  %v1795_v38 = vmul.f32 %v1753_v49, %v5261_v43  ;;  %v1896_v37 = vmul.f32 %v5370_v59, %v5498_v18  ;;  %v5507_v60 = vadd.f32 %v1829_v19, %v5242_v27 }
 0x279   :  { %v1755_v56 = vpop.xlane.xlu0 %1754 }
 0x27a   :  { %7490 = vst [vmem:[#allocation35_spill] sm:$0xff] %v5507_v60  ;;  %v1831_v8 = vadd.f32 %v5360_v1, %v1795_v38  ;;  %v1796_v51 = vmul.f32 %v1755_v56, %v5269_v46  ;;  %1944 = vadd.xlane.f32.xlu1 %v1895_v58  ;;  %v5512_v3 = vadd.f32 %v1830_v63, %v5256_v39 }
 0x27b   :  { %1946 = vadd.xlane.f32.xlu0 %v1896_v37  ;;  %v1757_v5 = vpop.xlane.xlu1 %1756  ;;  %v1897_v49 = vmul.f32 %v5370_v59, %v5507_v60 }
 0x27c   :  { %7491 = vst [vmem:[#allocation36_spill] sm:$0xff] %v5512_v3  ;;  %v1832_v23 = vadd.f32 %v5360_v1, %v1796_v51  ;;  %v1797_v18 = vmul.f32 %v1757_v5, %v5266_v4  ;;  %v1898_v19 = vmul.f32 %v5370_v59, %v5512_v3  ;;  %v5521_v38 = vadd.f32 %v1831_v8, %v5261_v43 }
 0x27d   :  { %v1759_v56 = vpop.xlane.xlu0 %1758 }
 0x27e   :  { %7492 = vst [vmem:[#allocation37_spill] sm:$0xff] %v5521_v38  ;;  %v1833_v58 = vadd.f32 %v5360_v1, %v1797_v18  ;;  %v1798_v63 = vmul.f32 %v1759_v56, %v5280_v2  ;;  %1948 = vadd.xlane.f32.xlu1 %v1897_v49  ;;  %v5526_v37 = vadd.f32 %v1832_v23, %v5269_v46 }
 0x27f   :  { %1950 = vadd.xlane.f32.xlu0 %v1898_v19  ;;  %v1761_v60 = vpop.xlane.xlu1 %1760  ;;  %v1899_v5 = vmul.f32 %v5370_v59, %v5521_v38 }
 0x280   :  { %7493 = vst [vmem:[#allocation38_spill] sm:$0xff] %v5526_v37  ;;  %v1834_v51 = vadd.f32 %v5360_v1, %v1798_v63  ;;  %v1799_v3 = vmul.f32 %v1761_v60, %v5285_v6  ;;  %v1900_v8 = vmul.f32 %v5370_v59, %v5526_v37  ;;  %v5535_v18 = vadd.f32 %v1833_v58, %v5266_v4 }
 0x281   :  { %v1763_v56 = vpop.xlane.xlu0 %1762 }
 0x282   :  { %7494 = vst [vmem:[#allocation39_spill] sm:$0xff] %v5535_v18  ;;  %v1835_v49 = vadd.f32 %v5360_v1, %v1799_v3  ;;  %v1800_v23 = vmul.f32 %v1763_v56, %v5293_v11  ;;  %1952 = vadd.xlane.f32.xlu1 %v1899_v5  ;;  %v5540_v19 = vadd.f32 %v1834_v51, %v5280_v2 }
 0x283   :  { %1954 = vadd.xlane.f32.xlu0 %v1900_v8  ;;  %v1765_v38 = vpop.xlane.xlu1 %1764  ;;  %v1901_v60 = vmul.f32 %v5370_v59, %v5535_v18 }
 0x284   :  { %7495 = vst [vmem:[#allocation40_spill] sm:$0xff] %v5540_v19  ;;  %v1836_v63 = vadd.f32 %v5360_v1, %v1800_v23  ;;  %v1801_v37 = vmul.f32 %v1765_v38, %v5290_v53  ;;  %v1902_v58 = vmul.f32 %v5370_v59, %v5540_v19  ;;  %v5549_v3 = vadd.f32 %v1835_v49, %v5285_v6 }
 0x285   :  { %v1767_v56 = vpop.xlane.xlu0 %1766 }
 0x286   :  { %7496 = vst [vmem:[#allocation41_spill] sm:$0xff] %v5549_v3  ;;  %v1837_v5 = vadd.f32 %v5360_v1, %v1801_v37  ;;  %v1802_v51 = vmul.f32 %v1767_v56, %v5304_v22  ;;  %1956 = vadd.xlane.f32.xlu1 %v1901_v60  ;;  %v5554_v8 = vadd.f32 %v1836_v63, %v5293_v11 }
 0x287   :  { %1958 = vadd.xlane.f32.xlu0 %v1902_v58  ;;  %v1769_v18 = vpop.xlane.xlu1 %1768  ;;  %v1903_v38 = vmul.f32 %v5370_v59, %v5549_v3 }
 0x288   :  { %7497 = vst [vmem:[#allocation42_spill] sm:$0xff] %v5554_v8  ;;  %v1838_v23 = vadd.f32 %v5360_v1, %v1802_v51  ;;  %v1803_v19 = vmul.f32 %v1769_v18, %v5309_v33  ;;  %v1904_v49 = vmul.f32 %v5370_v59, %v5554_v8  ;;  %v5563_v37 = vadd.f32 %v1837_v5, %v5290_v53 }
 0x289   :  { %v1771_v56 = vpop.xlane.xlu0 %1770 }
 0x28a   :  { %7498 = vst [vmem:[#allocation43_spill] sm:$0xff] %v5563_v37  ;;  %v1839_v60 = vadd.f32 %v5360_v1, %v1803_v19  ;;  %v1804_v63 = vmul.f32 %v1771_v56, %v5317_v36  ;;  %1960 = vadd.xlane.f32.xlu1 %v1903_v38  ;;  %v5568_v58 = vadd.f32 %v1838_v23, %v5304_v22  ;;  %v1144_v38 = vld [vmem:[%s7327_s2 + $0x8c] sm:$0x1] }
 0x28b   :  { %1962 = vadd.xlane.f32.xlu0 %v1904_v49  ;;  %v1773_v3 = vpop.xlane.xlu1 %1772  ;;  %v1905_v18 = vmul.f32 %v5370_v59, %v5563_v37  ;;  %v1145_v56 = vunpack.c.l.bf16 %v1144_v38 }
 0x28c   :  { %7499 = vst [vmem:[#allocation44_spill] sm:$0xff] %v5568_v58  ;;  %v1840_v51 = vadd.f32 %v5360_v1, %v1804_v63  ;;  %v1805_v8 = vmul.f32 %v1773_v3, %v5314_v35  ;;  %v1906_v5 = vmul.f32 %v5370_v59, %v5568_v58  ;;  %v5577_v19 = vadd.f32 %v1839_v60, %v5309_v33 }
 0x28d   :  { %v5594_v37 = vrot.slane %v1145_v56, %v5121_v61 }
 0x28e   :  { %7500 = vst [vmem:[#allocation45_spill] sm:$0xff] %v5577_v19  ;;  %v1841_v23 = vadd.f32 %v5360_v1, %v1805_v8  ;;  %1964 = vadd.xlane.f32.xlu1 %v1905_v18  ;;  %v5584_v49 = vadd.f32 %v1840_v51, %v5317_v36  ;;  %v1907_v63 = vmul.f32 %v5370_v59, %v5577_v19 }
 0x28f   :  { %1966 = vadd.xlane.f32.xlu0 %v1906_v5 }
 0x290   :  { %7501 = vst [vmem:[#allocation46_spill] sm:$0xff] %v5584_v49  ;;  %v1908_v3 = vmul.f32 %v5370_v59, %v5584_v49  ;;  %v5591_v60 = vadd.f32 %v1841_v23, %v5314_v35 }
 0x292   :  { %7502 = vst [vmem:[#allocation47_spill] sm:$0xff] %v5591_v60  ;;  %1968 = vadd.xlane.f32.xlu1 %v1907_v63  ;;  %v1909_v1 = vmul.f32 %v5370_v59, %v5591_v60 }
 0x293   :  { %1970 = vadd.xlane.f32.xlu0 %v1908_v3 }
 0x296   :  { %v4320_v8 = vpop.f32.mrb[48].mxu0  ;;  %1972 = vadd.xlane.f32.xlu1 %v1909_v1 }
 0x297   :  { %v1241_v18 = vadd.f32 %v4320_v8, %v5594_v37  ;;  %v1232_v51 = vpop.f32.mrb[49].mxu0 }
 0x298   :  { %v1233_v5 = vadd.f32 %v1232_v51, %v5594_v37  ;;  %v4321_v38 = vpop.f32.mrb[50].mxu0 }
 0x299   :  { %v1244_v19 = vadd.f32 %v4321_v38, %v5594_v37  ;;  %v1235_v23 = vpop.f32.mrb[51].mxu0  ;;  %v1361_v63 = vmax.f32 %v1241_v18, 0.0 }
 0x29a   :  { %v1236_v3 = vadd.f32 %v1235_v23, %v5594_v37  ;;  %v1359_v56 = vmax.f32 %v1233_v5, 0.0 }
 0x29b   :  { %v1362_v49 = vmax.f32 %v1244_v19, 0.0 }
 0x29c   :  { %v1360_v61 = vmax.f32 %v1236_v3, 0.0 }
 0x29d   :  { %v1392_v35 = vpack.c.bf16 %v1362_v49, %v1361_v63 }
 0x29e   :  { %v1391_v58 = vpack.c.bf16 %v1360_v61, %v1359_v56  ;;  %v4324_v59 = vpop.f32.mrb[52].mxu0 }
 0x29f   :  { %v1257_v1 = vadd.f32 %v4324_v59, %v5594_v37  ;;  %v1248_v60 = vpop.f32.mrb[53].mxu0 }
 0x2a0   :  { %v1249_v8 = vadd.f32 %v1248_v60, %v5594_v37  ;;  %v4325_v33 = vpop.f32.mrb[54].mxu0  ;;  %4366 = vmatprep.mubr.bf16.mxu0 %v1391_v58 }
 0x2a1   :  { %v1260_v51 = vadd.f32 %v4325_v33, %v5594_v37  ;;  %v1251_v38 = vpop.f32.mrb[55].mxu0  ;;  %4367 = vmatmul.mubr.bf16.vlgmr.msra.gmra.mrb[80].mxu0 %v1392_v35  ;;  %v1365_v18 = vmax.f32 %v1257_v1, 0.0 }
 0x2a2   :  { %v1252_v23 = vadd.f32 %v1251_v38, %v5594_v37  ;;  %v1363_v5 = vmax.f32 %v1249_v8, 0.0 }
 0x2a3   :  { %v1366_v19 = vmax.f32 %v1260_v51, 0.0 }
 0x2a4   :  { %v1364_v3 = vmax.f32 %v1252_v23, 0.0 }
 0x2a5   :  { %v1394_v49 = vpack.c.bf16 %v1366_v19, %v1365_v18 }
 0x2a6   :  { %v1393_v61 = vpack.c.bf16 %v1364_v3, %v1363_v5  ;;  %v4328_v63 = vpop.f32.mrb[56].mxu0 }
 0x2a7   :  { %v1273_v56 = vadd.f32 %v4328_v63, %v5594_v37  ;;  %v1264_v59 = vpop.f32.mrb[57].mxu0 }
 0x2a8   :  { %v1265_v60 = vadd.f32 %v1264_v59, %v5594_v37  ;;  %v4329_v36 = vpop.f32.mrb[58].mxu0  ;;  %4370 = vmatprep.mubr.bf16.mxu0 %v1393_v61 }
 0x2a9   :  { %v1276_v33 = vadd.f32 %v4329_v36, %v5594_v37  ;;  %v1267_v58 = vpop.f32.mrb[59].mxu0  ;;  %4371 = vmatmul.mubr.bf16.gmra.mrb[84].mxu0 %v1394_v49  ;;  %v1369_v1 = vmax.f32 %v1273_v56, 0.0 }
 0x2aa   :  { %v1268_v35 = vadd.f32 %v1267_v58, %v5594_v37  ;;  %v1367_v8 = vmax.f32 %v1265_v60, 0.0 }
 0x2ab   :  { %v1370_v51 = vmax.f32 %v1276_v33, 0.0 }
 0x2ac   :  { %v1368_v38 = vmax.f32 %v1268_v35, 0.0 }
 0x2ad   :  { %v1396_v23 = vpack.c.bf16 %v1370_v51, %v1369_v1 }
 0x2ae   :  { %v1395_v18 = vpack.c.bf16 %v1368_v38, %v1367_v8  ;;  %v4332_v19 = vpop.f32.mrb[60].mxu0 }
 0x2af   :  { %v1289_v5 = vadd.f32 %v4332_v19, %v5594_v37  ;;  %v1280_v3 = vpop.f32.mrb[61].mxu0 }
 0x2b0   :  { %v1281_v63 = vadd.f32 %v1280_v3, %v5594_v37  ;;  %v4333_v59 = vpop.f32.mrb[62].mxu0  ;;  %4374 = vmatprep.mubr.bf16.mxu0 %v1395_v18 }
 0x2b1   :  { %v1292_v36 = vadd.f32 %v4333_v59, %v5594_v37  ;;  %v1283_v61 = vpop.f32.mrb[63].mxu0  ;;  %4375 = vmatmul.mubr.bf16.gmra.mrb[88].mxu0 %v1396_v23  ;;  %v1373_v56 = vmax.f32 %v1289_v5, 0.0 }
 0x2b2   :  { %v1284_v49 = vadd.f32 %v1283_v61, %v5594_v37  ;;  %v1371_v60 = vmax.f32 %v1281_v63, 0.0 }
 0x2b3   :  { %v1374_v33 = vmax.f32 %v1292_v36, 0.0 }
 0x2b4   :  { %v1372_v58 = vmax.f32 %v1284_v49, 0.0 }
 0x2b5   :  { %v1398_v35 = vpack.c.bf16 %v1374_v33, %v1373_v56 }
 0x2b6   :  { %v1397_v1 = vpack.c.bf16 %v1372_v58, %v1371_v60  ;;  %v4336_v51 = vpop.f32.mrb[64].mxu0 }
 0x2b7   :  { %v1305_v8 = vadd.f32 %v4336_v51, %v5594_v37  ;;  %v1296_v38 = vpop.f32.mrb[65].mxu0 }
 0x2b8   :  { %v1297_v19 = vadd.f32 %v1296_v38, %v5594_v37  ;;  %v4337_v3 = vpop.f32.mrb[66].mxu0  ;;  %4378 = vmatprep.mubr.bf16.mxu0 %v1397_v1 }
 0x2b9   :  { %v1308_v18 = vadd.f32 %v4337_v3, %v5594_v37  ;;  %v1299_v59 = vpop.f32.mrb[67].mxu0  ;;  %4379 = vmatmul.mubr.bf16.gmra.mrb[92].mxu0 %v1398_v35  ;;  %v1377_v5 = vmax.f32 %v1305_v8, 0.0 }
 0x2ba   :  { %v1300_v23 = vadd.f32 %v1299_v59, %v5594_v37  ;;  %v1375_v63 = vmax.f32 %v1297_v19, 0.0 }
 0x2bb   :  { %v1378_v36 = vmax.f32 %v1308_v18, 0.0 }
 0x2bc   :  { %v1376_v61 = vmax.f32 %v1300_v23, 0.0 }
 0x2bd   :  { %v1400_v49 = vpack.c.bf16 %v1378_v36, %v1377_v5 }
 0x2be   :  { %v1399_v56 = vpack.c.bf16 %v1376_v61, %v1375_v63  ;;  %v4340_v33 = vpop.f32.mrb[68].mxu0 }
 0x2bf   :  { %v1321_v60 = vadd.f32 %v4340_v33, %v5594_v37  ;;  %v1312_v58 = vpop.f32.mrb[69].mxu0 }
 0x2c0   :  { %v1313_v51 = vadd.f32 %v1312_v58, %v5594_v37  ;;  %v4341_v38 = vpop.f32.mrb[70].mxu0  ;;  %4382 = vmatprep.mubr.bf16.mxu0 %v1399_v56 }
 0x2c1   :  { %v1324_v1 = vadd.f32 %v4341_v38, %v5594_v37  ;;  %v1315_v3 = vpop.f32.mrb[71].mxu0  ;;  %4383 = vmatmul.mubr.bf16.gmra.mrb[96].mxu0 %v1400_v49  ;;  %v1381_v8 = vmax.f32 %v1321_v60, 0.0 }
 0x2c2   :  { %v1316_v35 = vadd.f32 %v1315_v3, %v5594_v37  ;;  %v1379_v19 = vmax.f32 %v1313_v51, 0.0 }
 0x2c3   :  { %v1382_v18 = vmax.f32 %v1324_v1, 0.0 }
 0x2c4   :  { %v1380_v59 = vmax.f32 %v1316_v35, 0.0 }
 0x2c5   :  { %v1402_v23 = vpack.c.bf16 %v1382_v18, %v1381_v8 }
 0x2c6   :  { %v1401_v5 = vpack.c.bf16 %v1380_v59, %v1379_v19  ;;  %v4344_v36 = vpop.f32.mrb[72].mxu0 }
 0x2c7   :  { %v1337_v63 = vadd.f32 %v4344_v36, %v5594_v37  ;;  %v1328_v61 = vpop.f32.mrb[73].mxu0 }
 0x2c8   :  { %v1329_v33 = vadd.f32 %v1328_v61, %v5594_v37  ;;  %v4345_v58 = vpop.f32.mrb[74].mxu0  ;;  %4386 = vmatprep.mubr.bf16.mxu0 %v1401_v5 }
 0x2c9   :  { %v1340_v56 = vadd.f32 %v4345_v58, %v5594_v37  ;;  %v1331_v38 = vpop.f32.mrb[75].mxu0  ;;  %4387 = vmatmul.mubr.bf16.gmra.mrb[100].mxu0 %v1402_v23  ;;  %v1385_v60 = vmax.f32 %v1337_v63, 0.0 }
 0x2ca   :  { %v1332_v49 = vadd.f32 %v1331_v38, %v5594_v37  ;;  %v1383_v51 = vmax.f32 %v1329_v33, 0.0 }
 0x2cb   :  { %v1386_v1 = vmax.f32 %v1340_v56, 0.0 }
 0x2cc   :  { %v1384_v3 = vmax.f32 %v1332_v49, 0.0 }
 0x2cd   :  { %v1404_v35 = vpack.c.bf16 %v1386_v1, %v1385_v60  ;;  %v7503_v1 = vsub.s32 1, %v5110_v57 }
 0x2ce   :  { %v1403_v8 = vpack.c.bf16 %v1384_v3, %v1383_v51  ;;  %v4348_v18 = vpop.f32.mrb[76].mxu0  ;;  %v7360_v3 = vsub.s32 2, %v5110_v57 }
 0x2cf   :  { %v1353_v19 = vadd.f32 %v4348_v18, %v5594_v37  ;;  %v1344_v59 = vpop.f32.mrb[77].mxu0  ;;  %v5633_v51 = vrot.slane %v5356_v0, %v7503_v1 }
 0x2d0   :  { %v1345_v36 = vadd.f32 %v1344_v59, %v5594_v37  ;;  %v4349_v61 = vpop.f32.mrb[78].mxu0  ;;  %4390 = vmatprep.mubr.bf16.mxu0 %v1403_v8  ;;  %v5641_v18 = vrot.slane %v5124_v62, %v7360_v3 }
 0x2d1   :  { %v1356_v5 = vadd.f32 %v4349_v61, %v5594_v37  ;;  %v1347_v58 = vpop.f32.mrb[79].mxu0  ;;  %4391 = vmatmul.mubr.bf16.gmra.mrb[104].mxu0 %v1404_v35  ;;  %v1389_v63 = vmax.f32 %v1353_v19, 0.0 }
 0x2d2   :  { %v1348_v23 = vadd.f32 %v1347_v58, %v5594_v37  ;;  %v1387_v33 = vmax.f32 %v1345_v36, 0.0 }
 0x2d3   :  { %v1390_v56 = vmax.f32 %v1356_v5, 0.0 }
 0x2d4   :  { %v1388_v38 = vmax.f32 %v1348_v23, 0.0 }
 0x2d5   :  { %v1406_v49 = vpack.c.bf16 %v1390_v56, %v1389_v63 }
 0x2d6   :  { %v1405_v60 = vpack.c.bf16 %v1388_v38, %v1387_v33 }
 0x2d8   :  { %4394 = vmatprep.mubr.bf16.mxu0 %v1405_v60 }
 0x2d9   :  { %4395 = vmatmul.mubr.bf16.gmra.mrb[108].mxu0 %v1406_v49 }
 0x2e3   :  { %v1911_v8 = vpop.xlane.xlu0 %1910 }
 0x2e4   :  { %v1974_v35 = vmul.f32 %v1911_v8, %v5137_v10 }
 0x2e6   :  { %v2010_v37 = vadd.f32 %v5633_v51, %v1974_v35 }
 0x2e7   :  { %v1915_v19 = vpop.xlane.xlu0 %1914  ;;  %v1913_v59 = vpop.xlane.xlu1 %1912 }
 0x2e8   :  { %v1976_v36 = vmul.f32 %v1915_v19, %v5134_v7  ;;  %v1975_v61 = vmul.f32 %v1913_v59, %v5145_v14  ;;  %v5646_v5 = vadd.f32 %v2010_v37, %v5375_v34 }
 0x2ea   :  { %v2012_v58 = vadd.f32 %v5633_v51, %v1976_v36  ;;  %v2011_v23 = vadd.f32 %v5633_v51, %v1975_v61  ;;  %v2078_v63 = vmul.f32 %v5641_v18, %v5646_v5 }
 0x2eb   :  { %v1919_v56 = vpop.xlane.xlu0 %1918  ;;  %v1917_v33 = vpop.xlane.xlu1 %1916 }
 0x2ec   :  { %v1978_v38 = vmul.f32 %v1919_v56, %v5158_v28  ;;  %v1977_v49 = vmul.f32 %v1917_v33, %v5140_v12  ;;  %2110 = vadd.xlane.f32.xlu0 %v2078_v63  ;;  %v5655_v60 = vadd.f32 %v2012_v58, %v5382_v41  ;;  %v5658_v34 = vadd.f32 %v2011_v23, %v5386_v44 }
 0x2ee   :  { %v2014_v1 = vadd.f32 %v5633_v51, %v1978_v38  ;;  %v2013_v8 = vadd.f32 %v5633_v51, %v1977_v49  ;;  %v2080_v35 = vmul.f32 %v5641_v18, %v5655_v60  ;;  %v2079_v37 = vmul.f32 %v5641_v18, %v5658_v34 }
 0x2ef   :  { %v1923_v19 = vpop.xlane.xlu0 %1922  ;;  %v1921_v59 = vpop.xlane.xlu1 %1920 }
 0x2f0   :  { %v1980_v36 = vmul.f32 %v1923_v19, %v5161_v30  ;;  %v1979_v41 = vmul.f32 %v1921_v59, %v5167_v32  ;;  %2114 = vadd.xlane.f32.xlu0 %v2080_v35  ;;  %2112 = vadd.xlane.f32.xlu1 %v2079_v37  ;;  %v5669_v44 = vadd.f32 %v2014_v1, %v5400_v16 }
 0x2f1   :  { %v5672_v61 = vadd.f32 %v2013_v8, %v5389_v50 }
 0x2f2   :  { %v2016_v58 = vadd.f32 %v5633_v51, %v1980_v36  ;;  %v2015_v23 = vadd.f32 %v5633_v51, %v1979_v41  ;;  %v2082_v63 = vmul.f32 %v5641_v18, %v5669_v44 }
 0x2f3   :  { %v1927_v56 = vpop.xlane.xlu0 %1926  ;;  %v1925_v33 = vpop.xlane.xlu1 %1924  ;;  %v2081_v38 = vmul.f32 %v5641_v18, %v5672_v61 }
 0x2f4   :  { %v1982_v49 = vmul.f32 %v1927_v56, %v5181_v45  ;;  %v1981_v16 = vmul.f32 %v1925_v33, %v5164_v31  ;;  %2118 = vadd.xlane.f32.xlu0 %v2082_v63  ;;  %v5683_v50 = vadd.f32 %v2016_v58, %v5414_v40  ;;  %v5686_v1 = vadd.f32 %v2015_v23, %v5409_v24 }
 0x2f5   :  { %2116 = vadd.xlane.f32.xlu1 %v2081_v38 }
 0x2f6   :  { %v2018_v8 = vadd.f32 %v5633_v51, %v1982_v49  ;;  %v2017_v35 = vadd.f32 %v5633_v51, %v1981_v16  ;;  %v2084_v37 = vmul.f32 %v5641_v18, %v5683_v50  ;;  %v2083_v19 = vmul.f32 %v5641_v18, %v5686_v1 }
 0x2f7   :  { %v1931_v59 = vpop.xlane.xlu0 %1930  ;;  %v1929_v36 = vpop.xlane.xlu1 %1928 }
 0x2f8   :  { %v1984_v41 = vmul.f32 %v1931_v59, %v5187_v47  ;;  %v1983_v40 = vmul.f32 %v1929_v36, %v5193_v17  ;;  %2122 = vadd.xlane.f32.xlu0 %v2084_v37  ;;  %v5697_v24 = vadd.f32 %v2018_v8, %v5428_v55  ;;  %v5700_v58 = vadd.f32 %v2017_v35, %v5423_v52 }
 0x2f9   :  { %2120 = vadd.xlane.f32.xlu1 %v2083_v19 }
 0x2fa   :  { %v2020_v23 = vadd.f32 %v5633_v51, %v1984_v41  ;;  %v2019_v63 = vadd.f32 %v5633_v51, %v1983_v40  ;;  %v2086_v56 = vmul.f32 %v5641_v18, %v5697_v24  ;;  %v2085_v33 = vmul.f32 %v5641_v18, %v5700_v58 }
 0x2fb   :  { %v1933_v49 = vpop.xlane.xlu1 %1932 }
 0x2fc   :  { %v1935_v38 = vpop.xlane.xlu0 %1934  ;;  %v1985_v55 = vmul.f32 %v1933_v49, %v5190_v48  ;;  %2126 = vadd.xlane.f32.xlu0 %v2086_v56  ;;  %v5711_v52 = vadd.f32 %v2020_v23, %v5442_v42  ;;  %v5714_v8 = vadd.f32 %v2019_v63, %v5437_v26  ;;  %v7504_v23 = vld [vmem:[#allocation28_spill] sm:$0xff] }
 0x2fd   :  { %v1986_v16 = vmul.f32 %v1935_v38, %v5209_v9  ;;  %2124 = vadd.xlane.f32.xlu1 %v2085_v33 }
 0x2fe   :  { %v2021_v37 = vadd.f32 %v5633_v51, %v1985_v55  ;;  %v2088_v19 = vmul.f32 %v5641_v18, %v5711_v52  ;;  %v2087_v59 = vmul.f32 %v5641_v18, %v5714_v8 }
 0x2ff   :  { %v2022_v35 = vadd.f32 %v5633_v51, %v1986_v16  ;;  %v1937_v41 = vpop.xlane.xlu1 %1936 }
 0x300   :  { %v1939_v36 = vpop.xlane.xlu0 %1938  ;;  %v1987_v42 = vmul.f32 %v1937_v41, %v5221_v15  ;;  %2130 = vadd.xlane.f32.xlu0 %v2088_v19  ;;  %v5728_v63 = vadd.f32 %v2021_v37, %v7504_v23 }
 0x301   :  { %v1988_v40 = vmul.f32 %v1939_v36, %v5215_v54  ;;  %v5725_v26 = vadd.f32 %v2022_v35, %v5456_v20  ;;  %2128 = vadd.xlane.f32.xlu1 %v2087_v59  ;;  %v7505_v35 = vld [vmem:[#allocation30_spill] sm:$0xff]  ;;  %v7506_v59 = vld [vmem:[#allocation29_spill] sm:$0xff] }
 0x302   :  { %v2023_v33 = vadd.f32 %v5633_v51, %v1987_v42  ;;  %v2089_v49 = vmul.f32 %v5641_v18, %v5728_v63 }
 0x303   :  { %v2024_v56 = vadd.f32 %v5633_v51, %v1988_v40  ;;  %v2090_v38 = vmul.f32 %v5641_v18, %v5725_v26  ;;  %v1941_v55 = vpop.xlane.xlu1 %1940 }
 0x304   :  { %v1943_v16 = vpop.xlane.xlu0 %1942  ;;  %v1989_v20 = vmul.f32 %v1941_v55, %v5218_v13  ;;  %v5742_v36 = vadd.f32 %v2023_v33, %v7506_v59  ;;  %v7507_v33 = vld [vmem:[#allocation32_spill] sm:$0xff] }
 0x305   :  { %v1990_v19 = vmul.f32 %v1943_v16, %v5232_v21  ;;  %2134 = vadd.xlane.f32.xlu0 %v2090_v38  ;;  %v5739_v37 = vadd.f32 %v2024_v56, %v7505_v35  ;;  %2132 = vadd.xlane.f32.xlu1 %v2089_v49  ;;  %v7508_v49 = vld [vmem:[#allocation31_spill] sm:$0xff] }
 0x306   :  { %v2025_v40 = vadd.f32 %v5633_v51, %v1989_v20  ;;  %v2091_v23 = vmul.f32 %v5641_v18, %v5742_v36 }
 0x307   :  { %v2026_v41 = vadd.f32 %v5633_v51, %v1990_v19  ;;  %v2092_v42 = vmul.f32 %v5641_v18, %v5739_v37  ;;  %v1945_v55 = vpop.xlane.xlu1 %1944 }
 0x308   :  { %v1947_v16 = vpop.xlane.xlu0 %1946  ;;  %v1991_v56 = vmul.f32 %v1945_v55, %v5237_v25  ;;  %v5756_v19 = vadd.f32 %v2025_v40, %v7508_v49  ;;  %v7509_v40 = vld [vmem:[#allocation34_spill] sm:$0xff] }
 0x309   :  { %v1992_v38 = vmul.f32 %v1947_v16, %v5245_v29  ;;  %2138 = vadd.xlane.f32.xlu0 %v2092_v42  ;;  %v5753_v35 = vadd.f32 %v2026_v41, %v7507_v33  ;;  %2136 = vadd.xlane.f32.xlu1 %v2091_v23  ;;  %v7510_v23 = vld [vmem:[#allocation33_spill] sm:$0xff] }
 0x30a   :  { %v2027_v59 = vadd.f32 %v5633_v51, %v1991_v56  ;;  %v2093_v16 = vmul.f32 %v5641_v18, %v5756_v19 }
 0x30b   :  { %v2028_v20 = vadd.f32 %v5633_v51, %v1992_v38  ;;  %v2094_v3 = vmul.f32 %v5641_v18, %v5753_v35  ;;  %v1949_v55 = vpop.xlane.xlu1 %1948 }
 0x30c   :  { %v1951_v29 = vpop.xlane.xlu0 %1950  ;;  %v1993_v41 = vmul.f32 %v1949_v55, %v5242_v27  ;;  %v5770_v38 = vadd.f32 %v2027_v59, %v7510_v23  ;;  %v7511_v59 = vld [vmem:[#allocation36_spill] sm:$0xff] }
 0x30d   :  { %v1994_v42 = vmul.f32 %v1951_v29, %v5256_v39  ;;  %2142 = vadd.xlane.f32.xlu0 %v2094_v3  ;;  %v5767_v33 = vadd.f32 %v2028_v20, %v7509_v40  ;;  %2140 = vadd.xlane.f32.xlu1 %v2093_v16  ;;  %v7512_v16 = vld [vmem:[#allocation35_spill] sm:$0xff] }
 0x30e   :  { %v2029_v49 = vadd.f32 %v5633_v51, %v1993_v41  ;;  %v2095_v29 = vmul.f32 %v5641_v18, %v5770_v38 }
 0x30f   :  { %v2030_v56 = vadd.f32 %v5633_v51, %v1994_v42  ;;  %v2096_v25 = vmul.f32 %v5641_v18, %v5767_v33  ;;  %v1953_v55 = vpop.xlane.xlu1 %1952 }
 0x310   :  { %v1955_v39 = vpop.xlane.xlu0 %1954  ;;  %v1995_v20 = vmul.f32 %v1953_v55, %v5261_v43  ;;  %v5784_v42 = vadd.f32 %v2029_v49, %v7512_v16  ;;  %v7513_v49 = vld [vmem:[#allocation38_spill] sm:$0xff] }
 0x311   :  { %v1996_v3 = vmul.f32 %v1955_v39, %v5269_v46  ;;  %2146 = vadd.xlane.f32.xlu0 %v2096_v25  ;;  %v5781_v40 = vadd.f32 %v2030_v56, %v7511_v59  ;;  %2144 = vadd.xlane.f32.xlu1 %v2095_v29  ;;  %v7514_v29 = vld [vmem:[#allocation37_spill] sm:$0xff] }
 0x312   :  { %v2031_v23 = vadd.f32 %v5633_v51, %v1995_v20  ;;  %v2097_v39 = vmul.f32 %v5641_v18, %v5784_v42 }
 0x313   :  { %v2032_v41 = vadd.f32 %v5633_v51, %v1996_v3  ;;  %v2098_v27 = vmul.f32 %v5641_v18, %v5781_v40  ;;  %v1957_v55 = vpop.xlane.xlu1 %1956 }
 0x314   :  { %v1959_v46 = vpop.xlane.xlu0 %1958  ;;  %v1997_v56 = vmul.f32 %v1957_v55, %v5266_v4  ;;  %v5798_v3 = vadd.f32 %v2031_v23, %v7514_v29  ;;  %v7515_v23 = vld [vmem:[#allocation40_spill] sm:$0xff] }
 0x315   :  { %v1998_v25 = vmul.f32 %v1959_v46, %v5280_v2  ;;  %2150 = vadd.xlane.f32.xlu0 %v2098_v27  ;;  %v5795_v59 = vadd.f32 %v2032_v41, %v7513_v49  ;;  %2148 = vadd.xlane.f32.xlu1 %v2097_v39  ;;  %v7516_v39 = vld [vmem:[#allocation39_spill] sm:$0xff] }
 0x316   :  { %v2033_v16 = vadd.f32 %v5633_v51, %v1997_v56  ;;  %v2099_v46 = vmul.f32 %v5641_v18, %v5798_v3 }
 0x317   :  { %v2034_v20 = vadd.f32 %v5633_v51, %v1998_v25  ;;  %v2100_v43 = vmul.f32 %v5641_v18, %v5795_v59  ;;  %v1961_v55 = vpop.xlane.xlu1 %1960 }
 0x318   :  { %v1963_v2 = vpop.xlane.xlu0 %1962  ;;  %v1999_v41 = vmul.f32 %v1961_v55, %v5285_v6  ;;  %v5812_v25 = vadd.f32 %v2033_v16, %v7516_v39  ;;  %v7517_v16 = vld [vmem:[#allocation42_spill] sm:$0xff] }
 0x319   :  { %v2000_v27 = vmul.f32 %v1963_v2, %v5293_v11  ;;  %2154 = vadd.xlane.f32.xlu0 %v2100_v43  ;;  %v5809_v49 = vadd.f32 %v2034_v20, %v7515_v23  ;;  %2152 = vadd.xlane.f32.xlu1 %v2099_v46  ;;  %v7519_v46 = vld [vmem:[#allocation41_spill] sm:$0xff] }
 0x31a   :  { %v2035_v29 = vadd.f32 %v5633_v51, %v1999_v41  ;;  %v2101_v2 = vmul.f32 %v5641_v18, %v5812_v25 }
 0x31b   :  { %v2036_v56 = vadd.f32 %v5633_v51, %v2000_v27  ;;  %v2102_v4 = vmul.f32 %v5641_v18, %v5809_v49  ;;  %v1965_v55 = vpop.xlane.xlu1 %1964 }
 0x31c   :  { %v1967_v11 = vpop.xlane.xlu0 %1966  ;;  %v2001_v20 = vmul.f32 %v1965_v55, %v5290_v53  ;;  %v5826_v27 = vadd.f32 %v2035_v29, %v7519_v46  ;;  %v7523_v29 = vld [vmem:[#allocation44_spill] sm:$0xff] }
 0x31d   :  { %v2002_v43 = vmul.f32 %v1967_v11, %v5304_v22  ;;  %2158 = vadd.xlane.f32.xlu0 %v2102_v4  ;;  %v5823_v23 = vadd.f32 %v2036_v56, %v7517_v16  ;;  %2156 = vadd.xlane.f32.xlu1 %v2101_v2  ;;  %v7521_v4 = vld [vmem:[#allocation26_spill] sm:$0xff]  ;;  %v7522_v56 = vld [vmem:[#allocation24_spill] sm:$0xff]  ;;  %v7524_v2 = vld [vmem:[#allocation43_spill] sm:$0xff] }
 0x31e   :  { %7520 = vst [vmem:[#allocation30_spill] sm:$0xff] %v5826_v27  ;;  %v2037_v39 = vadd.f32 %v5633_v51, %v2001_v20  ;;  %v2103_v11 = vmul.f32 %v5641_v18, %v5826_v27 }
 0x31f   :  { %7518 = vst [vmem:[#allocation28_spill] sm:$0xff] %v5823_v23  ;;  %v2038_v41 = vadd.f32 %v5633_v51, %v2002_v43  ;;  %v2104_v6 = vmul.f32 %v5641_v18, %v5823_v23  ;;  %v1969_v55 = vpop.xlane.xlu1 %1968 }
 0x320   :  { %v1971_v22 = vpop.xlane.xlu0 %1970  ;;  %v2003_v16 = vmul.f32 %v1969_v55, %v7522_v56  ;;  %v5840_v43 = vadd.f32 %v2037_v39, %v7524_v2  ;;  %v7526_v55 = vld [vmem:[#allocation25_spill] sm:$0xff]  ;;  %v7531_v56 = vld [vmem:[#allocation47_spill] sm:$0xff] }
 0x321   :  { %v2004_v53 = vmul.f32 %v1971_v22, %v7521_v4  ;;  %2162 = vadd.xlane.f32.xlu0 %v2104_v6  ;;  %v5837_v46 = vadd.f32 %v2038_v41, %v7523_v29  ;;  %2160 = vadd.xlane.f32.xlu1 %v2103_v11  ;;  %v7527_v41 = vld [vmem:[#allocation46_spill] sm:$0xff]  ;;  %v7529_v39 = vld [vmem:[#allocation45_spill] sm:$0xff] }
 0x322   :  { %7525 = vst [vmem:[#allocation29_spill] sm:$0xff] %v5840_v43  ;;  %v2039_v23 = vadd.f32 %v5633_v51, %v2003_v16  ;;  %v2105_v22 = vmul.f32 %v5641_v18, %v5840_v43 }
 0x323   :  { %v2040_v20 = vadd.f32 %v5633_v51, %v2004_v53  ;;  %v2106_v27 = vmul.f32 %v5641_v18, %v5837_v46  ;;  %v1973_v4 = vpop.xlane.xlu1 %1972 }
 0x324   :  { %v2005_v6 = vmul.f32 %v1973_v4, %v7526_v55  ;;  %v5853_v2 = vadd.f32 %v2039_v23, %v7529_v39  ;;  %v1423_v23 = vld [vmem:[%s7327_s2 + $0xd0] sm:$0x1]  ;;  %v7533_v4 = vld [vmem:[#allocation2_spill] sm:$0xff] }
 0x325   :  { %2166 = vadd.xlane.f32.xlu0 %v2106_v27  ;;  %v5850_v29 = vadd.f32 %v2040_v20, %v7527_v41  ;;  %2164 = vadd.xlane.f32.xlu1 %v2105_v22 }
 0x326   :  { %7530 = vst [vmem:[#allocation31_spill] sm:$0xff] %v5853_v2  ;;  %v2041_v53 = vadd.f32 %v5633_v51, %v2005_v6  ;;  %v2107_v16 = vmul.f32 %v5641_v18, %v5853_v2  ;;  %v1424_v51 = vunpack.c.l.bf16 %v1423_v23  ;;  %v7393_v23 = vsub.s32 3, %v5110_v57 }
 0x327   :  { %7528 = vst [vmem:[#allocation32_spill] sm:$0xff] %v5850_v29  ;;  %v2108_v11 = vmul.f32 %v5641_v18, %v5850_v29 }
 0x328   :  { %v5861_v43 = vadd.f32 %v2041_v53, %v7531_v56  ;;  %v5869_v20 = vrot.slane %v1424_v51, %v7533_v4 }
 0x329   :  { %2170 = vadd.xlane.f32.xlu0 %v2108_v11  ;;  %2168 = vadd.xlane.f32.xlu1 %v2107_v16  ;;  %v7534_v16 = vsub.s32 2, %v5110_v57 }
 0x32a   :  { %7532 = vst [vmem:[#allocation34_spill] sm:$0xff] %v5861_v43  ;;  %v2109_v27 = vmul.f32 %v5641_v18, %v5861_v43 }
 0x32d   :  { %2172 = vadd.xlane.f32.xlu1 %v2109_v27  ;;  %v5878_v27 = vrot.slane %v5356_v0, %v7534_v16  ;;  %v5890_v16 = vrot.slane %v5124_v62, %v7393_v23 }
 0x374   :  { %v4368_v22 = vpop.f32.mrb[80].mxu0 }
 0x375   :  { %v1520_v6 = vadd.f32 %v4368_v22, %v5869_v20  ;;  %v1511_v41 = vpop.f32.mrb[81].mxu0 }
 0x376   :  { %v1512_v56 = vadd.f32 %v1511_v41, %v5869_v20  ;;  %v4369_v39 = vpop.f32.mrb[82].mxu0 }
 0x377   :  { %v1523_v53 = vadd.f32 %v4369_v39, %v5869_v20  ;;  %v1514_v11 = vpop.f32.mrb[83].mxu0  ;;  %v1640_v51 = vmax.f32 %v1520_v6, 0.0 }
 0x378   :  { %v1515_v18 = vadd.f32 %v1514_v11, %v5869_v20  ;;  %v1638_v22 = vmax.f32 %v1512_v56, 0.0 }
 0x379   :  { %v1641_v4 = vmax.f32 %v1523_v53, 0.0  ;;  %v2111_v43 = vpop.xlane.xlu0 %2110 }
 0x37a   :  { %v1639_v55 = vmax.f32 %v1515_v18, 0.0  ;;  %v2174_v41 = vmul.f32 %v2111_v43, %v5137_v10 }
 0x37b   :  { %v5882_v2 = vpack.c.bf16 %v1641_v4, %v1640_v51 }
 0x37c   :  { %v5884_v39 = vpack.c.bf16 %v1639_v55, %v1638_v22  ;;  %v2210_v11 = vadd.f32 %v5878_v27, %v2174_v41  ;;  %v4372_v29 = vpop.f32.mrb[84].mxu0 }
 0x37d   :  { %7535 = vst [vmem:[#allocation33_spill] sm:$0xff] %v5882_v2  ;;  %v1536_v6 = vadd.f32 %v4372_v29, %v5869_v20  ;;  %v2115_v53 = vpop.xlane.xlu0 %2114  ;;  %v2113_v0 = vpop.xlane.xlu1 %2112 }
 0x37e   :  { %7536 = vst [vmem:[#allocation36_spill] sm:$0xff] %v5884_v39  ;;  %v2176_v56 = vmul.f32 %v2115_v53, %v5134_v7  ;;  %v2175_v43 = vmul.f32 %v2113_v0, %v5145_v14  ;;  %v1527_v4 = vpop.f32.mrb[85].mxu0  ;;  %v5896_v55 = vadd.f32 %v2210_v11, %v5646_v5 }
 0x37f   :  { %v1528_v18 = vadd.f32 %v1527_v4, %v5869_v20  ;;  %v4373_v51 = vpop.f32.mrb[86].mxu0  ;;  %v1644_v53 = vmax.f32 %v1536_v6, 0.0 }
 0x380   :  { %7537 = vst [vmem:[#allocation35_spill] sm:$0xff] %v5896_v55  ;;  %v2212_v22 = vadd.f32 %v5878_v27, %v2176_v56  ;;  %v2211_v41 = vadd.f32 %v5878_v27, %v2175_v43  ;;  %v1539_v23 = vadd.f32 %v4373_v51, %v5869_v20  ;;  %v1530_v29 = vpop.f32.mrb[87].mxu0  ;;  %v2278_v2 = vmul.f32 %v5890_v16, %v5896_v55 }
 0x381   :  { %v1531_v0 = vadd.f32 %v1530_v29, %v5869_v20  ;;  %v2119_v39 = vpop.xlane.xlu0 %2118  ;;  %v1642_v43 = vmax.f32 %v1528_v18, 0.0 }
 0x382   :  { %v5906_v5 = vadd.f32 %v2212_v22, %v5655_v60  ;;  %v1645_v11 = vmax.f32 %v1539_v23, 0.0  ;;  %v2178_v4 = vmul.f32 %v2119_v39, %v5158_v28  ;;  %v2117_v14 = vpop.xlane.xlu1 %2116  ;;  %2310 = vadd.xlane.f32.xlu0 %v2278_v2  ;;  %v5910_v56 = vadd.f32 %v2211_v41, %v5658_v34 }
 0x383   :  { %v1643_v51 = vmax.f32 %v1531_v0, 0.0  ;;  %v2177_v7 = vmul.f32 %v2117_v14, %v5140_v12 }
 0x384   :  { %v5913_v55 = vpack.c.bf16 %v1645_v11, %v1644_v53  ;;  %v2214_v6 = vadd.f32 %v5878_v27, %v2178_v4  ;;  %v4376_v29 = vpop.f32.mrb[88].mxu0  ;;  %v2280_v60 = vmul.f32 %v5890_v16, %v5906_v5  ;;  %v2279_v23 = vmul.f32 %v5890_v16, %v5910_v56 }
 0x385   :  { %v5920_v39 = vpack.c.bf16 %v1643_v51, %v1642_v43  ;;  %v2213_v34 = vadd.f32 %v5878_v27, %v2177_v7  ;;  %v1552_v2 = vadd.f32 %v4376_v29, %v5869_v20  ;;  %v2123_v18 = vpop.xlane.xlu0 %2122  ;;  %v1543_v22 = vpop.f32.mrb[89].mxu0 }
 0x386   :  { %7538 = vst [vmem:[#allocation38_spill] sm:$0xff] %v5913_v55  ;;  %v5925_v14 = vadd.f32 %v2214_v6, %v5669_v44  ;;  %v2180_v41 = vmul.f32 %v2123_v18, %v5161_v30  ;;  %v2121_v53 = vpop.xlane.xlu1 %2120  ;;  %v1544_v0 = vadd.f32 %v1543_v22, %v5869_v20  ;;  %2314 = vadd.xlane.f32.xlu0 %v2280_v60  ;;  %v4377_v11 = vpop.f32.mrb[90].mxu0 }
 0x387   :  { %7539 = vst [vmem:[#allocation37_spill] sm:$0xff] %v5920_v39  ;;  %2312 = vadd.xlane.f32.xlu1 %v2279_v23  ;;  %v5930_v4 = vadd.f32 %v2213_v34, %v5672_v61  ;;  %v2179_v7 = vmul.f32 %v2121_v53, %v5167_v32  ;;  %v1555_v43 = vadd.f32 %v4377_v11, %v5869_v20  ;;  %v1546_v51 = vpop.f32.mrb[91].mxu0  ;;  %v1648_v18 = vmax.f32 %v1552_v2, 0.0 }
 0x388   :  { %v2216_v29 = vadd.f32 %v5878_v27, %v2180_v41  ;;  %v1547_v44 = vadd.f32 %v1546_v51, %v5869_v20  ;;  %v2282_v6 = vmul.f32 %v5890_v16, %v5925_v14  ;;  %v1646_v53 = vmax.f32 %v1544_v0, 0.0 }
 0x389   :  { %v2215_v60 = vadd.f32 %v5878_v27, %v2179_v7  ;;  %v1649_v23 = vmax.f32 %v1555_v43, 0.0  ;;  %v2127_v22 = vpop.xlane.xlu0 %2126  ;;  %v2281_v61 = vmul.f32 %v5890_v16, %v5930_v4 }
 0x38a   :  { %v5942_v34 = vadd.f32 %v2216_v29, %v5683_v50  ;;  %v1647_v11 = vmax.f32 %v1547_v44, 0.0  ;;  %v2182_v41 = vmul.f32 %v2127_v22, %v5181_v45  ;;  %v2125_v55 = vpop.xlane.xlu1 %2124  ;;  %2318 = vadd.xlane.f32.xlu0 %v2282_v6 }
 0x38b   :  { %v5946_v51 = vadd.f32 %v2215_v60, %v5686_v1  ;;  %v5948_v2 = vpack.c.bf16 %v1649_v23, %v1648_v18  ;;  %v2181_v7 = vmul.f32 %v2125_v55, %v5164_v31  ;;  %2316 = vadd.xlane.f32.xlu1 %v2281_v61 }
 0x38c   :  { %v5951_v43 = vpack.c.bf16 %v1647_v11, %v1646_v53  ;;  %v2218_v39 = vadd.f32 %v5878_v27, %v2182_v41  ;;  %v4380_v50 = vpop.f32.mrb[92].mxu0  ;;  %v2284_v0 = vmul.f32 %v5890_v16, %v5942_v34 }
 0x38d   :  { %7540 = vst [vmem:[#allocation40_spill] sm:$0xff] %v5948_v2  ;;  %v2217_v29 = vadd.f32 %v5878_v27, %v2181_v7  ;;  %v1568_v44 = vadd.f32 %v4380_v50, %v5869_v20  ;;  %v2131_v6 = vpop.xlane.xlu0 %2130  ;;  %v1559_v1 = vpop.f32.mrb[93].mxu0  ;;  %v2283_v18 = vmul.f32 %v5890_v16, %v5946_v51 }
 0x38e   :  { %7541 = vst [vmem:[#allocation39_spill] sm:$0xff] %v5951_v43  ;;  %v5961_v55 = vadd.f32 %v2218_v39, %v5697_v24  ;;  %v2184_v60 = vmul.f32 %v2131_v6, %v5187_v47  ;;  %v2129_v23 = vpop.xlane.xlu1 %2128  ;;  %v1560_v22 = vadd.f32 %v1559_v1, %v5869_v20  ;;  %2322 = vadd.xlane.f32.xlu0 %v2284_v0  ;;  %v4381_v61 = vpop.f32.mrb[94].mxu0 }
 0x38f   :  { %v5966_v53 = vadd.f32 %v2217_v29, %v5700_v58  ;;  %v2183_v11 = vmul.f32 %v2129_v23, %v5193_v17  ;;  %2320 = vadd.xlane.f32.xlu1 %v2283_v18  ;;  %v1571_v41 = vadd.f32 %v4381_v61, %v5869_v20  ;;  %v1562_v7 = vpop.f32.mrb[95].mxu0  ;;  %v1652_v6 = vmax.f32 %v1568_v44, 0.0 }
 0x390   :  { %v2220_v50 = vadd.f32 %v5878_v27, %v2184_v60  ;;  %v1563_v24 = vadd.f32 %v1562_v7, %v5869_v20  ;;  %v2286_v39 = vmul.f32 %v5890_v16, %v5961_v55  ;;  %v1650_v18 = vmax.f32 %v1560_v22, 0.0 }
 0x391   :  { %v2219_v0 = vadd.f32 %v5878_v27, %v2183_v11  ;;  %v1653_v1 = vmax.f32 %v1571_v41, 0.0  ;;  %v2285_v58 = vmul.f32 %v5890_v16, %v5966_v53 }
 0x392   :  { %v2135_v2 = vpop.xlane.xlu0 %2134  ;;  %v5978_v29 = vadd.f32 %v2220_v50, %v5711_v52  ;;  %v1651_v23 = vmax.f32 %v1563_v24, 0.0  ;;  %v2133_v61 = vpop.xlane.xlu1 %2132  ;;  %2326 = vadd.xlane.f32.xlu0 %v2286_v39 }
 0x393   :  { %v2186_v60 = vmul.f32 %v2135_v2, %v5209_v9  ;;  %v5982_v7 = vadd.f32 %v2219_v0, %v5714_v8  ;;  %v5984_v44 = vpack.c.bf16 %v1653_v1, %v1652_v6  ;;  %v2185_v11 = vmul.f32 %v2133_v61, %v5190_v48  ;;  %2324 = vadd.xlane.f32.xlu1 %v2285_v58 }
 0x394   :  { %v5987_v41 = vpack.c.bf16 %v1651_v23, %v1650_v18  ;;  %v4384_v52 = vpop.f32.mrb[96].mxu0  ;;  %v2288_v22 = vmul.f32 %v5890_v16, %v5978_v29 }
 0x395   :  { %7542 = vst [vmem:[#allocation42_spill] sm:$0xff] %v5984_v44  ;;  %v2222_v43 = vadd.f32 %v5878_v27, %v2186_v60  ;;  %v2221_v2 = vadd.f32 %v5878_v27, %v2185_v11  ;;  %v1584_v50 = vadd.f32 %v4384_v52, %v5869_v20  ;;  %v1575_v8 = vpop.f32.mrb[97].mxu0  ;;  %v2287_v39 = vmul.f32 %v5890_v16, %v5982_v7 }
 0x396   :  { %7543 = vst [vmem:[#allocation41_spill] sm:$0xff] %v5987_v41  ;;  %v2139_v24 = vpop.xlane.xlu0 %2138  ;;  %v2137_v1 = vpop.xlane.xlu1 %2136  ;;  %v1576_v58 = vadd.f32 %v1575_v8, %v5869_v20  ;;  %2330 = vadd.xlane.f32.xlu0 %v2288_v22 }
 0x397   :  { %v5997_v6 = vadd.f32 %v2222_v43, %v5725_v26  ;;  %v2188_v0 = vmul.f32 %v2139_v24, %v5215_v54  ;;  %v4385_v18 = vpop.f32.mrb[98].mxu0  ;;  %v6002_v23 = vadd.f32 %v2221_v2, %v5728_v63  ;;  %v2187_v60 = vmul.f32 %v2137_v1, %v5221_v15  ;;  %2328 = vadd.xlane.f32.xlu1 %v2287_v39 }
 0x398   :  { %v1587_v61 = vadd.f32 %v4385_v18, %v5869_v20  ;;  %v1578_v11 = vpop.f32.mrb[99].mxu0  ;;  %v1656_v24 = vmax.f32 %v1584_v50, 0.0  ;;  %v1654_v39 = vmax.f32 %v1576_v58, 0.0 }
 0x399   :  { %v2224_v52 = vadd.f32 %v5878_v27, %v2188_v0  ;;  %v1579_v26 = vadd.f32 %v1578_v11, %v5869_v20  ;;  %v2290_v43 = vmul.f32 %v5890_v16, %v5997_v6  ;;  %v2223_v22 = vadd.f32 %v5878_v27, %v2187_v60 }
 0x39a   :  { %v1657_v8 = vmax.f32 %v1587_v61, 0.0  ;;  %v2143_v44 = vpop.xlane.xlu0 %2142  ;;  %v2289_v63 = vmul.f32 %v5890_v16, %v6002_v23  ;;  %v2141_v18 = vpop.xlane.xlu1 %2140 }
 0x39b   :  { %v6014_v2 = vadd.f32 %v2224_v52, %v5739_v37  ;;  %v1655_v1 = vmax.f32 %v1579_v26, 0.0  ;;  %v2190_v0 = vmul.f32 %v2143_v44, %v5232_v21  ;;  %2334 = vadd.xlane.f32.xlu0 %v2290_v43  ;;  %v6018_v11 = vadd.f32 %v2223_v22, %v5742_v36  ;;  %v7547_v22 = vld [vmem:[#allocation14_spill] sm:$0xff] }
 0x39c   :  { %v6020_v50 = vpack.c.bf16 %v1657_v8, %v1656_v24  ;;  %v2189_v60 = vmul.f32 %v2141_v18, %v5218_v13  ;;  %2332 = vadd.xlane.f32.xlu1 %v2289_v63  ;;  %v4388_v37 = vpop.f32.mrb[100].mxu0  ;;  %v7549_v18 = vld [vmem:[#allocation12_spill] sm:$0xff] }
 0x39d   :  { %v6023_v61 = vpack.c.bf16 %v1655_v1, %v1654_v39  ;;  %v2226_v41 = vadd.f32 %v5878_v27, %v2190_v0  ;;  %v2292_v58 = vmul.f32 %v5890_v16, %v6014_v2  ;;  %v1600_v52 = vadd.f32 %v4388_v37, %v5869_v20  ;;  %v1591_v36 = vpop.f32.mrb[101].mxu0 }
 0x39e   :  { %7544 = vst [vmem:[#allocation44_spill] sm:$0xff] %v6020_v50  ;;  %v2225_v44 = vadd.f32 %v5878_v27, %v2189_v60  ;;  %v2147_v26 = vpop.xlane.xlu0 %2146  ;;  %v2291_v43 = vmul.f32 %v5890_v16, %v6018_v11  ;;  %v2145_v63 = vpop.xlane.xlu1 %2144  ;;  %v1592_v39 = vadd.f32 %v1591_v36, %v5869_v20 }
 0x39f   :  { %7545 = vst [vmem:[#allocation43_spill] sm:$0xff] %v6023_v61  ;;  %v6033_v24 = vadd.f32 %v2226_v41, %v5753_v35  ;;  %v2192_v8 = vmul.f32 %v2147_v26, %v7547_v22  ;;  %2338 = vadd.xlane.f32.xlu0 %v2292_v58  ;;  %v4389_v1 = vpop.f32.mrb[102].mxu0  ;;  %v2191_v60 = vmul.f32 %v2145_v63, %v7549_v18  ;;  %v1660_v26 = vmax.f32 %v1600_v52, 0.0 }
 0x3a0   :  { %v6038_v0 = vadd.f32 %v2225_v44, %v5756_v19  ;;  %2336 = vadd.xlane.f32.xlu1 %v2291_v43  ;;  %v1603_v37 = vadd.f32 %v4389_v1, %v5869_v20  ;;  %v1594_v50 = vpop.f32.mrb[103].mxu0  ;;  %v1658_v43 = vmax.f32 %v1592_v39, 0.0  ;;  %v7550_v1 = vld [vmem:[#allocation15_spill] sm:$0xff] }
 0x3a1   :  { %7546 = vst [vmem:[#allocation46_spill] sm:$0xff] %v6033_v24  ;;  %v2228_v61 = vadd.f32 %v5878_v27, %v2192_v8  ;;  %v1595_v35 = vadd.f32 %v1594_v50, %v5869_v20  ;;  %v2294_v41 = vmul.f32 %v5890_v16, %v6033_v24  ;;  %v2227_v58 = vadd.f32 %v5878_v27, %v2191_v60  ;;  %v7552_v60 = vld [vmem:[#allocation13_spill] sm:$0xff] }
 0x3a2   :  { %7548 = vst [vmem:[#allocation45_spill] sm:$0xff] %v6038_v0  ;;  %v1661_v36 = vmax.f32 %v1603_v37, 0.0  ;;  %v2151_v22 = vpop.xlane.xlu0 %2150  ;;  %v2293_v19 = vmul.f32 %v5890_v16, %v6038_v0  ;;  %v2149_v18 = vpop.xlane.xlu1 %2148 }
 0x3a3   :  { %v6050_v44 = vadd.f32 %v2228_v61, %v5767_v33  ;;  %v1659_v63 = vmax.f32 %v1595_v35, 0.0  ;;  %v2194_v8 = vmul.f32 %v2151_v22, %v7550_v1  ;;  %2342 = vadd.xlane.f32.xlu0 %v2294_v41  ;;  %v6054_v50 = vadd.f32 %v2227_v58, %v5770_v38 }
 0x3a4   :  { %v6056_v52 = vpack.c.bf16 %v1661_v36, %v1660_v26  ;;  %v2193_v37 = vmul.f32 %v2149_v18, %v7552_v60  ;;  %2340 = vadd.xlane.f32.xlu1 %v2293_v19  ;;  %v4392_v33 = vpop.f32.mrb[104].mxu0  ;;  %v7555_v26 = vld [vmem:[#allocation18_spill] sm:$0xff] }
 0x3a5   :  { %v6059_v24 = vpack.c.bf16 %v1659_v63, %v1658_v43  ;;  %v2230_v0 = vadd.f32 %v5878_v27, %v2194_v8  ;;  %v2296_v61 = vmul.f32 %v5890_v16, %v6050_v44  ;;  %v1616_v39 = vadd.f32 %v4392_v33, %v5869_v20  ;;  %v1607_v38 = vpop.f32.mrb[105].mxu0  ;;  %v7557_v8 = vld [vmem:[#allocation16_spill] sm:$0xff] }
 0x3a6   :  { %7551 = vst [vmem:[#allocation47_spill] sm:$0xff] %v6056_v52  ;;  %v2229_v22 = vadd.f32 %v5878_v27, %v2193_v37  ;;  %v2155_v35 = vpop.xlane.xlu0 %2154  ;;  %v2295_v41 = vmul.f32 %v5890_v16, %v6054_v50  ;;  %v2153_v36 = vpop.xlane.xlu1 %2152  ;;  %v1608_v19 = vadd.f32 %v1607_v38, %v5869_v20 }
 0x3a7   :  { %7553 = vst [vmem:[#allocation48_spill] sm:$0xff] %v6059_v24  ;;  %v6069_v18 = vadd.f32 %v2230_v0, %v5781_v40  ;;  %v2196_v58 = vmul.f32 %v2155_v35, %v7555_v26  ;;  %2346 = vadd.xlane.f32.xlu0 %v2296_v61  ;;  %v4393_v43 = vpop.f32.mrb[106].mxu0  ;;  %v2195_v37 = vmul.f32 %v2153_v36, %v7557_v8  ;;  %v1664_v35 = vmax.f32 %v1616_v39, 0.0 }
 0x3a8   :  { %v6074_v63 = vadd.f32 %v2229_v22, %v5784_v42  ;;  %2344 = vadd.xlane.f32.xlu1 %v2295_v41  ;;  %v1619_v33 = vadd.f32 %v4393_v43, %v5869_v20  ;;  %v1610_v52 = vpop.f32.mrb[107].mxu0  ;;  %v1662_v41 = vmax.f32 %v1608_v19, 0.0  ;;  %v7558_v43 = vld [vmem:[#allocation19_spill] sm:$0xff] }
 0x3a9   :  { %7554 = vst [vmem:[#allocation49_spill] sm:$0xff] %v6069_v18  ;;  %v2232_v24 = vadd.f32 %v5878_v27, %v2196_v58  ;;  %v1611_v40 = vadd.f32 %v1610_v52, %v5869_v20  ;;  %v2298_v0 = vmul.f32 %v5890_v16, %v6069_v18  ;;  %v2231_v61 = vadd.f32 %v5878_v27, %v2195_v37  ;;  %v7560_v37 = vld [vmem:[#allocation17_spill] sm:$0xff] }
 0x3aa   :  { %7556 = vst [vmem:[#allocation50_spill] sm:$0xff] %v6074_v63  ;;  %v1665_v38 = vmax.f32 %v1619_v33, 0.0  ;;  %v2159_v26 = vpop.xlane.xlu0 %2158  ;;  %v2297_v42 = vmul.f32 %v5890_v16, %v6074_v63  ;;  %v2157_v8 = vpop.xlane.xlu1 %2156 }
 0x3ab   :  { %v6086_v22 = vadd.f32 %v2232_v24, %v5795_v59  ;;  %v1663_v36 = vmax.f32 %v1611_v40, 0.0  ;;  %v2198_v58 = vmul.f32 %v2159_v26, %v7558_v43  ;;  %2350 = vadd.xlane.f32.xlu0 %v2298_v0  ;;  %v6090_v52 = vadd.f32 %v2231_v61, %v5798_v3 }
 0x3ac   :  { %v6092_v39 = vpack.c.bf16 %v1665_v38, %v1664_v35  ;;  %v2197_v33 = vmul.f32 %v2157_v8, %v7560_v37  ;;  %2348 = vadd.xlane.f32.xlu1 %v2297_v42  ;;  %v4396_v59 = vpop.f32.mrb[108].mxu0  ;;  %v7563_v35 = vld [vmem:[#allocation22_spill] sm:$0xff] }
 0x3ad   :  { %v6095_v18 = vpack.c.bf16 %v1663_v36, %v1662_v41  ;;  %v2234_v63 = vadd.f32 %v5878_v27, %v2198_v58  ;;  %v2300_v24 = vmul.f32 %v5890_v16, %v6086_v22  ;;  %v1632_v19 = vadd.f32 %v4396_v59, %v5869_v20  ;;  %v1623_v3 = vpop.f32.mrb[109].mxu0  ;;  %v7565_v58 = vld [vmem:[#allocation20_spill] sm:$0xff] }
 0x3ae   :  { %7559 = vst [vmem:[#allocation51_spill] sm:$0xff] %v6092_v39  ;;  %v2233_v26 = vadd.f32 %v5878_v27, %v2197_v33  ;;  %v2163_v40 = vpop.xlane.xlu0 %2162  ;;  %v2299_v0 = vmul.f32 %v5890_v16, %v6090_v52  ;;  %v2161_v38 = vpop.xlane.xlu1 %2160  ;;  %v1624_v42 = vadd.f32 %v1623_v3, %v5869_v20 }
 0x3af   :  { %7561 = vst [vmem:[#allocation52_spill] sm:$0xff] %v6095_v18  ;;  %v6105_v8 = vadd.f32 %v2234_v63, %v5809_v49  ;;  %v2200_v61 = vmul.f32 %v2163_v40, %v7563_v35  ;;  %2354 = vadd.xlane.f32.xlu0 %v2300_v24  ;;  %v4397_v41 = vpop.f32.mrb[110].mxu0  ;;  %v2199_v33 = vmul.f32 %v2161_v38, %v7565_v58  ;;  %v1668_v40 = vmax.f32 %v1632_v19, 0.0  ;;  %v7567_v58 = vld [vmem:[#allocation23_spill] sm:$0xff] }
 0x3b0   :  { %v6110_v36 = vadd.f32 %v2233_v26, %v5812_v25  ;;  %2352 = vadd.xlane.f32.xlu1 %v2299_v0  ;;  %v1635_v59 = vadd.f32 %v4397_v41, %v5869_v20  ;;  %v1626_v39 = vpop.f32.mrb[111].mxu0  ;;  %v7566_v26 = vld [vmem:[#allocation28_spill] sm:$0xff]  ;;  %v1666_v38 = vmax.f32 %v1624_v42, 0.0 }
 0x3b1   :  { %7562 = vst [vmem:[#allocation53_spill] sm:$0xff] %v6105_v8  ;;  %v2236_v18 = vadd.f32 %v5878_v27, %v2200_v61  ;;  %v1627_v49 = vadd.f32 %v1626_v39, %v5869_v20  ;;  %v2302_v63 = vmul.f32 %v5890_v16, %v6105_v8  ;;  %v2235_v24 = vadd.f32 %v5878_v27, %v2199_v33  ;;  %v7568_v20 = vld [vmem:[#allocation30_spill] sm:$0xff]  ;;  %v7570_v33 = vld [vmem:[#allocation21_spill] sm:$0xff] }
 0x3b2   :  { %7564 = vst [vmem:[#allocation54_spill] sm:$0xff] %v6110_v36  ;;  %v1669_v3 = vmax.f32 %v1635_v59, 0.0  ;;  %v2167_v35 = vpop.xlane.xlu0 %2166  ;;  %v2301_v25 = vmul.f32 %v5890_v16, %v6110_v36  ;;  %v2165_v37 = vpop.xlane.xlu1 %2164 }
 0x3b3   :  { %v6122_v0 = vadd.f32 %v2236_v18, %v7566_v26  ;;  %v1667_v41 = vmax.f32 %v1627_v49, 0.0  ;;  %v2202_v61 = vmul.f32 %v2167_v35, %v7567_v58  ;;  %2358 = vadd.xlane.f32.xlu0 %v2302_v63  ;;  %v6126_v39 = vadd.f32 %v2235_v24, %v7568_v20  ;;  %v7574_v26 = vld [vmem:[#allocation24_spill] sm:$0xff] }
 0x3b4   :  { %v6128_v19 = vpack.c.bf16 %v1669_v3, %v1668_v40  ;;  %v2201_v59 = vmul.f32 %v2165_v37, %v7570_v33  ;;  %2356 = vadd.xlane.f32.xlu1 %v2301_v25  ;;  %v7572_v40 = vld [vmem:[#allocation26_spill] sm:$0xff]  ;;  %v7573_v3 = vld [vmem:[#allocation29_spill] sm:$0xff] }
 0x3b5   :  { %v6131_v8 = vpack.c.bf16 %v1667_v41, %v1666_v38  ;;  %v2238_v36 = vadd.f32 %v5878_v27, %v2202_v61  ;;  %v2304_v18 = vmul.f32 %v5890_v16, %v6122_v0  ;;  %v2303_v49 = vmul.f32 %v5890_v16, %v6126_v39 }
 0x3b6   :  { %7569 = vst [vmem:[#allocation28_spill] sm:$0xff] %v6128_v19  ;;  %v2237_v42 = vadd.f32 %v5878_v27, %v2201_v59  ;;  %v2171_v35 = vpop.xlane.xlu0 %2170  ;;  %v2169_v37 = vpop.xlane.xlu1 %2168  ;;  %v7578_v19 = vld [vmem:[#allocation34_spill] sm:$0xff] }
 0x3b7   :  { %7571 = vst [vmem:[#allocation23_spill] sm:$0xff] %v6131_v8  ;;  %v6140_v63 = vadd.f32 %v2238_v36, %v5837_v46  ;;  %v2204_v24 = vmul.f32 %v2171_v35, %v7572_v40  ;;  %2362 = vadd.xlane.f32.xlu0 %v2304_v18  ;;  %v2203_v38 = vmul.f32 %v2169_v37, %v7574_v26  ;;  %v7575_v36 = vld [vmem:[#allocation32_spill] sm:$0xff]  ;;  %v7577_v37 = vld [vmem:[#allocation25_spill] sm:$0xff]  ;;  %v7584_v8 = vld [vmem:[#allocation7_spill] sm:$0xff] }
 0x3b8   :  { %v6144_v25 = vadd.f32 %v2237_v42, %v7573_v3  ;;  %2360 = vadd.xlane.f32.xlu1 %v2303_v49  ;;  %v7576_v42 = vld [vmem:[#allocation31_spill] sm:$0xff] }
 0x3b9   :  { %v2240_v41 = vadd.f32 %v5878_v27, %v2204_v24  ;;  %v2306_v61 = vmul.f32 %v5890_v16, %v6140_v63  ;;  %v2239_v20 = vadd.f32 %v5878_v27, %v2203_v38 }
 0x3ba   :  { %v2305_v46 = vmul.f32 %v5890_v16, %v6144_v25  ;;  %v2173_v18 = vpop.xlane.xlu1 %2172 }
 0x3bb   :  { %v6154_v59 = vadd.f32 %v2240_v41, %v7575_v36  ;;  %2366 = vadd.xlane.f32.xlu0 %v2306_v61  ;;  %v6157_v35 = vadd.f32 %v2239_v20, %v7576_v42  ;;  %v2205_v49 = vmul.f32 %v2173_v18, %v7577_v37  ;;  %v7580_v20 = vsub.s32 3, %v5110_v57 }
 0x3bc   :  { %2364 = vadd.xlane.f32.xlu1 %v2305_v46  ;;  %v7581_v46 = vld [vmem:[#allocation27_spill] sm:$0xff]  ;;  %v7408_v18 = vsub.s32 4, %v5110_v57 }
 0x3bd   :  { %v2308_v24 = vmul.f32 %v5890_v16, %v6154_v59  ;;  %v2241_v3 = vadd.f32 %v5878_v27, %v2205_v49  ;;  %v2307_v38 = vmul.f32 %v5890_v16, %v6157_v35  ;;  %v6173_v36 = vrot.slane %v7581_v46, %v7580_v20 }
 0x3bf   :  { %2370 = vadd.xlane.f32.xlu0 %v2308_v24  ;;  %v6166_v41 = vadd.f32 %v2241_v3, %v7578_v19  ;;  %v6181_v19 = vrot.slane %v5124_v62, %v7408_v18  ;;  %v7582_v3 = vld [vmem:[#allocation35_spill] sm:$0xff] }
 0x3c0   :  { %2368 = vadd.xlane.f32.xlu1 %v2307_v38 }
 0x3c1   :  { %7579 = vst [vmem:[#allocation30_spill] sm:$0xff] %v6166_v41  ;;  %v2309_v61 = vmul.f32 %v5890_v16, %v6166_v41 }
 0x3c4   :  { %2372 = vadd.xlane.f32.xlu1 %v2309_v61  ;;  %v7583_v61 = vld [vmem:[#allocation4_spill] sm:$0xff] }
 0x40f   :  { %v2311_v27 = vpop.xlane.xlu0 %2310 }
 0x410   :  { %v2374_v42 = vmul.f32 %v2311_v27, %v5137_v10 }
 0x412   :  { %v2410_v49 = vadd.f32 %v6173_v36, %v2374_v42 }
 0x413   :  { %v2315_v24 = vpop.xlane.xlu0 %2314 }
 0x414   :  { %v2313_v16 = vpop.xlane.xlu1 %2312  ;;  %v6184_v38 = vadd.f32 %v2410_v49, %v7582_v3  ;;  %v2376_v20 = vmul.f32 %v2315_v24, %v7583_v61 }
 0x415   :  { %v2375_v46 = vmul.f32 %v2313_v16, %v7584_v8 }
 0x416   :  { %v2412_v41 = vadd.f32 %v6173_v36, %v2376_v20  ;;  %v2478_v42 = vmul.f32 %v6181_v19, %v6184_v38 }
 0x417   :  { %v2411_v27 = vadd.f32 %v6173_v36, %v2375_v46  ;;  %v2319_v10 = vpop.xlane.xlu0 %2318 }
 0x418   :  { %v6193_v18 = vadd.f32 %v2412_v41, %v5906_v5  ;;  %v2378_v49 = vmul.f32 %v2319_v10, %v5158_v28  ;;  %v2317_v3 = vpop.xlane.xlu1 %2316  ;;  %2510 = vadd.xlane.f32.xlu0 %v2478_v42 }
 0x419   :  { %v6196_v62 = vadd.f32 %v2411_v27, %v5910_v56  ;;  %v2377_v24 = vmul.f32 %v2317_v3, %v5140_v12 }
 0x41a   :  { %v2414_v16 = vadd.f32 %v6173_v36, %v2378_v49  ;;  %v2480_v46 = vmul.f32 %v6181_v19, %v6193_v18 }
 0x41b   :  { %v2479_v20 = vmul.f32 %v6181_v19, %v6196_v62  ;;  %v2413_v5 = vadd.f32 %v6173_v36, %v2377_v24  ;;  %v2323_v41 = vpop.xlane.xlu0 %2322 }
 0x41c   :  { %v6207_v56 = vadd.f32 %v2414_v16, %v5925_v14  ;;  %v2380_v10 = vmul.f32 %v2323_v41, %v5161_v30  ;;  %v2321_v27 = vpop.xlane.xlu1 %2320  ;;  %2514 = vadd.xlane.f32.xlu0 %v2480_v46 }
 0x41d   :  { %2512 = vadd.xlane.f32.xlu1 %v2479_v20  ;;  %v6211_v42 = vadd.f32 %v2413_v5, %v5930_v4  ;;  %v2379_v49 = vmul.f32 %v2321_v27, %v5167_v32 }
 0x41e   :  { %v2416_v3 = vadd.f32 %v6173_v36, %v2380_v10  ;;  %v2482_v12 = vmul.f32 %v6181_v19, %v6207_v56 }
 0x41f   :  { %v2415_v24 = vadd.f32 %v6173_v36, %v2379_v49  ;;  %v2327_v28 = vpop.xlane.xlu0 %2326  ;;  %v2481_v14 = vmul.f32 %v6181_v19, %v6211_v42 }
 0x420   :  { %v6221_v16 = vadd.f32 %v2416_v3, %v5942_v34  ;;  %v2382_v46 = vmul.f32 %v2327_v28, %v5181_v45  ;;  %v2325_v4 = vpop.xlane.xlu1 %2324  ;;  %2518 = vadd.xlane.f32.xlu0 %v2482_v12 }
 0x421   :  { %v6225_v20 = vadd.f32 %v2415_v24, %v5946_v51  ;;  %v2381_v5 = vmul.f32 %v2325_v4, %v5164_v31  ;;  %2516 = vadd.xlane.f32.xlu1 %v2481_v14 }
 0x422   :  { %v2418_v41 = vadd.f32 %v6173_v36, %v2382_v46  ;;  %v2484_v10 = vmul.f32 %v6181_v19, %v6221_v16 }
 0x423   :  { %v2417_v27 = vadd.f32 %v6173_v36, %v2381_v5  ;;  %v2331_v49 = vpop.xlane.xlu0 %2330  ;;  %v2483_v34 = vmul.f32 %v6181_v19, %v6225_v20 }
 0x424   :  { %v6235_v28 = vadd.f32 %v2418_v41, %v5961_v55  ;;  %v2384_v12 = vmul.f32 %v2331_v49, %v5187_v47  ;;  %v2329_v51 = vpop.xlane.xlu1 %2328  ;;  %2522 = vadd.xlane.f32.xlu0 %v2484_v10 }
 0x425   :  { %v6239_v3 = vadd.f32 %v2417_v27, %v5966_v53  ;;  %v2383_v24 = vmul.f32 %v2329_v51, %v5193_v17  ;;  %2520 = vadd.xlane.f32.xlu1 %v2483_v34 }
 0x426   :  { %v2420_v14 = vadd.f32 %v6173_v36, %v2384_v12  ;;  %v2486_v46 = vmul.f32 %v6181_v19, %v6235_v28 }
 0x427   :  { %v2419_v4 = vadd.f32 %v6173_v36, %v2383_v24  ;;  %v2485_v55 = vmul.f32 %v6181_v19, %v6239_v3 }
 0x428   :  { %v2335_v5 = vpop.xlane.xlu0 %2334  ;;  %v6249_v41 = vadd.f32 %v2420_v14, %v5978_v29  ;;  %2526 = vadd.xlane.f32.xlu0 %v2486_v46 }
 0x429   :  { %v2386_v53 = vmul.f32 %v2335_v5, %v5209_v9  ;;  %v2333_v10 = vpop.xlane.xlu1 %2332  ;;  %v6253_v27 = vadd.f32 %v2419_v4, %v5982_v7  ;;  %2524 = vadd.xlane.f32.xlu1 %v2485_v55 }
 0x42a   :  { %v2385_v49 = vmul.f32 %v2333_v10, %v5190_v48  ;;  %v2488_v12 = vmul.f32 %v6181_v19, %v6249_v41 }
 0x42b   :  { %v2422_v34 = vadd.f32 %v6173_v36, %v2386_v53  ;;  %v2487_v29 = vmul.f32 %v6181_v19, %v6253_v27 }
 0x42c   :  { %v2421_v51 = vadd.f32 %v6173_v36, %v2385_v49  ;;  %v2339_v24 = vpop.xlane.xlu0 %2338  ;;  %2530 = vadd.xlane.f32.xlu0 %v2488_v12 }
 0x42d   :  { %v6263_v14 = vadd.f32 %v2422_v34, %v5997_v6  ;;  %v2388_v7 = vmul.f32 %v2339_v24, %v5215_v54  ;;  %v2337_v46 = vpop.xlane.xlu1 %2336  ;;  %2528 = vadd.xlane.f32.xlu1 %v2487_v29 }
 0x42e   :  { %v6267_v4 = vadd.f32 %v2421_v51, %v6002_v23  ;;  %v2387_v5 = vmul.f32 %v2337_v46, %v5221_v15 }
 0x42f   :  { %v2424_v55 = vadd.f32 %v6173_v36, %v2388_v7  ;;  %v2490_v53 = vmul.f32 %v6181_v19, %v6263_v14 }
 0x430   :  { %v2423_v10 = vadd.f32 %v6173_v36, %v2387_v5  ;;  %v2343_v49 = vpop.xlane.xlu0 %2342  ;;  %v2489_v6 = vmul.f32 %v6181_v19, %v6267_v4 }
 0x431   :  { %v6277_v34 = vadd.f32 %v2424_v55, %v6014_v2  ;;  %v2390_v23 = vmul.f32 %v2343_v49, %v5232_v21  ;;  %v2341_v12 = vpop.xlane.xlu1 %2340  ;;  %2534 = vadd.xlane.f32.xlu0 %v2490_v53  ;;  %v7587_v55 = vld [vmem:[#allocation46_spill] sm:$0xff] }
 0x432   :  { %v6281_v51 = vadd.f32 %v2423_v10, %v6018_v11  ;;  %v2389_v24 = vmul.f32 %v2341_v12, %v5218_v13  ;;  %2532 = vadd.xlane.f32.xlu1 %v2489_v6  ;;  %v7588_v53 = vld [vmem:[#allocation14_spill] sm:$0xff]  ;;  %v7589_v12 = vld [vmem:[#allocation45_spill] sm:$0xff] }
 0x433   :  { %7585 = vst [vmem:[#allocation21_spill] sm:$0xff] %v6277_v34  ;;  %v2426_v29 = vadd.f32 %v6173_v36, %v2390_v23  ;;  %v2492_v7 = vmul.f32 %v6181_v19, %v6277_v34  ;;  %v7590_v23 = vld [vmem:[#allocation12_spill] sm:$0xff] }
 0x434   :  { %7586 = vst [vmem:[#allocation26_spill] sm:$0xff] %v6281_v51  ;;  %v2425_v46 = vadd.f32 %v6173_v36, %v2389_v24  ;;  %v2347_v5 = vpop.xlane.xlu0 %2346  ;;  %v2491_v2 = vmul.f32 %v6181_v19, %v6281_v51 }
 0x435   :  { %v6291_v49 = vadd.f32 %v2426_v29, %v7587_v55  ;;  %v2392_v11 = vmul.f32 %v2347_v5, %v7588_v53  ;;  %v2345_v10 = vpop.xlane.xlu1 %2344  ;;  %2538 = vadd.xlane.f32.xlu0 %v2492_v7 }
 0x436   :  { %v6295_v6 = vadd.f32 %v2425_v46, %v7589_v12  ;;  %v2391_v13 = vmul.f32 %v2345_v10, %v7590_v23  ;;  %2536 = vadd.xlane.f32.xlu1 %v2491_v2 }
 0x437   :  { %v2428_v21 = vadd.f32 %v6173_v36, %v2392_v11  ;;  %v2494_v24 = vmul.f32 %v6181_v19, %v6291_v49 }
 0x438   :  { %v2427_v51 = vadd.f32 %v6173_v36, %v2391_v13  ;;  %v2351_v34 = vpop.xlane.xlu0 %2350  ;;  %v2493_v29 = vmul.f32 %v6181_v19, %v6295_v6 }
 0x439   :  { %v6305_v5 = vadd.f32 %v2428_v21, %v6050_v44  ;;  %v2394_v7 = vmul.f32 %v2351_v34, %v7550_v1  ;;  %v2349_v46 = vpop.xlane.xlu1 %2348  ;;  %2542 = vadd.xlane.f32.xlu0 %v2494_v24  ;;  %v7593_v44 = vld [vmem:[#allocation49_spill] sm:$0xff]  ;;  %v7594_v24 = vld [vmem:[#allocation18_spill] sm:$0xff] }
 0x43a   :  { %v6309_v2 = vadd.f32 %v2427_v51, %v6054_v50  ;;  %v2393_v55 = vmul.f32 %v2349_v46, %v7552_v60  ;;  %2540 = vadd.xlane.f32.xlu1 %v2493_v29  ;;  %v7595_v46 = vld [vmem:[#allocation50_spill] sm:$0xff] }
 0x43b   :  { %7591 = vst [vmem:[#allocation29_spill] sm:$0xff] %v6305_v5  ;;  %v2430_v11 = vadd.f32 %v6173_v36, %v2394_v7  ;;  %v2496_v13 = vmul.f32 %v6181_v19, %v6305_v5  ;;  %v7596_v7 = vld [vmem:[#allocation16_spill] sm:$0xff] }
 0x43c   :  { %7592 = vst [vmem:[#allocation24_spill] sm:$0xff] %v6309_v2  ;;  %v2429_v10 = vadd.f32 %v6173_v36, %v2393_v55  ;;  %v2355_v12 = vpop.xlane.xlu0 %2354  ;;  %v2495_v21 = vmul.f32 %v6181_v19, %v6309_v2 }
 0x43d   :  { %v6319_v34 = vadd.f32 %v2430_v11, %v7593_v44  ;;  %v2396_v50 = vmul.f32 %v2355_v12, %v7594_v24  ;;  %v2353_v51 = vpop.xlane.xlu1 %2352  ;;  %2546 = vadd.xlane.f32.xlu0 %v2496_v13  ;;  %v7599_v44 = vld [vmem:[#allocation17_spill] sm:$0xff] }
 0x43e   :  { %v6323_v29 = vadd.f32 %v2429_v10, %v7595_v46  ;;  %v2395_v60 = vmul.f32 %v2353_v51, %v7596_v7  ;;  %2544 = vadd.xlane.f32.xlu1 %v2495_v21 }
 0x43f   :  { %v2432_v1 = vadd.f32 %v6173_v36, %v2396_v50  ;;  %v2498_v55 = vmul.f32 %v6181_v19, %v6319_v34 }
 0x440   :  { %v2431_v2 = vadd.f32 %v6173_v36, %v2395_v60  ;;  %v2359_v5 = vpop.xlane.xlu0 %2358  ;;  %v2497_v11 = vmul.f32 %v6181_v19, %v6323_v29 }
 0x441   :  { %v6333_v12 = vadd.f32 %v2432_v1, %v6086_v22  ;;  %v2398_v13 = vmul.f32 %v2359_v5, %v7558_v43  ;;  %v2357_v10 = vpop.xlane.xlu1 %2356  ;;  %2550 = vadd.xlane.f32.xlu0 %v2498_v55  ;;  %v7600_v22 = vld [vmem:[#allocation53_spill] sm:$0xff]  ;;  %v7601_v55 = vld [vmem:[#allocation22_spill] sm:$0xff] }
 0x442   :  { %v6337_v21 = vadd.f32 %v2431_v2, %v6090_v52  ;;  %v2397_v50 = vmul.f32 %v2357_v10, %v7599_v44  ;;  %2548 = vadd.xlane.f32.xlu1 %v2497_v11  ;;  %v7602_v10 = vld [vmem:[#allocation54_spill] sm:$0xff] }
 0x443   :  { %7597 = vst [vmem:[#allocation32_spill] sm:$0xff] %v6333_v12  ;;  %v2434_v51 = vadd.f32 %v6173_v36, %v2398_v13  ;;  %v2500_v60 = vmul.f32 %v6181_v19, %v6333_v12  ;;  %v7603_v13 = vld [vmem:[#allocation20_spill] sm:$0xff] }
 0x444   :  { %7598 = vst [vmem:[#allocation31_spill] sm:$0xff] %v6337_v21  ;;  %v2433_v46 = vadd.f32 %v6173_v36, %v2397_v50  ;;  %v2363_v7 = vpop.xlane.xlu0 %2362  ;;  %v2499_v1 = vmul.f32 %v6181_v19, %v6337_v21 }
 0x445   :  { %v6347_v5 = vadd.f32 %v2434_v51, %v7600_v22  ;;  %v2400_v52 = vmul.f32 %v2363_v7, %v7601_v55  ;;  %v2361_v2 = vpop.xlane.xlu1 %2360  ;;  %2554 = vadd.xlane.f32.xlu0 %v2500_v60 }
 0x446   :  { %v6351_v11 = vadd.f32 %v2433_v46, %v7602_v10  ;;  %v2399_v44 = vmul.f32 %v2361_v2, %v7603_v13  ;;  %2552 = vadd.xlane.f32.xlu1 %v2499_v1 }
 0x447   :  { %v2436_v43 = vadd.f32 %v6173_v36, %v2400_v52  ;;  %v2502_v50 = vmul.f32 %v6181_v19, %v6347_v5 }
 0x448   :  { %v2435_v21 = vadd.f32 %v6173_v36, %v2399_v44  ;;  %v2367_v12 = vpop.xlane.xlu0 %2366  ;;  %v2501_v51 = vmul.f32 %v6181_v19, %v6351_v11 }
 0x449   :  { %v6361_v7 = vadd.f32 %v2436_v43, %v6122_v0  ;;  %v2402_v60 = vmul.f32 %v2367_v12, %v7567_v58  ;;  %v2365_v46 = vpop.xlane.xlu1 %2364  ;;  %2558 = vadd.xlane.f32.xlu0 %v2502_v50 }
 0x44a   :  { %v6365_v1 = vadd.f32 %v2435_v21, %v6126_v39  ;;  %v2401_v22 = vmul.f32 %v2365_v46, %v7570_v33  ;;  %2556 = vadd.xlane.f32.xlu1 %v2501_v51 }
 0x44b   :  { %v2438_v52 = vadd.f32 %v6173_v36, %v2402_v60  ;;  %v2504_v44 = vmul.f32 %v6181_v19, %v6361_v7 }
 0x44c   :  { %v2437_v2 = vadd.f32 %v6173_v36, %v2401_v22  ;;  %v2371_v10 = vpop.xlane.xlu0 %2370  ;;  %v2503_v43 = vmul.f32 %v6181_v19, %v6365_v1 }
 0x44d   :  { %v6375_v0 = vadd.f32 %v2438_v52, %v6140_v63  ;;  %v2404_v39 = vmul.f32 %v2371_v10, %v7572_v40  ;;  %v2369_v12 = vpop.xlane.xlu1 %2368  ;;  %2562 = vadd.xlane.f32.xlu0 %v2504_v44 }
 0x44e   :  { %v6379_v21 = vadd.f32 %v2437_v2, %v6144_v25  ;;  %v2403_v50 = vmul.f32 %v2369_v12, %v7574_v26  ;;  %2560 = vadd.xlane.f32.xlu1 %v2503_v43  ;;  %v4587_v12 = vld [vmem:[%s7327_s2 + $0x11c] sm:$0xff]  }
 0x44f   :  { %v2440_v51 = vadd.f32 %v6173_v36, %v2404_v39  ;;  %v2506_v60 = vmul.f32 %v6181_v19, %v6375_v0  ;;  %v7604_v39 = vld [vmem:[#allocation30_spill] sm:$0xff]  ;;  %4398 = vmatprep.subr.bf16.mxu1 %v4587_v12 }
 0x450   :  { %v2439_v46 = vadd.f32 %v6173_v36, %v2403_v50  ;;  %v2505_v63 = vmul.f32 %v6181_v19, %v6379_v21  ;;  %4399 = vmatpush3.bf16.msra.mxu1 %v4587_v12  ;;  %v4589_v50 = vld [vmem:[%s7327_s2 + $0x12c] sm:$0xff]  }
 0x451   :  { %v6389_v22 = vadd.f32 %v2440_v51, %v6154_v59  ;;  %v2373_v52 = vpop.xlane.xlu1 %2372  ;;  %2566 = vadd.xlane.f32.xlu0 %v2506_v60  ;;  %v4591_v51 = vld [vmem:[%s7327_s2 + $0x13c] sm:$0xff]   ;;  %v4592_v60 = vld [vmem:[%s7327_s2 + $0x144] sm:$0xff]  }
 0x452   :  { %v6392_v25 = vadd.f32 %v2439_v46, %v6157_v35  ;;  %v2405_v44 = vmul.f32 %v2373_v52, %v7577_v37  ;;  %2564 = vadd.xlane.f32.xlu1 %v2505_v63  ;;  %v4593_v46 = vld [vmem:[%s7327_s2 + $0x14c] sm:$0xff]   ;;  %v7605_v63 = vsub.s32 4, %v5110_v57 }
 0x453   :  { %v2508_v2 = vmul.f32 %v6181_v19, %v6389_v22  ;;  %v7606_v52 = vld [vmem:[#allocation27_spill] sm:$0xff] }
 0x454   :  { %v2441_v10 = vadd.f32 %v6173_v36, %v2405_v44  ;;  %v2507_v43 = vmul.f32 %v6181_v19, %v6392_v25  ;;  %v4588_v36 = vld [vmem:[%s7327_s2 + $0x124] sm:$0xff]   ;;  %v6429_v44 = vrot.slane %v7606_v52, %v7605_v63 }
 0x455   :  { %2570 = vadd.xlane.f32.xlu0 %v2508_v2  ;;  %4400 = vmatprep.subr.bf16.mxu1 %v4588_v36  ;;  %v7427_v2 = vsub.s32 5, %v5110_v57  ;;  %v7608_v12 = vld [vmem:[#allocation3_spill] sm:$0xff] }
 0x456   :  { %v6401_v59 = vadd.f32 %v2441_v10, %v7604_v39  ;;  %2568 = vadd.xlane.f32.xlu1 %v2507_v43  ;;  %4401 = vmatpush3.bf16.msra.mxu1 %v4588_v36  ;;  %v7607_v43 = vld [vmem:[#allocation5_spill] sm:$0xff] }
 0x457   :  { %4402 = vmatprep.subr.bf16.mxu1 %v4589_v50  ;;  %v6437_v36 = vrot.slane %v7608_v12, %v7427_v2 }
 0x458   :  { %v2509_v35 = vmul.f32 %v6181_v19, %v6401_v59  ;;  %v4590_v19 = vld [vmem:[%s7327_s2 + $0x134] sm:$0xff]  }
 0x45a   :  { %2572 = vadd.xlane.f32.xlu1 %v2509_v35  ;;  %4403 = vmatpush3.bf16.msra.mxu1 %v4589_v50 }
 0x45b   :  { %4404 = vmatprep.subr.bf16.mxu1 %v4590_v19 }
 0x45e   :  { %4405 = vmatpush3.bf16.msra.mxu1 %v4590_v19 }
 0x45f   :  { %4406 = vmatprep.subr.bf16.mxu1 %v4591_v51 }
 0x462   :  { %4407 = vmatpush3.bf16.msra.mxu1 %v4591_v51 }
 0x463   :  { %4408 = vmatprep.subr.bf16.mxu1 %v4592_v60 }
 0x466   :  { %4409 = vmatpush3.bf16.msra.mxu1 %v4592_v60 }
 0x467   :  { %4410 = vmatprep.subr.bf16.mxu1 %v4593_v46 }
 0x46a   :  { %4411 = vmatpush3.bf16.msra.mxu1 %v4593_v46 }
 0x4a5   :  { %v2511_v10 = vpop.xlane.xlu0 %2510 }
 0x4a6   :  { %v2574_v39 = vmul.f32 %v2511_v10, %v7607_v43 }
 0x4a8   :  { %v2610_v35 = vadd.f32 %v6429_v44, %v2574_v39 }
 0x4a9   :  { %v2515_v50 = vpop.xlane.xlu0 %2514 }
 0x4aa   :  { %v2513_v19 = vpop.xlane.xlu1 %2512  ;;  %v6440_v51 = vadd.f32 %v2610_v35, %v6184_v38  ;;  %v2576_v60 = vmul.f32 %v2515_v50, %v7583_v61  ;;  %v7611_v38 = vld [vmem:[#allocation8_spill] sm:$0xff]  ;;  %v7612_v50 = vld [vmem:[#allocation6_spill] sm:$0xff] }
 0x4ab   :  { %v2575_v46 = vmul.f32 %v2513_v19, %v7584_v8 }
 0x4ac   :  { %7609 = vst [vmem:[#allocation25_spill] sm:$0xff] %v6440_v51  ;;  %v2612_v63 = vadd.f32 %v6429_v44, %v2576_v60  ;;  %v2678_v39 = vmul.f32 %v6437_v36, %v6440_v51 }
 0x4ad   :  { %v2611_v10 = vadd.f32 %v6429_v44, %v2575_v46  ;;  %v2519_v43 = vpop.xlane.xlu0 %2518 }
 0x4ae   :  { %v6449_v12 = vadd.f32 %v2612_v63, %v6193_v18  ;;  %v2578_v35 = vmul.f32 %v2519_v43, %v7611_v38  ;;  %v2517_v52 = vpop.xlane.xlu1 %2516  ;;  %2710 = vadd.xlane.f32.xlu0 %v2678_v39 }
 0x4af   :  { %v6452_v2 = vadd.f32 %v2611_v10, %v6196_v62  ;;  %v2577_v19 = vmul.f32 %v2517_v52, %v7612_v50 }
 0x4b0   :  { %7610 = vst [vmem:[#allocation34_spill] sm:$0xff] %v6449_v12  ;;  %v2614_v60 = vadd.f32 %v6429_v44, %v2578_v35  ;;  %v2680_v46 = vmul.f32 %v6437_v36, %v6449_v12 }
 0x4b1   :  { %v2679_v51 = vmul.f32 %v6437_v36, %v6452_v2  ;;  %v2613_v18 = vadd.f32 %v6429_v44, %v2577_v19  ;;  %v2523_v63 = vpop.xlane.xlu0 %2522 }
 0x4b2   :  { %v6463_v62 = vadd.f32 %v2614_v60, %v6207_v56  ;;  %v2580_v43 = vmul.f32 %v2523_v63, %v5161_v30  ;;  %v2521_v10 = vpop.xlane.xlu1 %2520  ;;  %2714 = vadd.xlane.f32.xlu0 %v2680_v46 }
 0x4b3   :  { %2712 = vadd.xlane.f32.xlu1 %v2679_v51  ;;  %v6467_v52 = vadd.f32 %v2613_v18, %v6211_v42  ;;  %v2579_v39 = vmul.f32 %v2521_v10, %v5167_v32 }
 0x4b4   :  { %v2616_v35 = vadd.f32 %v6429_v44, %v2580_v43  ;;  %v2682_v12 = vmul.f32 %v6437_v36, %v6463_v62 }
 0x4b5   :  { %v2615_v19 = vadd.f32 %v6429_v44, %v2579_v39  ;;  %v2527_v50 = vpop.xlane.xlu0 %2526  ;;  %v2681_v56 = vmul.f32 %v6437_v36, %v6467_v52 }
 0x4b6   :  { %v6477_v60 = vadd.f32 %v2616_v35, %v6221_v16  ;;  %v2582_v51 = vmul.f32 %v2527_v50, %v5181_v45  ;;  %v2525_v42 = vpop.xlane.xlu1 %2524  ;;  %2718 = vadd.xlane.f32.xlu0 %v2682_v12 }
 0x4b7   :  { %v6481_v46 = vadd.f32 %v2615_v19, %v6225_v20  ;;  %v2581_v18 = vmul.f32 %v2525_v42, %v5164_v31  ;;  %2716 = vadd.xlane.f32.xlu1 %v2681_v56 }
 0x4b8   :  { %v2618_v63 = vadd.f32 %v6429_v44, %v2582_v51  ;;  %v2684_v43 = vmul.f32 %v6437_v36, %v6477_v60 }
 0x4b9   :  { %v2617_v10 = vadd.f32 %v6429_v44, %v2581_v18  ;;  %v2531_v39 = vpop.xlane.xlu0 %2530  ;;  %v2683_v16 = vmul.f32 %v6437_v36, %v6481_v46 }
 0x4ba   :  { %v6491_v50 = vadd.f32 %v2618_v63, %v6235_v28  ;;  %v2584_v20 = vmul.f32 %v2531_v39, %v5187_v47  ;;  %v2529_v12 = vpop.xlane.xlu1 %2528  ;;  %2722 = vadd.xlane.f32.xlu0 %v2684_v43 }
 0x4bb   :  { %v6495_v35 = vadd.f32 %v2617_v10, %v6239_v3  ;;  %v2583_v19 = vmul.f32 %v2529_v12, %v5193_v17  ;;  %2720 = vadd.xlane.f32.xlu1 %v2683_v16 }
 0x4bc   :  { %v2620_v56 = vadd.f32 %v6429_v44, %v2584_v20  ;;  %v2686_v51 = vmul.f32 %v6437_v36, %v6491_v50 }
 0x4bd   :  { %v2619_v42 = vadd.f32 %v6429_v44, %v2583_v19  ;;  %v2685_v28 = vmul.f32 %v6437_v36, %v6495_v35 }
 0x4be   :  { %v2535_v18 = vpop.xlane.xlu0 %2534  ;;  %v6505_v63 = vadd.f32 %v2620_v56, %v6249_v41  ;;  %2726 = vadd.xlane.f32.xlu0 %v2686_v51 }
 0x4bf   :  { %v2586_v3 = vmul.f32 %v2535_v18, %v5209_v9  ;;  %v2533_v43 = vpop.xlane.xlu1 %2532  ;;  %v6509_v10 = vadd.f32 %v2619_v42, %v6253_v27  ;;  %2724 = vadd.xlane.f32.xlu1 %v2685_v28 }
 0x4c0   :  { %v2585_v39 = vmul.f32 %v2533_v43, %v5190_v48  ;;  %v2688_v20 = vmul.f32 %v6437_v36, %v6505_v63 }
 0x4c1   :  { %v2622_v16 = vadd.f32 %v6429_v44, %v2586_v3  ;;  %v2687_v41 = vmul.f32 %v6437_v36, %v6509_v10 }
 0x4c2   :  { %v2621_v12 = vadd.f32 %v6429_v44, %v2585_v39  ;;  %v2539_v19 = vpop.xlane.xlu0 %2538  ;;  %2730 = vadd.xlane.f32.xlu0 %v2688_v20 }
 0x4c3   :  { %v6519_v56 = vadd.f32 %v2622_v16, %v6263_v14  ;;  %v2588_v27 = vmul.f32 %v2539_v19, %v5215_v54  ;;  %v2537_v51 = vpop.xlane.xlu1 %2536  ;;  %2728 = vadd.xlane.f32.xlu1 %v2687_v41  ;;  %v4594_v14 = vld [vmem:[%s7327_s2 + $0x154] sm:$0xff]  }
 0x4c4   :  { %v6523_v42 = vadd.f32 %v2621_v12, %v6267_v4  ;;  %v2587_v18 = vmul.f32 %v2537_v51, %v5221_v15  ;;  %v7615_v4 = vld [vmem:[#allocation21_spill] sm:$0xff]  ;;  %v7617_v12 = vld [vmem:[#allocation11_spill] sm:$0xff]  ;;  %4412 = vmatprep.subr.bf16.mxu1 %v4594_v14 }
 0x4c5   :  { %7613 = vst [vmem:[#allocation35_spill] sm:$0xff] %v6519_v56  ;;  %v2624_v28 = vadd.f32 %v6429_v44, %v2588_v27  ;;  %v2690_v3 = vmul.f32 %v6437_v36, %v6519_v56  ;;  %v7618_v27 = vld [vmem:[#allocation26_spill] sm:$0xff]  ;;  %v7619_v56 = vld [vmem:[#allocation9_spill] sm:$0xff]  ;;  %4413 = vmatpush3.bf16.msra.mxu1 %v4594_v14 }
 0x4c6   :  { %7614 = vst [vmem:[#allocation4_spill] sm:$0xff] %v6523_v42  ;;  %v2623_v43 = vadd.f32 %v6429_v44, %v2587_v18  ;;  %v2543_v39 = vpop.xlane.xlu0 %2542  ;;  %v2689_v16 = vmul.f32 %v6437_v36, %v6523_v42 }
 0x4c7   :  { %v6536_v20 = vadd.f32 %v2624_v28, %v7615_v4  ;;  %v2590_v19 = vmul.f32 %v2543_v39, %v7617_v12  ;;  %v2541_v41 = vpop.xlane.xlu1 %2540  ;;  %2734 = vadd.xlane.f32.xlu0 %v2690_v3 }
 0x4c8   :  { %v6540_v51 = vadd.f32 %v2623_v43, %v7618_v27  ;;  %v2589_v15 = vmul.f32 %v2541_v41, %v7619_v56  ;;  %2732 = vadd.xlane.f32.xlu1 %v2689_v16 }
 0x4c9   :  { %7616 = vst [vmem:[#allocation7_spill] sm:$0xff] %v6536_v20  ;;  %v2626_v18 = vadd.f32 %v6429_v44, %v2590_v19  ;;  %v2692_v42 = vmul.f32 %v6437_v36, %v6536_v20 }
 0x4ca   :  { %v2625_v28 = vadd.f32 %v6429_v44, %v2589_v15  ;;  %v2547_v4 = vpop.xlane.xlu0 %2546  ;;  %v2691_v39 = vmul.f32 %v6437_v36, %v6540_v51 }
 0x4cb   :  { %v6550_v3 = vadd.f32 %v2626_v18, %v6291_v49  ;;  %v2592_v43 = vmul.f32 %v2547_v4, %v7588_v53  ;;  %v2545_v27 = vpop.xlane.xlu1 %2544  ;;  %2738 = vadd.xlane.f32.xlu0 %v2692_v42  ;;  %v6566_v42 = vld [vmem:[%s7327_s2 + $0xdc] sm:$0xff]  }
 0x4cc   :  { %v6554_v14 = vadd.f32 %v2625_v28, %v6295_v6  ;;  %v2591_v16 = vmul.f32 %v2545_v27, %v7590_v23  ;;  %2736 = vadd.xlane.f32.xlu1 %v2691_v39  ;;  %v7621_v6 = vld [vmem:[#allocation29_spill] sm:$0xff]  ;;  %v7623_v28 = vld [vmem:[#allocation15_spill] sm:$0xff]  ;;  %4446 = vmatprep.subr.bf16.mxu1 %v6566_v42 }
 0x4cd   :  { %7620 = vst [vmem:[#allocation46_spill] sm:$0xff] %v6550_v3  ;;  %v2628_v19 = vadd.f32 %v6429_v44, %v2592_v43  ;;  %v2694_v15 = vmul.f32 %v6437_v36, %v6550_v3  ;;  %v7624_v43 = vld [vmem:[#allocation24_spill] sm:$0xff] }
 0x4ce   :  { %v2627_v41 = vadd.f32 %v6429_v44, %v2591_v16  ;;  %v2551_v20 = vpop.xlane.xlu0 %2550  ;;  %v2693_v49 = vmul.f32 %v6437_v36, %v6554_v14  ;;  %v7626_v16 = vld [vmem:[#allocation13_spill] sm:$0xff] }
 0x4cf   :  { %v6569_v18 = vadd.f32 %v2628_v19, %v7621_v6  ;;  %v2594_v4 = vmul.f32 %v2551_v20, %v7623_v28  ;;  %v2549_v39 = vpop.xlane.xlu1 %2548  ;;  %2742 = vadd.xlane.f32.xlu0 %v2694_v15 }
 0x4d0   :  { %v6573_v27 = vadd.f32 %v2627_v41, %v7624_v43  ;;  %v2593_v3 = vmul.f32 %v2549_v39, %v7626_v16  ;;  %2740 = vadd.xlane.f32.xlu1 %v2693_v49 }
 0x4d1   :  { %7622 = vst [vmem:[#allocation45_spill] sm:$0xff] %v6569_v18  ;;  %v2630_v23 = vadd.f32 %v6429_v44, %v2594_v4  ;;  %v2696_v53 = vmul.f32 %v6437_v36, %v6569_v18  ;;  %v7629_v4 = vld [vmem:[#allocation16_spill] sm:$0xff] }
 0x4d2   :  { %7625 = vst [vmem:[#allocation49_spill] sm:$0xff] %v6573_v27  ;;  %v2629_v19 = vadd.f32 %v6429_v44, %v2593_v3  ;;  %v2555_v6 = vpop.xlane.xlu0 %2554  ;;  %v2695_v20 = vmul.f32 %v6437_v36, %v6573_v27 }
 0x4d3   :  { %v6584_v15 = vadd.f32 %v2630_v23, %v6319_v34  ;;  %v2596_v41 = vmul.f32 %v2555_v6, %v7594_v24  ;;  %v2553_v39 = vpop.xlane.xlu1 %2552  ;;  %2746 = vadd.xlane.f32.xlu0 %v2696_v53  ;;  %v7630_v34 = vld [vmem:[#allocation32_spill] sm:$0xff]  ;;  %v7631_v53 = vld [vmem:[#allocation19_spill] sm:$0xff] }
 0x4d4   :  { %v6588_v49 = vadd.f32 %v2629_v19, %v6323_v29  ;;  %v2595_v43 = vmul.f32 %v2553_v39, %v7629_v4  ;;  %2744 = vadd.xlane.f32.xlu1 %v2695_v20  ;;  %v7632_v39 = vld [vmem:[#allocation31_spill] sm:$0xff] }
 0x4d5   :  { %7627 = vst [vmem:[#allocation50_spill] sm:$0xff] %v6584_v15  ;;  %v2632_v18 = vadd.f32 %v6429_v44, %v2596_v41  ;;  %v2698_v3 = vmul.f32 %v6437_v36, %v6584_v15  ;;  %v7633_v41 = vld [vmem:[#allocation17_spill] sm:$0xff] }
 0x4d6   :  { %7628 = vst [vmem:[#allocation53_spill] sm:$0xff] %v6588_v49  ;;  %v2631_v16 = vadd.f32 %v6429_v44, %v2595_v43  ;;  %v2559_v27 = vpop.xlane.xlu0 %2558  ;;  %v2697_v23 = vmul.f32 %v6437_v36, %v6588_v49 }
 0x4d7   :  { %v6598_v6 = vadd.f32 %v2632_v18, %v7630_v34  ;;  %v2598_v29 = vmul.f32 %v2559_v27, %v7631_v53  ;;  %v2557_v19 = vpop.xlane.xlu1 %2556  ;;  %2750 = vadd.xlane.f32.xlu0 %v2698_v3 }
 0x4d8   :  { %v6602_v20 = vadd.f32 %v2631_v16, %v7632_v39  ;;  %v2597_v4 = vmul.f32 %v2557_v19, %v7633_v41  ;;  %2748 = vadd.xlane.f32.xlu1 %v2697_v23 }
 0x4d9   :  { %v2634_v15 = vadd.f32 %v6429_v44, %v2598_v29  ;;  %v2700_v43 = vmul.f32 %v6437_v36, %v6598_v6 }
 0x4da   :  { %v2633_v24 = vadd.f32 %v6429_v44, %v2597_v4  ;;  %v2563_v49 = vpop.xlane.xlu0 %2562  ;;  %v2699_v18 = vmul.f32 %v6437_v36, %v6602_v20 }
 0x4db   :  { %v6612_v27 = vadd.f32 %v2634_v15, %v6347_v5  ;;  %v2600_v16 = vmul.f32 %v2563_v49, %v7601_v55  ;;  %v2561_v3 = vpop.xlane.xlu1 %2560  ;;  %2754 = vadd.xlane.f32.xlu0 %v2700_v43 }
 0x4dc   :  { %v6616_v23 = vadd.f32 %v2633_v24, %v6351_v11  ;;  %v2599_v34 = vmul.f32 %v2561_v3, %v7603_v13  ;;  %2752 = vadd.xlane.f32.xlu1 %v2699_v18 }
 0x4dd   :  { %v2636_v29 = vadd.f32 %v6429_v44, %v2600_v16  ;;  %v2702_v4 = vmul.f32 %v6437_v36, %v6612_v27 }
 0x4de   :  { %v2635_v19 = vadd.f32 %v6429_v44, %v2599_v34  ;;  %v2567_v39 = vpop.xlane.xlu0 %2566  ;;  %v2701_v5 = vmul.f32 %v6437_v36, %v6616_v23 }
 0x4df   :  { %v6626_v15 = vadd.f32 %v2636_v29, %v6361_v7  ;;  %v2602_v24 = vmul.f32 %v2567_v39, %v7567_v58  ;;  %v2565_v11 = vpop.xlane.xlu1 %2564  ;;  %2758 = vadd.xlane.f32.xlu0 %v2702_v4 }
 0x4e0   :  { %v6630_v49 = vadd.f32 %v2635_v19, %v6365_v1  ;;  %v2601_v43 = vmul.f32 %v2565_v11, %v7570_v33  ;;  %2756 = vadd.xlane.f32.xlu1 %v2701_v5 }
 0x4e1   :  { %v2638_v18 = vadd.f32 %v6429_v44, %v2602_v24  ;;  %v2704_v16 = vmul.f32 %v6437_v36, %v6626_v15 }
 0x4e2   :  { %v2637_v3 = vadd.f32 %v6429_v44, %v2601_v43  ;;  %v2571_v34 = vpop.xlane.xlu0 %2570  ;;  %v2703_v7 = vmul.f32 %v6437_v36, %v6630_v49 }
 0x4e3   :  { %v6640_v29 = vadd.f32 %v2638_v18, %v6375_v0  ;;  %v2604_v1 = vmul.f32 %v2571_v34, %v7572_v40  ;;  %v2569_v4 = vpop.xlane.xlu1 %2568  ;;  %2762 = vadd.xlane.f32.xlu0 %v2704_v16 }
 0x4e4   :  { %v6644_v19 = vadd.f32 %v2637_v3, %v6379_v21  ;;  %v2603_v39 = vmul.f32 %v2569_v4, %v7574_v26  ;;  %2760 = vadd.xlane.f32.xlu1 %v2703_v7  ;;  %v7635_v4 = vsub.s32 5, %v5110_v57 }
 0x4e5   :  { %v2640_v5 = vadd.f32 %v6429_v44, %v2604_v1  ;;  %v2706_v24 = vmul.f32 %v6437_v36, %v6640_v29 }
 0x4e6   :  { %v2639_v11 = vadd.f32 %v6429_v44, %v2603_v39  ;;  %v2705_v0 = vmul.f32 %v6437_v36, %v6644_v19  ;;  %v7636_v39 = vld [vmem:[#allocation27_spill] sm:$0xff] }
 0x4e7   :  { %v6654_v43 = vadd.f32 %v2640_v5, %v6389_v22  ;;  %v2573_v18 = vpop.xlane.xlu1 %2572  ;;  %2766 = vadd.xlane.f32.xlu0 %v2706_v24  ;;  %v6673_v5 = vrot.slane %v7636_v39, %v7635_v4  ;;  %v7637_v24 = vld [vmem:[#allocation5_spill] sm:$0xff]  ;;  %v7639_v39 = vld [vmem:[#allocation6_spill] sm:$0xff] }
 0x4e8   :  { %v6657_v21 = vadd.f32 %v2639_v11, %v6392_v25  ;;  %v2605_v16 = vmul.f32 %v2573_v18, %v7577_v37  ;;  %2764 = vadd.xlane.f32.xlu1 %v2705_v0 }
 0x4e9   :  { %v2708_v3 = vmul.f32 %v6437_v36, %v6654_v43 }
 0x4ea   :  { %v2641_v34 = vadd.f32 %v6429_v44, %v2605_v16  ;;  %v2707_v7 = vmul.f32 %v6437_v36, %v6657_v21 }
 0x4eb   :  { %2770 = vadd.xlane.f32.xlu0 %v2708_v3 }
 0x4ec   :  { %v6666_v22 = vadd.f32 %v2641_v34, %v6401_v59  ;;  %2768 = vadd.xlane.f32.xlu1 %v2707_v7  ;;  %v7638_v34 = vld [vmem:[#allocation25_spill] sm:$0xff] }
 0x4ee   :  { %7634 = vst [vmem:[#allocation22_spill] sm:$0xff] %v6666_v22  ;;  %v2709_v25 = vmul.f32 %v6437_v36, %v6666_v22 }
 0x4f0   :  { %2772 = vadd.xlane.f32.xlu1 %v2709_v25 }
 0x53b   :  { %v2711_v1 = vpop.xlane.xlu0 %2710 }
 0x53c   :  { %v2774_v44 = vmul.f32 %v2711_v1, %v7637_v24 }
 0x53e   :  { %v2810_v18 = vadd.f32 %v6673_v5, %v2774_v44 }
 0x53f   :  { %v2715_v11 = vpop.xlane.xlu0 %2714 }
 0x540   :  { %v2713_v0 = vpop.xlane.xlu1 %2712  ;;  %v2776_v59 = vmul.f32 %v2715_v11, %v7583_v61  ;;  %v2842_v7 = vadd.f32 %v2810_v18, %v7638_v34  ;;  %v7640_v11 = vld [vmem:[#allocation34_spill] sm:$0xff] }
 0x541   :  { %v2775_v16 = vmul.f32 %v2713_v0, %v7584_v8  ;;  %v4596_v34 = vld [vmem:[%s7327_s2 + $0xe4] sm:$0xff]  }
 0x542   :  { %v2812_v57 = vadd.f32 %v6673_v5, %v2776_v59 }
 0x543   :  { %v2811_v3 = vadd.f32 %v6673_v5, %v2775_v16  ;;  %v2719_v36 = vpop.xlane.xlu0 %2718 }
 0x544   :  { %v2717_v4 = vpop.xlane.xlu1 %2716  ;;  %v2778_v1 = vmul.f32 %v2719_v36, %v7611_v38  ;;  %v2844_v8 = vadd.f32 %v2812_v57, %v7640_v11 }
 0x545   :  { %v2843_v25 = vadd.f32 %v2811_v3, %v6452_v2  ;;  %v2777_v24 = vmul.f32 %v2717_v4, %v7639_v39 }
 0x546   :  { %v2814_v16 = vadd.f32 %v6673_v5, %v2778_v1 }
 0x547   :  { %v2906_v22 = vpack.c.bf16 %v2843_v25, %v2842_v7  ;;  %v2813_v44 = vadd.f32 %v6673_v5, %v2777_v24  ;;  %v2723_v61 = vpop.xlane.xlu0 %2722 }
 0x548   :  { %v2721_v0 = vpop.xlane.xlu1 %2720  ;;  %v2780_v59 = vmul.f32 %v2723_v61, %v5161_v30 }
 0x549   :  { %4414 = vmatprep.mubr.bf16.mxu1 %v2906_v22  ;;  %v2845_v18 = vadd.f32 %v2813_v44, %v6467_v52  ;;  %v2779_v2 = vmul.f32 %v2721_v0, %v5167_v32  ;;  %v2846_v22 = vadd.f32 %v2814_v16, %v6463_v62 }
 0x54a   :  { %v2816_v25 = vadd.f32 %v6673_v5, %v2780_v59 }
 0x54b   :  { %v2907_v3 = vpack.c.bf16 %v2845_v18, %v2844_v8  ;;  %v2815_v38 = vadd.f32 %v6673_v5, %v2779_v2  ;;  %v2727_v36 = vpop.xlane.xlu0 %2726  ;;  %v4598_v8 = vld [vmem:[%s7327_s2 + $0xf4] sm:$0xff]  }
 0x54c   :  { %v2782_v7 = vmul.f32 %v2727_v36, %v5181_v45  ;;  %v2725_v57 = vpop.xlane.xlu1 %2724  ;;  %v4597_v45 = vld [vmem:[%s7327_s2 + $0xec] sm:$0xff]   ;;  %v2848_v24 = vadd.f32 %v2816_v25, %v6477_v60 }
 0x54d   :  { %v2847_v52 = vadd.f32 %v2815_v38, %v6481_v46  ;;  %v2781_v30 = vmul.f32 %v2725_v57, %v5164_v31  ;;  %4415 = vmatmul.mubr.bf16.vlgmr.msra.gmra.mrb[32].mxu1 %v2907_v3  ;;  %v7641_v36 = vld [vmem:[#allocation4_spill] sm:$0xff] }
 0x54e   :  { %4447 = vmatpush3.bf16.msra.mxu1 %v6566_v42  ;;  %v2818_v62 = vadd.f32 %v6673_v5, %v2782_v7 }
 0x54f   :  { %v2817_v32 = vadd.f32 %v6673_v5, %v2781_v30  ;;  %v2731_v4 = vpop.xlane.xlu0 %2730  ;;  %v2908_v1 = vpack.c.bf16 %v2847_v52, %v2846_v22  ;;  %4448 = vmatprep.subr.bf16.mxu1 %v4596_v34  ;;  %v7643_v30 = vld [vmem:[#allocation35_spill] sm:$0xff] }
 0x550   :  { %v2729_v39 = vpop.xlane.xlu1 %2728  ;;  %v2784_v31 = vmul.f32 %v2731_v4, %v5187_v47  ;;  %v2850_v0 = vadd.f32 %v2818_v62, %v6491_v50  ;;  %v4599_v50 = vld [vmem:[%s7327_s2 + $0xfc] sm:$0xff]  }
 0x551   :  { %v2849_v46 = vadd.f32 %v2817_v32, %v6495_v35  ;;  %v2783_v42 = vmul.f32 %v2729_v39, %v5193_v17  ;;  %4418 = vmatprep.mubr.bf16.mxu1 %v2908_v1 }
 0x552   :  { %4449 = vmatpush3.bf16.msra.mxu1 %v4596_v34  ;;  %v2820_v35 = vadd.f32 %v6673_v5, %v2784_v31  ;;  %v7642_v34 = vld [vmem:[#allocation10_spill] sm:$0xff]  ;;  %v7644_v31 = vld [vmem:[#allocation7_spill] sm:$0xff] }
 0x553   :  { %v2819_v44 = vadd.f32 %v6673_v5, %v2783_v42  ;;  %v2909_v11 = vpack.c.bf16 %v2849_v46, %v2848_v24  ;;  %4450 = vmatprep.subr.bf16.mxu1 %v4597_v45  ;;  %v4601_v46 = vld [vmem:[%s7327_s2 + $0x10c] sm:$0xff]  }
 0x554   :  { %v2735_v61 = vpop.xlane.xlu0 %2734 }
 0x555   :  { %v2733_v60 = vpop.xlane.xlu1 %2732  ;;  %v2851_v47 = vadd.f32 %v2819_v44, %v6509_v10  ;;  %v2786_v17 = vmul.f32 %v2735_v61, %v5209_v9  ;;  %4419 = vmatmul.mubr.bf16.gmra.mrb[36].mxu1 %v2909_v11  ;;  %v2852_v10 = vadd.f32 %v2820_v35, %v6505_v63  ;;  %v7645_v61 = vld [vmem:[#allocation14_spill] sm:$0xff]  ;;  %v7646_v11 = vld [vmem:[#allocation12_spill] sm:$0xff] }
 0x556   :  { %v2785_v16 = vmul.f32 %v2733_v60, %v5190_v48  ;;  %4451 = vmatpush3.bf16.msra.mxu1 %v4597_v45 }
 0x557   :  { %v2910_v2 = vpack.c.bf16 %v2851_v47, %v2850_v0  ;;  %4452 = vmatprep.subr.bf16.mxu1 %v4598_v8  ;;  %v2822_v9 = vadd.f32 %v6673_v5, %v2786_v17  ;;  %v4602_v47 = vld [vmem:[%s7327_s2 + $0x114] sm:$0xff]  }
 0x558   :  { %v2821_v18 = vadd.f32 %v6673_v5, %v2785_v16  ;;  %v2739_v59 = vpop.xlane.xlu0 %2738 }
 0x559   :  { %v2788_v3 = vmul.f32 %v2739_v59, %v5215_v54  ;;  %v2737_v38 = vpop.xlane.xlu1 %2736  ;;  %4422 = vmatprep.mubr.bf16.mxu1 %v2910_v2  ;;  %v4600_v54 = vld [vmem:[%s7327_s2 + $0x104] sm:$0xff]   ;;  %v2854_v32 = vadd.f32 %v2822_v9, %v7643_v30  ;;  %v7648_v2 = vld [vmem:[#allocation49_spill] sm:$0xff] }
 0x55a   :  { %v2853_v48 = vadd.f32 %v2821_v18, %v7641_v36  ;;  %v2787_v7 = vmul.f32 %v2737_v38, %v7642_v34  ;;  %4453 = vmatpush3.bf16.msra.mxu1 %v4598_v8  ;;  %v7647_v18 = vld [vmem:[#allocation46_spill] sm:$0xff] }
 0x55b   :  { %4454 = vmatprep.subr.bf16.mxu1 %v4599_v50  ;;  %v2824_v52 = vadd.f32 %v6673_v5, %v2788_v3  ;;  %v7649_v3 = vld [vmem:[#allocation13_spill] sm:$0xff] }
 0x55c   :  { %v2823_v57 = vadd.f32 %v6673_v5, %v2787_v7  ;;  %v2743_v22 = vpop.xlane.xlu0 %2742  ;;  %v2911_v25 = vpack.c.bf16 %v2853_v48, %v2852_v10 }
 0x55d   :  { %v2741_v63 = vpop.xlane.xlu1 %2740  ;;  %v2790_v1 = vmul.f32 %v2743_v22, %v7617_v12  ;;  %v2856_v42 = vadd.f32 %v2824_v52, %v7644_v31  ;;  %v7653_v52 = vld [vmem:[#allocation16_spill] sm:$0xff] }
 0x55e   :  { %v2855_v4 = vadd.f32 %v2823_v57, %v6540_v51  ;;  %v2789_v45 = vmul.f32 %v2741_v63, %v7619_v56  ;;  %4423 = vmatmul.mubr.bf16.gmra.mrb[40].mxu1 %v2911_v25  ;;  %v7651_v57 = vld [vmem:[#allocation53_spill] sm:$0xff]  ;;  %v7652_v25 = vld [vmem:[#allocation18_spill] sm:$0xff] }
 0x55f   :  { %4455 = vmatpush3.bf16.msra.mxu1 %v4599_v50  ;;  %v2826_v51 = vadd.f32 %v6673_v5, %v2790_v1  ;;  %v7654_v1 = vld [vmem:[#allocation50_spill] sm:$0xff] }
 0x560   :  { %v2825_v62 = vadd.f32 %v6673_v5, %v2789_v45  ;;  %v2747_v39 = vpop.xlane.xlu0 %2746  ;;  %v2912_v24 = vpack.c.bf16 %v2855_v4, %v2854_v32  ;;  %4456 = vmatprep.subr.bf16.mxu1 %v4600_v54 }
 0x561   :  { %v2745_v44 = vpop.xlane.xlu1 %2744  ;;  %v2792_v56 = vmul.f32 %v2747_v39, %v7645_v61 }
 0x562   :  { %v2857_v12 = vadd.f32 %v2825_v62, %v6554_v14  ;;  %v2791_v8 = vmul.f32 %v2745_v44, %v7646_v11  ;;  %4426 = vmatprep.mubr.bf16.mxu1 %v2912_v24  ;;  %v2858_v14 = vadd.f32 %v2826_v51, %v7647_v18 }
 0x563   :  { %4457 = vmatpush3.bf16.msra.mxu1 %v4600_v54  ;;  %v2828_v59 = vadd.f32 %v6673_v5, %v2792_v56 }
 0x564   :  { %v2827_v0 = vadd.f32 %v6673_v5, %v2791_v8  ;;  %v2751_v60 = vpop.xlane.xlu0 %2750  ;;  %v2913_v35 = vpack.c.bf16 %v2857_v12, %v2856_v42  ;;  %4458 = vmatprep.subr.bf16.mxu1 %v4601_v46 }
 0x565   :  { %v2794_v17 = vmul.f32 %v2751_v60, %v7623_v28  ;;  %v2749_v16 = vpop.xlane.xlu1 %2748  ;;  %v7650_v28 = vld [vmem:[#allocation45_spill] sm:$0xff] }
 0x566   :  { %v2859_v50 = vadd.f32 %v2827_v0, %v7648_v2  ;;  %v2793_v38 = vmul.f32 %v2749_v16, %v7649_v3  ;;  %4427 = vmatmul.mubr.bf16.gmra.mrb[44].mxu1 %v2913_v35  ;;  %v2860_v7 = vadd.f32 %v2828_v59, %v7650_v28  ;;  %v7658_v28 = vld [vmem:[#allocation37_spill] sm:$0xff] }
 0x567   :  { %4459 = vmatpush3.bf16.msra.mxu1 %v4601_v46  ;;  %v2830_v48 = vadd.f32 %v6673_v5, %v2794_v17 }
 0x568   :  { %v2829_v10 = vadd.f32 %v6673_v5, %v2793_v38  ;;  %v2755_v9 = vpop.xlane.xlu0 %2754  ;;  %v2914_v36 = vpack.c.bf16 %v2859_v50, %v2858_v14  ;;  %4460 = vmatprep.subr.bf16.mxu1 %v4602_v47 }
 0x569   :  { %v2753_v34 = vpop.xlane.xlu1 %2752  ;;  %v2796_v54 = vmul.f32 %v2755_v9, %v7652_v25  ;;  %v2862_v45 = vadd.f32 %v2830_v48, %v7654_v1  ;;  %v7666_v25 = vld [vmem:[#allocation48_spill] sm:$0xff] }
 0x56a   :  { %v2861_v22 = vadd.f32 %v2829_v10, %v7651_v57  ;;  %v2795_v63 = vmul.f32 %v2753_v34, %v7653_v52  ;;  %4430 = vmatprep.mubr.bf16.mxu1 %v2914_v36  ;;  %v7656_v34 = vld [vmem:[#allocation36_spill] sm:$0xff]  ;;  %v7664_v57 = vld [vmem:[#allocation43_spill] sm:$0xff] }
 0x56b   :  { %4461 = vmatpush3.bf16.msra.mxu1 %v4602_v47  ;;  %v2832_v39 = vadd.f32 %v6673_v5, %v2796_v54  ;;  %v7667_v54 = vld [vmem:[#allocation47_spill] sm:$0xff]  ;;  %v7668_v52 = vld [vmem:[#allocation52_spill] sm:$0xff] }
 0x56c   :  { %v2831_v30 = vadd.f32 %v6673_v5, %v2795_v63  ;;  %v2759_v32 = vpop.xlane.xlu0 %2758  ;;  %v2915_v4 = vpack.c.bf16 %v2861_v22, %v2860_v7  ;;  %v7661_v7 = vld [vmem:[#allocation40_spill] sm:$0xff]  ;;  %v7669_v63 = vld [vmem:[#allocation51_spill] sm:$0xff] }
 0x56d   :  { %v2757_v62 = vpop.xlane.xlu1 %2756  ;;  %v2798_v46 = vmul.f32 %v2759_v32, %v7631_v53  ;;  %v2864_v56 = vadd.f32 %v2832_v39, %v6598_v6  ;;  %v7665_v22 = vld [vmem:[#allocation44_spill] sm:$0xff] }
 0x56e   :  { %v2863_v24 = vadd.f32 %v2831_v30, %v6602_v20  ;;  %v2797_v31 = vmul.f32 %v2757_v62, %v7633_v41  ;;  %4431 = vmatmul.mubr.bf16.gmra.mrb[48].mxu1 %v2915_v4  ;;  %v7670_v30 = vld [vmem:[#allocation23_spill] sm:$0xff]  ;;  %v7671_v32 = vld [vmem:[#allocation28_spill] sm:$0xff]  ;;  %v3356_v4 = vld [vmem:[%s7327_s2 + $0x15c] sm:$0x1] }
 0x56f   :  { %v2834_v11 = vadd.f32 %v6673_v5, %v2798_v46  ;;  %v3357_v1 = vunpack.c.l.bf16 %v3356_v4 }
 0x570   :  { %v2833_v42 = vadd.f32 %v6673_v5, %v2797_v31  ;;  %v2763_v44 = vpop.xlane.xlu0 %2762  ;;  %v2916_v51 = vpack.c.bf16 %v2863_v24, %v2862_v45  ;;  %v7672_v45 = vld [vmem:[#allocation2_spill] sm:$0xff] }
 0x571   :  { %v2800_v12 = vmul.f32 %v2763_v44, %v7601_v55  ;;  %v2761_v61 = vpop.xlane.xlu1 %2760  ;;  %v2866_v47 = vadd.f32 %v2834_v11, %v6612_v27  ;;  %v6813_v62 = vrot.slane %v3357_v1, %v7672_v45 }
 0x572   :  { %v2865_v8 = vadd.f32 %v2833_v42, %v6616_v23  ;;  %v2799_v20 = vmul.f32 %v2761_v61, %v7603_v13  ;;  %4434 = vmatprep.mubr.bf16.mxu1 %v2916_v51 }
 0x573   :  { %v2836_v60 = vadd.f32 %v6673_v5, %v2800_v12 }
 0x574   :  { %v2835_v53 = vadd.f32 %v6673_v5, %v2799_v20  ;;  %v2767_v41 = vpop.xlane.xlu0 %2766  ;;  %v2917_v0 = vpack.c.bf16 %v2865_v8, %v2864_v56 }
 0x575   :  { %v2765_v35 = vpop.xlane.xlu1 %2764  ;;  %v2802_v6 = vmul.f32 %v2767_v41, %v7567_v58  ;;  %v2868_v18 = vadd.f32 %v2836_v60, %v6626_v15 }
 0x576   :  { %v2867_v55 = vadd.f32 %v2835_v53, %v6630_v49  ;;  %v2801_v17 = vmul.f32 %v2765_v35, %v7570_v33  ;;  %4435 = vmatmul.mubr.bf16.gmra.mrb[52].mxu1 %v2917_v0 }
 0x577   :  { %v2838_v59 = vadd.f32 %v6673_v5, %v2802_v6 }
 0x578   :  { %v2837_v23 = vadd.f32 %v6673_v5, %v2801_v17  ;;  %v2771_v13 = vpop.xlane.xlu0 %2770  ;;  %v2918_v16 = vpack.c.bf16 %v2867_v55, %v2866_v47 }
 0x579   :  { %v2769_v14 = vpop.xlane.xlu1 %2768  ;;  %v2804_v27 = vmul.f32 %v2771_v13, %v7572_v40  ;;  %v2870_v3 = vadd.f32 %v2838_v59, %v6640_v29  ;;  %v7657_v29 = vld [vmem:[#allocation33_spill] sm:$0xff] }
 0x57a   :  { %v2869_v2 = vadd.f32 %v2837_v23, %v6644_v19  ;;  %v2803_v49 = vmul.f32 %v2769_v14, %v7574_v26  ;;  %4438 = vmatprep.mubr.bf16.mxu1 %v2918_v16  ;;  %v7655_v26 = vld [vmem:[#allocation22_spill] sm:$0xff] }
 0x57b   :  { %v2840_v38 = vadd.f32 %v6673_v5, %v2804_v27 }
 0x57c   :  { %v2839_v58 = vadd.f32 %v6673_v5, %v2803_v49  ;;  %v2919_v33 = vpack.c.bf16 %v2869_v2, %v2868_v18 }
 0x57d   :  { %v2773_v50 = vpop.xlane.xlu1 %2772  ;;  %v2872_v40 = vadd.f32 %v2840_v38, %v6654_v43  ;;  %v7663_v43 = vld [vmem:[#allocation42_spill] sm:$0xff] }
 0x57e   :  { %v2871_v15 = vadd.f32 %v2839_v58, %v6657_v21  ;;  %v2805_v10 = vmul.f32 %v2773_v50, %v7577_v37  ;;  %4439 = vmatmul.mubr.bf16.gmra.mrb[56].mxu1 %v2919_v33  ;;  %v7659_v21 = vld [vmem:[#allocation38_spill] sm:$0xff]  ;;  %v7660_v37 = vld [vmem:[#allocation39_spill] sm:$0xff] }
 0x580   :  { %v2841_v19 = vadd.f32 %v6673_v5, %v2805_v10  ;;  %v2920_v9 = vpack.c.bf16 %v2871_v15, %v2870_v3  ;;  %v7662_v5 = vld [vmem:[#allocation41_spill] sm:$0xff] }
 0x582   :  { %v2873_v36 = vadd.f32 %v2841_v19, %v7655_v26  ;;  %4442 = vmatprep.mubr.bf16.mxu1 %v2920_v9 }
 0x584   :  { %v2921_v48 = vpack.c.bf16 %v2873_v36, %v2872_v40 }
 0x586   :  { %4443 = vmatmul.mubr.bf16.gmra.mrb[60].mxu1 %v2921_v48 }
 0x587   :  { %4462 = vmatprep.mubr.bf16.mxu1 %v7656_v34 }
 0x58e   :  { %4463 = vmatmul.mubr.bf16.vlgmr.msra.gmra.mrb[32].mxu1 %v7657_v29 }
 0x58f   :  { %4466 = vmatprep.mubr.bf16.mxu1 %v7658_v28 }
 0x596   :  { %4467 = vmatmul.mubr.bf16.gmra.mrb[36].mxu1 %v7659_v21 }
 0x597   :  { %4470 = vmatprep.mubr.bf16.mxu1 %v7660_v37 }
 0x59e   :  { %4471 = vmatmul.mubr.bf16.gmra.mrb[40].mxu1 %v7661_v7 }
 0x59f   :  { %4474 = vmatprep.mubr.bf16.mxu1 %v7662_v5 }
 0x5a6   :  { %4475 = vmatmul.mubr.bf16.gmra.mrb[44].mxu1 %v7663_v43 }
 0x5a7   :  { %4478 = vmatprep.mubr.bf16.mxu1 %v7664_v57 }
 0x5ae   :  { %4479 = vmatmul.mubr.bf16.gmra.mrb[48].mxu1 %v7665_v22 }
 0x5af   :  { %4482 = vmatprep.mubr.bf16.mxu1 %v7666_v25 }
 0x5b6   :  { %4483 = vmatmul.mubr.bf16.gmra.mrb[52].mxu1 %v7667_v54 }
 0x5b7   :  { %4486 = vmatprep.mubr.bf16.mxu1 %v7668_v52 }
 0x5be   :  { %4487 = vmatmul.mubr.bf16.gmra.mrb[56].mxu1 %v7669_v63 }
 0x5bf   :  { %4490 = vmatprep.mubr.bf16.mxu1 %v7670_v30 }
 0x5c6   :  { %4491 = vmatmul.mubr.bf16.gmra.mrb[60].mxu1 %v7671_v32 }
 0x661   :  { %v4464_v39 = vpop.f32.mrb[32].mxu1 }
 0x662   :  { %v6816_v24 = vadd.f32 %v4464_v39, %v6813_v62  ;;  %v3229_v46 = vpop.f32.mrb[33].mxu1 }
 0x663   :  { %v4465_v31 = vpop.f32.mrb[34].mxu1  ;;  %v6819_v42 = vadd.f32 %v6813_v62, %v3229_v46 }
 0x664   :  { %v6822_v44 = vadd.f32 %v4465_v31, %v6813_v62  ;;  %v3232_v51 = vpop.f32.mrb[35].mxu1  ;;  %v3401_v12 = vsel %vm3394_vm4, %v6816_v24, -inf }
 0x665   :  { %3402 = vmax.xlane.f32.xlu0 %v3401_v12  ;;  %v6827_v61 = vadd.f32 %v6813_v62, %v3232_v51  ;;  %v3395_v11 = vsel %vm3394_vm4, %v6819_v42, -inf }
 0x666   :  { %v3404_v56 = vsel %vm3394_vm4, %v6822_v44, -inf }
 0x667   :  { %3405 = vmax.xlane.f32.xlu1 %v3404_v56  ;;  %v3398_v41 = vsel %vm3394_vm4, %v6827_v61, -inf }
 0x669   :  { %3396 = vmax.xlane.f32.xlu0 %v3395_v11  ;;  %v4468_v8 = vpop.f32.mrb[36].mxu1 }
 0x66a   :  { %v6834_v20 = vadd.f32 %v4468_v8, %v6813_v62  ;;  %v3245_v53 = vpop.f32.mrb[37].mxu1 }
 0x66b   :  { %3399 = vmax.xlane.f32.xlu1 %v3398_v41  ;;  %v4469_v0 = vpop.f32.mrb[38].mxu1  ;;  %v6839_v60 = vadd.f32 %v6813_v62, %v3245_v53 }
 0x66c   :  { %v6842_v35 = vadd.f32 %v4469_v0, %v6813_v62  ;;  %v3248_v47 = vpop.f32.mrb[39].mxu1  ;;  %v3413_v55 = vsel %vm3394_vm4, %v6834_v20, -inf }
 0x66d   :  { %3414 = vmax.xlane.f32.xlu0 %v3413_v55  ;;  %v6847_v6 = vadd.f32 %v6813_v62, %v3248_v47  ;;  %v3407_v23 = vsel %vm3394_vm4, %v6839_v60, -inf }
 0x66e   :  { %v3416_v17 = vsel %vm3394_vm4, %v6842_v35, -inf }
 0x66f   :  { %3417 = vmax.xlane.f32.xlu1 %v3416_v17  ;;  %v3410_v14 = vsel %vm3394_vm4, %v6847_v6, -inf }
 0x671   :  { %3408 = vmax.xlane.f32.xlu0 %v3407_v23  ;;  %v4472_v13 = vpop.f32.mrb[40].mxu1 }
 0x672   :  { %v6854_v16 = vadd.f32 %v4472_v13, %v6813_v62  ;;  %v3261_v18 = vpop.f32.mrb[41].mxu1 }
 0x673   :  { %3411 = vmax.xlane.f32.xlu1 %v3410_v14  ;;  %v4473_v59 = vpop.f32.mrb[42].mxu1  ;;  %v6859_v2 = vadd.f32 %v6813_v62, %v3261_v18 }
 0x674   :  { %v6862_v27 = vadd.f32 %v4473_v59, %v6813_v62  ;;  %v3264_v49 = vpop.f32.mrb[43].mxu1  ;;  %v3425_v58 = vsel %vm3394_vm4, %v6854_v16, -inf }
 0x675   :  { %3426 = vmax.xlane.f32.xlu0 %v3425_v58  ;;  %v6867_v33 = vadd.f32 %v6813_v62, %v3264_v49  ;;  %v3419_v3 = vsel %vm3394_vm4, %v6859_v2, -inf }
 0x676   :  { %v3428_v50 = vsel %vm3394_vm4, %v6862_v27, -inf }
 0x677   :  { %3429 = vmax.xlane.f32.xlu1 %v3428_v50  ;;  %v3422_v19 = vsel %vm3394_vm4, %v6867_v33, -inf }
 0x679   :  { %3420 = vmax.xlane.f32.xlu0 %v3419_v3  ;;  %v4476_v38 = vpop.f32.mrb[44].mxu1 }
 0x67a   :  { %v6874_v15 = vadd.f32 %v4476_v38, %v6813_v62  ;;  %v3277_v10 = vpop.f32.mrb[45].mxu1 }
 0x67b   :  { %3423 = vmax.xlane.f32.xlu1 %v3422_v19  ;;  %v4477_v9 = vpop.f32.mrb[46].mxu1  ;;  %v6879_v40 = vadd.f32 %v6813_v62, %v3277_v10 }
 0x67c   :  { %v6882_v26 = vadd.f32 %v4477_v9, %v6813_v62  ;;  %v3280_v36 = vpop.f32.mrb[47].mxu1  ;;  %v3437_v48 = vsel %vm3394_vm4, %v6874_v15, -inf }
 0x67d   :  { %3438 = vmax.xlane.f32.xlu0 %v3437_v48  ;;  %v6887_v34 = vadd.f32 %v6813_v62, %v3280_v36  ;;  %v3431_v28 = vsel %vm3394_vm4, %v6879_v40, -inf }
 0x67e   :  { %v3440_v29 = vsel %vm3394_vm4, %v6882_v26, -inf }
 0x67f   :  { %3441 = vmax.xlane.f32.xlu1 %v3440_v29  ;;  %v3434_v5 = vsel %vm3394_vm4, %v6887_v34, -inf }
 0x681   :  { %3432 = vmax.xlane.f32.xlu0 %v3431_v28  ;;  %v4480_v21 = vpop.f32.mrb[48].mxu1 }
 0x682   :  { %v6894_v37 = vadd.f32 %v4480_v21, %v6813_v62  ;;  %v3293_v7 = vpop.f32.mrb[49].mxu1 }
 0x683   :  { %3435 = vmax.xlane.f32.xlu1 %v3434_v5  ;;  %v4481_v43 = vpop.f32.mrb[50].mxu1  ;;  %v6899_v57 = vadd.f32 %v6813_v62, %v3293_v7 }
 0x684   :  { %v6902_v22 = vadd.f32 %v4481_v43, %v6813_v62  ;;  %v3296_v25 = vpop.f32.mrb[51].mxu1  ;;  %v3449_v54 = vsel %vm3394_vm4, %v6894_v37, -inf }
 0x685   :  { %7673 = vst [vmem:[#allocation54_spill] sm:$0xff] %v6899_v57  ;;  %3450 = vmax.xlane.f32.xlu0 %v3449_v54  ;;  %v6907_v52 = vadd.f32 %v6813_v62, %v3296_v25  ;;  %v3443_v30 = vsel %vm3394_vm4, %v6899_v57, -inf }
 0x686   :  { %v3452_v63 = vsel %vm3394_vm4, %v6902_v22, -inf }
 0x687   :  { %7674 = vst [vmem:[#allocation20_spill] sm:$0xff] %v6907_v52  ;;  %3453 = vmax.xlane.f32.xlu1 %v3452_v63  ;;  %v3446_v45 = vsel %vm3394_vm4, %v6907_v52, -inf }
 0x689   :  { %3444 = vmax.xlane.f32.xlu0 %v3443_v30  ;;  %v4484_v32 = vpop.f32.mrb[52].mxu1 }
 0x68a   :  { %v6914_v4 = vadd.f32 %v4484_v32, %v6813_v62  ;;  %v3309_v1 = vpop.f32.mrb[53].mxu1 }
 0x68b   :  { %3447 = vmax.xlane.f32.xlu1 %v3446_v45  ;;  %v4485_v39 = vpop.f32.mrb[54].mxu1  ;;  %v6919_v46 = vadd.f32 %v6813_v62, %v3309_v1 }
 0x68c   :  { %7675 = vst [vmem:[#allocation30_spill] sm:$0xff] %v6914_v4  ;;  %v6922_v31 = vadd.f32 %v4485_v39, %v6813_v62  ;;  %v3312_v51 = vpop.f32.mrb[55].mxu1  ;;  %v3461_v12 = vsel %vm3394_vm4, %v6914_v4, -inf }
 0x68d   :  { %7676 = vst [vmem:[#allocation3_spill] sm:$0xff] %v6919_v46  ;;  %3462 = vmax.xlane.f32.xlu0 %v3461_v12  ;;  %v6927_v56 = vadd.f32 %v6813_v62, %v3312_v51  ;;  %v3455_v8 = vsel %vm3394_vm4, %v6919_v46, -inf }
 0x68e   :  { %7677 = vst [vmem:[#allocation8_spill] sm:$0xff] %v6922_v31  ;;  %v3464_v11 = vsel %vm3394_vm4, %v6922_v31, -inf }
 0x68f   :  { %7678 = vst [vmem:[#allocation21_spill] sm:$0xff] %v6927_v56  ;;  %3465 = vmax.xlane.f32.xlu1 %v3464_v11  ;;  %v3458_v47 = vsel %vm3394_vm4, %v6927_v56, -inf }
 0x691   :  { %3456 = vmax.xlane.f32.xlu0 %v3455_v8  ;;  %v4488_v53 = vpop.f32.mrb[56].mxu1 }
 0x692   :  { %v6934_v41 = vadd.f32 %v4488_v53, %v6813_v62  ;;  %v3325_v0 = vpop.f32.mrb[57].mxu1 }
 0x693   :  { %3459 = vmax.xlane.f32.xlu1 %v3458_v47  ;;  %v4489_v55 = vpop.f32.mrb[58].mxu1  ;;  %v6939_v17 = vadd.f32 %v6813_v62, %v3325_v0 }
 0x694   :  { %7679 = vst [vmem:[#allocation11_spill] sm:$0xff] %v6934_v41  ;;  %v6942_v23 = vadd.f32 %v4489_v55, %v6813_v62  ;;  %v3328_v13 = vpop.f32.mrb[59].mxu1  ;;  %v3473_v18 = vsel %vm3394_vm4, %v6934_v41, -inf }
 0x695   :  { %7680 = vst [vmem:[#allocation26_spill] sm:$0xff] %v6939_v17  ;;  %3474 = vmax.xlane.f32.xlu0 %v3473_v18  ;;  %v6947_v14 = vadd.f32 %v6813_v62, %v3328_v13  ;;  %v3467_v49 = vsel %vm3394_vm4, %v6939_v17, -inf }
 0x696   :  { %7681 = vst [vmem:[#allocation9_spill] sm:$0xff] %v6942_v23  ;;  %v3476_v59 = vsel %vm3394_vm4, %v6942_v23, -inf }
 0x697   :  { %3477 = vmax.xlane.f32.xlu1 %v3476_v59  ;;  %v3470_v3 = vsel %vm3394_vm4, %v6947_v14, -inf }
 0x699   :  { %3468 = vmax.xlane.f32.xlu0 %v3467_v49  ;;  %v4492_v58 = vpop.f32.mrb[60].mxu1 }
 0x69a   :  { %v3341_v50 = vpop.f32.mrb[61].mxu1  ;;  %v6962_v36 = vadd.f32 %v4492_v58, %v6813_v62 }
 0x69b   :  { %v6956_v38 = vadd.f32 %v6813_v62, %v3341_v50  ;;  %3471 = vmax.xlane.f32.xlu1 %v3470_v3  ;;  %v4493_v10 = vpop.f32.mrb[62].mxu1 }
 0x69c   :  { %v6959_v19 = vadd.f32 %v4493_v10, %v6813_v62  ;;  %v3344_v9 = vpop.f32.mrb[63].mxu1  ;;  %7684 = vst [vmem:[#allocation24_spill] sm:$0xff] %v6962_v36  ;;  %v3485_v21 = vsel %vm3394_vm4, %v6962_v36, -inf }
 0x69d   :  { %7682 = vst [vmem:[#allocation29_spill] sm:$0xff] %v6956_v38  ;;  %v6965_v48 = vadd.f32 %v6813_v62, %v3344_v9  ;;  %v3479_v29 = vsel %vm3394_vm4, %v6956_v38, -inf }
 0x69e   :  { %7683 = vst [vmem:[#allocation15_spill] sm:$0xff] %v6959_v19  ;;  %3480 = vmax.xlane.f32.xlu0 %v3479_v29  ;;  %v3488_v7 = vsel %vm3394_vm4, %v6959_v19, -inf }
 0x69f   :  { %7685 = vst [vmem:[#allocation32_spill] sm:$0xff] %v6965_v48  ;;  %v3482_v28 = vsel %vm3394_vm4, %v6965_v48, -inf }
 0x6a0   :  { %3483 = vmax.xlane.f32.xlu1 %v3482_v28 }
 0x6a2   :  { %3486 = vmax.xlane.f32.xlu0 %v3485_v21 }
 0x6a4   :  { %3489 = vmax.xlane.f32.xlu1 %v3488_v7 }
 0x6f2   :  { %v6975_v5 = vpop.xlane.xlu0 %3402 }
 0x6f3   :  { %v3493_v62 = vsub.f32 %v6816_v24, %v6975_v5 }
 0x6f4   :  { %v6979_v43 = vpop.xlane.xlu1 %3405 }
 0x6f5   :  { %v3527_v25 = vmul.f32 1.442695, %v3493_v62  ;;  %v3494_v54 = vsub.f32 %v6822_v44, %v6979_v43 }
 0x6f6   :  { %v6983_v63 = vpop.xlane.xlu0 %3396 }
 0x6f7   :  { %4603 = vpow2.f32 %v3527_v25  ;;  %v3529_v30 = vmul.f32 1.442695, %v3494_v54  ;;  %v3491_v32 = vsub.f32 %v6819_v42, %v6983_v63 }
 0x6f8   :  { %v6987_v1 = vpop.xlane.xlu1 %3399 }
 0x6f9   :  { %4605 = vpow2.f32 %v3529_v30  ;;  %v3523_v45 = vmul.f32 1.442695, %v3491_v32  ;;  %v3492_v39 = vsub.f32 %v6827_v61, %v6987_v1 }
 0x6fa   :  { %v6991_v51 = vpop.xlane.xlu0 %3414 }
 0x6fb   :  { %4607 = vpow2.f32 %v3523_v45  ;;  %v3525_v12 = vmul.f32 1.442695, %v3492_v39  ;;  %v3497_v11 = vsub.f32 %v6834_v20, %v6991_v51 }
 0x6fc   :  { %v6995_v8 = vpop.xlane.xlu1 %3417 }
 0x6fd   :  { %4609 = vpow2.f32 %v3525_v12  ;;  %v3535_v53 = vmul.f32 1.442695, %v3497_v11  ;;  %v3498_v0 = vsub.f32 %v6842_v35, %v6995_v8 }
 0x6fe   :  { %v6999_v47 = vpop.xlane.xlu0 %3408 }
 0x6ff   :  { %4611 = vpow2.f32 %v3535_v53  ;;  %v3537_v55 = vmul.f32 1.442695, %v3498_v0  ;;  %v3495_v13 = vsub.f32 %v6839_v60, %v6999_v47 }
 0x700   :  { %v7003_v18 = vpop.xlane.xlu1 %3411 }
 0x701   :  { %v4604_v59 = vpop.eup %4603  ;;  %4613 = vpow2.f32 %v3537_v55  ;;  %v3531_v49 = vmul.f32 1.442695, %v3495_v13  ;;  %v3496_v58 = vsub.f32 %v6847_v6, %v7003_v18 }
 0x702   :  { %v7007_v50 = vpop.xlane.xlu0 %3426  ;;  %v3593_v3 = vsel %vm3394_vm4, %v4604_v59, 0.0 }
 0x703   :  { %v4606_v10 = vpop.eup %4605  ;;  %4615 = vpow2.f32 %v3531_v49  ;;  %v3533_v9 = vmul.f32 1.442695, %v3496_v58  ;;  %v3501_v29 = vsub.f32 %v6854_v16, %v7007_v50  ;;  %3594 = vadd.xlane.f32.xlu0 %v3593_v3 }
 0x704   :  { %v7012_v28 = vpop.xlane.xlu1 %3429  ;;  %v3596_v21 = vsel %vm3394_vm4, %v4606_v10, 0.0 }
 0x705   :  { %v4608_v7 = vpop.eup %4607  ;;  %4617 = vpow2.f32 %v3533_v9  ;;  %v3543_v62 = vmul.f32 1.442695, %v3501_v29  ;;  %v3502_v25 = vsub.f32 %v6862_v27, %v7012_v28  ;;  %3597 = vadd.xlane.f32.xlu1 %v3596_v21 }
 0x706   :  { %v7017_v54 = vpop.xlane.xlu0 %3420  ;;  %v3587_v30 = vsel %vm3394_vm4, %v4608_v7, 0.0 }
 0x707   :  { %v4610_v32 = vpop.eup %4609  ;;  %4619 = vpow2.f32 %v3543_v62  ;;  %v3545_v45 = vmul.f32 1.442695, %v3502_v25  ;;  %v3499_v39 = vsub.f32 %v6859_v2, %v7017_v54  ;;  %3588 = vadd.xlane.f32.xlu0 %v3587_v30 }
 0x708   :  { %v7022_v12 = vpop.xlane.xlu1 %3423  ;;  %v3590_v11 = vsel %vm3394_vm4, %v4610_v32, 0.0 }
 0x709   :  { %v4612_v53 = vpop.eup %4611  ;;  %4621 = vpow2.f32 %v3545_v45  ;;  %v3539_v0 = vmul.f32 1.442695, %v3499_v39  ;;  %v3500_v55 = vsub.f32 %v6867_v33, %v7022_v12  ;;  %3591 = vadd.xlane.f32.xlu1 %v3590_v11 }
 0x70a   :  { %v7027_v13 = vpop.xlane.xlu0 %3438  ;;  %v3605_v59 = vsel %vm3394_vm4, %v4612_v53, 0.0 }
 0x70b   :  { %v4614_v49 = vpop.eup %4613  ;;  %4623 = vpow2.f32 %v3539_v0  ;;  %v3541_v58 = vmul.f32 1.442695, %v3500_v55  ;;  %v3505_v3 = vsub.f32 %v6874_v15, %v7027_v13  ;;  %3606 = vadd.xlane.f32.xlu0 %v3605_v59 }
 0x70c   :  { %v7032_v10 = vpop.xlane.xlu1 %3441  ;;  %v3608_v9 = vsel %vm3394_vm4, %v4614_v49, 0.0 }
 0x70d   :  { %v4616_v29 = vpop.eup %4615  ;;  %4625 = vpow2.f32 %v3541_v58  ;;  %v3551_v21 = vmul.f32 1.442695, %v3505_v3  ;;  %v3506_v7 = vsub.f32 %v6882_v26, %v7032_v10  ;;  %3609 = vadd.xlane.f32.xlu1 %v3608_v9 }
 0x70e   :  { %v7037_v62 = vpop.xlane.xlu0 %3432  ;;  %v3599_v25 = vsel %vm3394_vm4, %v4616_v29, 0.0 }
 0x70f   :  { %v4618_v30 = vpop.eup %4617  ;;  %4627 = vpow2.f32 %v3551_v21  ;;  %v3553_v32 = vmul.f32 1.442695, %v3506_v7  ;;  %v3503_v45 = vsub.f32 %v6879_v40, %v7037_v62  ;;  %3600 = vadd.xlane.f32.xlu0 %v3599_v25 }
 0x710   :  { %v7042_v39 = vpop.xlane.xlu1 %3435  ;;  %v3602_v11 = vsel %vm3394_vm4, %v4618_v30, 0.0 }
 0x711   :  { %v4620_v53 = vpop.eup %4619  ;;  %4629 = vpow2.f32 %v3553_v32  ;;  %v3547_v0 = vmul.f32 1.442695, %v3503_v45  ;;  %v3504_v55 = vsub.f32 %v6887_v34, %v7042_v39  ;;  %3603 = vadd.xlane.f32.xlu1 %v3602_v11 }
 0x712   :  { %v7047_v59 = vpop.xlane.xlu0 %3450  ;;  %v3617_v49 = vsel %vm3394_vm4, %v4620_v53, 0.0 }
 0x713   :  { %v4622_v58 = vpop.eup %4621  ;;  %4631 = vpow2.f32 %v3547_v0  ;;  %v3549_v3 = vmul.f32 1.442695, %v3504_v55  ;;  %v3509_v9 = vsub.f32 %v6894_v37, %v7047_v59  ;;  %3618 = vadd.xlane.f32.xlu0 %v3617_v49 }
 0x714   :  { %v7052_v29 = vpop.xlane.xlu1 %3453  ;;  %v3620_v21 = vsel %vm3394_vm4, %v4622_v58, 0.0 }
 0x715   :  { %v4624_v7 = vpop.eup %4623  ;;  %4633 = vpow2.f32 %v3549_v3  ;;  %v3559_v25 = vmul.f32 1.442695, %v3509_v9  ;;  %v3510_v30 = vsub.f32 %v6902_v22, %v7052_v29  ;;  %3621 = vadd.xlane.f32.xlu1 %v3620_v21 }
 0x716   :  { %v7057_v32 = vpop.xlane.xlu0 %3444  ;;  %v3611_v45 = vsel %vm3394_vm4, %v4624_v7, 0.0 }
 0x717   :  { %v4626_v11 = vpop.eup %4625  ;;  %4635 = vpow2.f32 %v3559_v25  ;;  %v3561_v53 = vmul.f32 1.442695, %v3510_v30  ;;  %v3507_v0 = vsub.f32 %v6899_v57, %v7057_v32  ;;  %3612 = vadd.xlane.f32.xlu0 %v3611_v45 }
 0x718   :  { %v7062_v55 = vpop.xlane.xlu1 %3447  ;;  %v3614_v49 = vsel %vm3394_vm4, %v4626_v11, 0.0 }
 0x719   :  { %v4628_v58 = vpop.eup %4627  ;;  %4637 = vpow2.f32 %v3561_v53  ;;  %v3555_v3 = vmul.f32 1.442695, %v3507_v0  ;;  %v3508_v9 = vsub.f32 %v6907_v52, %v7062_v55  ;;  %3615 = vadd.xlane.f32.xlu1 %v3614_v49 }
 0x71a   :  { %v7067_v21 = vpop.xlane.xlu0 %3462  ;;  %v3629_v7 = vsel %vm3394_vm4, %v4628_v58, 0.0 }
 0x71b   :  { %v4630_v25 = vpop.eup %4629  ;;  %4639 = vpow2.f32 %v3555_v3  ;;  %v3557_v30 = vmul.f32 1.442695, %v3508_v9  ;;  %v3513_v45 = vsub.f32 %v6914_v4, %v7067_v21  ;;  %3630 = vadd.xlane.f32.xlu0 %v3629_v7 }
 0x71c   :  { %v7072_v57 = vpop.xlane.xlu1 %3465  ;;  %v3632_v11 = vsel %vm3394_vm4, %v4630_v25, 0.0 }
 0x71d   :  { %v4632_v53 = vpop.eup %4631  ;;  %4641 = vpow2.f32 %v3557_v30  ;;  %v3567_v0 = vmul.f32 1.442695, %v3513_v45  ;;  %v3514_v49 = vsub.f32 %v6922_v31, %v7072_v57  ;;  %3633 = vadd.xlane.f32.xlu1 %v3632_v11 }
 0x71e   :  { %v7077_v52 = vpop.xlane.xlu0 %3456  ;;  %v3623_v58 = vsel %vm3394_vm4, %v4632_v53, 0.0 }
 0x71f   :  { %v4634_v3 = vpop.eup %4633  ;;  %4643 = vpow2.f32 %v3567_v0  ;;  %v3569_v9 = vmul.f32 1.442695, %v3514_v49  ;;  %v3511_v7 = vsub.f32 %v6919_v46, %v7077_v52  ;;  %3624 = vadd.xlane.f32.xlu0 %v3623_v58 }
 0x720   :  { %v7082_v4 = vpop.xlane.xlu1 %3459  ;;  %v3626_v25 = vsel %vm3394_vm4, %v4634_v3, 0.0 }
 0x721   :  { %v4636_v30 = vpop.eup %4635  ;;  %4645 = vpow2.f32 %v3569_v9  ;;  %v3563_v45 = vmul.f32 1.442695, %v3511_v7  ;;  %v3512_v11 = vsub.f32 %v6927_v56, %v7082_v4  ;;  %3627 = vadd.xlane.f32.xlu1 %v3626_v25 }
 0x722   :  { %v7087_v31 = vpop.xlane.xlu0 %3474  ;;  %v3641_v53 = vsel %vm3394_vm4, %v4636_v30, 0.0 }
 0x723   :  { %v4638_v0 = vpop.eup %4637  ;;  %4647 = vpow2.f32 %v3563_v45  ;;  %v3565_v49 = vmul.f32 1.442695, %v3512_v11  ;;  %v3517_v58 = vsub.f32 %v6934_v41, %v7087_v31  ;;  %3642 = vadd.xlane.f32.xlu0 %v3641_v53 }
 0x724   :  { %v7092_v46 = vpop.xlane.xlu1 %3477  ;;  %v3644_v3 = vsel %vm3394_vm4, %v4638_v0, 0.0 }
 0x725   :  { %v4640_v9 = vpop.eup %4639  ;;  %4649 = vpow2.f32 %v3565_v49  ;;  %v3575_v7 = vmul.f32 1.442695, %v3517_v58  ;;  %v3518_v25 = vsub.f32 %v6942_v23, %v7092_v46  ;;  %3645 = vadd.xlane.f32.xlu1 %v3644_v3 }
 0x726   :  { %v7097_v56 = vpop.xlane.xlu0 %3468  ;;  %v3635_v30 = vsel %vm3394_vm4, %v4640_v9, 0.0 }
 0x727   :  { %v4642_v45 = vpop.eup %4641  ;;  %4651 = vpow2.f32 %v3575_v7  ;;  %v3577_v11 = vmul.f32 1.442695, %v3518_v25  ;;  %v3515_v53 = vsub.f32 %v6939_v17, %v7097_v56  ;;  %3636 = vadd.xlane.f32.xlu0 %v3635_v30 }
 0x728   :  { %v7102_v41 = vpop.xlane.xlu1 %3471  ;;  %v3638_v0 = vsel %vm3394_vm4, %v4642_v45, 0.0 }
 0x729   :  { %v4644_v49 = vpop.eup %4643  ;;  %4653 = vpow2.f32 %v3577_v11  ;;  %v3571_v58 = vmul.f32 1.442695, %v3515_v53  ;;  %v3516_v3 = vsub.f32 %v6947_v14, %v7102_v41  ;;  %3639 = vadd.xlane.f32.xlu1 %v3638_v0 }
 0x72a   :  { %v3653_v9 = vsel %vm3394_vm4, %v4644_v49, 0.0 }
 0x72b   :  { %v4646_v23 = vpop.eup %4645  ;;  %4655 = vpow2.f32 %v3571_v58  ;;  %v3573_v7 = vmul.f32 1.442695, %v3516_v3  ;;  %3654 = vadd.xlane.f32.xlu0 %v3653_v9  ;;  %v7108_v25 = vpop.xlane.xlu0 %3480 }
 0x72c   :  { %v3519_v30 = vsub.f32 %v6956_v38, %v7108_v25  ;;  %v3656_v45 = vsel %vm3394_vm4, %v4646_v23, 0.0 }
 0x72d   :  { %v4648_v17 = vpop.eup %4647  ;;  %4657 = vpow2.f32 %v3573_v7  ;;  %3657 = vadd.xlane.f32.xlu1 %v3656_v45  ;;  %v7113_v11 = vpop.xlane.xlu1 %3483 }
 0x72e   :  { %v3579_v53 = vmul.f32 1.442695, %v3519_v30  ;;  %v3520_v0 = vsub.f32 %v6965_v48, %v7113_v11  ;;  %v3647_v49 = vsel %vm3394_vm4, %v4648_v17, 0.0 }
 0x72f   :  { %v4650_v58 = vpop.eup %4649  ;;  %3648 = vadd.xlane.f32.xlu0 %v3647_v49  ;;  %v7118_v3 = vpop.xlane.xlu0 %3486 }
 0x730   :  { %4659 = vpow2.f32 %v3579_v53  ;;  %v3581_v9 = vmul.f32 1.442695, %v3520_v0  ;;  %v3521_v23 = vsub.f32 %v6962_v36, %v7118_v3  ;;  %v3650_v7 = vsel %vm3394_vm4, %v4650_v58, 0.0 }
 0x731   :  { %v4652_v45 = vpop.eup %4651  ;;  %3651 = vadd.xlane.f32.xlu1 %v3650_v7  ;;  %v7123_v38 = vpop.xlane.xlu1 %3489 }
 0x732   :  { %7686 = vst [vmem:[#allocation19_spill] sm:$0xff] %v7123_v38  ;;  %4661 = vpow2.f32 %v3581_v9  ;;  %v3583_v30 = vmul.f32 1.442695, %v3521_v23  ;;  %v3522_v17 = vsub.f32 %v6959_v19, %v7123_v38  ;;  %v3665_v49 = vsel %vm3394_vm4, %v4652_v45, 0.0 }
 0x733   :  { %v4654_v48 = vpop.eup %4653  ;;  %3666 = vadd.xlane.f32.xlu0 %v3665_v49 }
 0x734   :  { %4663 = vpow2.f32 %v3583_v30  ;;  %v3585_v53 = vmul.f32 1.442695, %v3522_v17  ;;  %v3668_v0 = vsel %vm3394_vm4, %v4654_v48, 0.0 }
 0x735   :  { %v4656_v36 = vpop.eup %4655  ;;  %3669 = vadd.xlane.f32.xlu1 %v3668_v0 }
 0x736   :  { %4665 = vpow2.f32 %v3585_v53  ;;  %v3659_v58 = vsel %vm3394_vm4, %v4656_v36, 0.0 }
 0x737   :  { %v4658_v7 = vpop.eup %4657  ;;  %3660 = vadd.xlane.f32.xlu0 %v3659_v58 }
 0x738   :  { %v3662_v9 = vsel %vm3394_vm4, %v4658_v7, 0.0 }
 0x739   :  { %3663 = vadd.xlane.f32.xlu1 %v3662_v9 }
 0x73a   :  { %v4660_v23 = vpop.eup %4659 }
 0x73b   :  { %v3671_v19 = vsel %vm3394_vm4, %v4660_v23, 0.0 }
 0x73c   :  { %v4662_v45 = vpop.eup %4661  ;;  %3672 = vadd.xlane.f32.xlu0 %v3671_v19 }
 0x73d   :  { %v3674_v30 = vsel %vm3394_vm4, %v4662_v45, 0.0 }
 0x73e   :  { %v4664_v17 = vpop.eup %4663  ;;  %3675 = vadd.xlane.f32.xlu1 %v3674_v30 }
 0x73f   :  { %v3677_v48 = vsel %vm3394_vm4, %v4664_v17, 0.0 }
 0x740   :  { %v4666_v49 = vpop.eup %4665  ;;  %3678 = vadd.xlane.f32.xlu0 %v3677_v48 }
 0x741   :  { %v3680_v36 = vsel %vm3394_vm4, %v4666_v49, 0.0 }
 0x742   :  { %3681 = vadd.xlane.f32.xlu1 %v3680_v36 }
 0x790   :  { %v3595_v53 = vpop.xlane.xlu0 %3594 }
 0x791   :  { %4667 = vlog2.f32 %v3595_v53 }
 0x792   :  { %v3598_v0 = vpop.xlane.xlu1 %3597 }
 0x793   :  { %4669 = vlog2.f32 %v3598_v0 }
 0x794   :  { %v3589_v58 = vpop.xlane.xlu0 %3588 }
 0x795   :  { %4671 = vlog2.f32 %v3589_v58 }
 0x796   :  { %v3592_v7 = vpop.xlane.xlu1 %3591 }
 0x797   :  { %4673 = vlog2.f32 %v3592_v7 }
 0x798   :  { %v3607_v19 = vpop.xlane.xlu0 %3606 }
 0x799   :  { %4675 = vlog2.f32 %v3607_v19 }
 0x79a   :  { %v3610_v9 = vpop.xlane.xlu1 %3609 }
 0x79b   :  { %v4668_v23 = vpop.eup %4667  ;;  %4677 = vlog2.f32 %v3610_v9 }
 0x79c   :  { %v3688_v45 = vmul.f32 0.6931472, %v4668_v23  ;;  %v3601_v30 = vpop.xlane.xlu0 %3600 }
 0x79d   :  { %v4670_v17 = vpop.eup %4669  ;;  %4679 = vlog2.f32 %v3601_v30 }
 0x79e   :  { %v3749_v48 = vadd.f32 %v3688_v45, %v6975_v5  ;;  %v3690_v49 = vmul.f32 0.6931472, %v4670_v17  ;;  %v3604_v36 = vpop.xlane.xlu1 %3603 }
 0x79f   :  { %v4672_v53 = vpop.eup %4671  ;;  %4681 = vlog2.f32 %v3604_v36 }
 0x7a0   :  { %v3781_v0 = vsub.f32 %v6816_v24, %v3749_v48  ;;  %v3750_v58 = vadd.f32 %v3690_v49, %v6979_v43  ;;  %v3684_v7 = vmul.f32 0.6931472, %v4672_v53  ;;  %v3619_v38 = vpop.xlane.xlu0 %3618 }
 0x7a1   :  { %v4674_v19 = vpop.eup %4673  ;;  %4683 = vlog2.f32 %v3619_v38 }
 0x7a2   :  { %3813 = vst.msk [vmem:[%s7330_s3 + $0x10] sm:$0xff] %vm3394_vm4, %v3781_v0  ;;  %v3782_v9 = vsub.f32 %v6822_v44, %v3750_v58  ;;  %v3747_v5 = vadd.f32 %v3684_v7, %v6983_v63  ;;  %v3686_v23 = vmul.f32 0.6931472, %v4674_v19  ;;  %v3622_v45 = vpop.xlane.xlu1 %3621 }
 0x7a3   :  { %v4676_v30 = vpop.eup %4675  ;;  %4685 = vlog2.f32 %v3622_v45 }
 0x7a4   :  { %3814 = vst.msk [vmem:[%s7330_s3 + $0x18] sm:$0xff] %vm3394_vm4, %v3782_v9  ;;  %v3779_v24 = vsub.f32 %v6819_v42, %v3747_v5  ;;  %v3748_v38 = vadd.f32 %v3686_v23, %v6987_v1  ;;  %v3696_v43 = vmul.f32 0.6931472, %v4676_v30  ;;  %v3613_v17 = vpop.xlane.xlu0 %3612 }
 0x7a5   :  { %v4678_v48 = vpop.eup %4677  ;;  %4687 = vlog2.f32 %v3613_v17 }
 0x7a6   :  { %3811 = vst.msk [vmem:[%s7330_s3] sm:$0xff] %vm3394_vm4, %v3779_v24  ;;  %v3780_v44 = vsub.f32 %v6827_v61, %v3748_v38  ;;  %v3753_v63 = vadd.f32 %v3696_v43, %v6991_v51  ;;  %v3698_v49 = vmul.f32 0.6931472, %v4678_v48  ;;  %v3616_v36 = vpop.xlane.xlu1 %3615 }
 0x7a7   :  { %v4680_v53 = vpop.eup %4679  ;;  %4689 = vlog2.f32 %v3616_v36 }
 0x7a8   :  { %3812 = vst.msk [vmem:[%s7330_s3 + $0x8] sm:$0xff] %vm3394_vm4, %v3780_v44  ;;  %v3785_v42 = vsub.f32 %v6834_v20, %v3753_v63  ;;  %v3754_v1 = vadd.f32 %v3698_v49, %v6995_v8  ;;  %v3692_v0 = vmul.f32 0.6931472, %v4680_v53  ;;  %v3631_v58 = vpop.xlane.xlu0 %3630 }
 0x7a9   :  { %v4682_v7 = vpop.eup %4681  ;;  %4691 = vlog2.f32 %v3631_v58 }
 0x7aa   :  { %3817 = vst.msk [vmem:[%s7330_s3 + $0x30] sm:$0xff] %vm3394_vm4, %v3785_v42  ;;  %v3786_v61 = vsub.f32 %v6842_v35, %v3754_v1  ;;  %v3751_v51 = vadd.f32 %v3692_v0, %v6999_v47  ;;  %v3694_v19 = vmul.f32 0.6931472, %v4682_v7  ;;  %v3634_v9 = vpop.xlane.xlu1 %3633 }
 0x7ab   :  { %v4684_v5 = vpop.eup %4683  ;;  %4693 = vlog2.f32 %v3634_v9 }
 0x7ac   :  { %3818 = vst.msk [vmem:[%s7330_s3 + $0x38] sm:$0xff] %vm3394_vm4, %v3786_v61  ;;  %v3783_v20 = vsub.f32 %v6839_v60, %v3751_v51  ;;  %v3752_v8 = vadd.f32 %v3694_v19, %v7003_v18  ;;  %v3704_v23 = vmul.f32 0.6931472, %v4684_v5  ;;  %v3625_v45 = vpop.xlane.xlu0 %3624 }
 0x7ad   :  { %v4686_v30 = vpop.eup %4685  ;;  %4695 = vlog2.f32 %v3625_v45 }
 0x7ae   :  { %3815 = vst.msk [vmem:[%s7330_s3 + $0x20] sm:$0xff] %vm3394_vm4, %v3783_v20  ;;  %v3784_v35 = vsub.f32 %v6847_v6, %v3752_v8  ;;  %v3757_v47 = vadd.f32 %v3704_v23, %v7007_v50  ;;  %v3706_v24 = vmul.f32 0.6931472, %v4686_v30  ;;  %v3628_v38 = vpop.xlane.xlu1 %3627 }
 0x7af   :  { %v4688_v43 = vpop.eup %4687  ;;  %4697 = vlog2.f32 %v3628_v38 }
 0x7b0   :  { %3816 = vst.msk [vmem:[%s7330_s3 + $0x28] sm:$0xff] %vm3394_vm4, %v3784_v35  ;;  %v3789_v60 = vsub.f32 %v6854_v16, %v3757_v47  ;;  %v3758_v18 = vadd.f32 %v3706_v24, %v7012_v28  ;;  %v3700_v17 = vmul.f32 0.6931472, %v4688_v43  ;;  %v3643_v48 = vpop.xlane.xlu0 %3642 }
 0x7b1   :  { %v4690_v44 = vpop.eup %4689  ;;  %4699 = vlog2.f32 %v3643_v48 }
 0x7b2   :  { %3821 = vst.msk [vmem:[%s7330_s3 + $0x50] sm:$0xff] %vm3394_vm4, %v3789_v60  ;;  %v3790_v6 = vsub.f32 %v6862_v27, %v3758_v18  ;;  %v3755_v50 = vadd.f32 %v3700_v17, %v7017_v54  ;;  %v3702_v63 = vmul.f32 0.6931472, %v4690_v44  ;;  %v3646_v49 = vpop.xlane.xlu1 %3645 }
 0x7b3   :  { %v4692_v36 = vpop.eup %4691  ;;  %4701 = vlog2.f32 %v3646_v49 }
 0x7b4   :  { %3822 = vst.msk [vmem:[%s7330_s3 + $0x58] sm:$0xff] %vm3394_vm4, %v3790_v6  ;;  %v3787_v16 = vsub.f32 %v6859_v2, %v3755_v50  ;;  %v3756_v28 = vadd.f32 %v3702_v63, %v7022_v12  ;;  %v3712_v53 = vmul.f32 0.6931472, %v4692_v36  ;;  %v3637_v42 = vpop.xlane.xlu0 %3636 }
 0x7b5   :  { %v4694_v1 = vpop.eup %4693  ;;  %4703 = vlog2.f32 %v3637_v42 }
 0x7b6   :  { %3819 = vst.msk [vmem:[%s7330_s3 + $0x40] sm:$0xff] %vm3394_vm4, %v3787_v16  ;;  %v3788_v27 = vsub.f32 %v6867_v33, %v3756_v28  ;;  %v3761_v54 = vadd.f32 %v3712_v53, %v7027_v13  ;;  %v3714_v0 = vmul.f32 0.6931472, %v4694_v1  ;;  %v3640_v58 = vpop.xlane.xlu1 %3639 }
 0x7b7   :  { %v4696_v7 = vpop.eup %4695  ;;  %4705 = vlog2.f32 %v3640_v58 }
 0x7b8   :  { %3820 = vst.msk [vmem:[%s7330_s3 + $0x48] sm:$0xff] %vm3394_vm4, %v3788_v27  ;;  %v3793_v2 = vsub.f32 %v6874_v15, %v3761_v54  ;;  %v3762_v12 = vadd.f32 %v3714_v0, %v7032_v10  ;;  %v3708_v61 = vmul.f32 0.6931472, %v4696_v7  ;;  %v3655_v51 = vpop.xlane.xlu0 %3654 }
 0x7b9   :  { %v4698_v19 = vpop.eup %4697  ;;  %4707 = vlog2.f32 %v3655_v51 }
 0x7ba   :  { %3825 = vst.msk [vmem:[%s7330_s3 + $0x70] sm:$0xff] %vm3394_vm4, %v3793_v2  ;;  %v3794_v33 = vsub.f32 %v6882_v26, %v3762_v12  ;;  %v3759_v13 = vadd.f32 %v3708_v61, %v7037_v62  ;;  %v3710_v9 = vmul.f32 0.6931472, %v4698_v19  ;;  %v3658_v5 = vpop.xlane.xlu1 %3657 }
 0x7bb   :  { %v4700_v20 = vpop.eup %4699  ;;  %4709 = vlog2.f32 %v3658_v5 }
 0x7bc   :  { %3826 = vst.msk [vmem:[%s7330_s3 + $0x78] sm:$0xff] %vm3394_vm4, %v3794_v33  ;;  %v3791_v15 = vsub.f32 %v6879_v40, %v3759_v13  ;;  %v3760_v10 = vadd.f32 %v3710_v9, %v7042_v39  ;;  %v3720_v8 = vmul.f32 0.6931472, %v4700_v20  ;;  %v3649_v23 = vpop.xlane.xlu0 %3648 }
 0x7bd   :  { %v4702_v45 = vpop.eup %4701  ;;  %4711 = vlog2.f32 %v3649_v23 }
 0x7be   :  { %3823 = vst.msk [vmem:[%s7330_s3 + $0x60] sm:$0xff] %vm3394_vm4, %v3791_v15  ;;  %v3792_v26 = vsub.f32 %v6887_v34, %v3760_v10  ;;  %v3765_v62 = vadd.f32 %v3720_v8, %v7047_v59  ;;  %v3722_v30 = vmul.f32 0.6931472, %v4702_v45  ;;  %v3652_v35 = vpop.xlane.xlu1 %3651 }
 0x7bf   :  { %v4704_v47 = vpop.eup %4703  ;;  %4713 = vlog2.f32 %v3652_v35 }
 0x7c0   :  { %3824 = vst.msk [vmem:[%s7330_s3 + $0x68] sm:$0xff] %vm3394_vm4, %v3792_v26  ;;  %v3797_v40 = vsub.f32 %v6894_v37, %v3765_v62  ;;  %v3766_v39 = vadd.f32 %v3722_v30, %v7052_v29  ;;  %v3716_v24 = vmul.f32 0.6931472, %v4704_v47  ;;  %v3667_v38 = vpop.xlane.xlu0 %3666  ;;  %v7687_v37 = vld [vmem:[#allocation54_spill] sm:$0xff] }
 0x7c1   :  { %v4706_v43 = vpop.eup %4705  ;;  %4715 = vlog2.f32 %v3667_v38 }
 0x7c2   :  { %3829 = vst.msk [vmem:[%s7330_s3 + $0x90] sm:$0xff] %vm3394_vm4, %v3797_v40  ;;  %v3798_v34 = vsub.f32 %v6902_v22, %v3766_v39  ;;  %v3763_v59 = vadd.f32 %v3716_v24, %v7057_v32  ;;  %v3718_v60 = vmul.f32 0.6931472, %v4706_v43  ;;  %v3670_v18 = vpop.xlane.xlu1 %3669  ;;  %v7688_v22 = vld [vmem:[#allocation20_spill] sm:$0xff] }
 0x7c3   :  { %v4708_v17 = vpop.eup %4707  ;;  %4717 = vlog2.f32 %v3670_v18 }
 0x7c4   :  { %3830 = vst.msk [vmem:[%s7330_s3 + $0x98] sm:$0xff] %vm3394_vm4, %v3798_v34  ;;  %v3795_v29 = vsub.f32 %v7687_v37, %v3763_v59  ;;  %v3764_v48 = vadd.f32 %v3718_v60, %v7062_v55  ;;  %v3728_v44 = vmul.f32 0.6931472, %v4708_v17  ;;  %v3661_v6 = vpop.xlane.xlu0 %3660  ;;  %v7689_v55 = vld [vmem:[#allocation30_spill] sm:$0xff]  ;;  %v7696_v59 = vld [vmem:[#allocation29_spill] sm:$0xff] }
 0x7c5   :  { %v4710_v50 = vpop.eup %4709  ;;  %4719 = vlog2.f32 %v3661_v6 }
 0x7c6   :  { %3827 = vst.msk [vmem:[%s7330_s3 + $0x80] sm:$0xff] %vm3394_vm4, %v3795_v29  ;;  %v3796_v32 = vsub.f32 %v7688_v22, %v3764_v48  ;;  %v3769_v63 = vadd.f32 %v3728_v44, %v7067_v21  ;;  %v3730_v49 = vmul.f32 0.6931472, %v4710_v50  ;;  %v3664_v36 = vpop.xlane.xlu1 %3663  ;;  %v7690_v21 = vld [vmem:[#allocation8_spill] sm:$0xff]  ;;  %v7700_v50 = vld [vmem:[#allocation15_spill] sm:$0xff] }
 0x7c7   :  { %v4712_v16 = vpop.eup %4711  ;;  %4721 = vlog2.f32 %v3664_v36  ;;  %v7698_v48 = vld [vmem:[#allocation24_spill] sm:$0xff] }
 0x7c8   :  { %3828 = vst.msk [vmem:[%s7330_s3 + $0x88] sm:$0xff] %vm3394_vm4, %v3796_v32  ;;  %v3801_v28 = vsub.f32 %v7689_v55, %v3769_v63  ;;  %v3770_v53 = vadd.f32 %v3730_v49, %v7072_v57  ;;  %v3724_v42 = vmul.f32 0.6931472, %v4712_v16  ;;  %v7691_v57 = vld [vmem:[#allocation3_spill] sm:$0xff] }
 0x7c9   :  { %v4714_v1 = vpop.eup %4713  ;;  %v3673_v27 = vpop.xlane.xlu0 %3672 }
 0x7ca   :  { %3833 = vst.msk [vmem:[%s7330_s3 + $0xb0] sm:$0xff] %vm3394_vm4, %v3801_v28  ;;  %v3802_v54 = vsub.f32 %v7690_v21, %v3770_v53  ;;  %v3767_v0 = vadd.f32 %v3724_v42, %v7077_v52  ;;  %v3726_v58 = vmul.f32 0.6931472, %v4714_v1  ;;  %4723 = vlog2.f32 %v3673_v27  ;;  %v7692_v52 = vld [vmem:[#allocation21_spill] sm:$0xff] }
 0x7cb   :  { %v4716_v7 = vpop.eup %4715  ;;  %v3676_v2 = vpop.xlane.xlu1 %3675 }
 0x7cc   :  { %3834 = vst.msk [vmem:[%s7330_s3 + $0xb8] sm:$0xff] %vm3394_vm4, %v3802_v54  ;;  %v3799_v12 = vsub.f32 %v7691_v57, %v3767_v0  ;;  %v3768_v61 = vadd.f32 %v3726_v58, %v7082_v4  ;;  %v3736_v51 = vmul.f32 0.6931472, %v4716_v7  ;;  %4725 = vlog2.f32 %v3676_v2  ;;  %v7693_v4 = vld [vmem:[#allocation11_spill] sm:$0xff] }
 0x7cd   :  { %v4718_v19 = vpop.eup %4717  ;;  %v3679_v33 = vpop.xlane.xlu0 %3678 }
 0x7ce   :  { %3831 = vst.msk [vmem:[%s7330_s3 + $0xa0] sm:$0xff] %vm3394_vm4, %v3799_v12  ;;  %v3800_v13 = vsub.f32 %v7692_v52, %v3768_v61  ;;  %v3773_v9 = vadd.f32 %v3736_v51, %v7087_v31  ;;  %v3738_v5 = vmul.f32 0.6931472, %v4718_v19  ;;  %4727 = vlog2.f32 %v3679_v33  ;;  %v7694_v31 = vld [vmem:[#allocation9_spill] sm:$0xff] }
 0x7cf   :  { %v4720_v20 = vpop.eup %4719  ;;  %v3682_v15 = vpop.xlane.xlu1 %3681 }
 0x7d0   :  { %3832 = vst.msk [vmem:[%s7330_s3 + $0xa8] sm:$0xff] %vm3394_vm4, %v3800_v13  ;;  %v3805_v10 = vsub.f32 %v7693_v4, %v3773_v9  ;;  %v3774_v8 = vadd.f32 %v3738_v5, %v7092_v46  ;;  %v3732_v23 = vmul.f32 0.6931472, %v4720_v20  ;;  %4729 = vlog2.f32 %v3682_v15  ;;  %v7695_v46 = vld [vmem:[#allocation26_spill] sm:$0xff] }
 0x7d1   :  { %v4722_v45 = vpop.eup %4721 }
 0x7d2   :  { %3837 = vst.msk [vmem:[%s7330_s3 + $0xd0] sm:$0xff] %vm3394_vm4, %v3805_v10  ;;  %v3806_v26 = vsub.f32 %v7694_v31, %v3774_v8  ;;  %v3771_v62 = vadd.f32 %v3732_v23, %v7097_v56  ;;  %v3734_v30 = vmul.f32 0.6931472, %v4722_v45 }
 0x7d4   :  { %v4724_v35 = vpop.eup %4723  ;;  %3838 = vst.msk [vmem:[%s7330_s3 + $0xd8] sm:$0xff] %vm3394_vm4, %v3806_v26  ;;  %v3803_v47 = vsub.f32 %v7695_v46, %v3771_v62  ;;  %v3772_v40 = vadd.f32 %v3734_v30, %v7102_v41 }
 0x7d5   :  { %v3740_v39 = vmul.f32 0.6931472, %v4724_v35 }
 0x7d6   :  { %v4726_v24 = vpop.eup %4725  ;;  %3835 = vst.msk [vmem:[%s7330_s3 + $0xc0] sm:$0xff] %vm3394_vm4, %v3803_v47  ;;  %v3804_v56 = vsub.f32 %v6947_v14, %v3772_v40  ;;  %v7697_v14 = vld [vmem:[#allocation32_spill] sm:$0xff] }
 0x7d7   :  { %v3775_v38 = vadd.f32 %v3740_v39, %v7108_v25  ;;  %v3742_v43 = vmul.f32 0.6931472, %v4726_v24 }
 0x7d8   :  { %v4728_v34 = vpop.eup %4727  ;;  %3836 = vst.msk [vmem:[%s7330_s3 + $0xc8] sm:$0xff] %vm3394_vm4, %v3804_v56 }
 0x7d9   :  { %v3807_v41 = vsub.f32 %v7696_v59, %v3775_v38  ;;  %v3776_v60 = vadd.f32 %v3742_v43, %v7113_v11  ;;  %v3744_v18 = vmul.f32 0.6931472, %v4728_v34  ;;  %v7699_v11 = vld [vmem:[#allocation19_spill] sm:$0xff] }
 0x7da   :  { %v4730_v17 = vpop.eup %4729 }
 0x7db   :  { %3839 = vst.msk [vmem:[%s7330_s3 + $0xe0] sm:$0xff] %vm3394_vm4, %v3807_v41  ;;  %v3808_v25 = vsub.f32 %v7697_v14, %v3776_v60  ;;  %v3777_v37 = vadd.f32 %v3744_v18, %v7118_v3  ;;  %v3746_v29 = vmul.f32 0.6931472, %v4730_v17 }
 0x7dd   :  { %3840 = vst.msk [vmem:[%s7330_s3 + $0xe8] sm:$0xff] %vm3394_vm4, %v3808_v25  ;;  %v3809_v44 = vsub.f32 %v7698_v48, %v3777_v37  ;;  %v3778_v6 = vadd.f32 %v3746_v29, %v7699_v11 }
 0x7df   :  { %3841 = vst.msk [vmem:[%s7330_s3 + $0xf0] sm:$0xff] %vm3394_vm4, %v3809_v44  ;;  %v3810_v22 = vsub.f32 %v7700_v50, %v3778_v6 }
 0x7e1   :  { %3842 = vst.msk [vmem:[%s7330_s3 + $0xf8] sm:$0xff] %vm3394_vm4, %v3810_v22 }

// kernel: tpu_custom_call.1
= control target key start
LH: loop header
LB: loop body
LE: loop exit
PB: predicated region body
PF: predicated region fallthrough
CT: control target
= control target key end

     0   :  { %vm210_vm0 = vcmask 1042432   ;;  %vm113_vm1 = vcmask 23552   ;;  %vm700_vm2 = vcmask 1041408   ;;  %vm651_vm3 = vcmask 31744   ;;  %s7327_s2 = inlined_call_operand.vmem [shape: bf16[704,128], index: 2, kind: input, shape index: {}]   ;;  %s7328_s0 = inlined_call_operand.vmem [shape: s32[256,3], index: 0, kind: input, shape index: {}]   ;;  %s7329_s1 = inlined_call_operand.vmem [shape: f32[256,4], index: 1, kind: input, shape index: {}]   ;;  %s7330_s3 = inlined_call_operand.vmem [shape: f32[256,2], index: 3, kind: output, shape index: {}]  }
   0x1   :  { %v111_v0 = vld [vmem:[%s7327_s2] sm:$0x3]  ;;  %v16_v2 = vld [vmem:[%s7328_s0 + $0x8] sm:$0xff]  ;;  %v17_v6 = vld [vmem:[%s7328_s0 + $0x10] sm:$0xff] }
   0x2   :  { %v15_v1 = vld [vmem:[%s7328_s0] sm:$0xff]  ;;  %v112_v3 = vunpack.c.l.bf16 %v111_v0  ;;  %v48_v5 = vcvt.s32.f32 %v16_v2  ;;  %v49_v7 = vcvt.s32.f32 %v17_v6  ;;  %v18_v8 = vld [vmem:[%s7328_s0 + $0x18] sm:$0xff]  ;;  %v20_v12 = vld [vmem:[%s7328_s0 + $0x28] sm:$0xff] }
   0x3   :  { %v47_v4 = vcvt.s32.f32 %v15_v1  ;;  %v19_v9 = vld [vmem:[%s7328_s0 + $0x20] sm:$0xff]  ;;  %v50_v10 = vcvt.s32.f32 %v18_v8  ;;  %v21_v13 = vld [vmem:[%s7328_s0 + $0x30] sm:$0xff]  ;;  %v52_v14 = vcvt.s32.f32 %v20_v12  ;;  %v22_v16 = vld [vmem:[%s7328_s0 + $0x38] sm:$0xff] }
   0x4   :  { %4170 = vmatprep.subr.msk.mxu0 %vm210_vm0, %v112_v3  ;;  %v51_v11 = vcvt.s32.f32 %v19_v9  ;;  %v53_v15 = vcvt.s32.f32 %v21_v13  ;;  %v23_v17 = vld [vmem:[%s7328_s0 + $0x40] sm:$0xff]  ;;  %v96_v20 = vld [vmem:[%s7329_s1 + $0x88] sm:$0xff]  ;;  %v54_v25 = vcvt.s32.f32 %v22_v16  ;;  %v25_v26 = vld [vmem:[%s7328_s0 + $0x50] sm:$0xff] }
   0x5   :  { %4172 = vmatprep.mubr.msk.f32.mxu0 %vm113_vm1, %v47_v4  ;;  %4171 = vmatpush3.msk.msra.mxu0 %vm210_vm0, %v112_v3  ;;  %v650_v18 = vld [vmem:[%s7327_s2 + $0x44] sm:$0x3]  ;;  %v24_v21 = vld [vmem:[%s7328_s0 + $0x48] sm:$0xff]  ;;  %v97_v27 = vld [vmem:[%s7329_s1 + $0x90] sm:$0xff]  ;;  %v55_v29 = vcvt.s32.f32 %v23_v17  ;;  %v57_v38 = vcvt.s32.f32 %v25_v26 }
   0x6   :  { %4173 = vmatmul.mubr.msk.f32.vlgmr.msra.gmra.mrb[0].mxu0 %vm113_vm1, %v48_v5  ;;  %v95_v19 = vld [vmem:[%s7329_s1 + $0x80] sm:$0xff]  ;;  %4560 = vmatprep.subr.msk.bf16.mxu0 %vm700_vm2, %v650_v18  ;;  %v702_v22 = vsel %vm700_vm2, %v650_v18, 0  ;;  %v98_v28 = vld [vmem:[%s7329_s1 + $0x98] sm:$0xff]  ;;  %v4564_v31 = vld [vmem:[%s7327_s2 + $0xc] sm:$0xff]   ;;  %v56_v36 = vcvt.s32.f32 %v24_v21 }
   0x7   :  { %4175 = vmatprep.mubr.msk.f32.mxu0 %vm113_vm1, %v49_v7  ;;  %4561 = vmatprep.subr.msk.bf16.mxu1 %vm700_vm2, %v650_v18  ;;  %v642_v23 = vpack.c.bf16 %v96_v20, %v95_v19  ;;  %v4563_v24 = vld [vmem:[%s7327_s2 + $0x4] sm:$0xff]   ;;  %v643_v30 = vpack.c.bf16 %v98_v28, %v97_v27  ;;  %v101_v35 = vld [vmem:[%s7329_s1 + $0xb0] sm:$0xff]  ;;  %v102_v37 = vld [vmem:[%s7329_s1 + $0xb8] sm:$0xff] }
   0x8   :  { %4495 = vmatpush3.bf16.msra.mxu1 %v702_v22  ;;  %4221 = vmatpush3.bf16.msra.mxu0 %v702_v22  ;;  %v99_v32 = vld [vmem:[%s7329_s1 + $0xa0] sm:$0xff]  ;;  %v100_v33 = vld [vmem:[%s7329_s1 + $0xa8] sm:$0xff]  ;;  %v26_v39 = vld [vmem:[%s7328_s0 + $0x58] sm:$0xff]  ;;  %v645_v44 = vpack.c.bf16 %v102_v37, %v101_v35 }
   0x9   :  { %4238 = vmatprep.mubr.msk.bf16.mxu1 %vm651_vm3, %v642_v23  ;;  %4254 = vmatprep.subr.bf16.mxu1 %v4563_v24  ;;  %v644_v34 = vpack.c.bf16 %v100_v33, %v99_v32  ;;  %v4565_v40 = vld [vmem:[%s7327_s2 + $0x14] sm:$0xff]   ;;  %v27_v41 = vld [vmem:[%s7328_s0 + $0x60] sm:$0xff]  ;;  %v28_v43 = vld [vmem:[%s7328_s0 + $0x68] sm:$0xff]  ;;  %v58_v46 = vcvt.s32.f32 %v26_v39 }
   0xa   :  { %4176 = vmatmul.mubr.msk.f32.gmra.mrb[2].mxu0 %vm113_vm1, %v50_v10  ;;  %v103_v42 = vld [vmem:[%s7329_s1 + $0xc0] sm:$0xff]  ;;  %v104_v45 = vld [vmem:[%s7329_s1 + $0xc8] sm:$0xff]  ;;  %v29_v47 = vld [vmem:[%s7328_s0 + $0x70] sm:$0xff]  ;;  %v59_v49 = vcvt.s32.f32 %v27_v41  ;;  %v60_v55 = vcvt.s32.f32 %v28_v43 }
   0xb   :  { %4178 = vmatprep.mubr.msk.f32.mxu0 %vm113_vm1, %v51_v11  ;;  %4239 = vmatmul.mubr.msk.bf16.vlgmr.msra.gmra.mrb[0].mxu1 %vm651_vm3, %v643_v30  ;;  %v4566_v48 = vld [vmem:[%s7327_s2 + $0x1c] sm:$0xff]   ;;  %v646_v50 = vpack.c.bf16 %v104_v45, %v103_v42  ;;  %v105_v51 = vld [vmem:[%s7329_s1 + $0xd0] sm:$0xff]  ;;  %v4567_v54 = vld [vmem:[%s7327_s2 + $0x24] sm:$0xff]   ;;  %v61_v57 = vcvt.s32.f32 %v29_v47 }
   0xc   :  { %4255 = vmatpush3.bf16.msra.mxu1 %v4563_v24  ;;  %4242 = vmatprep.mubr.msk.bf16.mxu1 %vm651_vm3, %v644_v34  ;;  %v106_v52 = vld [vmem:[%s7329_s1 + $0xd8] sm:$0xff]  ;;  %v31_v56 = vld [vmem:[%s7328_s0 + $0x80] sm:$0xff]  ;;  %v32_v58 = vld [vmem:[%s7328_s0 + $0x88] sm:$0xff] }
   0xd   :  { %4256 = vmatprep.subr.bf16.mxu1 %v4564_v31  ;;  %v30_v53 = vld [vmem:[%s7328_s0 + $0x78] sm:$0xff]  ;;  %v647_v59 = vpack.c.bf16 %v106_v52, %v105_v51  ;;  %v4568_v60 = vld [vmem:[%s7327_s2 + $0x2c] sm:$0xff]   ;;  %v63_v63 = vcvt.s32.f32 %v31_v56  ;;  %v64_v1 = vcvt.s32.f32 %v32_v58  ;;  %v35_v2 = vld [vmem:[%s7328_s0 + $0xa0] sm:$0xff] }
   0xe   :  { %4179 = vmatmul.mubr.msk.f32.gmra.mrb[4].mxu0 %vm113_vm1, %v52_v14  ;;  %v62_v61 = vcvt.s32.f32 %v30_v53  ;;  %v33_v62 = vld [vmem:[%s7328_s0 + $0x90] sm:$0xff]  ;;  %v34_v0 = vld [vmem:[%s7328_s0 + $0x98] sm:$0xff]  ;;  %v36_v4 = vld [vmem:[%s7328_s0 + $0xa8] sm:$0xff]  ;;  %v67_v7 = vcvt.s32.f32 %v35_v2  ;;  %v439_v2 = vlaneseq }
   0xf   :  { %4181 = vmatprep.mubr.msk.f32.mxu0 %vm113_vm1, %v53_v15  ;;  %v65_v3 = vcvt.s32.f32 %v33_v62  ;;  %v66_v5 = vcvt.s32.f32 %v34_v0  ;;  %v37_v6 = vld [vmem:[%s7328_s0 + $0xb0] sm:$0xff]  ;;  %v38_v8 = vld [vmem:[%s7328_s0 + $0xb8] sm:$0xff]  ;;  %v68_v9 = vcvt.s32.f32 %v36_v4  ;;  %v39_v10 = vld [vmem:[%s7328_s0 + $0xc0] sm:$0xff] }
  0x10   :  { %4257 = vmatpush3.bf16.msra.mxu1 %v4564_v31  ;;  %v69_v11 = vcvt.s32.f32 %v37_v6  ;;  %v70_v12 = vcvt.s32.f32 %v38_v8  ;;  %v71_v13 = vcvt.s32.f32 %v39_v10  ;;  %v40_v14 = vld [vmem:[%s7328_s0 + $0xc8] sm:$0xff]  ;;  %v41_v15 = vld [vmem:[%s7328_s0 + $0xd0] sm:$0xff]  ;;  %v42_v18 = vld [vmem:[%s7328_s0 + $0xd8] sm:$0xff] }
  0x11   :  { %4258 = vmatprep.subr.bf16.mxu1 %v4565_v40  ;;  %v72_v16 = vcvt.s32.f32 %v40_v14  ;;  %v73_v17 = vcvt.s32.f32 %v41_v15  ;;  %v43_v19 = vld [vmem:[%s7328_s0 + $0xe0] sm:$0xff]  ;;  %v74_v20 = vcvt.s32.f32 %v42_v18  ;;  %v44_v22 = vld [vmem:[%s7328_s0 + $0xe8] sm:$0xff]  ;;  %v45_v23 = vld [vmem:[%s7328_s0 + $0xf0] sm:$0xff] }
  0x12   :  { %4182 = vmatmul.mubr.msk.f32.gmra.mrb[6].mxu0 %vm113_vm1, %v54_v25  ;;  %v75_v21 = vcvt.s32.f32 %v43_v19  ;;  %v76_v24 = vcvt.s32.f32 %v44_v22  ;;  %v77_v25 = vcvt.s32.f32 %v45_v23  ;;  %v46_v26 = vld [vmem:[%s7328_s0 + $0xf8] sm:$0xff]  ;;  %v107_v28 = vld [vmem:[%s7329_s1 + $0xe0] sm:$0xff]  ;;  %v109_v31 = vld [vmem:[%s7329_s1 + $0xf0] sm:$0xff] }
  0x13   :  { %4184 = vmatprep.mubr.msk.f32.mxu0 %vm113_vm1, %v55_v29  ;;  %4243 = vmatmul.mubr.msk.bf16.gmra.mrb[4].mxu1 %vm651_vm3, %v645_v44  ;;  %v78_v27 = vcvt.s32.f32 %v46_v26  ;;  %v108_v29 = vld [vmem:[%s7329_s1 + $0xe8] sm:$0xff]  ;;  %v110_v32 = vld [vmem:[%s7329_s1 + $0xf8] sm:$0xff]  ;;  %v79_v35 = vld [vmem:[%s7329_s1] sm:$0xff] }
  0x14   :  { %4259 = vmatpush3.bf16.msra.mxu1 %v4565_v40  ;;  %4246 = vmatprep.mubr.msk.bf16.mxu1 %vm651_vm3, %v646_v50  ;;  %v648_v30 = vpack.c.bf16 %v108_v29, %v107_v28  ;;  %v4569_v33 = vld [vmem:[%s7327_s2 + $0x34] sm:$0xff]   ;;  %v649_v34 = vpack.c.bf16 %v110_v32, %v109_v31  ;;  %v4570_v37 = vld [vmem:[%s7327_s2 + $0x3c] sm:$0xff]   ;;  %v84_v43 = vld [vmem:[%s7329_s1 + $0x28] sm:$0xff] }
  0x15   :  { %4260 = vmatprep.subr.bf16.mxu1 %v4566_v48  ;;  %v81_v39 = vld [vmem:[%s7329_s1 + $0x10] sm:$0xff]  ;;  %v82_v40 = vld [vmem:[%s7329_s1 + $0x18] sm:$0xff]  ;;  %v83_v42 = vld [vmem:[%s7329_s1 + $0x20] sm:$0xff] }
  0x16   :  { %4185 = vmatmul.mubr.msk.f32.gmra.mrb[8].mxu0 %vm113_vm1, %v56_v36  ;;  %v80_v36 = vld [vmem:[%s7329_s1 + $0x8] sm:$0xff]  ;;  %v635_v41 = vpack.c.bf16 %v82_v40, %v81_v39  ;;  %v636_v44 = vpack.c.bf16 %v84_v43, %v83_v42  ;;  %v85_v45 = vld [vmem:[%s7329_s1 + $0x30] sm:$0xff]  ;;  %v90_v52 = vld [vmem:[%s7329_s1 + $0x58] sm:$0xff] }
  0x17   :  { %4187 = vmatprep.mubr.msk.f32.mxu0 %vm113_vm1, %v57_v38  ;;  %v634_v38 = vpack.c.bf16 %v80_v36, %v79_v35  ;;  %v89_v51 = vld [vmem:[%s7329_s1 + $0x50] sm:$0xff]  ;;  %v94_v58 = vld [vmem:[%s7329_s1 + $0x78] sm:$0xff] }
  0x18   :  { %4261 = vmatpush3.bf16.msra.mxu1 %v4566_v48  ;;  %v87_v48 = vld [vmem:[%s7329_s1 + $0x40] sm:$0xff]  ;;  %v639_v53 = vpack.c.bf16 %v90_v52, %v89_v51  ;;  %v4575_v0 = vld [vmem:[%s7327_s2 + $0x6c] sm:$0xff]  }
  0x19   :  { %4262 = vmatprep.subr.bf16.mxu1 %v4567_v54  ;;  %v4573_v62 = vld [vmem:[%s7327_s2 + $0x5c] sm:$0xff]  }
  0x1a   :  { %4188 = vmatmul.mubr.msk.f32.gmra.mrb[10].mxu0 %vm113_vm1, %v58_v46  ;;  %v86_v46 = vld [vmem:[%s7329_s1 + $0x38] sm:$0xff] }
  0x1b   :  { %4190 = vmatprep.mubr.msk.f32.mxu0 %vm113_vm1, %v59_v49  ;;  %4247 = vmatmul.mubr.msk.bf16.gmra.mrb[8].mxu1 %vm651_vm3, %v647_v59  ;;  %v637_v47 = vpack.c.bf16 %v86_v46, %v85_v45  ;;  %v88_v49 = vld [vmem:[%s7329_s1 + $0x48] sm:$0xff] }
  0x1c   :  { %4263 = vmatpush3.bf16.msra.mxu1 %v4567_v54  ;;  %4250 = vmatprep.mubr.msk.bf16.mxu1 %vm651_vm3, %v648_v30  ;;  %v638_v50 = vpack.c.bf16 %v88_v49, %v87_v48  ;;  %v91_v54 = vld [vmem:[%s7329_s1 + $0x60] sm:$0xff] }
  0x1d   :  { %4264 = vmatprep.subr.bf16.mxu1 %v4568_v60 }
  0x1e   :  { %4191 = vmatmul.mubr.msk.f32.gmra.mrb[12].mxu0 %vm113_vm1, %v60_v55  ;;  %v92_v55 = vld [vmem:[%s7329_s1 + $0x68] sm:$0xff] }
  0x1f   :  { %4193 = vmatprep.mubr.msk.f32.mxu0 %vm113_vm1, %v61_v57  ;;  %v640_v56 = vpack.c.bf16 %v92_v55, %v91_v54  ;;  %v93_v57 = vld [vmem:[%s7329_s1 + $0x70] sm:$0xff] }
  0x20   :  { %4265 = vmatpush3.bf16.msra.mxu1 %v4568_v60  ;;  %v641_v59 = vpack.c.bf16 %v94_v58, %v93_v57  ;;  %v4571_v60 = vld [vmem:[%s7327_s2 + $0x4c] sm:$0xff]  }
  0x21   :  { %4266 = vmatprep.subr.bf16.mxu1 %v4569_v33  ;;  %4302 = vmatprep.subr.bf16.mxu0 %v4571_v60 }
  0x22   :  { %4194 = vmatmul.mubr.msk.f32.gmra.mrb[14].mxu0 %vm113_vm1, %v62_v61  ;;  %v4572_v61 = vld [vmem:[%s7327_s2 + $0x54] sm:$0xff]  }
  0x23   :  { %4196 = vmatprep.mubr.msk.f32.mxu0 %vm113_vm1, %v63_v63  ;;  %4251 = vmatmul.mubr.msk.bf16.gmra.mrb[12].mxu1 %vm651_vm3, %v649_v34  ;;  %v4574_v63 = vld [vmem:[%s7327_s2 + $0x64] sm:$0xff]  }
  0x24   :  { %4267 = vmatpush3.bf16.msra.mxu1 %v4569_v33 }
  0x25   :  { %4268 = vmatprep.subr.bf16.mxu1 %v4570_v37 }
  0x26   :  { %4197 = vmatmul.mubr.msk.f32.gmra.mrb[16].mxu0 %vm113_vm1, %v64_v1  ;;  %v4576_v1 = vld [vmem:[%s7327_s2 + $0x74] sm:$0xff]  }
  0x27   :  { %4199 = vmatprep.mubr.msk.f32.mxu0 %vm113_vm1, %v65_v3  ;;  %v440_v3 = vand.u32 127, %v439_v2 }
  0x28   :  { %4269 = vmatpush3.bf16.msra.mxu1 %v4570_v37 }
  0x29   :  { %v5041_v4 = vcvt.s32.f32 %v440_v3 }
  0x2a   :  { %4200 = vmatmul.mubr.msk.f32.gmra.mrb[18].mxu0 %vm113_vm1, %v66_v5 }
  0x2b   :  { %4202 = vmatprep.mubr.msk.f32.mxu0 %vm113_vm1, %v67_v7 }
  0x2e   :  { %4203 = vmatmul.mubr.msk.f32.gmra.mrb[20].mxu0 %vm113_vm1, %v68_v9 }
  0x2f   :  { %4205 = vmatprep.mubr.msk.f32.mxu0 %vm113_vm1, %v69_v11 }
  0x32   :  { %4206 = vmatmul.mubr.msk.f32.gmra.mrb[22].mxu0 %vm113_vm1, %v70_v12 }
  0x33   :  { %4208 = vmatprep.mubr.msk.f32.mxu0 %vm113_vm1, %v71_v13 }
  0x36   :  { %4209 = vmatmul.mubr.msk.f32.gmra.mrb[24].mxu0 %vm113_vm1, %v72_v16 }
  0x37   :  { %4211 = vmatprep.mubr.msk.f32.mxu0 %vm113_vm1, %v73_v17  ;;  %v4731_v17 = vmov 1.0|1.0  }
  0x3a   :  { %4212 = vmatmul.mubr.msk.f32.gmra.mrb[26].mxu0 %vm113_vm1, %v74_v20 }
  0x3b   :  { %4214 = vmatprep.mubr.msk.f32.mxu0 %vm113_vm1, %v75_v21 }
  0x3e   :  { %4215 = vmatmul.mubr.msk.f32.gmra.mrb[28].mxu0 %vm113_vm1, %v76_v24 }
  0x3f   :  { %4217 = vmatprep.mubr.msk.f32.mxu0 %vm113_vm1, %v77_v25 }
  0x42   :  { %4218 = vmatmul.mubr.msk.f32.gmra.mrb[30].mxu0 %vm113_vm1, %v78_v27 }
  0x43   :  { %4222 = vmatprep.mubr.msk.bf16.mxu0 %vm651_vm3, %v634_v38 }
  0x46   :  { %4223 = vmatmul.mubr.msk.bf16.vlgmr.msra.gmra.mrb[32].mxu0 %vm651_vm3, %v635_v41 }
  0x47   :  { %4226 = vmatprep.mubr.msk.bf16.mxu0 %vm651_vm3, %v636_v44  ;;  %4303 = vmatpush3.bf16.msra.mxu0 %v4571_v60 }
  0x48   :  { %4304 = vmatprep.subr.bf16.mxu0 %v4572_v61 }
  0x4b   :  { %4305 = vmatpush3.bf16.msra.mxu0 %v4572_v61 }
  0x4c   :  { %4306 = vmatprep.subr.bf16.mxu0 %v4573_v62 }
  0x4e   :  { %4227 = vmatmul.mubr.msk.bf16.gmra.mrb[36].mxu0 %vm651_vm3, %v637_v47 }
  0x4f   :  { %4230 = vmatprep.mubr.msk.bf16.mxu0 %vm651_vm3, %v638_v50  ;;  %4307 = vmatpush3.bf16.msra.mxu0 %v4573_v62 }
  0x50   :  { %4308 = vmatprep.subr.bf16.mxu0 %v4574_v63 }
  0x53   :  { %4309 = vmatpush3.bf16.msra.mxu0 %v4574_v63 }
  0x54   :  { %4310 = vmatprep.subr.bf16.mxu0 %v4575_v0 }
  0x56   :  { %4231 = vmatmul.mubr.msk.bf16.gmra.mrb[40].mxu0 %vm651_vm3, %v639_v53 }
  0x57   :  { %4234 = vmatprep.mubr.msk.bf16.mxu0 %vm651_vm3, %v640_v56  ;;  %4311 = vmatpush3.bf16.msra.mxu0 %v4575_v0 }
  0x58   :  { %4312 = vmatprep.subr.bf16.mxu0 %v4576_v1 }
  0x5b   :  { %4313 = vmatpush3.bf16.msra.mxu0 %v4576_v1 }
  0x5e   :  { %4235 = vmatmul.mubr.msk.bf16.gmra.mrb[44].mxu0 %vm651_vm3, %v641_v59 }
  0xd9   :  { %v4174_v5 = vpop.f32.mrb[0].mxu0 }
  0xda   :  { %v443_v6 = vsub.f32 %v5041_v4, %v4174_v5  ;;  %v280_v7 = vpop.f32.mrb[1].mxu0 }
  0xdb   :  { %v442_v8 = vsub.f32 %v5041_v4, %v280_v7 }
  0xdc   :  { %v475_v9 = vand.u32 2147483647, %v443_v6 }
  0xdd   :  { %v474_v10 = vand.u32 2147483647, %v442_v8  ;;  %v4177_v11 = vpop.f32.mrb[2].mxu0 }
  0xde   :  { %vm507_vm4 = vcmp.lt.f32.partialorder %v475_v9, 0.5  ;;  %v445_v12 = vsub.f32 %v5041_v4, %v4177_v11  ;;  %v290_v13 = vpop.f32.mrb[3].mxu0 }
  0xdf   :  { %vm506_vm5 = vcmp.lt.f32.partialorder %v474_v10, 0.5  ;;  %v444_v14 = vsub.f32 %v5041_v4, %v290_v13 }
  0xe0   :  { %vm3936_vm6 = vmpackc.low %vm507_vm4, %vm506_vm5  ;;  %v477_v15 = vand.u32 2147483647, %v445_v12 }
  0xe1   :  { %v476_v16 = vand.u32 2147483647, %v444_v14  ;;  %4270 = vmatprep.mubr.msk.bf16.mxu1 %vm3936_vm6, %v4731_v17  ;;  %v4180_v18 = vpop.f32.mrb[4].mxu0 }
  0xe2   :  { %vm509_vm7 = vcmp.lt.f32.partialorder %v477_v15, 0.5  ;;  %v447_v19 = vsub.f32 %v5041_v4, %v4180_v18  ;;  %v300_v20 = vpop.f32.mrb[5].mxu0 }
  0xe3   :  { %vm508_vm8 = vcmp.lt.f32.partialorder %v476_v16, 0.5  ;;  %v446_v21 = vsub.f32 %v5041_v4, %v300_v20 }
  0xe4   :  { %vm3938_vm9 = vmpackc.low %vm509_vm7, %vm508_vm8  ;;  %v479_v22 = vand.u32 2147483647, %v447_v19 }
  0xe5   :  { %v478_v23 = vand.u32 2147483647, %v446_v21  ;;  %v4183_v24 = vpop.f32.mrb[6].mxu0  ;;  %4271 = vmatmul.mubr.msk.bf16.vlgmr.msra.gmra.mrb[16].mxu1 %vm3938_vm9, %v4731_v17 }
  0xe6   :  { %vm511_vm10 = vcmp.lt.f32.partialorder %v479_v22, 0.5  ;;  %v449_v25 = vsub.f32 %v5041_v4, %v4183_v24  ;;  %v310_v26 = vpop.f32.mrb[7].mxu0 }
  0xe7   :  { %vm510_vm11 = vcmp.lt.f32.partialorder %v478_v23, 0.5  ;;  %v448_v27 = vsub.f32 %v5041_v4, %v310_v26 }
  0xe8   :  { %vm3940_vm12 = vmpackc.low %vm511_vm10, %vm510_vm11  ;;  %v481_v28 = vand.u32 2147483647, %v449_v25 }
  0xe9   :  { %v480_v29 = vand.u32 2147483647, %v448_v27  ;;  %v4186_v30 = vpop.f32.mrb[8].mxu0  ;;  %4274 = vmatprep.mubr.msk.bf16.mxu1 %vm3940_vm12, %v4731_v17 }
  0xea   :  { %vm513_vm13 = vcmp.lt.f32.partialorder %v481_v28, 0.5  ;;  %v451_v31 = vsub.f32 %v5041_v4, %v4186_v30  ;;  %v320_v32 = vpop.f32.mrb[9].mxu0 }
  0xeb   :  { %vm512_vm14 = vcmp.lt.f32.partialorder %v480_v29, 0.5  ;;  %v450_v33 = vsub.f32 %v5041_v4, %v320_v32 }
  0xec   :  { %vm3942_vm15 = vmpackc.low %vm513_vm13, %vm512_vm14  ;;  %v483_v34 = vand.u32 2147483647, %v451_v31 }
  0xed   :  { %v482_v35 = vand.u32 2147483647, %v450_v33  ;;  %v4189_v36 = vpop.f32.mrb[10].mxu0  ;;  %4275 = vmatmul.mubr.msk.bf16.gmra.mrb[20].mxu1 %vm3942_vm15, %v4731_v17 }
  0xee   :  { %vm515_vm0 = vcmp.lt.f32.partialorder %v483_v34, 0.5  ;;  %v453_v37 = vsub.f32 %v5041_v4, %v4189_v36  ;;  %v330_v38 = vpop.f32.mrb[11].mxu0 }
  0xef   :  { %vm514_vm1 = vcmp.lt.f32.partialorder %v482_v35, 0.5  ;;  %v452_v39 = vsub.f32 %v5041_v4, %v330_v38 }
  0xf0   :  { %vm3944_vm2 = vmpackc.low %vm515_vm0, %vm514_vm1  ;;  %v485_v40 = vand.u32 2147483647, %v453_v37 }
  0xf1   :  { %v484_v41 = vand.u32 2147483647, %v452_v39  ;;  %v4192_v42 = vpop.f32.mrb[12].mxu0  ;;  %4278 = vmatprep.mubr.msk.bf16.mxu1 %vm3944_vm2, %v4731_v17 }
  0xf2   :  { %vm517_vm3 = vcmp.lt.f32.partialorder %v485_v40, 0.5  ;;  %v455_v43 = vsub.f32 %v5041_v4, %v4192_v42  ;;  %v340_v44 = vpop.f32.mrb[13].mxu0 }
  0xf3   :  { %vm516_vm4 = vcmp.lt.f32.partialorder %v484_v41, 0.5  ;;  %v454_v45 = vsub.f32 %v5041_v4, %v340_v44 }
  0xf4   :  { %vm3946_vm5 = vmpackc.low %vm517_vm3, %vm516_vm4  ;;  %v487_v46 = vand.u32 2147483647, %v455_v43 }
  0xf5   :  { %v486_v47 = vand.u32 2147483647, %v454_v45  ;;  %v4195_v48 = vpop.f32.mrb[14].mxu0  ;;  %4279 = vmatmul.mubr.msk.bf16.gmra.mrb[24].mxu1 %vm3946_vm5, %v4731_v17  ;;  %v4577_v45 = vld [vmem:[%s7327_s2 + $0x7c] sm:$0xff]  }
  0xf6   :  { %vm519_vm6 = vcmp.lt.f32.partialorder %v487_v46, 0.5  ;;  %v457_v49 = vsub.f32 %v5041_v4, %v4195_v48  ;;  %v350_v50 = vpop.f32.mrb[15].mxu0  ;;  %4314 = vmatprep.subr.bf16.mxu0 %v4577_v45 }
  0xf7   :  { %vm518_vm7 = vcmp.lt.f32.partialorder %v486_v47, 0.5  ;;  %v456_v51 = vsub.f32 %v5041_v4, %v350_v50  ;;  %4315 = vmatpush3.bf16.msra.mxu0 %v4577_v45 }
  0xf8   :  { %vm3948_vm8 = vmpackc.low %vm519_vm6, %vm518_vm7  ;;  %v489_v52 = vand.u32 2147483647, %v457_v49 }
  0xf9   :  { %v488_v53 = vand.u32 2147483647, %v456_v51  ;;  %4282 = vmatprep.mubr.msk.bf16.mxu1 %vm3948_vm8, %v4731_v17  ;;  %v4198_v54 = vpop.f32.mrb[16].mxu0 }
  0xfa   :  { %vm521_vm9 = vcmp.lt.f32.partialorder %v489_v52, 0.5  ;;  %v459_v55 = vsub.f32 %v5041_v4, %v4198_v54  ;;  %v360_v56 = vpop.f32.mrb[17].mxu0 }
  0xfb   :  { %vm520_vm10 = vcmp.lt.f32.partialorder %v488_v53, 0.5  ;;  %v458_v57 = vsub.f32 %v5041_v4, %v360_v56 }
  0xfc   :  { %vm3950_vm11 = vmpackc.low %vm521_vm9, %vm520_vm10  ;;  %v491_v58 = vand.u32 2147483647, %v459_v55 }
  0xfd   :  { %v490_v59 = vand.u32 2147483647, %v458_v57  ;;  %v4201_v60 = vpop.f32.mrb[18].mxu0  ;;  %4283 = vmatmul.mubr.msk.bf16.gmra.mrb[28].mxu1 %vm3950_vm11, %v4731_v17  ;;  %v5110_v57 = vshrl.u32 %v439_v2, 7 }
  0xfe   :  { %vm523_vm12 = vcmp.lt.f32.partialorder %v491_v58, 0.5  ;;  %v461_v61 = vsub.f32 %v5041_v4, %v4201_v60  ;;  %v370_v62 = vpop.f32.mrb[19].mxu0  ;;  %v1074_v58 = vld [vmem:[%s7327_s2 + $0x48] sm:$0x1] }
  0xff   :  { %vm522_vm13 = vcmp.lt.f32.partialorder %v490_v59, 0.5  ;;  %v460_v63 = vsub.f32 %v5041_v4, %v370_v62  ;;  %v5118_v59 = vld [vmem:[%s7327_s2 + $0xd4] sm:$0xff]   ;;  %v1075_v60 = vunpack.c.l.bf16 %v1074_v58 }
 0x100   :  { %vm3952_vm14 = vmpackc.low %vm523_vm12, %vm522_vm13  ;;  %v493_v0 = vand.u32 2147483647, %v461_v61  ;;  %v5121_v61 = vsub.s32 0, %v5110_v57  ;;  %v5124_v62 = vunpack.c.l.bf16 %v5118_v59 }
 0x101   :  { %v492_v1 = vand.u32 2147483647, %v460_v63  ;;  %v4204_v3 = vpop.f32.mrb[20].mxu0  ;;  %4286 = vmatprep.mubr.msk.bf16.mxu1 %vm3952_vm14, %v4731_v17 }
 0x102   :  { %vm525_vm15 = vcmp.lt.f32.partialorder %v493_v0, 0.5  ;;  %v463_v5 = vsub.f32 %v5041_v4, %v4204_v3  ;;  %v380_v6 = vpop.f32.mrb[21].mxu0  ;;  %7457 = vst [vmem:[#allocation2_spill] sm:$0xff] %v5121_v61  ;;  %7458 = vst [vmem:[#allocation3_spill] sm:$0xff] %v5124_v62  ;;  %v5127_v63 = vrot.slane %v1075_v60, %v5121_v61  ;;  %v5131_v3 = vrot.slane %v5124_v62, %v5121_v61 }
 0x103   :  { %vm524_vm0 = vcmp.lt.f32.partialorder %v492_v1, 0.5  ;;  %v462_v7 = vsub.f32 %v5041_v4, %v380_v6 }
 0x104   :  { %vm3954_vm1 = vmpackc.low %vm525_vm15, %vm524_vm0  ;;  %v495_v8 = vand.u32 2147483647, %v463_v5 }
 0x105   :  { %v494_v9 = vand.u32 2147483647, %v462_v7  ;;  %v4207_v10 = vpop.f32.mrb[22].mxu0  ;;  %4287 = vmatmul.mubr.msk.bf16.gmra.mrb[0].mxu1 %vm3954_vm1, %v4731_v17 }
 0x106   :  { %vm527_vm2 = vcmp.lt.f32.partialorder %v495_v8, 0.5  ;;  %v465_v11 = vsub.f32 %v5041_v4, %v4207_v10  ;;  %v390_v12 = vpop.f32.mrb[23].mxu0 }
 0x107   :  { %vm526_vm3 = vcmp.lt.f32.partialorder %v494_v9, 0.5  ;;  %v464_v13 = vsub.f32 %v5041_v4, %v390_v12 }
 0x108   :  { %vm3956_vm4 = vmpackc.low %vm527_vm2, %vm526_vm3  ;;  %v497_v14 = vand.u32 2147483647, %v465_v11 }
 0x109   :  { %v496_v15 = vand.u32 2147483647, %v464_v13  ;;  %v4210_v16 = vpop.f32.mrb[24].mxu0  ;;  %4290 = vmatprep.mubr.msk.bf16.mxu1 %vm3956_vm4, %v4731_v17  ;;  %vm3394_vm4 = vcmask 15360  }
 0x10a   :  { %vm529_vm5 = vcmp.lt.f32.partialorder %v497_v14, 0.5  ;;  %v467_v18 = vsub.f32 %v5041_v4, %v4210_v16  ;;  %v400_v19 = vpop.f32.mrb[25].mxu0 }
 0x10b   :  { %vm528_vm6 = vcmp.lt.f32.partialorder %v496_v15, 0.5  ;;  %v466_v20 = vsub.f32 %v5041_v4, %v400_v19 }
 0x10c   :  { %vm3958_vm7 = vmpackc.low %vm529_vm5, %vm528_vm6  ;;  %v499_v21 = vand.u32 2147483647, %v467_v18 }
 0x10d   :  { %v498_v22 = vand.u32 2147483647, %v466_v20  ;;  %v4213_v23 = vpop.f32.mrb[26].mxu0  ;;  %4291 = vmatmul.mubr.msk.bf16.gmra.mrb[4].mxu1 %vm3958_vm7, %v4731_v17 }
 0x10e   :  { %vm531_vm8 = vcmp.lt.f32.partialorder %v499_v21, 0.5  ;;  %v469_v24 = vsub.f32 %v5041_v4, %v4213_v23  ;;  %v410_v25 = vpop.f32.mrb[27].mxu0 }
 0x10f   :  { %vm530_vm9 = vcmp.lt.f32.partialorder %v498_v22, 0.5  ;;  %v468_v26 = vsub.f32 %v5041_v4, %v410_v25 }
 0x110   :  { %vm3960_vm10 = vmpackc.low %vm531_vm8, %vm530_vm9  ;;  %v501_v27 = vand.u32 2147483647, %v469_v24 }
 0x111   :  { %v500_v28 = vand.u32 2147483647, %v468_v26  ;;  %v4216_v29 = vpop.f32.mrb[28].mxu0  ;;  %4294 = vmatprep.mubr.msk.bf16.mxu1 %vm3960_vm10, %v4731_v17 }
 0x112   :  { %vm533_vm11 = vcmp.lt.f32.partialorder %v501_v27, 0.5  ;;  %v471_v30 = vsub.f32 %v5041_v4, %v4216_v29  ;;  %v420_v31 = vpop.f32.mrb[29].mxu0 }
 0x113   :  { %vm532_vm12 = vcmp.lt.f32.partialorder %v500_v28, 0.5  ;;  %v470_v32 = vsub.f32 %v5041_v4, %v420_v31 }
 0x114   :  { %vm3962_vm13 = vmpackc.low %vm533_vm11, %vm532_vm12  ;;  %v503_v33 = vand.u32 2147483647, %v471_v30 }
 0x115   :  { %v502_v34 = vand.u32 2147483647, %v470_v32  ;;  %v4219_v35 = vpop.f32.mrb[30].mxu0  ;;  %4295 = vmatmul.mubr.msk.bf16.gmra.mrb[8].mxu1 %vm3962_vm13, %v4731_v17 }
 0x116   :  { %vm535_vm14 = vcmp.lt.f32.partialorder %v503_v33, 0.5  ;;  %v473_v36 = vsub.f32 %v5041_v4, %v4219_v35  ;;  %v430_v37 = vpop.f32.mrb[31].mxu0 }
 0x117   :  { %vm534_vm15 = vcmp.lt.f32.partialorder %v502_v34, 0.5  ;;  %v472_v38 = vsub.f32 %v5041_v4, %v430_v37  ;;  %v4578_v4 = vld [vmem:[%s7327_s2 + $0x84] sm:$0xff]  }
 0x118   :  { %vm3964_vm0 = vmpackc.low %vm535_vm14, %vm534_vm15  ;;  %v505_v39 = vand.u32 2147483647, %v473_v36  ;;  %4316 = vmatprep.subr.bf16.mxu0 %v4578_v4 }
 0x119   :  { %v504_v40 = vand.u32 2147483647, %v472_v38  ;;  %4298 = vmatprep.mubr.msk.bf16.mxu1 %vm3964_vm0, %v4731_v17  ;;  %v4224_v41 = vpop.f32.mrb[32].mxu0  ;;  %4317 = vmatpush3.bf16.msra.mxu0 %v4578_v4 }
 0x11a   :  { %vm537_vm1 = vcmp.lt.f32.partialorder %v505_v39, 0.5  ;;  %v738_v42 = vpop.f32.mrb[33].mxu0 }
 0x11b   :  { %vm536_vm2 = vcmp.lt.f32.partialorder %v504_v40, 0.5  ;;  %v4225_v43 = vpop.f32.mrb[34].mxu0 }
 0x11c   :  { %vm3966_vm3 = vmpackc.low %vm537_vm1, %vm536_vm2  ;;  %v741_v44 = vpop.f32.mrb[35].mxu0 }
 0x11d   :  { %4299 = vmatmul.mubr.msk.bf16.gmra.mrb[12].mxu1 %vm3966_vm3, %v4731_v17 }
 0x121   :  { %v4228_v46 = vpop.f32.mrb[36].mxu0 }
 0x122   :  { %v754_v47 = vpop.f32.mrb[37].mxu0 }
 0x123   :  { %v4229_v48 = vpop.f32.mrb[38].mxu0 }
 0x124   :  { %v757_v17 = vpop.f32.mrb[39].mxu0 }
 0x129   :  { %v4232_v49 = vpop.f32.mrb[40].mxu0 }
 0x12a   :  { %v770_v50 = vpop.f32.mrb[41].mxu0 }
 0x12b   :  { %v5097_v51 = vpop.f32.mrb[42].mxu0 }
 0x12c   :  { %v5099_v52 = vpop.f32.mrb[43].mxu0 }
 0x131   :  { %v5101_v53 = vpop.f32.mrb[44].mxu0 }
 0x132   :  { %v5103_v54 = vpop.f32.mrb[45].mxu0 }
 0x133   :  { %v5105_v55 = vpop.f32.mrb[46].mxu0 }
 0x134   :  { %v5107_v56 = vpop.f32.mrb[47].mxu0 }
 0x1b8   :  { %v4272_v2 = vpop.f32.mrb[16].mxu1 }
 0x1b9   :  { %v956_v0 = vadd.f32 %v4272_v2, %v4224_v41  ;;  %v947_v1 = vpop.f32.mrb[17].mxu1 }
 0x1ba   :  { %v948_v5 = vadd.f32 %v947_v1, %v738_v42  ;;  %v4273_v6 = vpop.f32.mrb[18].mxu1 }
 0x1bb   :  { %v5134_v7 = vadd.f32 %v5127_v63, %v956_v0  ;;  %v959_v8 = vadd.f32 %v4273_v6, %v4225_v43  ;;  %v950_v9 = vpop.f32.mrb[19].mxu1 }
 0x1bc   :  { %v5137_v10 = vadd.f32 %v5127_v63, %v948_v5  ;;  %v951_v11 = vadd.f32 %v950_v9, %v741_v44 }
 0x1bd   :  { %7459 = vst [vmem:[#allocation4_spill] sm:$0xff] %v5134_v7  ;;  %v5140_v12 = vadd.f32 %v5127_v63, %v959_v8  ;;  %v1680_v13 = vmul.f32 %v5131_v3, %v5134_v7 }
 0x1be   :  { %7460 = vst [vmem:[#allocation5_spill] sm:$0xff] %v5137_v10  ;;  %v5145_v14 = vadd.f32 %v5127_v63, %v951_v11  ;;  %v1678_v15 = vmul.f32 %v5131_v3, %v5137_v10 }
 0x1bf   :  { %7461 = vst [vmem:[#allocation6_spill] sm:$0xff] %v5140_v12  ;;  %1714 = vadd.xlane.f32.xlu1 %v1680_v13  ;;  %v1681_v21 = vmul.f32 %v5131_v3, %v5140_v12  ;;  %v1113_v22 = vpack.c.bf16 %v5140_v12, %v5134_v7 }
 0x1c0   :  { %7462 = vst [vmem:[#allocation7_spill] sm:$0xff] %v5145_v14  ;;  %v4276_v16 = vpop.f32.mrb[20].mxu1  ;;  %1710 = vadd.xlane.f32.xlu0 %v1678_v15  ;;  %v1112_v18 = vpack.c.bf16 %v5145_v14, %v5137_v10  ;;  %v1679_v25 = vmul.f32 %v5131_v3, %v5145_v14 }
 0x1c1   :  { %v972_v19 = vadd.f32 %v4276_v16, %v4228_v46  ;;  %v963_v20 = vpop.f32.mrb[21].mxu1 }
 0x1c2   :  { %v964_v23 = vadd.f32 %v963_v20, %v754_v47  ;;  %v4277_v24 = vpop.f32.mrb[22].mxu1  ;;  %4318 = vmatprep.mubr.bf16.mxu0 %v1112_v18 }
 0x1c3   :  { %v975_v26 = vadd.f32 %v4277_v24, %v4229_v48  ;;  %v966_v27 = vpop.f32.mrb[23].mxu1  ;;  %1716 = vadd.xlane.f32.xlu1 %v1681_v21  ;;  %4319 = vmatmul.mubr.bf16.vlgmr.msra.gmra.mrb[48].mxu0 %v1113_v22  ;;  %v5161_v30 = vadd.f32 %v5127_v63, %v972_v19 }
 0x1c4   :  { %v5158_v28 = vadd.f32 %v5127_v63, %v964_v23  ;;  %v967_v29 = vadd.f32 %v966_v27, %v757_v17  ;;  %1712 = vadd.xlane.f32.xlu0 %v1679_v25 }
 0x1c5   :  { %v5164_v31 = vadd.f32 %v5127_v63, %v975_v26  ;;  %v1684_v42 = vmul.f32 %v5131_v3, %v5161_v30 }
 0x1c6   :  { %7463 = vst [vmem:[#allocation8_spill] sm:$0xff] %v5158_v28  ;;  %v5167_v32 = vadd.f32 %v5127_v63, %v967_v29  ;;  %v1682_v33 = vmul.f32 %v5131_v3, %v5158_v28 }
 0x1c7   :  { %v1115_v39 = vpack.c.bf16 %v5164_v31, %v5161_v30  ;;  %v1685_v46 = vmul.f32 %v5131_v3, %v5164_v31 }
 0x1c8   :  { %v4280_v34 = vpop.f32.mrb[24].mxu1  ;;  %1718 = vadd.xlane.f32.xlu0 %v1682_v33  ;;  %v1683_v35 = vmul.f32 %v5131_v3, %v5167_v32  ;;  %v1114_v36 = vpack.c.bf16 %v5167_v32, %v5158_v28 }
 0x1c9   :  { %v988_v37 = vadd.f32 %v4280_v34, %v4232_v49  ;;  %v979_v38 = vpop.f32.mrb[25].mxu1 }
 0x1ca   :  { %v980_v40 = vadd.f32 %v979_v38, %v770_v50  ;;  %v4281_v41 = vpop.f32.mrb[26].mxu1  ;;  %1720 = vadd.xlane.f32.xlu1 %v1683_v35  ;;  %4322 = vmatprep.mubr.bf16.mxu0 %v1114_v36 }
 0x1cb   :  { %v991_v43 = vadd.f32 %v4281_v41, %v5097_v51  ;;  %v982_v44 = vpop.f32.mrb[27].mxu1  ;;  %4323 = vmatmul.mubr.bf16.gmra.mrb[52].mxu0 %v1115_v39  ;;  %v5187_v47 = vadd.f32 %v5127_v63, %v988_v37 }
 0x1cc   :  { %v5181_v45 = vadd.f32 %v5127_v63, %v980_v40  ;;  %v983_v4 = vadd.f32 %v982_v44, %v5099_v52  ;;  %1722 = vadd.xlane.f32.xlu0 %v1684_v42 }
 0x1cd   :  { %v5190_v48 = vadd.f32 %v5127_v63, %v991_v43  ;;  %v1688_v5 = vmul.f32 %v5131_v3, %v5187_v47 }
 0x1ce   :  { %v5193_v17 = vadd.f32 %v5127_v63, %v983_v4  ;;  %1724 = vadd.xlane.f32.xlu1 %v1685_v46  ;;  %v1686_v49 = vmul.f32 %v5131_v3, %v5181_v45 }
 0x1cf   :  { %v1117_v2 = vpack.c.bf16 %v5190_v48, %v5187_v47  ;;  %v1689_v11 = vmul.f32 %v5131_v3, %v5190_v48 }
 0x1d0   :  { %v4284_v50 = vpop.f32.mrb[28].mxu1  ;;  %1726 = vadd.xlane.f32.xlu0 %v1686_v49  ;;  %v1687_v51 = vmul.f32 %v5131_v3, %v5193_v17  ;;  %v1116_v52 = vpack.c.bf16 %v5193_v17, %v5181_v45 }
 0x1d1   :  { %v1004_v58 = vadd.f32 %v4284_v50, %v5101_v53  ;;  %v995_v60 = vpop.f32.mrb[29].mxu1 }
 0x1d2   :  { %v996_v0 = vadd.f32 %v995_v60, %v5103_v54  ;;  %v4285_v1 = vpop.f32.mrb[30].mxu1  ;;  %1728 = vadd.xlane.f32.xlu1 %v1687_v51  ;;  %4326 = vmatprep.mubr.bf16.mxu0 %v1116_v52 }
 0x1d3   :  { %v1007_v6 = vadd.f32 %v4285_v1, %v5105_v55  ;;  %v998_v8 = vpop.f32.mrb[31].mxu1  ;;  %4327 = vmatmul.mubr.bf16.gmra.mrb[56].mxu0 %v1117_v2  ;;  %v5215_v54 = vadd.f32 %v5127_v63, %v1004_v58 }
 0x1d4   :  { %v5209_v9 = vadd.f32 %v5127_v63, %v996_v0  ;;  %v999_v53 = vadd.f32 %v998_v8, %v5107_v56  ;;  %1730 = vadd.xlane.f32.xlu0 %v1688_v5 }
 0x1d5   :  { %v5218_v13 = vadd.f32 %v5127_v63, %v1007_v6  ;;  %v1692_v23 = vmul.f32 %v5131_v3, %v5215_v54 }
 0x1d6   :  { %v5221_v15 = vadd.f32 %v5127_v63, %v999_v53  ;;  %1732 = vadd.xlane.f32.xlu1 %v1689_v11  ;;  %v1690_v55 = vmul.f32 %v5131_v3, %v5209_v9 }
 0x1d7   :  { %7464 = vst [vmem:[#allocation9_spill] sm:$0xff] %v5218_v13  ;;  %v1119_v20 = vpack.c.bf16 %v5218_v13, %v5215_v54  ;;  %v1693_v26 = vmul.f32 %v5131_v3, %v5218_v13 }
 0x1d8   :  { %7465 = vst [vmem:[#allocation10_spill] sm:$0xff] %v5221_v15  ;;  %v4288_v16 = vpop.f32.mrb[0].mxu1  ;;  %1734 = vadd.xlane.f32.xlu0 %v1690_v55  ;;  %v1691_v56 = vmul.f32 %v5131_v3, %v5221_v15  ;;  %v1118_v18 = vpack.c.bf16 %v5221_v15, %v5209_v9 }
 0x1d9   :  { %v1011_v19 = vpop.f32.mrb[1].mxu1  ;;  %v5245_v29 = vadd.f32 %v4288_v16, %v5127_v63 }
 0x1da   :  { %v5232_v21 = vadd.f32 %v5127_v63, %v1011_v19  ;;  %v4289_v22 = vpop.f32.mrb[2].mxu1  ;;  %1736 = vadd.xlane.f32.xlu1 %v1691_v56  ;;  %4330 = vmatprep.mubr.bf16.mxu0 %v1118_v18 }
 0x1db   :  { %v1014_v24 = vpop.f32.mrb[3].mxu1  ;;  %4331 = vmatmul.mubr.bf16.gmra.mrb[60].mxu0 %v1119_v20  ;;  %v5242_v27 = vadd.f32 %v4289_v22, %v5127_v63  ;;  %7469 = vst [vmem:[#allocation14_spill] sm:$0xff] %v5245_v29  ;;  %v1696_v41 = vmul.f32 %v5131_v3, %v5245_v29 }
 0x1dc   :  { %7466 = vst [vmem:[#allocation11_spill] sm:$0xff] %v5232_v21  ;;  %v5237_v25 = vadd.f32 %v5127_v63, %v1014_v24  ;;  %1738 = vadd.xlane.f32.xlu0 %v1692_v23  ;;  %v1694_v33 = vmul.f32 %v5131_v3, %v5232_v21 }
 0x1dd   :  { %7468 = vst [vmem:[#allocation13_spill] sm:$0xff] %v5242_v27  ;;  %v1121_v38 = vpack.c.bf16 %v5242_v27, %v5245_v29  ;;  %v1697_v44 = vmul.f32 %v5131_v3, %v5242_v27 }
 0x1de   :  { %7467 = vst [vmem:[#allocation12_spill] sm:$0xff] %v5237_v25  ;;  %1740 = vadd.xlane.f32.xlu1 %v1693_v26  ;;  %v1120_v34 = vpack.c.bf16 %v5237_v25, %v5232_v21  ;;  %v1695_v36 = vmul.f32 %v5131_v3, %v5237_v25 }
 0x1e0   :  { %v4292_v35 = vpop.f32.mrb[4].mxu1  ;;  %1742 = vadd.xlane.f32.xlu0 %v1694_v33  ;;  %4334 = vmatprep.mubr.bf16.mxu0 %v1120_v34 }
 0x1e1   :  { %v1027_v37 = vpop.f32.mrb[5].mxu1  ;;  %v5269_v46 = vadd.f32 %v4292_v35, %v5127_v63 }
 0x1e2   :  { %v5256_v39 = vadd.f32 %v5127_v63, %v1027_v37  ;;  %v4293_v40 = vpop.f32.mrb[6].mxu1  ;;  %1744 = vadd.xlane.f32.xlu1 %v1695_v36 }
 0x1e3   :  { %v1030_v42 = vpop.f32.mrb[7].mxu1  ;;  %4335 = vmatmul.mubr.bf16.gmra.mrb[64].mxu0 %v1121_v38  ;;  %v5266_v4 = vadd.f32 %v4293_v40, %v5127_v63  ;;  %7473 = vst [vmem:[#allocation18_spill] sm:$0xff] %v5269_v46  ;;  %v1700_v1 = vmul.f32 %v5131_v3, %v5269_v46 }
 0x1e4   :  { %7470 = vst [vmem:[#allocation15_spill] sm:$0xff] %v5256_v39  ;;  %v5261_v43 = vadd.f32 %v5127_v63, %v1030_v42  ;;  %1746 = vadd.xlane.f32.xlu0 %v1696_v41  ;;  %v1698_v49 = vmul.f32 %v5131_v3, %v5256_v39 }
 0x1e5   :  { %7472 = vst [vmem:[#allocation17_spill] sm:$0xff] %v5266_v4  ;;  %v1123_v60 = vpack.c.bf16 %v5266_v4, %v5269_v46  ;;  %v1701_v8 = vmul.f32 %v5131_v3, %v5266_v4 }
 0x1e6   :  { %7471 = vst [vmem:[#allocation16_spill] sm:$0xff] %v5261_v43  ;;  %1748 = vadd.xlane.f32.xlu1 %v1697_v44  ;;  %v1122_v50 = vpack.c.bf16 %v5261_v43, %v5256_v39  ;;  %v1699_v52 = vmul.f32 %v5131_v3, %v5261_v43  ;;  %v4579_v44 = vld [vmem:[%s7327_s2 + $0x90] sm:$0xff]  }
 0x1e7   :  { %4350 = vmatprep.subr.bf16.mxu0 %v4579_v44 }
 0x1e8   :  { %v4296_v51 = vpop.f32.mrb[8].mxu1  ;;  %1750 = vadd.xlane.f32.xlu0 %v1698_v49  ;;  %4338 = vmatprep.mubr.bf16.mxu0 %v1122_v50  ;;  %v4580_v49 = vld [vmem:[%s7327_s2 + $0x98] sm:$0xff]   ;;  %v4581_v50 = vld [vmem:[%s7327_s2 + $0xa0] sm:$0xff]  }
 0x1e9   :  { %v1043_v58 = vpop.f32.mrb[9].mxu1  ;;  %v5293_v11 = vadd.f32 %v4296_v51, %v5127_v63  ;;  %4351 = vmatpush3.bf16.msra.mxu0 %v4579_v44  ;;  %v4583_v51 = vld [vmem:[%s7327_s2 + $0xb0] sm:$0xff]  }
 0x1ea   :  { %v5280_v2 = vadd.f32 %v5127_v63, %v1043_v58  ;;  %v4297_v0 = vpop.f32.mrb[10].mxu1  ;;  %1752 = vadd.xlane.f32.xlu1 %v1699_v52  ;;  %4352 = vmatprep.subr.bf16.mxu0 %v4580_v49  ;;  %v4584_v52 = vld [vmem:[%s7327_s2 + $0xb8] sm:$0xff]   ;;  %v4585_v58 = vld [vmem:[%s7327_s2 + $0xc0] sm:$0xff]  }
 0x1eb   :  { %v1046_v5 = vpop.f32.mrb[11].mxu1  ;;  %4339 = vmatmul.mubr.bf16.gmra.mrb[68].mxu0 %v1123_v60  ;;  %v5290_v53 = vadd.f32 %v4297_v0, %v5127_v63  ;;  %7477 = vst [vmem:[#allocation22_spill] sm:$0xff] %v5293_v11  ;;  %v1704_v24 = vmul.f32 %v5131_v3, %v5293_v11  ;;  %v4586_v60 = vld [vmem:[%s7327_s2 + $0xc8] sm:$0xff]   ;;  %v5356_v0 = vunpack.c.h.bf16 %v5118_v59 }
 0x1ec   :  { %7474 = vst [vmem:[#allocation19_spill] sm:$0xff] %v5280_v2  ;;  %v5285_v6 = vadd.f32 %v5127_v63, %v1046_v5  ;;  %1754 = vadd.xlane.f32.xlu0 %v1700_v1  ;;  %v1702_v55 = vmul.f32 %v5131_v3, %v5280_v2 }
 0x1ed   :  { %7476 = vst [vmem:[#allocation21_spill] sm:$0xff] %v5290_v53  ;;  %v1125_v20 = vpack.c.bf16 %v5290_v53, %v5293_v11  ;;  %v1705_v34 = vmul.f32 %v5131_v3, %v5290_v53  ;;  %4353 = vmatpush3.bf16.msra.mxu0 %v4580_v49  ;;  %7482 = vst [vmem:[#allocation27_spill] sm:$0xff] %v5356_v0  ;;  %v5360_v1 = vrot.slane %v5356_v0, %v5121_v61 }
 0x1ee   :  { %7475 = vst [vmem:[#allocation20_spill] sm:$0xff] %v5285_v6  ;;  %1756 = vadd.xlane.f32.xlu1 %v1701_v8  ;;  %v1124_v16 = vpack.c.bf16 %v5285_v6, %v5280_v2  ;;  %v1703_v18 = vmul.f32 %v5131_v3, %v5285_v6  ;;  %4354 = vmatprep.subr.bf16.mxu0 %v4581_v50  ;;  %v7331_v8 = vsub.s32 1, %v5110_v57 }
 0x1f0   :  { %1758 = vadd.xlane.f32.xlu0 %v1702_v55  ;;  %v4300_v56 = vpop.f32.mrb[12].mxu1  ;;  %4342 = vmatprep.mubr.bf16.mxu0 %v1124_v16  ;;  %v5370_v59 = vrot.slane %v5124_v62, %v7331_v8 }
 0x1f1   :  { %v1059_v19 = vpop.f32.mrb[13].mxu1  ;;  %v5317_v36 = vadd.f32 %v4300_v56, %v5127_v63  ;;  %4355 = vmatpush3.bf16.msra.mxu0 %v4581_v50 }
 0x1f2   :  { %v5304_v22 = vadd.f32 %v5127_v63, %v1059_v19  ;;  %1760 = vadd.xlane.f32.xlu1 %v1703_v18  ;;  %v4301_v23 = vpop.f32.mrb[14].mxu1 }
 0x1f3   :  { %v1062_v26 = vpop.f32.mrb[15].mxu1  ;;  %4343 = vmatmul.mubr.bf16.gmra.mrb[72].mxu0 %v1125_v20  ;;  %v5314_v35 = vadd.f32 %v4301_v23, %v5127_v63  ;;  %7481 = vst [vmem:[#allocation26_spill] sm:$0xff] %v5317_v36 }
 0x1f4   :  { %7478 = vst [vmem:[#allocation23_spill] sm:$0xff] %v5304_v22  ;;  %v5309_v33 = vadd.f32 %v5127_v63, %v1062_v26  ;;  %1762 = vadd.xlane.f32.xlu0 %v1704_v24  ;;  %v1706_v37 = vmul.f32 %v5131_v3, %v5304_v22  ;;  %v1708_v63 = vmul.f32 %v5131_v3, %v5317_v36 }
 0x1f5   :  { %7480 = vst [vmem:[#allocation25_spill] sm:$0xff] %v5314_v35  ;;  %v1127_v41 = vpack.c.bf16 %v5314_v35, %v5317_v36  ;;  %v1709_v42 = vmul.f32 %v5131_v3, %v5314_v35 }
 0x1f6   :  { %7479 = vst [vmem:[#allocation24_spill] sm:$0xff] %v5309_v33  ;;  %1764 = vadd.xlane.f32.xlu1 %v1705_v34  ;;  %v1126_v38 = vpack.c.bf16 %v5309_v33, %v5304_v22  ;;  %v1707_v40 = vmul.f32 %v5131_v3, %v5309_v33  ;;  %v4582_v3 = vld [vmem:[%s7327_s2 + $0xa8] sm:$0xff]  }
 0x1f7   :  { %4356 = vmatprep.subr.bf16.mxu0 %v4582_v3 }
 0x1f8   :  { %1766 = vadd.xlane.f32.xlu0 %v1706_v37  ;;  %4346 = vmatprep.mubr.bf16.mxu0 %v1126_v38 }
 0x1f9   :  { %4357 = vmatpush3.bf16.msra.mxu0 %v4582_v3 }
 0x1fa   :  { %1768 = vadd.xlane.f32.xlu1 %v1707_v40  ;;  %4358 = vmatprep.subr.bf16.mxu0 %v4583_v51 }
 0x1fb   :  { %4347 = vmatmul.mubr.bf16.gmra.mrb[76].mxu0 %v1127_v41 }
 0x1fc   :  { %1770 = vadd.xlane.f32.xlu0 %v1708_v63 }
 0x1fd   :  { %4359 = vmatpush3.bf16.msra.mxu0 %v4583_v51 }
 0x1fe   :  { %1772 = vadd.xlane.f32.xlu1 %v1709_v42  ;;  %4360 = vmatprep.subr.bf16.mxu0 %v4584_v52 }
 0x201   :  { %4361 = vmatpush3.bf16.msra.mxu0 %v4584_v52 }
 0x202   :  { %4362 = vmatprep.subr.bf16.mxu0 %v4585_v58 }
 0x205   :  { %4363 = vmatpush3.bf16.msra.mxu0 %v4585_v58 }
 0x206   :  { %4364 = vmatprep.subr.bf16.mxu0 %v4586_v60 }
 0x209   :  { %4365 = vmatpush3.bf16.msra.mxu0 %v4586_v60 }
 0x24c   :  { %v1715_v5 = vpop.xlane.xlu1 %1714 }
 0x24d   :  { %v1776_v55 = vmul.f32 %v1715_v5, %v5134_v7  ;;  %v1711_v16 = vpop.xlane.xlu0 %1710 }
 0x24e   :  { %v1774_v56 = vmul.f32 %v1711_v16, %v5137_v10 }
 0x24f   :  { %v1812_v18 = vadd.f32 %v5360_v1, %v1776_v55 }
 0x250   :  { %v1810_v19 = vadd.f32 %v5360_v1, %v1774_v56  ;;  %v1717_v20 = vpop.xlane.xlu1 %1716 }
 0x251   :  { %v1777_v23 = vmul.f32 %v1717_v20, %v5140_v12  ;;  %v1713_v24 = vpop.xlane.xlu0 %1712  ;;  %v5382_v41 = vadd.f32 %v1812_v18, %v5134_v7 }
 0x252   :  { %v1775_v26 = vmul.f32 %v1713_v24, %v5145_v14  ;;  %v5375_v34 = vadd.f32 %v1810_v19, %v5137_v10 }
 0x253   :  { %v1813_v37 = vadd.f32 %v5360_v1, %v1777_v23  ;;  %v1880_v52 = vmul.f32 %v5370_v59, %v5382_v41 }
 0x254   :  { %v1811_v38 = vadd.f32 %v5360_v1, %v1775_v26  ;;  %v1878_v40 = vmul.f32 %v5370_v59, %v5375_v34 }
 0x255   :  { %v1719_v63 = vpop.xlane.xlu0 %1718  ;;  %v5389_v50 = vadd.f32 %v1813_v37, %v5140_v12 }
 0x256   :  { %v1778_v42 = vmul.f32 %v1719_v63, %v5158_v28  ;;  %1910 = vadd.xlane.f32.xlu0 %v1878_v40  ;;  %v5386_v44 = vadd.f32 %v1811_v38, %v5145_v14 }
 0x257   :  { %v1721_v49 = vpop.xlane.xlu1 %1720  ;;  %v1881_v18 = vmul.f32 %v5370_v59, %v5389_v50 }
 0x258   :  { %v1814_v3 = vadd.f32 %v5360_v1, %v1778_v42  ;;  %v1779_v51 = vmul.f32 %v1721_v49, %v5167_v32  ;;  %v1879_v58 = vmul.f32 %v5370_v59, %v5386_v44 }
 0x259   :  { %v1723_v60 = vpop.xlane.xlu0 %1722 }
 0x25a   :  { %v1815_v5 = vadd.f32 %v5360_v1, %v1779_v51  ;;  %v1780_v55 = vmul.f32 %v1723_v60, %v5161_v30  ;;  %1914 = vadd.xlane.f32.xlu0 %v1880_v52  ;;  %1912 = vadd.xlane.f32.xlu1 %v1879_v58  ;;  %v5400_v16 = vadd.f32 %v1814_v3, %v5158_v28 }
 0x25b   :  { %v1725_v56 = vpop.xlane.xlu1 %1724 }
 0x25c   :  { %v1816_v19 = vadd.f32 %v5360_v1, %v1780_v55  ;;  %v1781_v20 = vmul.f32 %v1725_v56, %v5164_v31  ;;  %v1882_v23 = vmul.f32 %v5370_v59, %v5400_v16  ;;  %v5409_v24 = vadd.f32 %v1815_v5, %v5167_v32 }
 0x25d   :  { %v1727_v26 = vpop.xlane.xlu0 %1726 }
 0x25e   :  { %v1817_v37 = vadd.f32 %v5360_v1, %v1781_v20  ;;  %v1782_v38 = vmul.f32 %v1727_v26, %v5181_v45  ;;  %1918 = vadd.xlane.f32.xlu0 %v1882_v23  ;;  %1916 = vadd.xlane.f32.xlu1 %v1881_v18  ;;  %v5414_v40 = vadd.f32 %v1816_v19, %v5161_v30 }
 0x25f   :  { %v1729_v63 = vpop.xlane.xlu1 %1728  ;;  %v1883_v42 = vmul.f32 %v5370_v59, %v5409_v24 }
 0x260   :  { %v1818_v49 = vadd.f32 %v5360_v1, %v1782_v38  ;;  %v1783_v3 = vmul.f32 %v1729_v63, %v5193_v17  ;;  %v1884_v51 = vmul.f32 %v5370_v59, %v5414_v40  ;;  %v5423_v52 = vadd.f32 %v1817_v37, %v5164_v31 }
 0x261   :  { %v1731_v58 = vpop.xlane.xlu0 %1730 }
 0x262   :  { %v1819_v60 = vadd.f32 %v5360_v1, %v1783_v3  ;;  %v1784_v5 = vmul.f32 %v1731_v58, %v5187_v47  ;;  %1922 = vadd.xlane.f32.xlu0 %v1884_v51  ;;  %1920 = vadd.xlane.f32.xlu1 %v1883_v42  ;;  %v5428_v55 = vadd.f32 %v1818_v49, %v5181_v45 }
 0x263   :  { %v1733_v56 = vpop.xlane.xlu1 %1732  ;;  %v1885_v18 = vmul.f32 %v5370_v59, %v5423_v52 }
 0x264   :  { %v1820_v19 = vadd.f32 %v5360_v1, %v1784_v5  ;;  %v1785_v20 = vmul.f32 %v1733_v56, %v5190_v48  ;;  %v1886_v23 = vmul.f32 %v5370_v59, %v5428_v55  ;;  %v5437_v26 = vadd.f32 %v1819_v60, %v5193_v17 }
 0x265   :  { %v1735_v37 = vpop.xlane.xlu0 %1734 }
 0x266   :  { %v1821_v38 = vadd.f32 %v5360_v1, %v1785_v20  ;;  %v1786_v63 = vmul.f32 %v1735_v37, %v5209_v9  ;;  %1926 = vadd.xlane.f32.xlu0 %v1886_v23  ;;  %1924 = vadd.xlane.f32.xlu1 %v1885_v18  ;;  %v5442_v42 = vadd.f32 %v1820_v19, %v5187_v47 }
 0x267   :  { %v1737_v49 = vpop.xlane.xlu1 %1736  ;;  %v1887_v3 = vmul.f32 %v5370_v59, %v5437_v26 }
 0x268   :  { %v1822_v51 = vadd.f32 %v5360_v1, %v1786_v63  ;;  %v1787_v58 = vmul.f32 %v1737_v49, %v5221_v15  ;;  %v1888_v60 = vmul.f32 %v5370_v59, %v5442_v42  ;;  %v5451_v5 = vadd.f32 %v1821_v38, %v5190_v48 }
 0x269   :  { %v1739_v56 = vpop.xlane.xlu0 %1738 }
 0x26a   :  { %7483 = vst [vmem:[#allocation28_spill] sm:$0xff] %v5451_v5  ;;  %v1823_v18 = vadd.f32 %v5360_v1, %v1787_v58  ;;  %v1788_v19 = vmul.f32 %v1739_v56, %v5215_v54  ;;  %1930 = vadd.xlane.f32.xlu0 %v1888_v60  ;;  %1928 = vadd.xlane.f32.xlu1 %v1887_v3 }
 0x26b   :  { %v5456_v20 = vadd.f32 %v1822_v51, %v5209_v9  ;;  %v1741_v23 = vpop.xlane.xlu1 %1740  ;;  %v1889_v37 = vmul.f32 %v5370_v59, %v5451_v5 }
 0x26c   :  { %v1824_v63 = vadd.f32 %v5360_v1, %v1788_v19  ;;  %v1789_v49 = vmul.f32 %v1741_v23, %v5218_v13  ;;  %v5465_v58 = vadd.f32 %v1823_v18, %v5221_v15 }
 0x26d   :  { %v1890_v38 = vmul.f32 %v5370_v59, %v5456_v20  ;;  %v1743_v56 = vpop.xlane.xlu0 %1742 }
 0x26e   :  { %7484 = vst [vmem:[#allocation29_spill] sm:$0xff] %v5465_v58  ;;  %v1825_v3 = vadd.f32 %v5360_v1, %v1789_v49  ;;  %v1790_v51 = vmul.f32 %v1743_v56, %v5232_v21  ;;  %1932 = vadd.xlane.f32.xlu1 %v1889_v37  ;;  %v5470_v60 = vadd.f32 %v1824_v63, %v5215_v54 }
 0x26f   :  { %1934 = vadd.xlane.f32.xlu0 %v1890_v38  ;;  %v1745_v8 = vpop.xlane.xlu1 %1744  ;;  %v1891_v19 = vmul.f32 %v5370_v59, %v5465_v58 }
 0x270   :  { %7485 = vst [vmem:[#allocation30_spill] sm:$0xff] %v5470_v60  ;;  %v1826_v23 = vadd.f32 %v5360_v1, %v1790_v51  ;;  %v1791_v5 = vmul.f32 %v1745_v8, %v5237_v25  ;;  %v1892_v18 = vmul.f32 %v5370_v59, %v5470_v60  ;;  %v5479_v49 = vadd.f32 %v1825_v3, %v5218_v13 }
 0x271   :  { %v1747_v56 = vpop.xlane.xlu0 %1746 }
 0x272   :  { %7486 = vst [vmem:[#allocation31_spill] sm:$0xff] %v5479_v49  ;;  %v1827_v37 = vadd.f32 %v5360_v1, %v1791_v5  ;;  %v1792_v63 = vmul.f32 %v1747_v56, %v5245_v29  ;;  %1936 = vadd.xlane.f32.xlu1 %v1891_v19  ;;  %v5484_v38 = vadd.f32 %v1826_v23, %v5232_v21 }
 0x273   :  { %1938 = vadd.xlane.f32.xlu0 %v1892_v18  ;;  %v1749_v58 = vpop.xlane.xlu1 %1748  ;;  %v1893_v8 = vmul.f32 %v5370_v59, %v5479_v49 }
 0x274   :  { %7487 = vst [vmem:[#allocation32_spill] sm:$0xff] %v5484_v38  ;;  %v1828_v51 = vadd.f32 %v5360_v1, %v1792_v63  ;;  %v1793_v60 = vmul.f32 %v1749_v58, %v5242_v27  ;;  %v1894_v3 = vmul.f32 %v5370_v59, %v5484_v38  ;;  %v5493_v5 = vadd.f32 %v1827_v37, %v5237_v25 }
 0x275   :  { %v1751_v56 = vpop.xlane.xlu0 %1750 }
 0x276   :  { %7488 = vst [vmem:[#allocation33_spill] sm:$0xff] %v5493_v5  ;;  %v1829_v19 = vadd.f32 %v5360_v1, %v1793_v60  ;;  %v1794_v23 = vmul.f32 %v1751_v56, %v5256_v39  ;;  %1940 = vadd.xlane.f32.xlu1 %v1893_v8  ;;  %v5498_v18 = vadd.f32 %v1828_v51, %v5245_v29 }
 0x277   :  { %1942 = vadd.xlane.f32.xlu0 %v1894_v3  ;;  %v1753_v49 = vpop.xlane.xlu1 %1752  ;;  %v1895_v58 = vmul.f32 %v5370_v59, %v5493_v5 }
 0x278   :  { %7489 = vst [vmem:[#allocation34_spill] sm:$0xff] %v5498_v18  ;;  %v1830_v63 = vadd.f32 %v5360_v1, %v1794_v23  ;;  %v1795_v38 = vmul.f32 %v1753_v49, %v5261_v43  ;;  %v1896_v37 = vmul.f32 %v5370_v59, %v5498_v18  ;;  %v5507_v60 = vadd.f32 %v1829_v19, %v5242_v27 }
 0x279   :  { %v1755_v56 = vpop.xlane.xlu0 %1754 }
 0x27a   :  { %7490 = vst [vmem:[#allocation35_spill] sm:$0xff] %v5507_v60  ;;  %v1831_v8 = vadd.f32 %v5360_v1, %v1795_v38  ;;  %v1796_v51 = vmul.f32 %v1755_v56, %v5269_v46  ;;  %1944 = vadd.xlane.f32.xlu1 %v1895_v58  ;;  %v5512_v3 = vadd.f32 %v1830_v63, %v5256_v39 }
 0x27b   :  { %1946 = vadd.xlane.f32.xlu0 %v1896_v37  ;;  %v1757_v5 = vpop.xlane.xlu1 %1756  ;;  %v1897_v49 = vmul.f32 %v5370_v59, %v5507_v60 }
 0x27c   :  { %7491 = vst [vmem:[#allocation36_spill] sm:$0xff] %v5512_v3  ;;  %v1832_v23 = vadd.f32 %v5360_v1, %v1796_v51  ;;  %v1797_v18 = vmul.f32 %v1757_v5, %v5266_v4  ;;  %v1898_v19 = vmul.f32 %v5370_v59, %v5512_v3  ;;  %v5521_v38 = vadd.f32 %v1831_v8, %v5261_v43 }
 0x27d   :  { %v1759_v56 = vpop.xlane.xlu0 %1758 }
 0x27e   :  { %7492 = vst [vmem:[#allocation37_spill] sm:$0xff] %v5521_v38  ;;  %v1833_v58 = vadd.f32 %v5360_v1, %v1797_v18  ;;  %v1798_v63 = vmul.f32 %v1759_v56, %v5280_v2  ;;  %1948 = vadd.xlane.f32.xlu1 %v1897_v49  ;;  %v5526_v37 = vadd.f32 %v1832_v23, %v5269_v46 }
 0x27f   :  { %1950 = vadd.xlane.f32.xlu0 %v1898_v19  ;;  %v1761_v60 = vpop.xlane.xlu1 %1760  ;;  %v1899_v5 = vmul.f32 %v5370_v59, %v5521_v38 }
 0x280   :  { %7493 = vst [vmem:[#allocation38_spill] sm:$0xff] %v5526_v37  ;;  %v1834_v51 = vadd.f32 %v5360_v1, %v1798_v63  ;;  %v1799_v3 = vmul.f32 %v1761_v60, %v5285_v6  ;;  %v1900_v8 = vmul.f32 %v5370_v59, %v5526_v37  ;;  %v5535_v18 = vadd.f32 %v1833_v58, %v5266_v4 }
 0x281   :  { %v1763_v56 = vpop.xlane.xlu0 %1762 }
 0x282   :  { %7494 = vst [vmem:[#allocation39_spill] sm:$0xff] %v5535_v18  ;;  %v1835_v49 = vadd.f32 %v5360_v1, %v1799_v3  ;;  %v1800_v23 = vmul.f32 %v1763_v56, %v5293_v11  ;;  %1952 = vadd.xlane.f32.xlu1 %v1899_v5  ;;  %v5540_v19 = vadd.f32 %v1834_v51, %v5280_v2 }
 0x283   :  { %1954 = vadd.xlane.f32.xlu0 %v1900_v8  ;;  %v1765_v38 = vpop.xlane.xlu1 %1764  ;;  %v1901_v60 = vmul.f32 %v5370_v59, %v5535_v18 }
 0x284   :  { %7495 = vst [vmem:[#allocation40_spill] sm:$0xff] %v5540_v19  ;;  %v1836_v63 = vadd.f32 %v5360_v1, %v1800_v23  ;;  %v1801_v37 = vmul.f32 %v1765_v38, %v5290_v53  ;;  %v1902_v58 = vmul.f32 %v5370_v59, %v5540_v19  ;;  %v5549_v3 = vadd.f32 %v1835_v49, %v5285_v6 }
 0x285   :  { %v1767_v56 = vpop.xlane.xlu0 %1766 }
 0x286   :  { %7496 = vst [vmem:[#allocation41_spill] sm:$0xff] %v5549_v3  ;;  %v1837_v5 = vadd.f32 %v5360_v1, %v1801_v37  ;;  %v1802_v51 = vmul.f32 %v1767_v56, %v5304_v22  ;;  %1956 = vadd.xlane.f32.xlu1 %v1901_v60  ;;  %v5554_v8 = vadd.f32 %v1836_v63, %v5293_v11 }
 0x287   :  { %1958 = vadd.xlane.f32.xlu0 %v1902_v58  ;;  %v1769_v18 = vpop.xlane.xlu1 %1768  ;;  %v1903_v38 = vmul.f32 %v5370_v59, %v5549_v3 }
 0x288   :  { %7497 = vst [vmem:[#allocation42_spill] sm:$0xff] %v5554_v8  ;;  %v1838_v23 = vadd.f32 %v5360_v1, %v1802_v51  ;;  %v1803_v19 = vmul.f32 %v1769_v18, %v5309_v33  ;;  %v1904_v49 = vmul.f32 %v5370_v59, %v5554_v8  ;;  %v5563_v37 = vadd.f32 %v1837_v5, %v5290_v53 }
 0x289   :  { %v1771_v56 = vpop.xlane.xlu0 %1770 }
 0x28a   :  { %7498 = vst [vmem:[#allocation43_spill] sm:$0xff] %v5563_v37  ;;  %v1839_v60 = vadd.f32 %v5360_v1, %v1803_v19  ;;  %v1804_v63 = vmul.f32 %v1771_v56, %v5317_v36  ;;  %1960 = vadd.xlane.f32.xlu1 %v1903_v38  ;;  %v5568_v58 = vadd.f32 %v1838_v23, %v5304_v22  ;;  %v1144_v38 = vld [vmem:[%s7327_s2 + $0x8c] sm:$0x1] }
 0x28b   :  { %1962 = vadd.xlane.f32.xlu0 %v1904_v49  ;;  %v1773_v3 = vpop.xlane.xlu1 %1772  ;;  %v1905_v18 = vmul.f32 %v5370_v59, %v5563_v37  ;;  %v1145_v56 = vunpack.c.l.bf16 %v1144_v38 }
 0x28c   :  { %7499 = vst [vmem:[#allocation44_spill] sm:$0xff] %v5568_v58  ;;  %v1840_v51 = vadd.f32 %v5360_v1, %v1804_v63  ;;  %v1805_v8 = vmul.f32 %v1773_v3, %v5314_v35  ;;  %v1906_v5 = vmul.f32 %v5370_v59, %v5568_v58  ;;  %v5577_v19 = vadd.f32 %v1839_v60, %v5309_v33 }
 0x28d   :  { %v5594_v37 = vrot.slane %v1145_v56, %v5121_v61 }
 0x28e   :  { %7500 = vst [vmem:[#allocation45_spill] sm:$0xff] %v5577_v19  ;;  %v1841_v23 = vadd.f32 %v5360_v1, %v1805_v8  ;;  %1964 = vadd.xlane.f32.xlu1 %v1905_v18  ;;  %v5584_v49 = vadd.f32 %v1840_v51, %v5317_v36  ;;  %v1907_v63 = vmul.f32 %v5370_v59, %v5577_v19 }
 0x28f   :  { %1966 = vadd.xlane.f32.xlu0 %v1906_v5 }
 0x290   :  { %7501 = vst [vmem:[#allocation46_spill] sm:$0xff] %v5584_v49  ;;  %v1908_v3 = vmul.f32 %v5370_v59, %v5584_v49  ;;  %v5591_v60 = vadd.f32 %v1841_v23, %v5314_v35 }
 0x292   :  { %7502 = vst [vmem:[#allocation47_spill] sm:$0xff] %v5591_v60  ;;  %1968 = vadd.xlane.f32.xlu1 %v1907_v63  ;;  %v1909_v1 = vmul.f32 %v5370_v59, %v5591_v60 }
 0x293   :  { %1970 = vadd.xlane.f32.xlu0 %v1908_v3 }
 0x296   :  { %v4320_v8 = vpop.f32.mrb[48].mxu0  ;;  %1972 = vadd.xlane.f32.xlu1 %v1909_v1 }
 0x297   :  { %v1241_v18 = vadd.f32 %v4320_v8, %v5594_v37  ;;  %v1232_v51 = vpop.f32.mrb[49].mxu0 }
 0x298   :  { %v1233_v5 = vadd.f32 %v1232_v51, %v5594_v37  ;;  %v4321_v38 = vpop.f32.mrb[50].mxu0 }
 0x299   :  { %v1244_v19 = vadd.f32 %v4321_v38, %v5594_v37  ;;  %v1235_v23 = vpop.f32.mrb[51].mxu0  ;;  %v1361_v63 = vmax.f32 %v1241_v18, 0.0 }
 0x29a   :  { %v1236_v3 = vadd.f32 %v1235_v23, %v5594_v37  ;;  %v1359_v56 = vmax.f32 %v1233_v5, 0.0 }
 0x29b   :  { %v1362_v49 = vmax.f32 %v1244_v19, 0.0 }
 0x29c   :  { %v1360_v61 = vmax.f32 %v1236_v3, 0.0 }
 0x29d   :  { %v1392_v35 = vpack.c.bf16 %v1362_v49, %v1361_v63 }
 0x29e   :  { %v1391_v58 = vpack.c.bf16 %v1360_v61, %v1359_v56  ;;  %v4324_v59 = vpop.f32.mrb[52].mxu0 }
 0x29f   :  { %v1257_v1 = vadd.f32 %v4324_v59, %v5594_v37  ;;  %v1248_v60 = vpop.f32.mrb[53].mxu0 }
 0x2a0   :  { %v1249_v8 = vadd.f32 %v1248_v60, %v5594_v37  ;;  %v4325_v33 = vpop.f32.mrb[54].mxu0  ;;  %4366 = vmatprep.mubr.bf16.mxu0 %v1391_v58 }
 0x2a1   :  { %v1260_v51 = vadd.f32 %v4325_v33, %v5594_v37  ;;  %v1251_v38 = vpop.f32.mrb[55].mxu0  ;;  %4367 = vmatmul.mubr.bf16.vlgmr.msra.gmra.mrb[80].mxu0 %v1392_v35  ;;  %v1365_v18 = vmax.f32 %v1257_v1, 0.0 }
 0x2a2   :  { %v1252_v23 = vadd.f32 %v1251_v38, %v5594_v37  ;;  %v1363_v5 = vmax.f32 %v1249_v8, 0.0 }
 0x2a3   :  { %v1366_v19 = vmax.f32 %v1260_v51, 0.0 }
 0x2a4   :  { %v1364_v3 = vmax.f32 %v1252_v23, 0.0 }
 0x2a5   :  { %v1394_v49 = vpack.c.bf16 %v1366_v19, %v1365_v18 }
 0x2a6   :  { %v1393_v61 = vpack.c.bf16 %v1364_v3, %v1363_v5  ;;  %v4328_v63 = vpop.f32.mrb[56].mxu0 }
 0x2a7   :  { %v1273_v56 = vadd.f32 %v4328_v63, %v5594_v37  ;;  %v1264_v59 = vpop.f32.mrb[57].mxu0 }
 0x2a8   :  { %v1265_v60 = vadd.f32 %v1264_v59, %v5594_v37  ;;  %v4329_v36 = vpop.f32.mrb[58].mxu0  ;;  %4370 = vmatprep.mubr.bf16.mxu0 %v1393_v61 }
 0x2a9   :  { %v1276_v33 = vadd.f32 %v4329_v36, %v5594_v37  ;;  %v1267_v58 = vpop.f32.mrb[59].mxu0  ;;  %4371 = vmatmul.mubr.bf16.gmra.mrb[84].mxu0 %v1394_v49  ;;  %v1369_v1 = vmax.f32 %v1273_v56, 0.0 }
 0x2aa   :  { %v1268_v35 = vadd.f32 %v1267_v58, %v5594_v37  ;;  %v1367_v8 = vmax.f32 %v1265_v60, 0.0 }
 0x2ab   :  { %v1370_v51 = vmax.f32 %v1276_v33, 0.0 }
 0x2ac   :  { %v1368_v38 = vmax.f32 %v1268_v35, 0.0 }
 0x2ad   :  { %v1396_v23 = vpack.c.bf16 %v1370_v51, %v1369_v1 }
 0x2ae   :  { %v1395_v18 = vpack.c.bf16 %v1368_v38, %v1367_v8  ;;  %v4332_v19 = vpop.f32.mrb[60].mxu0 }
 0x2af   :  { %v1289_v5 = vadd.f32 %v4332_v19, %v5594_v37  ;;  %v1280_v3 = vpop.f32.mrb[61].mxu0 }
 0x2b0   :  { %v1281_v63 = vadd.f32 %v1280_v3, %v5594_v37  ;;  %v4333_v59 = vpop.f32.mrb[62].mxu0  ;;  %4374 = vmatprep.mubr.bf16.mxu0 %v1395_v18 }
 0x2b1   :  { %v1292_v36 = vadd.f32 %v4333_v59, %v5594_v37  ;;  %v1283_v61 = vpop.f32.mrb[63].mxu0  ;;  %4375 = vmatmul.mubr.bf16.gmra.mrb[88].mxu0 %v1396_v23  ;;  %v1373_v56 = vmax.f32 %v1289_v5, 0.0 }
 0x2b2   :  { %v1284_v49 = vadd.f32 %v1283_v61, %v5594_v37  ;;  %v1371_v60 = vmax.f32 %v1281_v63, 0.0 }
 0x2b3   :  { %v1374_v33 = vmax.f32 %v1292_v36, 0.0 }
 0x2b4   :  { %v1372_v58 = vmax.f32 %v1284_v49, 0.0 }
 0x2b5   :  { %v1398_v35 = vpack.c.bf16 %v1374_v33, %v1373_v56 }
 0x2b6   :  { %v1397_v1 = vpack.c.bf16 %v1372_v58, %v1371_v60  ;;  %v4336_v51 = vpop.f32.mrb[64].mxu0 }
 0x2b7   :  { %v1305_v8 = vadd.f32 %v4336_v51, %v5594_v37  ;;  %v1296_v38 = vpop.f32.mrb[65].mxu0 }
 0x2b8   :  { %v1297_v19 = vadd.f32 %v1296_v38, %v5594_v37  ;;  %v4337_v3 = vpop.f32.mrb[66].mxu0  ;;  %4378 = vmatprep.mubr.bf16.mxu0 %v1397_v1 }
 0x2b9   :  { %v1308_v18 = vadd.f32 %v4337_v3, %v5594_v37  ;;  %v1299_v59 = vpop.f32.mrb[67].mxu0  ;;  %4379 = vmatmul.mubr.bf16.gmra.mrb[92].mxu0 %v1398_v35  ;;  %v1377_v5 = vmax.f32 %v1305_v8, 0.0 }
 0x2ba   :  { %v1300_v23 = vadd.f32 %v1299_v59, %v5594_v37  ;;  %v1375_v63 = vmax.f32 %v1297_v19, 0.0 }
 0x2bb   :  { %v1378_v36 = vmax.f32 %v1308_v18, 0.0 }
 0x2bc   :  { %v1376_v61 = vmax.f32 %v1300_v23, 0.0 }
 0x2bd   :  { %v1400_v49 = vpack.c.bf16 %v1378_v36, %v1377_v5 }
 0x2be   :  { %v1399_v56 = vpack.c.bf16 %v1376_v61, %v1375_v63  ;;  %v4340_v33 = vpop.f32.mrb[68].mxu0 }
 0x2bf   :  { %v1321_v60 = vadd.f32 %v4340_v33, %v5594_v37  ;;  %v1312_v58 = vpop.f32.mrb[69].mxu0 }
 0x2c0   :  { %v1313_v51 = vadd.f32 %v1312_v58, %v5594_v37  ;;  %v4341_v38 = vpop.f32.mrb[70].mxu0  ;;  %4382 = vmatprep.mubr.bf16.mxu0 %v1399_v56 }
 0x2c1   :  { %v1324_v1 = vadd.f32 %v4341_v38, %v5594_v37  ;;  %v1315_v3 = vpop.f32.mrb[71].mxu0  ;;  %4383 = vmatmul.mubr.bf16.gmra.mrb[96].mxu0 %v1400_v49  ;;  %v1381_v8 = vmax.f32 %v1321_v60, 0.0 }
 0x2c2   :  { %v1316_v35 = vadd.f32 %v1315_v3, %v5594_v37  ;;  %v1379_v19 = vmax.f32 %v1313_v51, 0.0 }
 0x2c3   :  { %v1382_v18 = vmax.f32 %v1324_v1, 0.0 }
 0x2c4   :  { %v1380_v59 = vmax.f32 %v1316_v35, 0.0 }
 0x2c5   :  { %v1402_v23 = vpack.c.bf16 %v1382_v18, %v1381_v8 }
 0x2c6   :  { %v1401_v5 = vpack.c.bf16 %v1380_v59, %v1379_v19  ;;  %v4344_v36 = vpop.f32.mrb[72].mxu0 }
 0x2c7   :  { %v1337_v63 = vadd.f32 %v4344_v36, %v5594_v37  ;;  %v1328_v61 = vpop.f32.mrb[73].mxu0 }
 0x2c8   :  { %v1329_v33 = vadd.f32 %v1328_v61, %v5594_v37  ;;  %v4345_v58 = vpop.f32.mrb[74].mxu0  ;;  %4386 = vmatprep.mubr.bf16.mxu0 %v1401_v5 }
 0x2c9   :  { %v1340_v56 = vadd.f32 %v4345_v58, %v5594_v37  ;;  %v1331_v38 = vpop.f32.mrb[75].mxu0  ;;  %4387 = vmatmul.mubr.bf16.gmra.mrb[100].mxu0 %v1402_v23  ;;  %v1385_v60 = vmax.f32 %v1337_v63, 0.0 }
 0x2ca   :  { %v1332_v49 = vadd.f32 %v1331_v38, %v5594_v37  ;;  %v1383_v51 = vmax.f32 %v1329_v33, 0.0 }
 0x2cb   :  { %v1386_v1 = vmax.f32 %v1340_v56, 0.0 }
 0x2cc   :  { %v1384_v3 = vmax.f32 %v1332_v49, 0.0 }
 0x2cd   :  { %v1404_v35 = vpack.c.bf16 %v1386_v1, %v1385_v60  ;;  %v7503_v1 = vsub.s32 1, %v5110_v57 }
 0x2ce   :  { %v1403_v8 = vpack.c.bf16 %v1384_v3, %v1383_v51  ;;  %v4348_v18 = vpop.f32.mrb[76].mxu0  ;;  %v7360_v3 = vsub.s32 2, %v5110_v57 }
 0x2cf   :  { %v1353_v19 = vadd.f32 %v4348_v18, %v5594_v37  ;;  %v1344_v59 = vpop.f32.mrb[77].mxu0  ;;  %v5633_v51 = vrot.slane %v5356_v0, %v7503_v1 }
 0x2d0   :  { %v1345_v36 = vadd.f32 %v1344_v59, %v5594_v37  ;;  %v4349_v61 = vpop.f32.mrb[78].mxu0  ;;  %4390 = vmatprep.mubr.bf16.mxu0 %v1403_v8  ;;  %v5641_v18 = vrot.slane %v5124_v62, %v7360_v3 }
 0x2d1   :  { %v1356_v5 = vadd.f32 %v4349_v61, %v5594_v37  ;;  %v1347_v58 = vpop.f32.mrb[79].mxu0  ;;  %4391 = vmatmul.mubr.bf16.gmra.mrb[104].mxu0 %v1404_v35  ;;  %v1389_v63 = vmax.f32 %v1353_v19, 0.0 }
 0x2d2   :  { %v1348_v23 = vadd.f32 %v1347_v58, %v5594_v37  ;;  %v1387_v33 = vmax.f32 %v1345_v36, 0.0 }
 0x2d3   :  { %v1390_v56 = vmax.f32 %v1356_v5, 0.0 }
 0x2d4   :  { %v1388_v38 = vmax.f32 %v1348_v23, 0.0 }
 0x2d5   :  { %v1406_v49 = vpack.c.bf16 %v1390_v56, %v1389_v63 }
 0x2d6   :  { %v1405_v60 = vpack.c.bf16 %v1388_v38, %v1387_v33 }
 0x2d8   :  { %4394 = vmatprep.mubr.bf16.mxu0 %v1405_v60 }
 0x2d9   :  { %4395 = vmatmul.mubr.bf16.gmra.mrb[108].mxu0 %v1406_v49 }
 0x2e3   :  { %v1911_v8 = vpop.xlane.xlu0 %1910 }
 0x2e4   :  { %v1974_v35 = vmul.f32 %v1911_v8, %v5137_v10 }
 0x2e6   :  { %v2010_v37 = vadd.f32 %v5633_v51, %v1974_v35 }
 0x2e7   :  { %v1915_v19 = vpop.xlane.xlu0 %1914  ;;  %v1913_v59 = vpop.xlane.xlu1 %1912 }
 0x2e8   :  { %v1976_v36 = vmul.f32 %v1915_v19, %v5134_v7  ;;  %v1975_v61 = vmul.f32 %v1913_v59, %v5145_v14  ;;  %v5646_v5 = vadd.f32 %v2010_v37, %v5375_v34 }
 0x2ea   :  { %v2012_v58 = vadd.f32 %v5633_v51, %v1976_v36  ;;  %v2011_v23 = vadd.f32 %v5633_v51, %v1975_v61  ;;  %v2078_v63 = vmul.f32 %v5641_v18, %v5646_v5 }
 0x2eb   :  { %v1919_v56 = vpop.xlane.xlu0 %1918  ;;  %v1917_v33 = vpop.xlane.xlu1 %1916 }
 0x2ec   :  { %v1978_v38 = vmul.f32 %v1919_v56, %v5158_v28  ;;  %v1977_v49 = vmul.f32 %v1917_v33, %v5140_v12  ;;  %2110 = vadd.xlane.f32.xlu0 %v2078_v63  ;;  %v5655_v60 = vadd.f32 %v2012_v58, %v5382_v41  ;;  %v5658_v34 = vadd.f32 %v2011_v23, %v5386_v44 }
 0x2ee   :  { %v2014_v1 = vadd.f32 %v5633_v51, %v1978_v38  ;;  %v2013_v8 = vadd.f32 %v5633_v51, %v1977_v49  ;;  %v2080_v35 = vmul.f32 %v5641_v18, %v5655_v60  ;;  %v2079_v37 = vmul.f32 %v5641_v18, %v5658_v34 }
 0x2ef   :  { %v1923_v19 = vpop.xlane.xlu0 %1922  ;;  %v1921_v59 = vpop.xlane.xlu1 %1920 }
 0x2f0   :  { %v1980_v36 = vmul.f32 %v1923_v19, %v5161_v30  ;;  %v1979_v41 = vmul.f32 %v1921_v59, %v5167_v32  ;;  %2114 = vadd.xlane.f32.xlu0 %v2080_v35  ;;  %2112 = vadd.xlane.f32.xlu1 %v2079_v37  ;;  %v5669_v44 = vadd.f32 %v2014_v1, %v5400_v16 }
 0x2f1   :  { %v5672_v61 = vadd.f32 %v2013_v8, %v5389_v50 }
 0x2f2   :  { %v2016_v58 = vadd.f32 %v5633_v51, %v1980_v36  ;;  %v2015_v23 = vadd.f32 %v5633_v51, %v1979_v41  ;;  %v2082_v63 = vmul.f32 %v5641_v18, %v5669_v44 }
 0x2f3   :  { %v1927_v56 = vpop.xlane.xlu0 %1926  ;;  %v1925_v33 = vpop.xlane.xlu1 %1924  ;;  %v2081_v38 = vmul.f32 %v5641_v18, %v5672_v61 }
 0x2f4   :  { %v1982_v49 = vmul.f32 %v1927_v56, %v5181_v45  ;;  %v1981_v16 = vmul.f32 %v1925_v33, %v5164_v31  ;;  %2118 = vadd.xlane.f32.xlu0 %v2082_v63  ;;  %v5683_v50 = vadd.f32 %v2016_v58, %v5414_v40  ;;  %v5686_v1 = vadd.f32 %v2015_v23, %v5409_v24 }
 0x2f5   :  { %2116 = vadd.xlane.f32.xlu1 %v2081_v38 }
 0x2f6   :  { %v2018_v8 = vadd.f32 %v5633_v51, %v1982_v49  ;;  %v2017_v35 = vadd.f32 %v5633_v51, %v1981_v16  ;;  %v2084_v37 = vmul.f32 %v5641_v18, %v5683_v50  ;;  %v2083_v19 = vmul.f32 %v5641_v18, %v5686_v1 }
 0x2f7   :  { %v1931_v59 = vpop.xlane.xlu0 %1930  ;;  %v1929_v36 = vpop.xlane.xlu1 %1928 }
 0x2f8   :  { %v1984_v41 = vmul.f32 %v1931_v59, %v5187_v47  ;;  %v1983_v40 = vmul.f32 %v1929_v36, %v5193_v17  ;;  %2122 = vadd.xlane.f32.xlu0 %v2084_v37  ;;  %v5697_v24 = vadd.f32 %v2018_v8, %v5428_v55  ;;  %v5700_v58 = vadd.f32 %v2017_v35, %v5423_v52 }
 0x2f9   :  { %2120 = vadd.xlane.f32.xlu1 %v2083_v19 }
 0x2fa   :  { %v2020_v23 = vadd.f32 %v5633_v51, %v1984_v41  ;;  %v2019_v63 = vadd.f32 %v5633_v51, %v1983_v40  ;;  %v2086_v56 = vmul.f32 %v5641_v18, %v5697_v24  ;;  %v2085_v33 = vmul.f32 %v5641_v18, %v5700_v58 }
 0x2fb   :  { %v1933_v49 = vpop.xlane.xlu1 %1932 }
 0x2fc   :  { %v1935_v38 = vpop.xlane.xlu0 %1934  ;;  %v1985_v55 = vmul.f32 %v1933_v49, %v5190_v48  ;;  %2126 = vadd.xlane.f32.xlu0 %v2086_v56  ;;  %v5711_v52 = vadd.f32 %v2020_v23, %v5442_v42  ;;  %v5714_v8 = vadd.f32 %v2019_v63, %v5437_v26  ;;  %v7504_v23 = vld [vmem:[#allocation28_spill] sm:$0xff] }
 0x2fd   :  { %v1986_v16 = vmul.f32 %v1935_v38, %v5209_v9  ;;  %2124 = vadd.xlane.f32.xlu1 %v2085_v33 }
 0x2fe   :  { %v2021_v37 = vadd.f32 %v5633_v51, %v1985_v55  ;;  %v2088_v19 = vmul.f32 %v5641_v18, %v5711_v52  ;;  %v2087_v59 = vmul.f32 %v5641_v18, %v5714_v8 }
 0x2ff   :  { %v2022_v35 = vadd.f32 %v5633_v51, %v1986_v16  ;;  %v1937_v41 = vpop.xlane.xlu1 %1936 }
 0x300   :  { %v1939_v36 = vpop.xlane.xlu0 %1938  ;;  %v1987_v42 = vmul.f32 %v1937_v41, %v5221_v15  ;;  %2130 = vadd.xlane.f32.xlu0 %v2088_v19  ;;  %v5728_v63 = vadd.f32 %v2021_v37, %v7504_v23 }
 0x301   :  { %v1988_v40 = vmul.f32 %v1939_v36, %v5215_v54  ;;  %v5725_v26 = vadd.f32 %v2022_v35, %v5456_v20  ;;  %2128 = vadd.xlane.f32.xlu1 %v2087_v59  ;;  %v7505_v35 = vld [vmem:[#allocation30_spill] sm:$0xff]  ;;  %v7506_v59 = vld [vmem:[#allocation29_spill] sm:$0xff] }
 0x302   :  { %v2023_v33 = vadd.f32 %v5633_v51, %v1987_v42  ;;  %v2089_v49 = vmul.f32 %v5641_v18, %v5728_v63 }
 0x303   :  { %v2024_v56 = vadd.f32 %v5633_v51, %v1988_v40  ;;  %v2090_v38 = vmul.f32 %v5641_v18, %v5725_v26  ;;  %v1941_v55 = vpop.xlane.xlu1 %1940 }
 0x304   :  { %v1943_v16 = vpop.xlane.xlu0 %1942  ;;  %v1989_v20 = vmul.f32 %v1941_v55, %v5218_v13  ;;  %v5742_v36 = vadd.f32 %v2023_v33, %v7506_v59  ;;  %v7507_v33 = vld [vmem:[#allocation32_spill] sm:$0xff] }
 0x305   :  { %v1990_v19 = vmul.f32 %v1943_v16, %v5232_v21  ;;  %2134 = vadd.xlane.f32.xlu0 %v2090_v38  ;;  %v5739_v37 = vadd.f32 %v2024_v56, %v7505_v35  ;;  %2132 = vadd.xlane.f32.xlu1 %v2089_v49  ;;  %v7508_v49 = vld [vmem:[#allocation31_spill] sm:$0xff] }
 0x306   :  { %v2025_v40 = vadd.f32 %v5633_v51, %v1989_v20  ;;  %v2091_v23 = vmul.f32 %v5641_v18, %v5742_v36 }
 0x307   :  { %v2026_v41 = vadd.f32 %v5633_v51, %v1990_v19  ;;  %v2092_v42 = vmul.f32 %v5641_v18, %v5739_v37  ;;  %v1945_v55 = vpop.xlane.xlu1 %1944 }
 0x308   :  { %v1947_v16 = vpop.xlane.xlu0 %1946  ;;  %v1991_v56 = vmul.f32 %v1945_v55, %v5237_v25  ;;  %v5756_v19 = vadd.f32 %v2025_v40, %v7508_v49  ;;  %v7509_v40 = vld [vmem:[#allocation34_spill] sm:$0xff] }
 0x309   :  { %v1992_v38 = vmul.f32 %v1947_v16, %v5245_v29  ;;  %2138 = vadd.xlane.f32.xlu0 %v2092_v42  ;;  %v5753_v35 = vadd.f32 %v2026_v41, %v7507_v33  ;;  %2136 = vadd.xlane.f32.xlu1 %v2091_v23  ;;  %v7510_v23 = vld [vmem:[#allocation33_spill] sm:$0xff] }
 0x30a   :  { %v2027_v59 = vadd.f32 %v5633_v51, %v1991_v56  ;;  %v2093_v16 = vmul.f32 %v5641_v18, %v5756_v19 }
 0x30b   :  { %v2028_v20 = vadd.f32 %v5633_v51, %v1992_v38  ;;  %v2094_v3 = vmul.f32 %v5641_v18, %v5753_v35  ;;  %v1949_v55 = vpop.xlane.xlu1 %1948 }
 0x30c   :  { %v1951_v29 = vpop.xlane.xlu0 %1950  ;;  %v1993_v41 = vmul.f32 %v1949_v55, %v5242_v27  ;;  %v5770_v38 = vadd.f32 %v2027_v59, %v7510_v23  ;;  %v7511_v59 = vld [vmem:[#allocation36_spill] sm:$0xff] }
 0x30d   :  { %v1994_v42 = vmul.f32 %v1951_v29, %v5256_v39  ;;  %2142 = vadd.xlane.f32.xlu0 %v2094_v3  ;;  %v5767_v33 = vadd.f32 %v2028_v20, %v7509_v40  ;;  %2140 = vadd.xlane.f32.xlu1 %v2093_v16  ;;  %v7512_v16 = vld [vmem:[#allocation35_spill] sm:$0xff] }
 0x30e   :  { %v2029_v49 = vadd.f32 %v5633_v51, %v1993_v41  ;;  %v2095_v29 = vmul.f32 %v5641_v18, %v5770_v38 }
 0x30f   :  { %v2030_v56 = vadd.f32 %v5633_v51, %v1994_v42  ;;  %v2096_v25 = vmul.f32 %v5641_v18, %v5767_v33  ;;  %v1953_v55 = vpop.xlane.xlu1 %1952 }
 0x310   :  { %v1955_v39 = vpop.xlane.xlu0 %1954  ;;  %v1995_v20 = vmul.f32 %v1953_v55, %v5261_v43  ;;  %v5784_v42 = vadd.f32 %v2029_v49, %v7512_v16  ;;  %v7513_v49 = vld [vmem:[#allocation38_spill] sm:$0xff] }
 0x311   :  { %v1996_v3 = vmul.f32 %v1955_v39, %v5269_v46  ;;  %2146 = vadd.xlane.f32.xlu0 %v2096_v25  ;;  %v5781_v40 = vadd.f32 %v2030_v56, %v7511_v59  ;;  %2144 = vadd.xlane.f32.xlu1 %v2095_v29  ;;  %v7514_v29 = vld [vmem:[#allocation37_spill] sm:$0xff] }
 0x312   :  { %v2031_v23 = vadd.f32 %v5633_v51, %v1995_v20  ;;  %v2097_v39 = vmul.f32 %v5641_v18, %v5784_v42 }
 0x313   :  { %v2032_v41 = vadd.f32 %v5633_v51, %v1996_v3  ;;  %v2098_v27 = vmul.f32 %v5641_v18, %v5781_v40  ;;  %v1957_v55 = vpop.xlane.xlu1 %1956 }
 0x314   :  { %v1959_v46 = vpop.xlane.xlu0 %1958  ;;  %v1997_v56 = vmul.f32 %v1957_v55, %v5266_v4  ;;  %v5798_v3 = vadd.f32 %v2031_v23, %v7514_v29  ;;  %v7515_v23 = vld [vmem:[#allocation40_spill] sm:$0xff] }
 0x315   :  { %v1998_v25 = vmul.f32 %v1959_v46, %v5280_v2  ;;  %2150 = vadd.xlane.f32.xlu0 %v2098_v27  ;;  %v5795_v59 = vadd.f32 %v2032_v41, %v7513_v49  ;;  %2148 = vadd.xlane.f32.xlu1 %v2097_v39  ;;  %v7516_v39 = vld [vmem:[#allocation39_spill] sm:$0xff] }
 0x316   :  { %v2033_v16 = vadd.f32 %v5633_v51, %v1997_v56  ;;  %v2099_v46 = vmul.f32 %v5641_v18, %v5798_v3 }
 0x317   :  { %v2034_v20 = vadd.f32 %v5633_v51, %v1998_v25  ;;  %v2100_v43 = vmul.f32 %v5641_v18, %v5795_v59  ;;  %v1961_v55 = vpop.xlane.xlu1 %1960 }
 0x318   :  { %v1963_v2 = vpop.xlane.xlu0 %1962  ;;  %v1999_v41 = vmul.f32 %v1961_v55, %v5285_v6  ;;  %v5812_v25 = vadd.f32 %v2033_v16, %v7516_v39  ;;  %v7517_v16 = vld [vmem:[#allocation42_spill] sm:$0xff] }
 0x319   :  { %v2000_v27 = vmul.f32 %v1963_v2, %v5293_v11  ;;  %2154 = vadd.xlane.f32.xlu0 %v2100_v43  ;;  %v5809_v49 = vadd.f32 %v2034_v20, %v7515_v23  ;;  %2152 = vadd.xlane.f32.xlu1 %v2099_v46  ;;  %v7519_v46 = vld [vmem:[#allocation41_spill] sm:$0xff] }
 0x31a   :  { %v2035_v29 = vadd.f32 %v5633_v51, %v1999_v41  ;;  %v2101_v2 = vmul.f32 %v5641_v18, %v5812_v25 }
 0x31b   :  { %v2036_v56 = vadd.f32 %v5633_v51, %v2000_v27  ;;  %v2102_v4 = vmul.f32 %v5641_v18, %v5809_v49  ;;  %v1965_v55 = vpop.xlane.xlu1 %1964 }
 0x31c   :  { %v1967_v11 = vpop.xlane.xlu0 %1966  ;;  %v2001_v20 = vmul.f32 %v1965_v55, %v5290_v53  ;;  %v5826_v27 = vadd.f32 %v2035_v29, %v7519_v46  ;;  %v7523_v29 = vld [vmem:[#allocation44_spill] sm:$0xff] }
 0x31d   :  { %v2002_v43 = vmul.f32 %v1967_v11, %v5304_v22  ;;  %2158 = vadd.xlane.f32.xlu0 %v2102_v4  ;;  %v5823_v23 = vadd.f32 %v2036_v56, %v7517_v16  ;;  %2156 = vadd.xlane.f32.xlu1 %v2101_v2  ;;  %v7521_v4 = vld [vmem:[#allocation26_spill] sm:$0xff]  ;;  %v7522_v56 = vld [vmem:[#allocation24_spill] sm:$0xff]  ;;  %v7524_v2 = vld [vmem:[#allocation43_spill] sm:$0xff] }
 0x31e   :  { %7520 = vst [vmem:[#allocation30_spill] sm:$0xff] %v5826_v27  ;;  %v2037_v39 = vadd.f32 %v5633_v51, %v2001_v20  ;;  %v2103_v11 = vmul.f32 %v5641_v18, %v5826_v27 }
 0x31f   :  { %7518 = vst [vmem:[#allocation28_spill] sm:$0xff] %v5823_v23  ;;  %v2038_v41 = vadd.f32 %v5633_v51, %v2002_v43  ;;  %v2104_v6 = vmul.f32 %v5641_v18, %v5823_v23  ;;  %v1969_v55 = vpop.xlane.xlu1 %1968 }
 0x320   :  { %v1971_v22 = vpop.xlane.xlu0 %1970  ;;  %v2003_v16 = vmul.f32 %v1969_v55, %v7522_v56  ;;  %v5840_v43 = vadd.f32 %v2037_v39, %v7524_v2  ;;  %v7526_v55 = vld [vmem:[#allocation25_spill] sm:$0xff]  ;;  %v7531_v56 = vld [vmem:[#allocation47_spill] sm:$0xff] }
 0x321   :  { %v2004_v53 = vmul.f32 %v1971_v22, %v7521_v4  ;;  %2162 = vadd.xlane.f32.xlu0 %v2104_v6  ;;  %v5837_v46 = vadd.f32 %v2038_v41, %v7523_v29  ;;  %2160 = vadd.xlane.f32.xlu1 %v2103_v11  ;;  %v7527_v41 = vld [vmem:[#allocation46_spill] sm:$0xff]  ;;  %v7529_v39 = vld [vmem:[#allocation45_spill] sm:$0xff] }
 0x322   :  { %7525 = vst [vmem:[#allocation29_spill] sm:$0xff] %v5840_v43  ;;  %v2039_v23 = vadd.f32 %v5633_v51, %v2003_v16  ;;  %v2105_v22 = vmul.f32 %v5641_v18, %v5840_v43 }
 0x323   :  { %v2040_v20 = vadd.f32 %v5633_v51, %v2004_v53  ;;  %v2106_v27 = vmul.f32 %v5641_v18, %v5837_v46  ;;  %v1973_v4 = vpop.xlane.xlu1 %1972 }
 0x324   :  { %v2005_v6 = vmul.f32 %v1973_v4, %v7526_v55  ;;  %v5853_v2 = vadd.f32 %v2039_v23, %v7529_v39  ;;  %v1423_v23 = vld [vmem:[%s7327_s2 + $0xd0] sm:$0x1]  ;;  %v7533_v4 = vld [vmem:[#allocation2_spill] sm:$0xff] }
 0x325   :  { %2166 = vadd.xlane.f32.xlu0 %v2106_v27  ;;  %v5850_v29 = vadd.f32 %v2040_v20, %v7527_v41  ;;  %2164 = vadd.xlane.f32.xlu1 %v2105_v22 }
 0x326   :  { %7530 = vst [vmem:[#allocation31_spill] sm:$0xff] %v5853_v2  ;;  %v2041_v53 = vadd.f32 %v5633_v51, %v2005_v6  ;;  %v2107_v16 = vmul.f32 %v5641_v18, %v5853_v2  ;;  %v1424_v51 = vunpack.c.l.bf16 %v1423_v23  ;;  %v7393_v23 = vsub.s32 3, %v5110_v57 }
 0x327   :  { %7528 = vst [vmem:[#allocation32_spill] sm:$0xff] %v5850_v29  ;;  %v2108_v11 = vmul.f32 %v5641_v18, %v5850_v29 }
 0x328   :  { %v5861_v43 = vadd.f32 %v2041_v53, %v7531_v56  ;;  %v5869_v20 = vrot.slane %v1424_v51, %v7533_v4 }
 0x329   :  { %2170 = vadd.xlane.f32.xlu0 %v2108_v11  ;;  %2168 = vadd.xlane.f32.xlu1 %v2107_v16  ;;  %v7534_v16 = vsub.s32 2, %v5110_v57 }
 0x32a   :  { %7532 = vst [vmem:[#allocation34_spill] sm:$0xff] %v5861_v43  ;;  %v2109_v27 = vmul.f32 %v5641_v18, %v5861_v43 }
 0x32d   :  { %2172 = vadd.xlane.f32.xlu1 %v2109_v27  ;;  %v5878_v27 = vrot.slane %v5356_v0, %v7534_v16  ;;  %v5890_v16 = vrot.slane %v5124_v62, %v7393_v23 }
 0x374   :  { %v4368_v22 = vpop.f32.mrb[80].mxu0 }
 0x375   :  { %v1520_v6 = vadd.f32 %v4368_v22, %v5869_v20  ;;  %v1511_v41 = vpop.f32.mrb[81].mxu0 }
 0x376   :  { %v1512_v56 = vadd.f32 %v1511_v41, %v5869_v20  ;;  %v4369_v39 = vpop.f32.mrb[82].mxu0 }
 0x377   :  { %v1523_v53 = vadd.f32 %v4369_v39, %v5869_v20  ;;  %v1514_v11 = vpop.f32.mrb[83].mxu0  ;;  %v1640_v51 = vmax.f32 %v1520_v6, 0.0 }
 0x378   :  { %v1515_v18 = vadd.f32 %v1514_v11, %v5869_v20  ;;  %v1638_v22 = vmax.f32 %v1512_v56, 0.0 }
 0x379   :  { %v1641_v4 = vmax.f32 %v1523_v53, 0.0  ;;  %v2111_v43 = vpop.xlane.xlu0 %2110 }
 0x37a   :  { %v1639_v55 = vmax.f32 %v1515_v18, 0.0  ;;  %v2174_v41 = vmul.f32 %v2111_v43, %v5137_v10 }
 0x37b   :  { %v5882_v2 = vpack.c.bf16 %v1641_v4, %v1640_v51 }
 0x37c   :  { %v5884_v39 = vpack.c.bf16 %v1639_v55, %v1638_v22  ;;  %v2210_v11 = vadd.f32 %v5878_v27, %v2174_v41  ;;  %v4372_v29 = vpop.f32.mrb[84].mxu0 }
 0x37d   :  { %7535 = vst [vmem:[#allocation33_spill] sm:$0xff] %v5882_v2  ;;  %v1536_v6 = vadd.f32 %v4372_v29, %v5869_v20  ;;  %v2115_v53 = vpop.xlane.xlu0 %2114  ;;  %v2113_v0 = vpop.xlane.xlu1 %2112 }
 0x37e   :  { %7536 = vst [vmem:[#allocation36_spill] sm:$0xff] %v5884_v39  ;;  %v2176_v56 = vmul.f32 %v2115_v53, %v5134_v7  ;;  %v2175_v43 = vmul.f32 %v2113_v0, %v5145_v14  ;;  %v1527_v4 = vpop.f32.mrb[85].mxu0  ;;  %v5896_v55 = vadd.f32 %v2210_v11, %v5646_v5 }
 0x37f   :  { %v1528_v18 = vadd.f32 %v1527_v4, %v5869_v20  ;;  %v4373_v51 = vpop.f32.mrb[86].mxu0  ;;  %v1644_v53 = vmax.f32 %v1536_v6, 0.0 }
 0x380   :  { %7537 = vst [vmem:[#allocation35_spill] sm:$0xff] %v5896_v55  ;;  %v2212_v22 = vadd.f32 %v5878_v27, %v2176_v56  ;;  %v2211_v41 = vadd.f32 %v5878_v27, %v2175_v43  ;;  %v1539_v23 = vadd.f32 %v4373_v51, %v5869_v20  ;;  %v1530_v29 = vpop.f32.mrb[87].mxu0  ;;  %v2278_v2 = vmul.f32 %v5890_v16, %v5896_v55 }
 0x381   :  { %v1531_v0 = vadd.f32 %v1530_v29, %v5869_v20  ;;  %v2119_v39 = vpop.xlane.xlu0 %2118  ;;  %v1642_v43 = vmax.f32 %v1528_v18, 0.0 }
 0x382   :  { %v5906_v5 = vadd.f32 %v2212_v22, %v5655_v60  ;;  %v1645_v11 = vmax.f32 %v1539_v23, 0.0  ;;  %v2178_v4 = vmul.f32 %v2119_v39, %v5158_v28  ;;  %v2117_v14 = vpop.xlane.xlu1 %2116  ;;  %2310 = vadd.xlane.f32.xlu0 %v2278_v2  ;;  %v5910_v56 = vadd.f32 %v2211_v41, %v5658_v34 }
 0x383   :  { %v1643_v51 = vmax.f32 %v1531_v0, 0.0  ;;  %v2177_v7 = vmul.f32 %v2117_v14, %v5140_v12 }
 0x384   :  { %v5913_v55 = vpack.c.bf16 %v1645_v11, %v1644_v53  ;;  %v2214_v6 = vadd.f32 %v5878_v27, %v2178_v4  ;;  %v4376_v29 = vpop.f32.mrb[88].mxu0  ;;  %v2280_v60 = vmul.f32 %v5890_v16, %v5906_v5  ;;  %v2279_v23 = vmul.f32 %v5890_v16, %v5910_v56 }
 0x385   :  { %v5920_v39 = vpack.c.bf16 %v1643_v51, %v1642_v43  ;;  %v2213_v34 = vadd.f32 %v5878_v27, %v2177_v7  ;;  %v1552_v2 = vadd.f32 %v4376_v29, %v5869_v20  ;;  %v2123_v18 = vpop.xlane.xlu0 %2122  ;;  %v1543_v22 = vpop.f32.mrb[89].mxu0 }
 0x386   :  { %7538 = vst [vmem:[#allocation38_spill] sm:$0xff] %v5913_v55  ;;  %v5925_v14 = vadd.f32 %v2214_v6, %v5669_v44  ;;  %v2180_v41 = vmul.f32 %v2123_v18, %v5161_v30  ;;  %v2121_v53 = vpop.xlane.xlu1 %2120  ;;  %v1544_v0 = vadd.f32 %v1543_v22, %v5869_v20  ;;  %2314 = vadd.xlane.f32.xlu0 %v2280_v60  ;;  %v4377_v11 = vpop.f32.mrb[90].mxu0 }
 0x387   :  { %7539 = vst [vmem:[#allocation37_spill] sm:$0xff] %v5920_v39  ;;  %2312 = vadd.xlane.f32.xlu1 %v2279_v23  ;;  %v5930_v4 = vadd.f32 %v2213_v34, %v5672_v61  ;;  %v2179_v7 = vmul.f32 %v2121_v53, %v5167_v32  ;;  %v1555_v43 = vadd.f32 %v4377_v11, %v5869_v20  ;;  %v1546_v51 = vpop.f32.mrb[91].mxu0  ;;  %v1648_v18 = vmax.f32 %v1552_v2, 0.0 }
 0x388   :  { %v2216_v29 = vadd.f32 %v5878_v27, %v2180_v41  ;;  %v1547_v44 = vadd.f32 %v1546_v51, %v5869_v20  ;;  %v2282_v6 = vmul.f32 %v5890_v16, %v5925_v14  ;;  %v1646_v53 = vmax.f32 %v1544_v0, 0.0 }
 0x389   :  { %v2215_v60 = vadd.f32 %v5878_v27, %v2179_v7  ;;  %v1649_v23 = vmax.f32 %v1555_v43, 0.0  ;;  %v2127_v22 = vpop.xlane.xlu0 %2126  ;;  %v2281_v61 = vmul.f32 %v5890_v16, %v5930_v4 }
 0x38a   :  { %v5942_v34 = vadd.f32 %v2216_v29, %v5683_v50  ;;  %v1647_v11 = vmax.f32 %v1547_v44, 0.0  ;;  %v2182_v41 = vmul.f32 %v2127_v22, %v5181_v45  ;;  %v2125_v55 = vpop.xlane.xlu1 %2124  ;;  %2318 = vadd.xlane.f32.xlu0 %v2282_v6 }
 0x38b   :  { %v5946_v51 = vadd.f32 %v2215_v60, %v5686_v1  ;;  %v5948_v2 = vpack.c.bf16 %v1649_v23, %v1648_v18  ;;  %v2181_v7 = vmul.f32 %v2125_v55, %v5164_v31  ;;  %2316 = vadd.xlane.f32.xlu1 %v2281_v61 }
 0x38c   :  { %v5951_v43 = vpack.c.bf16 %v1647_v11, %v1646_v53  ;;  %v2218_v39 = vadd.f32 %v5878_v27, %v2182_v41  ;;  %v4380_v50 = vpop.f32.mrb[92].mxu0  ;;  %v2284_v0 = vmul.f32 %v5890_v16, %v5942_v34 }
 0x38d   :  { %7540 = vst [vmem:[#allocation40_spill] sm:$0xff] %v5948_v2  ;;  %v2217_v29 = vadd.f32 %v5878_v27, %v2181_v7  ;;  %v1568_v44 = vadd.f32 %v4380_v50, %v5869_v20  ;;  %v2131_v6 = vpop.xlane.xlu0 %2130  ;;  %v1559_v1 = vpop.f32.mrb[93].mxu0  ;;  %v2283_v18 = vmul.f32 %v5890_v16, %v5946_v51 }
 0x38e   :  { %7541 = vst [vmem:[#allocation39_spill] sm:$0xff] %v5951_v43  ;;  %v5961_v55 = vadd.f32 %v2218_v39, %v5697_v24  ;;  %v2184_v60 = vmul.f32 %v2131_v6, %v5187_v47  ;;  %v2129_v23 = vpop.xlane.xlu1 %2128  ;;  %v1560_v22 = vadd.f32 %v1559_v1, %v5869_v20  ;;  %2322 = vadd.xlane.f32.xlu0 %v2284_v0  ;;  %v4381_v61 = vpop.f32.mrb[94].mxu0 }
 0x38f   :  { %v5966_v53 = vadd.f32 %v2217_v29, %v5700_v58  ;;  %v2183_v11 = vmul.f32 %v2129_v23, %v5193_v17  ;;  %2320 = vadd.xlane.f32.xlu1 %v2283_v18  ;;  %v1571_v41 = vadd.f32 %v4381_v61, %v5869_v20  ;;  %v1562_v7 = vpop.f32.mrb[95].mxu0  ;;  %v1652_v6 = vmax.f32 %v1568_v44, 0.0 }
 0x390   :  { %v2220_v50 = vadd.f32 %v5878_v27, %v2184_v60  ;;  %v1563_v24 = vadd.f32 %v1562_v7, %v5869_v20  ;;  %v2286_v39 = vmul.f32 %v5890_v16, %v5961_v55  ;;  %v1650_v18 = vmax.f32 %v1560_v22, 0.0 }
 0x391   :  { %v2219_v0 = vadd.f32 %v5878_v27, %v2183_v11  ;;  %v1653_v1 = vmax.f32 %v1571_v41, 0.0  ;;  %v2285_v58 = vmul.f32 %v5890_v16, %v5966_v53 }
 0x392   :  { %v2135_v2 = vpop.xlane.xlu0 %2134  ;;  %v5978_v29 = vadd.f32 %v2220_v50, %v5711_v52  ;;  %v1651_v23 = vmax.f32 %v1563_v24, 0.0  ;;  %v2133_v61 = vpop.xlane.xlu1 %2132  ;;  %2326 = vadd.xlane.f32.xlu0 %v2286_v39 }
 0x393   :  { %v2186_v60 = vmul.f32 %v2135_v2, %v5209_v9  ;;  %v5982_v7 = vadd.f32 %v2219_v0, %v5714_v8  ;;  %v5984_v44 = vpack.c.bf16 %v1653_v1, %v1652_v6  ;;  %v2185_v11 = vmul.f32 %v2133_v61, %v5190_v48  ;;  %2324 = vadd.xlane.f32.xlu1 %v2285_v58 }
 0x394   :  { %v5987_v41 = vpack.c.bf16 %v1651_v23, %v1650_v18  ;;  %v4384_v52 = vpop.f32.mrb[96].mxu0  ;;  %v2288_v22 = vmul.f32 %v5890_v16, %v5978_v29 }
 0x395   :  { %7542 = vst [vmem:[#allocation42_spill] sm:$0xff] %v5984_v44  ;;  %v2222_v43 = vadd.f32 %v5878_v27, %v2186_v60  ;;  %v2221_v2 = vadd.f32 %v5878_v27, %v2185_v11  ;;  %v1584_v50 = vadd.f32 %v4384_v52, %v5869_v20  ;;  %v1575_v8 = vpop.f32.mrb[97].mxu0  ;;  %v2287_v39 = vmul.f32 %v5890_v16, %v5982_v7 }
 0x396   :  { %7543 = vst [vmem:[#allocation41_spill] sm:$0xff] %v5987_v41  ;;  %v2139_v24 = vpop.xlane.xlu0 %2138  ;;  %v2137_v1 = vpop.xlane.xlu1 %2136  ;;  %v1576_v58 = vadd.f32 %v1575_v8, %v5869_v20  ;;  %2330 = vadd.xlane.f32.xlu0 %v2288_v22 }
 0x397   :  { %v5997_v6 = vadd.f32 %v2222_v43, %v5725_v26  ;;  %v2188_v0 = vmul.f32 %v2139_v24, %v5215_v54  ;;  %v4385_v18 = vpop.f32.mrb[98].mxu0  ;;  %v6002_v23 = vadd.f32 %v2221_v2, %v5728_v63  ;;  %v2187_v60 = vmul.f32 %v2137_v1, %v5221_v15  ;;  %2328 = vadd.xlane.f32.xlu1 %v2287_v39 }
 0x398   :  { %v1587_v61 = vadd.f32 %v4385_v18, %v5869_v20  ;;  %v1578_v11 = vpop.f32.mrb[99].mxu0  ;;  %v1656_v24 = vmax.f32 %v1584_v50, 0.0  ;;  %v1654_v39 = vmax.f32 %v1576_v58, 0.0 }
 0x399   :  { %v2224_v52 = vadd.f32 %v5878_v27, %v2188_v0  ;;  %v1579_v26 = vadd.f32 %v1578_v11, %v5869_v20  ;;  %v2290_v43 = vmul.f32 %v5890_v16, %v5997_v6  ;;  %v2223_v22 = vadd.f32 %v5878_v27, %v2187_v60 }
 0x39a   :  { %v1657_v8 = vmax.f32 %v1587_v61, 0.0  ;;  %v2143_v44 = vpop.xlane.xlu0 %2142  ;;  %v2289_v63 = vmul.f32 %v5890_v16, %v6002_v23  ;;  %v2141_v18 = vpop.xlane.xlu1 %2140 }
 0x39b   :  { %v6014_v2 = vadd.f32 %v2224_v52, %v5739_v37  ;;  %v1655_v1 = vmax.f32 %v1579_v26, 0.0  ;;  %v2190_v0 = vmul.f32 %v2143_v44, %v5232_v21  ;;  %2334 = vadd.xlane.f32.xlu0 %v2290_v43  ;;  %v6018_v11 = vadd.f32 %v2223_v22, %v5742_v36  ;;  %v7547_v22 = vld [vmem:[#allocation14_spill] sm:$0xff] }
 0x39c   :  { %v6020_v50 = vpack.c.bf16 %v1657_v8, %v1656_v24  ;;  %v2189_v60 = vmul.f32 %v2141_v18, %v5218_v13  ;;  %2332 = vadd.xlane.f32.xlu1 %v2289_v63  ;;  %v4388_v37 = vpop.f32.mrb[100].mxu0  ;;  %v7549_v18 = vld [vmem:[#allocation12_spill] sm:$0xff] }
 0x39d   :  { %v6023_v61 = vpack.c.bf16 %v1655_v1, %v1654_v39  ;;  %v2226_v41 = vadd.f32 %v5878_v27, %v2190_v0  ;;  %v2292_v58 = vmul.f32 %v5890_v16, %v6014_v2  ;;  %v1600_v52 = vadd.f32 %v4388_v37, %v5869_v20  ;;  %v1591_v36 = vpop.f32.mrb[101].mxu0 }
 0x39e   :  { %7544 = vst [vmem:[#allocation44_spill] sm:$0xff] %v6020_v50  ;;  %v2225_v44 = vadd.f32 %v5878_v27, %v2189_v60  ;;  %v2147_v26 = vpop.xlane.xlu0 %2146  ;;  %v2291_v43 = vmul.f32 %v5890_v16, %v6018_v11  ;;  %v2145_v63 = vpop.xlane.xlu1 %2144  ;;  %v1592_v39 = vadd.f32 %v1591_v36, %v5869_v20 }
 0x39f   :  { %7545 = vst [vmem:[#allocation43_spill] sm:$0xff] %v6023_v61  ;;  %v6033_v24 = vadd.f32 %v2226_v41, %v5753_v35  ;;  %v2192_v8 = vmul.f32 %v2147_v26, %v7547_v22  ;;  %2338 = vadd.xlane.f32.xlu0 %v2292_v58  ;;  %v4389_v1 = vpop.f32.mrb[102].mxu0  ;;  %v2191_v60 = vmul.f32 %v2145_v63, %v7549_v18  ;;  %v1660_v26 = vmax.f32 %v1600_v52, 0.0 }
 0x3a0   :  { %v6038_v0 = vadd.f32 %v2225_v44, %v5756_v19  ;;  %2336 = vadd.xlane.f32.xlu1 %v2291_v43  ;;  %v1603_v37 = vadd.f32 %v4389_v1, %v5869_v20  ;;  %v1594_v50 = vpop.f32.mrb[103].mxu0  ;;  %v1658_v43 = vmax.f32 %v1592_v39, 0.0  ;;  %v7550_v1 = vld [vmem:[#allocation15_spill] sm:$0xff] }
 0x3a1   :  { %7546 = vst [vmem:[#allocation46_spill] sm:$0xff] %v6033_v24  ;;  %v2228_v61 = vadd.f32 %v5878_v27, %v2192_v8  ;;  %v1595_v35 = vadd.f32 %v1594_v50, %v5869_v20  ;;  %v2294_v41 = vmul.f32 %v5890_v16, %v6033_v24  ;;  %v2227_v58 = vadd.f32 %v5878_v27, %v2191_v60  ;;  %v7552_v60 = vld [vmem:[#allocation13_spill] sm:$0xff] }
 0x3a2   :  { %7548 = vst [vmem:[#allocation45_spill] sm:$0xff] %v6038_v0  ;;  %v1661_v36 = vmax.f32 %v1603_v37, 0.0  ;;  %v2151_v22 = vpop.xlane.xlu0 %2150  ;;  %v2293_v19 = vmul.f32 %v5890_v16, %v6038_v0  ;;  %v2149_v18 = vpop.xlane.xlu1 %2148 }
 0x3a3   :  { %v6050_v44 = vadd.f32 %v2228_v61, %v5767_v33  ;;  %v1659_v63 = vmax.f32 %v1595_v35, 0.0  ;;  %v2194_v8 = vmul.f32 %v2151_v22, %v7550_v1  ;;  %2342 = vadd.xlane.f32.xlu0 %v2294_v41  ;;  %v6054_v50 = vadd.f32 %v2227_v58, %v5770_v38 }
 0x3a4   :  { %v6056_v52 = vpack.c.bf16 %v1661_v36, %v1660_v26  ;;  %v2193_v37 = vmul.f32 %v2149_v18, %v7552_v60  ;;  %2340 = vadd.xlane.f32.xlu1 %v2293_v19  ;;  %v4392_v33 = vpop.f32.mrb[104].mxu0  ;;  %v7555_v26 = vld [vmem:[#allocation18_spill] sm:$0xff] }
 0x3a5   :  { %v6059_v24 = vpack.c.bf16 %v1659_v63, %v1658_v43  ;;  %v2230_v0 = vadd.f32 %v5878_v27, %v2194_v8  ;;  %v2296_v61 = vmul.f32 %v5890_v16, %v6050_v44  ;;  %v1616_v39 = vadd.f32 %v4392_v33, %v5869_v20  ;;  %v1607_v38 = vpop.f32.mrb[105].mxu0  ;;  %v7557_v8 = vld [vmem:[#allocation16_spill] sm:$0xff] }
 0x3a6   :  { %7551 = vst [vmem:[#allocation47_spill] sm:$0xff] %v6056_v52  ;;  %v2229_v22 = vadd.f32 %v5878_v27, %v2193_v37  ;;  %v2155_v35 = vpop.xlane.xlu0 %2154  ;;  %v2295_v41 = vmul.f32 %v5890_v16, %v6054_v50  ;;  %v2153_v36 = vpop.xlane.xlu1 %2152  ;;  %v1608_v19 = vadd.f32 %v1607_v38, %v5869_v20 }
 0x3a7   :  { %7553 = vst [vmem:[#allocation48_spill] sm:$0xff] %v6059_v24  ;;  %v6069_v18 = vadd.f32 %v2230_v0, %v5781_v40  ;;  %v2196_v58 = vmul.f32 %v2155_v35, %v7555_v26  ;;  %2346 = vadd.xlane.f32.xlu0 %v2296_v61  ;;  %v4393_v43 = vpop.f32.mrb[106].mxu0  ;;  %v2195_v37 = vmul.f32 %v2153_v36, %v7557_v8  ;;  %v1664_v35 = vmax.f32 %v1616_v39, 0.0 }
 0x3a8   :  { %v6074_v63 = vadd.f32 %v2229_v22, %v5784_v42  ;;  %2344 = vadd.xlane.f32.xlu1 %v2295_v41  ;;  %v1619_v33 = vadd.f32 %v4393_v43, %v5869_v20  ;;  %v1610_v52 = vpop.f32.mrb[107].mxu0  ;;  %v1662_v41 = vmax.f32 %v1608_v19, 0.0  ;;  %v7558_v43 = vld [vmem:[#allocation19_spill] sm:$0xff] }
 0x3a9   :  { %7554 = vst [vmem:[#allocation49_spill] sm:$0xff] %v6069_v18  ;;  %v2232_v24 = vadd.f32 %v5878_v27, %v2196_v58  ;;  %v1611_v40 = vadd.f32 %v1610_v52, %v5869_v20  ;;  %v2298_v0 = vmul.f32 %v5890_v16, %v6069_v18  ;;  %v2231_v61 = vadd.f32 %v5878_v27, %v2195_v37  ;;  %v7560_v37 = vld [vmem:[#allocation17_spill] sm:$0xff] }
 0x3aa   :  { %7556 = vst [vmem:[#allocation50_spill] sm:$0xff] %v6074_v63  ;;  %v1665_v38 = vmax.f32 %v1619_v33, 0.0  ;;  %v2159_v26 = vpop.xlane.xlu0 %2158  ;;  %v2297_v42 = vmul.f32 %v5890_v16, %v6074_v63  ;;  %v2157_v8 = vpop.xlane.xlu1 %2156 }
 0x3ab   :  { %v6086_v22 = vadd.f32 %v2232_v24, %v5795_v59  ;;  %v1663_v36 = vmax.f32 %v1611_v40, 0.0  ;;  %v2198_v58 = vmul.f32 %v2159_v26, %v7558_v43  ;;  %2350 = vadd.xlane.f32.xlu0 %v2298_v0  ;;  %v6090_v52 = vadd.f32 %v2231_v61, %v5798_v3 }
 0x3ac   :  { %v6092_v39 = vpack.c.bf16 %v1665_v38, %v1664_v35  ;;  %v2197_v33 = vmul.f32 %v2157_v8, %v7560_v37  ;;  %2348 = vadd.xlane.f32.xlu1 %v2297_v42  ;;  %v4396_v59 = vpop.f32.mrb[108].mxu0  ;;  %v7563_v35 = vld [vmem:[#allocation22_spill] sm:$0xff] }
 0x3ad   :  { %v6095_v18 = vpack.c.bf16 %v1663_v36, %v1662_v41  ;;  %v2234_v63 = vadd.f32 %v5878_v27, %v2198_v58  ;;  %v2300_v24 = vmul.f32 %v5890_v16, %v6086_v22  ;;  %v1632_v19 = vadd.f32 %v4396_v59, %v5869_v20  ;;  %v1623_v3 = vpop.f32.mrb[109].mxu0  ;;  %v7565_v58 = vld [vmem:[#allocation20_spill] sm:$0xff] }
 0x3ae   :  { %7559 = vst [vmem:[#allocation51_spill] sm:$0xff] %v6092_v39  ;;  %v2233_v26 = vadd.f32 %v5878_v27, %v2197_v33  ;;  %v2163_v40 = vpop.xlane.xlu0 %2162  ;;  %v2299_v0 = vmul.f32 %v5890_v16, %v6090_v52  ;;  %v2161_v38 = vpop.xlane.xlu1 %2160  ;;  %v1624_v42 = vadd.f32 %v1623_v3, %v5869_v20 }
 0x3af   :  { %7561 = vst [vmem:[#allocation52_spill] sm:$0xff] %v6095_v18  ;;  %v6105_v8 = vadd.f32 %v2234_v63, %v5809_v49  ;;  %v2200_v61 = vmul.f32 %v2163_v40, %v7563_v35  ;;  %2354 = vadd.xlane.f32.xlu0 %v2300_v24  ;;  %v4397_v41 = vpop.f32.mrb[110].mxu0  ;;  %v2199_v33 = vmul.f32 %v2161_v38, %v7565_v58  ;;  %v1668_v40 = vmax.f32 %v1632_v19, 0.0  ;;  %v7567_v58 = vld [vmem:[#allocation23_spill] sm:$0xff] }
 0x3b0   :  { %v6110_v36 = vadd.f32 %v2233_v26, %v5812_v25  ;;  %2352 = vadd.xlane.f32.xlu1 %v2299_v0  ;;  %v1635_v59 = vadd.f32 %v4397_v41, %v5869_v20  ;;  %v1626_v39 = vpop.f32.mrb[111].mxu0  ;;  %v7566_v26 = vld [vmem:[#allocation28_spill] sm:$0xff]  ;;  %v1666_v38 = vmax.f32 %v1624_v42, 0.0 }
 0x3b1   :  { %7562 = vst [vmem:[#allocation53_spill] sm:$0xff] %v6105_v8  ;;  %v2236_v18 = vadd.f32 %v5878_v27, %v2200_v61  ;;  %v1627_v49 = vadd.f32 %v1626_v39, %v5869_v20  ;;  %v2302_v63 = vmul.f32 %v5890_v16, %v6105_v8  ;;  %v2235_v24 = vadd.f32 %v5878_v27, %v2199_v33  ;;  %v7568_v20 = vld [vmem:[#allocation30_spill] sm:$0xff]  ;;  %v7570_v33 = vld [vmem:[#allocation21_spill] sm:$0xff] }
 0x3b2   :  { %7564 = vst [vmem:[#allocation54_spill] sm:$0xff] %v6110_v36  ;;  %v1669_v3 = vmax.f32 %v1635_v59, 0.0  ;;  %v2167_v35 = vpop.xlane.xlu0 %2166  ;;  %v2301_v25 = vmul.f32 %v5890_v16, %v6110_v36  ;;  %v2165_v37 = vpop.xlane.xlu1 %2164 }
 0x3b3   :  { %v6122_v0 = vadd.f32 %v2236_v18, %v7566_v26  ;;  %v1667_v41 = vmax.f32 %v1627_v49, 0.0  ;;  %v2202_v61 = vmul.f32 %v2167_v35, %v7567_v58  ;;  %2358 = vadd.xlane.f32.xlu0 %v2302_v63  ;;  %v6126_v39 = vadd.f32 %v2235_v24, %v7568_v20  ;;  %v7574_v26 = vld [vmem:[#allocation24_spill] sm:$0xff] }
 0x3b4   :  { %v6128_v19 = vpack.c.bf16 %v1669_v3, %v1668_v40  ;;  %v2201_v59 = vmul.f32 %v2165_v37, %v7570_v33  ;;  %2356 = vadd.xlane.f32.xlu1 %v2301_v25  ;;  %v7572_v40 = vld [vmem:[#allocation26_spill] sm:$0xff]  ;;  %v7573_v3 = vld [vmem:[#allocation29_spill] sm:$0xff] }
 0x3b5   :  { %v6131_v8 = vpack.c.bf16 %v1667_v41, %v1666_v38  ;;  %v2238_v36 = vadd.f32 %v5878_v27, %v2202_v61  ;;  %v2304_v18 = vmul.f32 %v5890_v16, %v6122_v0  ;;  %v2303_v49 = vmul.f32 %v5890_v16, %v6126_v39 }
 0x3b6   :  { %7569 = vst [vmem:[#allocation28_spill] sm:$0xff] %v6128_v19  ;;  %v2237_v42 = vadd.f32 %v5878_v27, %v2201_v59  ;;  %v2171_v35 = vpop.xlane.xlu0 %2170  ;;  %v2169_v37 = vpop.xlane.xlu1 %2168  ;;  %v7578_v19 = vld [vmem:[#allocation34_spill] sm:$0xff] }
 0x3b7   :  { %7571 = vst [vmem:[#allocation23_spill] sm:$0xff] %v6131_v8  ;;  %v6140_v63 = vadd.f32 %v2238_v36, %v5837_v46  ;;  %v2204_v24 = vmul.f32 %v2171_v35, %v7572_v40  ;;  %2362 = vadd.xlane.f32.xlu0 %v2304_v18  ;;  %v2203_v38 = vmul.f32 %v2169_v37, %v7574_v26  ;;  %v7575_v36 = vld [vmem:[#allocation32_spill] sm:$0xff]  ;;  %v7577_v37 = vld [vmem:[#allocation25_spill] sm:$0xff]  ;;  %v7584_v8 = vld [vmem:[#allocation7_spill] sm:$0xff] }
 0x3b8   :  { %v6144_v25 = vadd.f32 %v2237_v42, %v7573_v3  ;;  %2360 = vadd.xlane.f32.xlu1 %v2303_v49  ;;  %v7576_v42 = vld [vmem:[#allocation31_spill] sm:$0xff] }
 0x3b9   :  { %v2240_v41 = vadd.f32 %v5878_v27, %v2204_v24  ;;  %v2306_v61 = vmul.f32 %v5890_v16, %v6140_v63  ;;  %v2239_v20 = vadd.f32 %v5878_v27, %v2203_v38 }
 0x3ba   :  { %v2305_v46 = vmul.f32 %v5890_v16, %v6144_v25  ;;  %v2173_v18 = vpop.xlane.xlu1 %2172 }
 0x3bb   :  { %v6154_v59 = vadd.f32 %v2240_v41, %v7575_v36  ;;  %2366 = vadd.xlane.f32.xlu0 %v2306_v61  ;;  %v6157_v35 = vadd.f32 %v2239_v20, %v7576_v42  ;;  %v2205_v49 = vmul.f32 %v2173_v18, %v7577_v37  ;;  %v7580_v20 = vsub.s32 3, %v5110_v57 }
 0x3bc   :  { %2364 = vadd.xlane.f32.xlu1 %v2305_v46  ;;  %v7581_v46 = vld [vmem:[#allocation27_spill] sm:$0xff]  ;;  %v7408_v18 = vsub.s32 4, %v5110_v57 }
 0x3bd   :  { %v2308_v24 = vmul.f32 %v5890_v16, %v6154_v59  ;;  %v2241_v3 = vadd.f32 %v5878_v27, %v2205_v49  ;;  %v2307_v38 = vmul.f32 %v5890_v16, %v6157_v35  ;;  %v6173_v36 = vrot.slane %v7581_v46, %v7580_v20 }
 0x3bf   :  { %2370 = vadd.xlane.f32.xlu0 %v2308_v24  ;;  %v6166_v41 = vadd.f32 %v2241_v3, %v7578_v19  ;;  %v6181_v19 = vrot.slane %v5124_v62, %v7408_v18  ;;  %v7582_v3 = vld [vmem:[#allocation35_spill] sm:$0xff] }
 0x3c0   :  { %2368 = vadd.xlane.f32.xlu1 %v2307_v38 }
 0x3c1   :  { %7579 = vst [vmem:[#allocation30_spill] sm:$0xff] %v6166_v41  ;;  %v2309_v61 = vmul.f32 %v5890_v16, %v6166_v41 }
 0x3c4   :  { %2372 = vadd.xlane.f32.xlu1 %v2309_v61  ;;  %v7583_v61 = vld [vmem:[#allocation4_spill] sm:$0xff] }
 0x40f   :  { %v2311_v27 = vpop.xlane.xlu0 %2310 }
 0x410   :  { %v2374_v42 = vmul.f32 %v2311_v27, %v5137_v10 }
 0x412   :  { %v2410_v49 = vadd.f32 %v6173_v36, %v2374_v42 }
 0x413   :  { %v2315_v24 = vpop.xlane.xlu0 %2314 }
 0x414   :  { %v2313_v16 = vpop.xlane.xlu1 %2312  ;;  %v6184_v38 = vadd.f32 %v2410_v49, %v7582_v3  ;;  %v2376_v20 = vmul.f32 %v2315_v24, %v7583_v61 }
 0x415   :  { %v2375_v46 = vmul.f32 %v2313_v16, %v7584_v8 }
 0x416   :  { %v2412_v41 = vadd.f32 %v6173_v36, %v2376_v20  ;;  %v2478_v42 = vmul.f32 %v6181_v19, %v6184_v38 }
 0x417   :  { %v2411_v27 = vadd.f32 %v6173_v36, %v2375_v46  ;;  %v2319_v10 = vpop.xlane.xlu0 %2318 }
 0x418   :  { %v6193_v18 = vadd.f32 %v2412_v41, %v5906_v5  ;;  %v2378_v49 = vmul.f32 %v2319_v10, %v5158_v28  ;;  %v2317_v3 = vpop.xlane.xlu1 %2316  ;;  %2510 = vadd.xlane.f32.xlu0 %v2478_v42 }
 0x419   :  { %v6196_v62 = vadd.f32 %v2411_v27, %v5910_v56  ;;  %v2377_v24 = vmul.f32 %v2317_v3, %v5140_v12 }
 0x41a   :  { %v2414_v16 = vadd.f32 %v6173_v36, %v2378_v49  ;;  %v2480_v46 = vmul.f32 %v6181_v19, %v6193_v18 }
 0x41b   :  { %v2479_v20 = vmul.f32 %v6181_v19, %v6196_v62  ;;  %v2413_v5 = vadd.f32 %v6173_v36, %v2377_v24  ;;  %v2323_v41 = vpop.xlane.xlu0 %2322 }
 0x41c   :  { %v6207_v56 = vadd.f32 %v2414_v16, %v5925_v14  ;;  %v2380_v10 = vmul.f32 %v2323_v41, %v5161_v30  ;;  %v2321_v27 = vpop.xlane.xlu1 %2320  ;;  %2514 = vadd.xlane.f32.xlu0 %v2480_v46 }
 0x41d   :  { %2512 = vadd.xlane.f32.xlu1 %v2479_v20  ;;  %v6211_v42 = vadd.f32 %v2413_v5, %v5930_v4  ;;  %v2379_v49 = vmul.f32 %v2321_v27, %v5167_v32 }
 0x41e   :  { %v2416_v3 = vadd.f32 %v6173_v36, %v2380_v10  ;;  %v2482_v12 = vmul.f32 %v6181_v19, %v6207_v56 }
 0x41f   :  { %v2415_v24 = vadd.f32 %v6173_v36, %v2379_v49  ;;  %v2327_v28 = vpop.xlane.xlu0 %2326  ;;  %v2481_v14 = vmul.f32 %v6181_v19, %v6211_v42 }
 0x420   :  { %v6221_v16 = vadd.f32 %v2416_v3, %v5942_v34  ;;  %v2382_v46 = vmul.f32 %v2327_v28, %v5181_v45  ;;  %v2325_v4 = vpop.xlane.xlu1 %2324  ;;  %2518 = vadd.xlane.f32.xlu0 %v2482_v12 }
 0x421   :  { %v6225_v20 = vadd.f32 %v2415_v24, %v5946_v51  ;;  %v2381_v5 = vmul.f32 %v2325_v4, %v5164_v31  ;;  %2516 = vadd.xlane.f32.xlu1 %v2481_v14 }
 0x422   :  { %v2418_v41 = vadd.f32 %v6173_v36, %v2382_v46  ;;  %v2484_v10 = vmul.f32 %v6181_v19, %v6221_v16 }
 0x423   :  { %v2417_v27 = vadd.f32 %v6173_v36, %v2381_v5  ;;  %v2331_v49 = vpop.xlane.xlu0 %2330  ;;  %v2483_v34 = vmul.f32 %v6181_v19, %v6225_v20 }
 0x424   :  { %v6235_v28 = vadd.f32 %v2418_v41, %v5961_v55  ;;  %v2384_v12 = vmul.f32 %v2331_v49, %v5187_v47  ;;  %v2329_v51 = vpop.xlane.xlu1 %2328  ;;  %2522 = vadd.xlane.f32.xlu0 %v2484_v10 }
 0x425   :  { %v6239_v3 = vadd.f32 %v2417_v27, %v5966_v53  ;;  %v2383_v24 = vmul.f32 %v2329_v51, %v5193_v17  ;;  %2520 = vadd.xlane.f32.xlu1 %v2483_v34 }
 0x426   :  { %v2420_v14 = vadd.f32 %v6173_v36, %v2384_v12  ;;  %v2486_v46 = vmul.f32 %v6181_v19, %v6235_v28 }
 0x427   :  { %v2419_v4 = vadd.f32 %v6173_v36, %v2383_v24  ;;  %v2485_v55 = vmul.f32 %v6181_v19, %v6239_v3 }
 0x428   :  { %v2335_v5 = vpop.xlane.xlu0 %2334  ;;  %v6249_v41 = vadd.f32 %v2420_v14, %v5978_v29  ;;  %2526 = vadd.xlane.f32.xlu0 %v2486_v46 }
 0x429   :  { %v2386_v53 = vmul.f32 %v2335_v5, %v5209_v9  ;;  %v2333_v10 = vpop.xlane.xlu1 %2332  ;;  %v6253_v27 = vadd.f32 %v2419_v4, %v5982_v7  ;;  %2524 = vadd.xlane.f32.xlu1 %v2485_v55 }
 0x42a   :  { %v2385_v49 = vmul.f32 %v2333_v10, %v5190_v48  ;;  %v2488_v12 = vmul.f32 %v6181_v19, %v6249_v41 }
 0x42b   :  { %v2422_v34 = vadd.f32 %v6173_v36, %v2386_v53  ;;  %v2487_v29 = vmul.f32 %v6181_v19, %v6253_v27 }
 0x42c   :  { %v2421_v51 = vadd.f32 %v6173_v36, %v2385_v49  ;;  %v2339_v24 = vpop.xlane.xlu0 %2338  ;;  %2530 = vadd.xlane.f32.xlu0 %v2488_v12 }
 0x42d   :  { %v6263_v14 = vadd.f32 %v2422_v34, %v5997_v6  ;;  %v2388_v7 = vmul.f32 %v2339_v24, %v5215_v54  ;;  %v2337_v46 = vpop.xlane.xlu1 %2336  ;;  %2528 = vadd.xlane.f32.xlu1 %v2487_v29 }
 0x42e   :  { %v6267_v4 = vadd.f32 %v2421_v51, %v6002_v23  ;;  %v2387_v5 = vmul.f32 %v2337_v46, %v5221_v15 }
 0x42f   :  { %v2424_v55 = vadd.f32 %v6173_v36, %v2388_v7  ;;  %v2490_v53 = vmul.f32 %v6181_v19, %v6263_v14 }
 0x430   :  { %v2423_v10 = vadd.f32 %v6173_v36, %v2387_v5  ;;  %v2343_v49 = vpop.xlane.xlu0 %2342  ;;  %v2489_v6 = vmul.f32 %v6181_v19, %v6267_v4 }
 0x431   :  { %v6277_v34 = vadd.f32 %v2424_v55, %v6014_v2  ;;  %v2390_v23 = vmul.f32 %v2343_v49, %v5232_v21  ;;  %v2341_v12 = vpop.xlane.xlu1 %2340  ;;  %2534 = vadd.xlane.f32.xlu0 %v2490_v53  ;;  %v7587_v55 = vld [vmem:[#allocation46_spill] sm:$0xff] }
 0x432   :  { %v6281_v51 = vadd.f32 %v2423_v10, %v6018_v11  ;;  %v2389_v24 = vmul.f32 %v2341_v12, %v5218_v13  ;;  %2532 = vadd.xlane.f32.xlu1 %v2489_v6  ;;  %v7588_v53 = vld [vmem:[#allocation14_spill] sm:$0xff]  ;;  %v7589_v12 = vld [vmem:[#allocation45_spill] sm:$0xff] }
 0x433   :  { %7585 = vst [vmem:[#allocation21_spill] sm:$0xff] %v6277_v34  ;;  %v2426_v29 = vadd.f32 %v6173_v36, %v2390_v23  ;;  %v2492_v7 = vmul.f32 %v6181_v19, %v6277_v34  ;;  %v7590_v23 = vld [vmem:[#allocation12_spill] sm:$0xff] }
 0x434   :  { %7586 = vst [vmem:[#allocation26_spill] sm:$0xff] %v6281_v51  ;;  %v2425_v46 = vadd.f32 %v6173_v36, %v2389_v24  ;;  %v2347_v5 = vpop.xlane.xlu0 %2346  ;;  %v2491_v2 = vmul.f32 %v6181_v19, %v6281_v51 }
 0x435   :  { %v6291_v49 = vadd.f32 %v2426_v29, %v7587_v55  ;;  %v2392_v11 = vmul.f32 %v2347_v5, %v7588_v53  ;;  %v2345_v10 = vpop.xlane.xlu1 %2344  ;;  %2538 = vadd.xlane.f32.xlu0 %v2492_v7 }
 0x436   :  { %v6295_v6 = vadd.f32 %v2425_v46, %v7589_v12  ;;  %v2391_v13 = vmul.f32 %v2345_v10, %v7590_v23  ;;  %2536 = vadd.xlane.f32.xlu1 %v2491_v2 }
 0x437   :  { %v2428_v21 = vadd.f32 %v6173_v36, %v2392_v11  ;;  %v2494_v24 = vmul.f32 %v6181_v19, %v6291_v49 }
 0x438   :  { %v2427_v51 = vadd.f32 %v6173_v36, %v2391_v13  ;;  %v2351_v34 = vpop.xlane.xlu0 %2350  ;;  %v2493_v29 = vmul.f32 %v6181_v19, %v6295_v6 }
 0x439   :  { %v6305_v5 = vadd.f32 %v2428_v21, %v6050_v44  ;;  %v2394_v7 = vmul.f32 %v2351_v34, %v7550_v1  ;;  %v2349_v46 = vpop.xlane.xlu1 %2348  ;;  %2542 = vadd.xlane.f32.xlu0 %v2494_v24  ;;  %v7593_v44 = vld [vmem:[#allocation49_spill] sm:$0xff]  ;;  %v7594_v24 = vld [vmem:[#allocation18_spill] sm:$0xff] }
 0x43a   :  { %v6309_v2 = vadd.f32 %v2427_v51, %v6054_v50  ;;  %v2393_v55 = vmul.f32 %v2349_v46, %v7552_v60  ;;  %2540 = vadd.xlane.f32.xlu1 %v2493_v29  ;;  %v7595_v46 = vld [vmem:[#allocation50_spill] sm:$0xff] }
 0x43b   :  { %7591 = vst [vmem:[#allocation29_spill] sm:$0xff] %v6305_v5  ;;  %v2430_v11 = vadd.f32 %v6173_v36, %v2394_v7  ;;  %v2496_v13 = vmul.f32 %v6181_v19, %v6305_v5  ;;  %v7596_v7 = vld [vmem:[#allocation16_spill] sm:$0xff] }
 0x43c   :  { %7592 = vst [vmem:[#allocation24_spill] sm:$0xff] %v6309_v2  ;;  %v2429_v10 = vadd.f32 %v6173_v36, %v2393_v55  ;;  %v2355_v12 = vpop.xlane.xlu0 %2354  ;;  %v2495_v21 = vmul.f32 %v6181_v19, %v6309_v2 }
 0x43d   :  { %v6319_v34 = vadd.f32 %v2430_v11, %v7593_v44  ;;  %v2396_v50 = vmul.f32 %v2355_v12, %v7594_v24  ;;  %v2353_v51 = vpop.xlane.xlu1 %2352  ;;  %2546 = vadd.xlane.f32.xlu0 %v2496_v13  ;;  %v7599_v44 = vld [vmem:[#allocation17_spill] sm:$0xff] }
 0x43e   :  { %v6323_v29 = vadd.f32 %v2429_v10, %v7595_v46  ;;  %v2395_v60 = vmul.f32 %v2353_v51, %v7596_v7  ;;  %2544 = vadd.xlane.f32.xlu1 %v2495_v21 }
 0x43f   :  { %v2432_v1 = vadd.f32 %v6173_v36, %v2396_v50  ;;  %v2498_v55 = vmul.f32 %v6181_v19, %v6319_v34 }
 0x440   :  { %v2431_v2 = vadd.f32 %v6173_v36, %v2395_v60  ;;  %v2359_v5 = vpop.xlane.xlu0 %2358  ;;  %v2497_v11 = vmul.f32 %v6181_v19, %v6323_v29 }
 0x441   :  { %v6333_v12 = vadd.f32 %v2432_v1, %v6086_v22  ;;  %v2398_v13 = vmul.f32 %v2359_v5, %v7558_v43  ;;  %v2357_v10 = vpop.xlane.xlu1 %2356  ;;  %2550 = vadd.xlane.f32.xlu0 %v2498_v55  ;;  %v7600_v22 = vld [vmem:[#allocation53_spill] sm:$0xff]  ;;  %v7601_v55 = vld [vmem:[#allocation22_spill] sm:$0xff] }
 0x442   :  { %v6337_v21 = vadd.f32 %v2431_v2, %v6090_v52  ;;  %v2397_v50 = vmul.f32 %v2357_v10, %v7599_v44  ;;  %2548 = vadd.xlane.f32.xlu1 %v2497_v11  ;;  %v7602_v10 = vld [vmem:[#allocation54_spill] sm:$0xff] }
 0x443   :  { %7597 = vst [vmem:[#allocation32_spill] sm:$0xff] %v6333_v12  ;;  %v2434_v51 = vadd.f32 %v6173_v36, %v2398_v13  ;;  %v2500_v60 = vmul.f32 %v6181_v19, %v6333_v12  ;;  %v7603_v13 = vld [vmem:[#allocation20_spill] sm:$0xff] }
 0x444   :  { %7598 = vst [vmem:[#allocation31_spill] sm:$0xff] %v6337_v21  ;;  %v2433_v46 = vadd.f32 %v6173_v36, %v2397_v50  ;;  %v2363_v7 = vpop.xlane.xlu0 %2362  ;;  %v2499_v1 = vmul.f32 %v6181_v19, %v6337_v21 }
 0x445   :  { %v6347_v5 = vadd.f32 %v2434_v51, %v7600_v22  ;;  %v2400_v52 = vmul.f32 %v2363_v7, %v7601_v55  ;;  %v2361_v2 = vpop.xlane.xlu1 %2360  ;;  %2554 = vadd.xlane.f32.xlu0 %v2500_v60 }
 0x446   :  { %v6351_v11 = vadd.f32 %v2433_v46, %v7602_v10  ;;  %v2399_v44 = vmul.f32 %v2361_v2, %v7603_v13  ;;  %2552 = vadd.xlane.f32.xlu1 %v2499_v1 }
 0x447   :  { %v2436_v43 = vadd.f32 %v6173_v36, %v2400_v52  ;;  %v2502_v50 = vmul.f32 %v6181_v19, %v6347_v5 }
 0x448   :  { %v2435_v21 = vadd.f32 %v6173_v36, %v2399_v44  ;;  %v2367_v12 = vpop.xlane.xlu0 %2366  ;;  %v2501_v51 = vmul.f32 %v6181_v19, %v6351_v11 }
 0x449   :  { %v6361_v7 = vadd.f32 %v2436_v43, %v6122_v0  ;;  %v2402_v60 = vmul.f32 %v2367_v12, %v7567_v58  ;;  %v2365_v46 = vpop.xlane.xlu1 %2364  ;;  %2558 = vadd.xlane.f32.xlu0 %v2502_v50 }
 0x44a   :  { %v6365_v1 = vadd.f32 %v2435_v21, %v6126_v39  ;;  %v2401_v22 = vmul.f32 %v2365_v46, %v7570_v33  ;;  %2556 = vadd.xlane.f32.xlu1 %v2501_v51 }
 0x44b   :  { %v2438_v52 = vadd.f32 %v6173_v36, %v2402_v60  ;;  %v2504_v44 = vmul.f32 %v6181_v19, %v6361_v7 }
 0x44c   :  { %v2437_v2 = vadd.f32 %v6173_v36, %v2401_v22  ;;  %v2371_v10 = vpop.xlane.xlu0 %2370  ;;  %v2503_v43 = vmul.f32 %v6181_v19, %v6365_v1 }
 0x44d   :  { %v6375_v0 = vadd.f32 %v2438_v52, %v6140_v63  ;;  %v2404_v39 = vmul.f32 %v2371_v10, %v7572_v40  ;;  %v2369_v12 = vpop.xlane.xlu1 %2368  ;;  %2562 = vadd.xlane.f32.xlu0 %v2504_v44 }
 0x44e   :  { %v6379_v21 = vadd.f32 %v2437_v2, %v6144_v25  ;;  %v2403_v50 = vmul.f32 %v2369_v12, %v7574_v26  ;;  %2560 = vadd.xlane.f32.xlu1 %v2503_v43  ;;  %v4587_v12 = vld [vmem:[%s7327_s2 + $0x11c] sm:$0xff]  }
 0x44f   :  { %v2440_v51 = vadd.f32 %v6173_v36, %v2404_v39  ;;  %v2506_v60 = vmul.f32 %v6181_v19, %v6375_v0  ;;  %v7604_v39 = vld [vmem:[#allocation30_spill] sm:$0xff]  ;;  %4398 = vmatprep.subr.bf16.mxu1 %v4587_v12 }
 0x450   :  { %v2439_v46 = vadd.f32 %v6173_v36, %v2403_v50  ;;  %v2505_v63 = vmul.f32 %v6181_v19, %v6379_v21  ;;  %4399 = vmatpush3.bf16.msra.mxu1 %v4587_v12  ;;  %v4589_v50 = vld [vmem:[%s7327_s2 + $0x12c] sm:$0xff]  }
 0x451   :  { %v6389_v22 = vadd.f32 %v2440_v51, %v6154_v59  ;;  %v2373_v52 = vpop.xlane.xlu1 %2372  ;;  %2566 = vadd.xlane.f32.xlu0 %v2506_v60  ;;  %v4591_v51 = vld [vmem:[%s7327_s2 + $0x13c] sm:$0xff]   ;;  %v4592_v60 = vld [vmem:[%s7327_s2 + $0x144] sm:$0xff]  }
 0x452   :  { %v6392_v25 = vadd.f32 %v2439_v46, %v6157_v35  ;;  %v2405_v44 = vmul.f32 %v2373_v52, %v7577_v37  ;;  %2564 = vadd.xlane.f32.xlu1 %v2505_v63  ;;  %v4593_v46 = vld [vmem:[%s7327_s2 + $0x14c] sm:$0xff]   ;;  %v7605_v63 = vsub.s32 4, %v5110_v57 }
 0x453   :  { %v2508_v2 = vmul.f32 %v6181_v19, %v6389_v22  ;;  %v7606_v52 = vld [vmem:[#allocation27_spill] sm:$0xff] }
 0x454   :  { %v2441_v10 = vadd.f32 %v6173_v36, %v2405_v44  ;;  %v2507_v43 = vmul.f32 %v6181_v19, %v6392_v25  ;;  %v4588_v36 = vld [vmem:[%s7327_s2 + $0x124] sm:$0xff]   ;;  %v6429_v44 = vrot.slane %v7606_v52, %v7605_v63 }
 0x455   :  { %2570 = vadd.xlane.f32.xlu0 %v2508_v2  ;;  %4400 = vmatprep.subr.bf16.mxu1 %v4588_v36  ;;  %v7427_v2 = vsub.s32 5, %v5110_v57  ;;  %v7608_v12 = vld [vmem:[#allocation3_spill] sm:$0xff] }
 0x456   :  { %v6401_v59 = vadd.f32 %v2441_v10, %v7604_v39  ;;  %2568 = vadd.xlane.f32.xlu1 %v2507_v43  ;;  %4401 = vmatpush3.bf16.msra.mxu1 %v4588_v36  ;;  %v7607_v43 = vld [vmem:[#allocation5_spill] sm:$0xff] }
 0x457   :  { %4402 = vmatprep.subr.bf16.mxu1 %v4589_v50  ;;  %v6437_v36 = vrot.slane %v7608_v12, %v7427_v2 }
 0x458   :  { %v2509_v35 = vmul.f32 %v6181_v19, %v6401_v59  ;;  %v4590_v19 = vld [vmem:[%s7327_s2 + $0x134] sm:$0xff]  }
 0x45a   :  { %2572 = vadd.xlane.f32.xlu1 %v2509_v35  ;;  %4403 = vmatpush3.bf16.msra.mxu1 %v4589_v50 }
 0x45b   :  { %4404 = vmatprep.subr.bf16.mxu1 %v4590_v19 }
 0x45e   :  { %4405 = vmatpush3.bf16.msra.mxu1 %v4590_v19 }
 0x45f   :  { %4406 = vmatprep.subr.bf16.mxu1 %v4591_v51 }
 0x462   :  { %4407 = vmatpush3.bf16.msra.mxu1 %v4591_v51 }
 0x463   :  { %4408 = vmatprep.subr.bf16.mxu1 %v4592_v60 }
 0x466   :  { %4409 = vmatpush3.bf16.msra.mxu1 %v4592_v60 }
 0x467   :  { %4410 = vmatprep.subr.bf16.mxu1 %v4593_v46 }
 0x46a   :  { %4411 = vmatpush3.bf16.msra.mxu1 %v4593_v46 }
 0x4a5   :  { %v2511_v10 = vpop.xlane.xlu0 %2510 }
 0x4a6   :  { %v2574_v39 = vmul.f32 %v2511_v10, %v7607_v43 }
 0x4a8   :  { %v2610_v35 = vadd.f32 %v6429_v44, %v2574_v39 }
 0x4a9   :  { %v2515_v50 = vpop.xlane.xlu0 %2514 }
 0x4aa   :  { %v2513_v19 = vpop.xlane.xlu1 %2512  ;;  %v6440_v51 = vadd.f32 %v2610_v35, %v6184_v38  ;;  %v2576_v60 = vmul.f32 %v2515_v50, %v7583_v61  ;;  %v7611_v38 = vld [vmem:[#allocation8_spill] sm:$0xff]  ;;  %v7612_v50 = vld [vmem:[#allocation6_spill] sm:$0xff] }
 0x4ab   :  { %v2575_v46 = vmul.f32 %v2513_v19, %v7584_v8 }
 0x4ac   :  { %7609 = vst [vmem:[#allocation25_spill] sm:$0xff] %v6440_v51  ;;  %v2612_v63 = vadd.f32 %v6429_v44, %v2576_v60  ;;  %v2678_v39 = vmul.f32 %v6437_v36, %v6440_v51 }
 0x4ad   :  { %v2611_v10 = vadd.f32 %v6429_v44, %v2575_v46  ;;  %v2519_v43 = vpop.xlane.xlu0 %2518 }
 0x4ae   :  { %v6449_v12 = vadd.f32 %v2612_v63, %v6193_v18  ;;  %v2578_v35 = vmul.f32 %v2519_v43, %v7611_v38  ;;  %v2517_v52 = vpop.xlane.xlu1 %2516  ;;  %2710 = vadd.xlane.f32.xlu0 %v2678_v39 }
 0x4af   :  { %v6452_v2 = vadd.f32 %v2611_v10, %v6196_v62  ;;  %v2577_v19 = vmul.f32 %v2517_v52, %v7612_v50 }
 0x4b0   :  { %7610 = vst [vmem:[#allocation34_spill] sm:$0xff] %v6449_v12  ;;  %v2614_v60 = vadd.f32 %v6429_v44, %v2578_v35  ;;  %v2680_v46 = vmul.f32 %v6437_v36, %v6449_v12 }
 0x4b1   :  { %v2679_v51 = vmul.f32 %v6437_v36, %v6452_v2  ;;  %v2613_v18 = vadd.f32 %v6429_v44, %v2577_v19  ;;  %v2523_v63 = vpop.xlane.xlu0 %2522 }
 0x4b2   :  { %v6463_v62 = vadd.f32 %v2614_v60, %v6207_v56  ;;  %v2580_v43 = vmul.f32 %v2523_v63, %v5161_v30  ;;  %v2521_v10 = vpop.xlane.xlu1 %2520  ;;  %2714 = vadd.xlane.f32.xlu0 %v2680_v46 }
 0x4b3   :  { %2712 = vadd.xlane.f32.xlu1 %v2679_v51  ;;  %v6467_v52 = vadd.f32 %v2613_v18, %v6211_v42  ;;  %v2579_v39 = vmul.f32 %v2521_v10, %v5167_v32 }
 0x4b4   :  { %v2616_v35 = vadd.f32 %v6429_v44, %v2580_v43  ;;  %v2682_v12 = vmul.f32 %v6437_v36, %v6463_v62 }
 0x4b5   :  { %v2615_v19 = vadd.f32 %v6429_v44, %v2579_v39  ;;  %v2527_v50 = vpop.xlane.xlu0 %2526  ;;  %v2681_v56 = vmul.f32 %v6437_v36, %v6467_v52 }
 0x4b6   :  { %v6477_v60 = vadd.f32 %v2616_v35, %v6221_v16  ;;  %v2582_v51 = vmul.f32 %v2527_v50, %v5181_v45  ;;  %v2525_v42 = vpop.xlane.xlu1 %2524  ;;  %2718 = vadd.xlane.f32.xlu0 %v2682_v12 }
 0x4b7   :  { %v6481_v46 = vadd.f32 %v2615_v19, %v6225_v20  ;;  %v2581_v18 = vmul.f32 %v2525_v42, %v5164_v31  ;;  %2716 = vadd.xlane.f32.xlu1 %v2681_v56 }
 0x4b8   :  { %v2618_v63 = vadd.f32 %v6429_v44, %v2582_v51  ;;  %v2684_v43 = vmul.f32 %v6437_v36, %v6477_v60 }
 0x4b9   :  { %v2617_v10 = vadd.f32 %v6429_v44, %v2581_v18  ;;  %v2531_v39 = vpop.xlane.xlu0 %2530  ;;  %v2683_v16 = vmul.f32 %v6437_v36, %v6481_v46 }
 0x4ba   :  { %v6491_v50 = vadd.f32 %v2618_v63, %v6235_v28  ;;  %v2584_v20 = vmul.f32 %v2531_v39, %v5187_v47  ;;  %v2529_v12 = vpop.xlane.xlu1 %2528  ;;  %2722 = vadd.xlane.f32.xlu0 %v2684_v43 }
 0x4bb   :  { %v6495_v35 = vadd.f32 %v2617_v10, %v6239_v3  ;;  %v2583_v19 = vmul.f32 %v2529_v12, %v5193_v17  ;;  %2720 = vadd.xlane.f32.xlu1 %v2683_v16 }
 0x4bc   :  { %v2620_v56 = vadd.f32 %v6429_v44, %v2584_v20  ;;  %v2686_v51 = vmul.f32 %v6437_v36, %v6491_v50 }
 0x4bd   :  { %v2619_v42 = vadd.f32 %v6429_v44, %v2583_v19  ;;  %v2685_v28 = vmul.f32 %v6437_v36, %v6495_v35 }
 0x4be   :  { %v2535_v18 = vpop.xlane.xlu0 %2534  ;;  %v6505_v63 = vadd.f32 %v2620_v56, %v6249_v41  ;;  %2726 = vadd.xlane.f32.xlu0 %v2686_v51 }
 0x4bf   :  { %v2586_v3 = vmul.f32 %v2535_v18, %v5209_v9  ;;  %v2533_v43 = vpop.xlane.xlu1 %2532  ;;  %v6509_v10 = vadd.f32 %v2619_v42, %v6253_v27  ;;  %2724 = vadd.xlane.f32.xlu1 %v2685_v28 }
 0x4c0   :  { %v2585_v39 = vmul.f32 %v2533_v43, %v5190_v48  ;;  %v2688_v20 = vmul.f32 %v6437_v36, %v6505_v63 }
 0x4c1   :  { %v2622_v16 = vadd.f32 %v6429_v44, %v2586_v3  ;;  %v2687_v41 = vmul.f32 %v6437_v36, %v6509_v10 }
 0x4c2   :  { %v2621_v12 = vadd.f32 %v6429_v44, %v2585_v39  ;;  %v2539_v19 = vpop.xlane.xlu0 %2538  ;;  %2730 = vadd.xlane.f32.xlu0 %v2688_v20 }
 0x4c3   :  { %v6519_v56 = vadd.f32 %v2622_v16, %v6263_v14  ;;  %v2588_v27 = vmul.f32 %v2539_v19, %v5215_v54  ;;  %v2537_v51 = vpop.xlane.xlu1 %2536  ;;  %2728 = vadd.xlane.f32.xlu1 %v2687_v41  ;;  %v4594_v14 = vld [vmem:[%s7327_s2 + $0x154] sm:$0xff]  }
 0x4c4   :  { %v6523_v42 = vadd.f32 %v2621_v12, %v6267_v4  ;;  %v2587_v18 = vmul.f32 %v2537_v51, %v5221_v15  ;;  %v7615_v4 = vld [vmem:[#allocation21_spill] sm:$0xff]  ;;  %v7617_v12 = vld [vmem:[#allocation11_spill] sm:$0xff]  ;;  %4412 = vmatprep.subr.bf16.mxu1 %v4594_v14 }
 0x4c5   :  { %7613 = vst [vmem:[#allocation35_spill] sm:$0xff] %v6519_v56  ;;  %v2624_v28 = vadd.f32 %v6429_v44, %v2588_v27  ;;  %v2690_v3 = vmul.f32 %v6437_v36, %v6519_v56  ;;  %v7618_v27 = vld [vmem:[#allocation26_spill] sm:$0xff]  ;;  %v7619_v56 = vld [vmem:[#allocation9_spill] sm:$0xff]  ;;  %4413 = vmatpush3.bf16.msra.mxu1 %v4594_v14 }
 0x4c6   :  { %7614 = vst [vmem:[#allocation4_spill] sm:$0xff] %v6523_v42  ;;  %v2623_v43 = vadd.f32 %v6429_v44, %v2587_v18  ;;  %v2543_v39 = vpop.xlane.xlu0 %2542  ;;  %v2689_v16 = vmul.f32 %v6437_v36, %v6523_v42 }
 0x4c7   :  { %v6536_v20 = vadd.f32 %v2624_v28, %v7615_v4  ;;  %v2590_v19 = vmul.f32 %v2543_v39, %v7617_v12  ;;  %v2541_v41 = vpop.xlane.xlu1 %2540  ;;  %2734 = vadd.xlane.f32.xlu0 %v2690_v3 }
 0x4c8   :  { %v6540_v51 = vadd.f32 %v2623_v43, %v7618_v27  ;;  %v2589_v15 = vmul.f32 %v2541_v41, %v7619_v56  ;;  %2732 = vadd.xlane.f32.xlu1 %v2689_v16 }
 0x4c9   :  { %7616 = vst [vmem:[#allocation7_spill] sm:$0xff] %v6536_v20  ;;  %v2626_v18 = vadd.f32 %v6429_v44, %v2590_v19  ;;  %v2692_v42 = vmul.f32 %v6437_v36, %v6536_v20 }
 0x4ca   :  { %v2625_v28 = vadd.f32 %v6429_v44, %v2589_v15  ;;  %v2547_v4 = vpop.xlane.xlu0 %2546  ;;  %v2691_v39 = vmul.f32 %v6437_v36, %v6540_v51 }
 0x4cb   :  { %v6550_v3 = vadd.f32 %v2626_v18, %v6291_v49  ;;  %v2592_v43 = vmul.f32 %v2547_v4, %v7588_v53  ;;  %v2545_v27 = vpop.xlane.xlu1 %2544  ;;  %2738 = vadd.xlane.f32.xlu0 %v2692_v42  ;;  %v6566_v42 = vld [vmem:[%s7327_s2 + $0xdc] sm:$0xff]  }
 0x4cc   :  { %v6554_v14 = vadd.f32 %v2625_v28, %v6295_v6  ;;  %v2591_v16 = vmul.f32 %v2545_v27, %v7590_v23  ;;  %2736 = vadd.xlane.f32.xlu1 %v2691_v39  ;;  %v7621_v6 = vld [vmem:[#allocation29_spill] sm:$0xff]  ;;  %v7623_v28 = vld [vmem:[#allocation15_spill] sm:$0xff]  ;;  %4446 = vmatprep.subr.bf16.mxu1 %v6566_v42 }
 0x4cd   :  { %7620 = vst [vmem:[#allocation46_spill] sm:$0xff] %v6550_v3  ;;  %v2628_v19 = vadd.f32 %v6429_v44, %v2592_v43  ;;  %v2694_v15 = vmul.f32 %v6437_v36, %v6550_v3  ;;  %v7624_v43 = vld [vmem:[#allocation24_spill] sm:$0xff] }
 0x4ce   :  { %v2627_v41 = vadd.f32 %v6429_v44, %v2591_v16  ;;  %v2551_v20 = vpop.xlane.xlu0 %2550  ;;  %v2693_v49 = vmul.f32 %v6437_v36, %v6554_v14  ;;  %v7626_v16 = vld [vmem:[#allocation13_spill] sm:$0xff] }
 0x4cf   :  { %v6569_v18 = vadd.f32 %v2628_v19, %v7621_v6  ;;  %v2594_v4 = vmul.f32 %v2551_v20, %v7623_v28  ;;  %v2549_v39 = vpop.xlane.xlu1 %2548  ;;  %2742 = vadd.xlane.f32.xlu0 %v2694_v15 }
 0x4d0   :  { %v6573_v27 = vadd.f32 %v2627_v41, %v7624_v43  ;;  %v2593_v3 = vmul.f32 %v2549_v39, %v7626_v16  ;;  %2740 = vadd.xlane.f32.xlu1 %v2693_v49 }
 0x4d1   :  { %7622 = vst [vmem:[#allocation45_spill] sm:$0xff] %v6569_v18  ;;  %v2630_v23 = vadd.f32 %v6429_v44, %v2594_v4  ;;  %v2696_v53 = vmul.f32 %v6437_v36, %v6569_v18  ;;  %v7629_v4 = vld [vmem:[#allocation16_spill] sm:$0xff] }
 0x4d2   :  { %7625 = vst [vmem:[#allocation49_spill] sm:$0xff] %v6573_v27  ;;  %v2629_v19 = vadd.f32 %v6429_v44, %v2593_v3  ;;  %v2555_v6 = vpop.xlane.xlu0 %2554  ;;  %v2695_v20 = vmul.f32 %v6437_v36, %v6573_v27 }
 0x4d3   :  { %v6584_v15 = vadd.f32 %v2630_v23, %v6319_v34  ;;  %v2596_v41 = vmul.f32 %v2555_v6, %v7594_v24  ;;  %v2553_v39 = vpop.xlane.xlu1 %2552  ;;  %2746 = vadd.xlane.f32.xlu0 %v2696_v53  ;;  %v7630_v34 = vld [vmem:[#allocation32_spill] sm:$0xff]  ;;  %v7631_v53 = vld [vmem:[#allocation19_spill] sm:$0xff] }
 0x4d4   :  { %v6588_v49 = vadd.f32 %v2629_v19, %v6323_v29  ;;  %v2595_v43 = vmul.f32 %v2553_v39, %v7629_v4  ;;  %2744 = vadd.xlane.f32.xlu1 %v2695_v20  ;;  %v7632_v39 = vld [vmem:[#allocation31_spill] sm:$0xff] }
 0x4d5   :  { %7627 = vst [vmem:[#allocation50_spill] sm:$0xff] %v6584_v15  ;;  %v2632_v18 = vadd.f32 %v6429_v44, %v2596_v41  ;;  %v2698_v3 = vmul.f32 %v6437_v36, %v6584_v15  ;;  %v7633_v41 = vld [vmem:[#allocation17_spill] sm:$0xff] }
 0x4d6   :  { %7628 = vst [vmem:[#allocation53_spill] sm:$0xff] %v6588_v49  ;;  %v2631_v16 = vadd.f32 %v6429_v44, %v2595_v43  ;;  %v2559_v27 = vpop.xlane.xlu0 %2558  ;;  %v2697_v23 = vmul.f32 %v6437_v36, %v6588_v49 }
 0x4d7   :  { %v6598_v6 = vadd.f32 %v2632_v18, %v7630_v34  ;;  %v2598_v29 = vmul.f32 %v2559_v27, %v7631_v53  ;;  %v2557_v19 = vpop.xlane.xlu1 %2556  ;;  %2750 = vadd.xlane.f32.xlu0 %v2698_v3 }
 0x4d8   :  { %v6602_v20 = vadd.f32 %v2631_v16, %v7632_v39  ;;  %v2597_v4 = vmul.f32 %v2557_v19, %v7633_v41  ;;  %2748 = vadd.xlane.f32.xlu1 %v2697_v23 }
 0x4d9   :  { %v2634_v15 = vadd.f32 %v6429_v44, %v2598_v29  ;;  %v2700_v43 = vmul.f32 %v6437_v36, %v6598_v6 }
 0x4da   :  { %v2633_v24 = vadd.f32 %v6429_v44, %v2597_v4  ;;  %v2563_v49 = vpop.xlane.xlu0 %2562  ;;  %v2699_v18 = vmul.f32 %v6437_v36, %v6602_v20 }
 0x4db   :  { %v6612_v27 = vadd.f32 %v2634_v15, %v6347_v5  ;;  %v2600_v16 = vmul.f32 %v2563_v49, %v7601_v55  ;;  %v2561_v3 = vpop.xlane.xlu1 %2560  ;;  %2754 = vadd.xlane.f32.xlu0 %v2700_v43 }
 0x4dc   :  { %v6616_v23 = vadd.f32 %v2633_v24, %v6351_v11  ;;  %v2599_v34 = vmul.f32 %v2561_v3, %v7603_v13  ;;  %2752 = vadd.xlane.f32.xlu1 %v2699_v18 }
 0x4dd   :  { %v2636_v29 = vadd.f32 %v6429_v44, %v2600_v16  ;;  %v2702_v4 = vmul.f32 %v6437_v36, %v6612_v27 }
 0x4de   :  { %v2635_v19 = vadd.f32 %v6429_v44, %v2599_v34  ;;  %v2567_v39 = vpop.xlane.xlu0 %2566  ;;  %v2701_v5 = vmul.f32 %v6437_v36, %v6616_v23 }
 0x4df   :  { %v6626_v15 = vadd.f32 %v2636_v29, %v6361_v7  ;;  %v2602_v24 = vmul.f32 %v2567_v39, %v7567_v58  ;;  %v2565_v11 = vpop.xlane.xlu1 %2564  ;;  %2758 = vadd.xlane.f32.xlu0 %v2702_v4 }
 0x4e0   :  { %v6630_v49 = vadd.f32 %v2635_v19, %v6365_v1  ;;  %v2601_v43 = vmul.f32 %v2565_v11, %v7570_v33  ;;  %2756 = vadd.xlane.f32.xlu1 %v2701_v5 }
 0x4e1   :  { %v2638_v18 = vadd.f32 %v6429_v44, %v2602_v24  ;;  %v2704_v16 = vmul.f32 %v6437_v36, %v6626_v15 }
 0x4e2   :  { %v2637_v3 = vadd.f32 %v6429_v44, %v2601_v43  ;;  %v2571_v34 = vpop.xlane.xlu0 %2570  ;;  %v2703_v7 = vmul.f32 %v6437_v36, %v6630_v49 }
 0x4e3   :  { %v6640_v29 = vadd.f32 %v2638_v18, %v6375_v0  ;;  %v2604_v1 = vmul.f32 %v2571_v34, %v7572_v40  ;;  %v2569_v4 = vpop.xlane.xlu1 %2568  ;;  %2762 = vadd.xlane.f32.xlu0 %v2704_v16 }
 0x4e4   :  { %v6644_v19 = vadd.f32 %v2637_v3, %v6379_v21  ;;  %v2603_v39 = vmul.f32 %v2569_v4, %v7574_v26  ;;  %2760 = vadd.xlane.f32.xlu1 %v2703_v7  ;;  %v7635_v4 = vsub.s32 5, %v5110_v57 }
 0x4e5   :  { %v2640_v5 = vadd.f32 %v6429_v44, %v2604_v1  ;;  %v2706_v24 = vmul.f32 %v6437_v36, %v6640_v29 }
 0x4e6   :  { %v2639_v11 = vadd.f32 %v6429_v44, %v2603_v39  ;;  %v2705_v0 = vmul.f32 %v6437_v36, %v6644_v19  ;;  %v7636_v39 = vld [vmem:[#allocation27_spill] sm:$0xff] }
 0x4e7   :  { %v6654_v43 = vadd.f32 %v2640_v5, %v6389_v22  ;;  %v2573_v18 = vpop.xlane.xlu1 %2572  ;;  %2766 = vadd.xlane.f32.xlu0 %v2706_v24  ;;  %v6673_v5 = vrot.slane %v7636_v39, %v7635_v4  ;;  %v7637_v24 = vld [vmem:[#allocation5_spill] sm:$0xff]  ;;  %v7639_v39 = vld [vmem:[#allocation6_spill] sm:$0xff] }
 0x4e8   :  { %v6657_v21 = vadd.f32 %v2639_v11, %v6392_v25  ;;  %v2605_v16 = vmul.f32 %v2573_v18, %v7577_v37  ;;  %2764 = vadd.xlane.f32.xlu1 %v2705_v0 }
 0x4e9   :  { %v2708_v3 = vmul.f32 %v6437_v36, %v6654_v43 }
 0x4ea   :  { %v2641_v34 = vadd.f32 %v6429_v44, %v2605_v16  ;;  %v2707_v7 = vmul.f32 %v6437_v36, %v6657_v21 }
 0x4eb   :  { %2770 = vadd.xlane.f32.xlu0 %v2708_v3 }
 0x4ec   :  { %v6666_v22 = vadd.f32 %v2641_v34, %v6401_v59  ;;  %2768 = vadd.xlane.f32.xlu1 %v2707_v7  ;;  %v7638_v34 = vld [vmem:[#allocation25_spill] sm:$0xff] }
 0x4ee   :  { %7634 = vst [vmem:[#allocation22_spill] sm:$0xff] %v6666_v22  ;;  %v2709_v25 = vmul.f32 %v6437_v36, %v6666_v22 }
 0x4f0   :  { %2772 = vadd.xlane.f32.xlu1 %v2709_v25 }
 0x53b   :  { %v2711_v1 = vpop.xlane.xlu0 %2710 }
 0x53c   :  { %v2774_v44 = vmul.f32 %v2711_v1, %v7637_v24 }
 0x53e   :  { %v2810_v18 = vadd.f32 %v6673_v5, %v2774_v44 }
 0x53f   :  { %v2715_v11 = vpop.xlane.xlu0 %2714 }
 0x540   :  { %v2713_v0 = vpop.xlane.xlu1 %2712  ;;  %v2776_v59 = vmul.f32 %v2715_v11, %v7583_v61  ;;  %v2842_v7 = vadd.f32 %v2810_v18, %v7638_v34  ;;  %v7640_v11 = vld [vmem:[#allocation34_spill] sm:$0xff] }
 0x541   :  { %v2775_v16 = vmul.f32 %v2713_v0, %v7584_v8  ;;  %v4596_v34 = vld [vmem:[%s7327_s2 + $0xe4] sm:$0xff]  }
 0x542   :  { %v2812_v57 = vadd.f32 %v6673_v5, %v2776_v59 }
 0x543   :  { %v2811_v3 = vadd.f32 %v6673_v5, %v2775_v16  ;;  %v2719_v36 = vpop.xlane.xlu0 %2718 }
 0x544   :  { %v2717_v4 = vpop.xlane.xlu1 %2716  ;;  %v2778_v1 = vmul.f32 %v2719_v36, %v7611_v38  ;;  %v2844_v8 = vadd.f32 %v2812_v57, %v7640_v11 }
 0x545   :  { %v2843_v25 = vadd.f32 %v2811_v3, %v6452_v2  ;;  %v2777_v24 = vmul.f32 %v2717_v4, %v7639_v39 }
 0x546   :  { %v2814_v16 = vadd.f32 %v6673_v5, %v2778_v1 }
 0x547   :  { %v2906_v22 = vpack.c.bf16 %v2843_v25, %v2842_v7  ;;  %v2813_v44 = vadd.f32 %v6673_v5, %v2777_v24  ;;  %v2723_v61 = vpop.xlane.xlu0 %2722 }
 0x548   :  { %v2721_v0 = vpop.xlane.xlu1 %2720  ;;  %v2780_v59 = vmul.f32 %v2723_v61, %v5161_v30 }
 0x549   :  { %4414 = vmatprep.mubr.bf16.mxu1 %v2906_v22  ;;  %v2845_v18 = vadd.f32 %v2813_v44, %v6467_v52  ;;  %v2779_v2 = vmul.f32 %v2721_v0, %v5167_v32  ;;  %v2846_v22 = vadd.f32 %v2814_v16, %v6463_v62 }
 0x54a   :  { %v2816_v25 = vadd.f32 %v6673_v5, %v2780_v59 }
 0x54b   :  { %v2907_v3 = vpack.c.bf16 %v2845_v18, %v2844_v8  ;;  %v2815_v38 = vadd.f32 %v6673_v5, %v2779_v2  ;;  %v2727_v36 = vpop.xlane.xlu0 %2726  ;;  %v4598_v8 = vld [vmem:[%s7327_s2 + $0xf4] sm:$0xff]  }
 0x54c   :  { %v2782_v7 = vmul.f32 %v2727_v36, %v5181_v45  ;;  %v2725_v57 = vpop.xlane.xlu1 %2724  ;;  %v4597_v45 = vld [vmem:[%s7327_s2 + $0xec] sm:$0xff]   ;;  %v2848_v24 = vadd.f32 %v2816_v25, %v6477_v60 }
 0x54d   :  { %v2847_v52 = vadd.f32 %v2815_v38, %v6481_v46  ;;  %v2781_v30 = vmul.f32 %v2725_v57, %v5164_v31  ;;  %4415 = vmatmul.mubr.bf16.vlgmr.msra.gmra.mrb[32].mxu1 %v2907_v3  ;;  %v7641_v36 = vld [vmem:[#allocation4_spill] sm:$0xff] }
 0x54e   :  { %4447 = vmatpush3.bf16.msra.mxu1 %v6566_v42  ;;  %v2818_v62 = vadd.f32 %v6673_v5, %v2782_v7 }
 0x54f   :  { %v2817_v32 = vadd.f32 %v6673_v5, %v2781_v30  ;;  %v2731_v4 = vpop.xlane.xlu0 %2730  ;;  %v2908_v1 = vpack.c.bf16 %v2847_v52, %v2846_v22  ;;  %4448 = vmatprep.subr.bf16.mxu1 %v4596_v34  ;;  %v7643_v30 = vld [vmem:[#allocation35_spill] sm:$0xff] }
 0x550   :  { %v2729_v39 = vpop.xlane.xlu1 %2728  ;;  %v2784_v31 = vmul.f32 %v2731_v4, %v5187_v47  ;;  %v2850_v0 = vadd.f32 %v2818_v62, %v6491_v50  ;;  %v4599_v50 = vld [vmem:[%s7327_s2 + $0xfc] sm:$0xff]  }
 0x551   :  { %v2849_v46 = vadd.f32 %v2817_v32, %v6495_v35  ;;  %v2783_v42 = vmul.f32 %v2729_v39, %v5193_v17  ;;  %4418 = vmatprep.mubr.bf16.mxu1 %v2908_v1 }
 0x552   :  { %4449 = vmatpush3.bf16.msra.mxu1 %v4596_v34  ;;  %v2820_v35 = vadd.f32 %v6673_v5, %v2784_v31  ;;  %v7642_v34 = vld [vmem:[#allocation10_spill] sm:$0xff]  ;;  %v7644_v31 = vld [vmem:[#allocation7_spill] sm:$0xff] }
 0x553   :  { %v2819_v44 = vadd.f32 %v6673_v5, %v2783_v42  ;;  %v2909_v11 = vpack.c.bf16 %v2849_v46, %v2848_v24  ;;  %4450 = vmatprep.subr.bf16.mxu1 %v4597_v45  ;;  %v4601_v46 = vld [vmem:[%s7327_s2 + $0x10c] sm:$0xff]  }
 0x554   :  { %v2735_v61 = vpop.xlane.xlu0 %2734 }
 0x555   :  { %v2733_v60 = vpop.xlane.xlu1 %2732  ;;  %v2851_v47 = vadd.f32 %v2819_v44, %v6509_v10  ;;  %v2786_v17 = vmul.f32 %v2735_v61, %v5209_v9  ;;  %4419 = vmatmul.mubr.bf16.gmra.mrb[36].mxu1 %v2909_v11  ;;  %v2852_v10 = vadd.f32 %v2820_v35, %v6505_v63  ;;  %v7645_v61 = vld [vmem:[#allocation14_spill] sm:$0xff]  ;;  %v7646_v11 = vld [vmem:[#allocation12_spill] sm:$0xff] }
 0x556   :  { %v2785_v16 = vmul.f32 %v2733_v60, %v5190_v48  ;;  %4451 = vmatpush3.bf16.msra.mxu1 %v4597_v45 }
 0x557   :  { %v2910_v2 = vpack.c.bf16 %v2851_v47, %v2850_v0  ;;  %4452 = vmatprep.subr.bf16.mxu1 %v4598_v8  ;;  %v2822_v9 = vadd.f32 %v6673_v5, %v2786_v17  ;;  %v4602_v47 = vld [vmem:[%s7327_s2 + $0x114] sm:$0xff]  }
 0x558   :  { %v2821_v18 = vadd.f32 %v6673_v5, %v2785_v16  ;;  %v2739_v59 = vpop.xlane.xlu0 %2738 }
 0x559   :  { %v2788_v3 = vmul.f32 %v2739_v59, %v5215_v54  ;;  %v2737_v38 = vpop.xlane.xlu1 %2736  ;;  %4422 = vmatprep.mubr.bf16.mxu1 %v2910_v2  ;;  %v4600_v54 = vld [vmem:[%s7327_s2 + $0x104] sm:$0xff]   ;;  %v2854_v32 = vadd.f32 %v2822_v9, %v7643_v30  ;;  %v7648_v2 = vld [vmem:[#allocation49_spill] sm:$0xff] }
 0x55a   :  { %v2853_v48 = vadd.f32 %v2821_v18, %v7641_v36  ;;  %v2787_v7 = vmul.f32 %v2737_v38, %v7642_v34  ;;  %4453 = vmatpush3.bf16.msra.mxu1 %v4598_v8  ;;  %v7647_v18 = vld [vmem:[#allocation46_spill] sm:$0xff] }
 0x55b   :  { %4454 = vmatprep.subr.bf16.mxu1 %v4599_v50  ;;  %v2824_v52 = vadd.f32 %v6673_v5, %v2788_v3  ;;  %v7649_v3 = vld [vmem:[#allocation13_spill] sm:$0xff] }
 0x55c   :  { %v2823_v57 = vadd.f32 %v6673_v5, %v2787_v7  ;;  %v2743_v22 = vpop.xlane.xlu0 %2742  ;;  %v2911_v25 = vpack.c.bf16 %v2853_v48, %v2852_v10 }
 0x55d   :  { %v2741_v63 = vpop.xlane.xlu1 %2740  ;;  %v2790_v1 = vmul.f32 %v2743_v22, %v7617_v12  ;;  %v2856_v42 = vadd.f32 %v2824_v52, %v7644_v31  ;;  %v7653_v52 = vld [vmem:[#allocation16_spill] sm:$0xff] }
 0x55e   :  { %v2855_v4 = vadd.f32 %v2823_v57, %v6540_v51  ;;  %v2789_v45 = vmul.f32 %v2741_v63, %v7619_v56  ;;  %4423 = vmatmul.mubr.bf16.gmra.mrb[40].mxu1 %v2911_v25  ;;  %v7651_v57 = vld [vmem:[#allocation53_spill] sm:$0xff]  ;;  %v7652_v25 = vld [vmem:[#allocation18_spill] sm:$0xff] }
 0x55f   :  { %4455 = vmatpush3.bf16.msra.mxu1 %v4599_v50  ;;  %v2826_v51 = vadd.f32 %v6673_v5, %v2790_v1  ;;  %v7654_v1 = vld [vmem:[#allocation50_spill] sm:$0xff] }
 0x560   :  { %v2825_v62 = vadd.f32 %v6673_v5, %v2789_v45  ;;  %v2747_v39 = vpop.xlane.xlu0 %2746  ;;  %v2912_v24 = vpack.c.bf16 %v2855_v4, %v2854_v32  ;;  %4456 = vmatprep.subr.bf16.mxu1 %v4600_v54 }
 0x561   :  { %v2745_v44 = vpop.xlane.xlu1 %2744  ;;  %v2792_v56 = vmul.f32 %v2747_v39, %v7645_v61 }
 0x562   :  { %v2857_v12 = vadd.f32 %v2825_v62, %v6554_v14  ;;  %v2791_v8 = vmul.f32 %v2745_v44, %v7646_v11  ;;  %4426 = vmatprep.mubr.bf16.mxu1 %v2912_v24  ;;  %v2858_v14 = vadd.f32 %v2826_v51, %v7647_v18 }
 0x563   :  { %4457 = vmatpush3.bf16.msra.mxu1 %v4600_v54  ;;  %v2828_v59 = vadd.f32 %v6673_v5, %v2792_v56 }
 0x564   :  { %v2827_v0 = vadd.f32 %v6673_v5, %v2791_v8  ;;  %v2751_v60 = vpop.xlane.xlu0 %2750  ;;  %v2913_v35 = vpack.c.bf16 %v2857_v12, %v2856_v42  ;;  %4458 = vmatprep.subr.bf16.mxu1 %v4601_v46 }
 0x565   :  { %v2794_v17 = vmul.f32 %v2751_v60, %v7623_v28  ;;  %v2749_v16 = vpop.xlane.xlu1 %2748  ;;  %v7650_v28 = vld [vmem:[#allocation45_spill] sm:$0xff] }
 0x566   :  { %v2859_v50 = vadd.f32 %v2827_v0, %v7648_v2  ;;  %v2793_v38 = vmul.f32 %v2749_v16, %v7649_v3  ;;  %4427 = vmatmul.mubr.bf16.gmra.mrb[44].mxu1 %v2913_v35  ;;  %v2860_v7 = vadd.f32 %v2828_v59, %v7650_v28  ;;  %v7658_v28 = vld [vmem:[#allocation37_spill] sm:$0xff] }
 0x567   :  { %4459 = vmatpush3.bf16.msra.mxu1 %v4601_v46  ;;  %v2830_v48 = vadd.f32 %v6673_v5, %v2794_v17 }
 0x568   :  { %v2829_v10 = vadd.f32 %v6673_v5, %v2793_v38  ;;  %v2755_v9 = vpop.xlane.xlu0 %2754  ;;  %v2914_v36 = vpack.c.bf16 %v2859_v50, %v2858_v14  ;;  %4460 = vmatprep.subr.bf16.mxu1 %v4602_v47 }
 0x569   :  { %v2753_v34 = vpop.xlane.xlu1 %2752  ;;  %v2796_v54 = vmul.f32 %v2755_v9, %v7652_v25  ;;  %v2862_v45 = vadd.f32 %v2830_v48, %v7654_v1  ;;  %v7666_v25 = vld [vmem:[#allocation48_spill] sm:$0xff] }
 0x56a   :  { %v2861_v22 = vadd.f32 %v2829_v10, %v7651_v57  ;;  %v2795_v63 = vmul.f32 %v2753_v34, %v7653_v52  ;;  %4430 = vmatprep.mubr.bf16.mxu1 %v2914_v36  ;;  %v7656_v34 = vld [vmem:[#allocation36_spill] sm:$0xff]  ;;  %v7664_v57 = vld [vmem:[#allocation43_spill] sm:$0xff] }
 0x56b   :  { %4461 = vmatpush3.bf16.msra.mxu1 %v4602_v47  ;;  %v2832_v39 = vadd.f32 %v6673_v5, %v2796_v54  ;;  %v7667_v54 = vld [vmem:[#allocation47_spill] sm:$0xff]  ;;  %v7668_v52 = vld [vmem:[#allocation52_spill] sm:$0xff] }
 0x56c   :  { %v2831_v30 = vadd.f32 %v6673_v5, %v2795_v63  ;;  %v2759_v32 = vpop.xlane.xlu0 %2758  ;;  %v2915_v4 = vpack.c.bf16 %v2861_v22, %v2860_v7  ;;  %v7661_v7 = vld [vmem:[#allocation40_spill] sm:$0xff]  ;;  %v7669_v63 = vld [vmem:[#allocation51_spill] sm:$0xff] }
 0x56d   :  { %v2757_v62 = vpop.xlane.xlu1 %2756  ;;  %v2798_v46 = vmul.f32 %v2759_v32, %v7631_v53  ;;  %v2864_v56 = vadd.f32 %v2832_v39, %v6598_v6  ;;  %v7665_v22 = vld [vmem:[#allocation44_spill] sm:$0xff] }
 0x56e   :  { %v2863_v24 = vadd.f32 %v2831_v30, %v6602_v20  ;;  %v2797_v31 = vmul.f32 %v2757_v62, %v7633_v41  ;;  %4431 = vmatmul.mubr.bf16.gmra.mrb[48].mxu1 %v2915_v4  ;;  %v7670_v30 = vld [vmem:[#allocation23_spill] sm:$0xff]  ;;  %v7671_v32 = vld [vmem:[#allocation28_spill] sm:$0xff]  ;;  %v3356_v4 = vld [vmem:[%s7327_s2 + $0x15c] sm:$0x1] }
 0x56f   :  { %v2834_v11 = vadd.f32 %v6673_v5, %v2798_v46  ;;  %v3357_v1 = vunpack.c.l.bf16 %v3356_v4 }
 0x570   :  { %v2833_v42 = vadd.f32 %v6673_v5, %v2797_v31  ;;  %v2763_v44 = vpop.xlane.xlu0 %2762  ;;  %v2916_v51 = vpack.c.bf16 %v2863_v24, %v2862_v45  ;;  %v7672_v45 = vld [vmem:[#allocation2_spill] sm:$0xff] }
 0x571   :  { %v2800_v12 = vmul.f32 %v2763_v44, %v7601_v55  ;;  %v2761_v61 = vpop.xlane.xlu1 %2760  ;;  %v2866_v47 = vadd.f32 %v2834_v11, %v6612_v27  ;;  %v6813_v62 = vrot.slane %v3357_v1, %v7672_v45 }
 0x572   :  { %v2865_v8 = vadd.f32 %v2833_v42, %v6616_v23  ;;  %v2799_v20 = vmul.f32 %v2761_v61, %v7603_v13  ;;  %4434 = vmatprep.mubr.bf16.mxu1 %v2916_v51 }
 0x573   :  { %v2836_v60 = vadd.f32 %v6673_v5, %v2800_v12 }
 0x574   :  { %v2835_v53 = vadd.f32 %v6673_v5, %v2799_v20  ;;  %v2767_v41 = vpop.xlane.xlu0 %2766  ;;  %v2917_v0 = vpack.c.bf16 %v2865_v8, %v2864_v56 }
 0x575   :  { %v2765_v35 = vpop.xlane.xlu1 %2764  ;;  %v2802_v6 = vmul.f32 %v2767_v41, %v7567_v58  ;;  %v2868_v18 = vadd.f32 %v2836_v60, %v6626_v15 }
 0x576   :  { %v2867_v55 = vadd.f32 %v2835_v53, %v6630_v49  ;;  %v2801_v17 = vmul.f32 %v2765_v35, %v7570_v33  ;;  %4435 = vmatmul.mubr.bf16.gmra.mrb[52].mxu1 %v2917_v0 }
 0x577   :  { %v2838_v59 = vadd.f32 %v6673_v5, %v2802_v6 }
 0x578   :  { %v2837_v23 = vadd.f32 %v6673_v5, %v2801_v17  ;;  %v2771_v13 = vpop.xlane.xlu0 %2770  ;;  %v2918_v16 = vpack.c.bf16 %v2867_v55, %v2866_v47 }
 0x579   :  { %v2769_v14 = vpop.xlane.xlu1 %2768  ;;  %v2804_v27 = vmul.f32 %v2771_v13, %v7572_v40  ;;  %v2870_v3 = vadd.f32 %v2838_v59, %v6640_v29  ;;  %v7657_v29 = vld [vmem:[#allocation33_spill] sm:$0xff] }
 0x57a   :  { %v2869_v2 = vadd.f32 %v2837_v23, %v6644_v19  ;;  %v2803_v49 = vmul.f32 %v2769_v14, %v7574_v26  ;;  %4438 = vmatprep.mubr.bf16.mxu1 %v2918_v16  ;;  %v7655_v26 = vld [vmem:[#allocation22_spill] sm:$0xff] }
 0x57b   :  { %v2840_v38 = vadd.f32 %v6673_v5, %v2804_v27 }
 0x57c   :  { %v2839_v58 = vadd.f32 %v6673_v5, %v2803_v49  ;;  %v2919_v33 = vpack.c.bf16 %v2869_v2, %v2868_v18 }
 0x57d   :  { %v2773_v50 = vpop.xlane.xlu1 %2772  ;;  %v2872_v40 = vadd.f32 %v2840_v38, %v6654_v43  ;;  %v7663_v43 = vld [vmem:[#allocation42_spill] sm:$0xff] }
 0x57e   :  { %v2871_v15 = vadd.f32 %v2839_v58, %v6657_v21  ;;  %v2805_v10 = vmul.f32 %v2773_v50, %v7577_v37  ;;  %4439 = vmatmul.mubr.bf16.gmra.mrb[56].mxu1 %v2919_v33  ;;  %v7659_v21 = vld [vmem:[#allocation38_spill] sm:$0xff]  ;;  %v7660_v37 = vld [vmem:[#allocation39_spill] sm:$0xff] }
 0x580   :  { %v2841_v19 = vadd.f32 %v6673_v5, %v2805_v10  ;;  %v2920_v9 = vpack.c.bf16 %v2871_v15, %v2870_v3  ;;  %v7662_v5 = vld [vmem:[#allocation41_spill] sm:$0xff] }
 0x582   :  { %v2873_v36 = vadd.f32 %v2841_v19, %v7655_v26  ;;  %4442 = vmatprep.mubr.bf16.mxu1 %v2920_v9 }
 0x584   :  { %v2921_v48 = vpack.c.bf16 %v2873_v36, %v2872_v40 }
 0x586   :  { %4443 = vmatmul.mubr.bf16.gmra.mrb[60].mxu1 %v2921_v48 }
 0x587   :  { %4462 = vmatprep.mubr.bf16.mxu1 %v7656_v34 }
 0x58e   :  { %4463 = vmatmul.mubr.bf16.vlgmr.msra.gmra.mrb[32].mxu1 %v7657_v29 }
 0x58f   :  { %4466 = vmatprep.mubr.bf16.mxu1 %v7658_v28 }
 0x596   :  { %4467 = vmatmul.mubr.bf16.gmra.mrb[36].mxu1 %v7659_v21 }
 0x597   :  { %4470 = vmatprep.mubr.bf16.mxu1 %v7660_v37 }
 0x59e   :  { %4471 = vmatmul.mubr.bf16.gmra.mrb[40].mxu1 %v7661_v7 }
 0x59f   :  { %4474 = vmatprep.mubr.bf16.mxu1 %v7662_v5 }
 0x5a6   :  { %4475 = vmatmul.mubr.bf16.gmra.mrb[44].mxu1 %v7663_v43 }
 0x5a7   :  { %4478 = vmatprep.mubr.bf16.mxu1 %v7664_v57 }
 0x5ae   :  { %4479 = vmatmul.mubr.bf16.gmra.mrb[48].mxu1 %v7665_v22 }
 0x5af   :  { %4482 = vmatprep.mubr.bf16.mxu1 %v7666_v25 }
 0x5b6   :  { %4483 = vmatmul.mubr.bf16.gmra.mrb[52].mxu1 %v7667_v54 }
 0x5b7   :  { %4486 = vmatprep.mubr.bf16.mxu1 %v7668_v52 }
 0x5be   :  { %4487 = vmatmul.mubr.bf16.gmra.mrb[56].mxu1 %v7669_v63 }
 0x5bf   :  { %4490 = vmatprep.mubr.bf16.mxu1 %v7670_v30 }
 0x5c6   :  { %4491 = vmatmul.mubr.bf16.gmra.mrb[60].mxu1 %v7671_v32 }
 0x661   :  { %v4464_v39 = vpop.f32.mrb[32].mxu1 }
 0x662   :  { %v6816_v24 = vadd.f32 %v4464_v39, %v6813_v62  ;;  %v3229_v46 = vpop.f32.mrb[33].mxu1 }
 0x663   :  { %v4465_v31 = vpop.f32.mrb[34].mxu1  ;;  %v6819_v42 = vadd.f32 %v6813_v62, %v3229_v46 }
 0x664   :  { %v6822_v44 = vadd.f32 %v4465_v31, %v6813_v62  ;;  %v3232_v51 = vpop.f32.mrb[35].mxu1  ;;  %v3401_v12 = vsel %vm3394_vm4, %v6816_v24, -inf }
 0x665   :  { %3402 = vmax.xlane.f32.xlu0 %v3401_v12  ;;  %v6827_v61 = vadd.f32 %v6813_v62, %v3232_v51  ;;  %v3395_v11 = vsel %vm3394_vm4, %v6819_v42, -inf }
 0x666   :  { %v3404_v56 = vsel %vm3394_vm4, %v6822_v44, -inf }
 0x667   :  { %3405 = vmax.xlane.f32.xlu1 %v3404_v56  ;;  %v3398_v41 = vsel %vm3394_vm4, %v6827_v61, -inf }
 0x669   :  { %3396 = vmax.xlane.f32.xlu0 %v3395_v11  ;;  %v4468_v8 = vpop.f32.mrb[36].mxu1 }
 0x66a   :  { %v6834_v20 = vadd.f32 %v4468_v8, %v6813_v62  ;;  %v3245_v53 = vpop.f32.mrb[37].mxu1 }
 0x66b   :  { %3399 = vmax.xlane.f32.xlu1 %v3398_v41  ;;  %v4469_v0 = vpop.f32.mrb[38].mxu1  ;;  %v6839_v60 = vadd.f32 %v6813_v62, %v3245_v53 }
 0x66c   :  { %v6842_v35 = vadd.f32 %v4469_v0, %v6813_v62  ;;  %v3248_v47 = vpop.f32.mrb[39].mxu1  ;;  %v3413_v55 = vsel %vm3394_vm4, %v6834_v20, -inf }
 0x66d   :  { %3414 = vmax.xlane.f32.xlu0 %v3413_v55  ;;  %v6847_v6 = vadd.f32 %v6813_v62, %v3248_v47  ;;  %v3407_v23 = vsel %vm3394_vm4, %v6839_v60, -inf }
 0x66e   :  { %v3416_v17 = vsel %vm3394_vm4, %v6842_v35, -inf }
 0x66f   :  { %3417 = vmax.xlane.f32.xlu1 %v3416_v17  ;;  %v3410_v14 = vsel %vm3394_vm4, %v6847_v6, -inf }
 0x671   :  { %3408 = vmax.xlane.f32.xlu0 %v3407_v23  ;;  %v4472_v13 = vpop.f32.mrb[40].mxu1 }
 0x672   :  { %v6854_v16 = vadd.f32 %v4472_v13, %v6813_v62  ;;  %v3261_v18 = vpop.f32.mrb[41].mxu1 }
 0x673   :  { %3411 = vmax.xlane.f32.xlu1 %v3410_v14  ;;  %v4473_v59 = vpop.f32.mrb[42].mxu1  ;;  %v6859_v2 = vadd.f32 %v6813_v62, %v3261_v18 }
 0x674   :  { %v6862_v27 = vadd.f32 %v4473_v59, %v6813_v62  ;;  %v3264_v49 = vpop.f32.mrb[43].mxu1  ;;  %v3425_v58 = vsel %vm3394_vm4, %v6854_v16, -inf }
 0x675   :  { %3426 = vmax.xlane.f32.xlu0 %v3425_v58  ;;  %v6867_v33 = vadd.f32 %v6813_v62, %v3264_v49  ;;  %v3419_v3 = vsel %vm3394_vm4, %v6859_v2, -inf }
 0x676   :  { %v3428_v50 = vsel %vm3394_vm4, %v6862_v27, -inf }
 0x677   :  { %3429 = vmax.xlane.f32.xlu1 %v3428_v50  ;;  %v3422_v19 = vsel %vm3394_vm4, %v6867_v33, -inf }
 0x679   :  { %3420 = vmax.xlane.f32.xlu0 %v3419_v3  ;;  %v4476_v38 = vpop.f32.mrb[44].mxu1 }
 0x67a   :  { %v6874_v15 = vadd.f32 %v4476_v38, %v6813_v62  ;;  %v3277_v10 = vpop.f32.mrb[45].mxu1 }
 0x67b   :  { %3423 = vmax.xlane.f32.xlu1 %v3422_v19  ;;  %v4477_v9 = vpop.f32.mrb[46].mxu1  ;;  %v6879_v40 = vadd.f32 %v6813_v62, %v3277_v10 }
 0x67c   :  { %v6882_v26 = vadd.f32 %v4477_v9, %v6813_v62  ;;  %v3280_v36 = vpop.f32.mrb[47].mxu1  ;;  %v3437_v48 = vsel %vm3394_vm4, %v6874_v15, -inf }
 0x67d   :  { %3438 = vmax.xlane.f32.xlu0 %v3437_v48  ;;  %v6887_v34 = vadd.f32 %v6813_v62, %v3280_v36  ;;  %v3431_v28 = vsel %vm3394_vm4, %v6879_v40, -inf }
 0x67e   :  { %v3440_v29 = vsel %vm3394_vm4, %v6882_v26, -inf }
 0x67f   :  { %3441 = vmax.xlane.f32.xlu1 %v3440_v29  ;;  %v3434_v5 = vsel %vm3394_vm4, %v6887_v34, -inf }
 0x681   :  { %3432 = vmax.xlane.f32.xlu0 %v3431_v28  ;;  %v4480_v21 = vpop.f32.mrb[48].mxu1 }
 0x682   :  { %v6894_v37 = vadd.f32 %v4480_v21, %v6813_v62  ;;  %v3293_v7 = vpop.f32.mrb[49].mxu1 }
 0x683   :  { %3435 = vmax.xlane.f32.xlu1 %v3434_v5  ;;  %v4481_v43 = vpop.f32.mrb[50].mxu1  ;;  %v6899_v57 = vadd.f32 %v6813_v62, %v3293_v7 }
 0x684   :  { %v6902_v22 = vadd.f32 %v4481_v43, %v6813_v62  ;;  %v3296_v25 = vpop.f32.mrb[51].mxu1  ;;  %v3449_v54 = vsel %vm3394_vm4, %v6894_v37, -inf }
 0x685   :  { %7673 = vst [vmem:[#allocation54_spill] sm:$0xff] %v6899_v57  ;;  %3450 = vmax.xlane.f32.xlu0 %v3449_v54  ;;  %v6907_v52 = vadd.f32 %v6813_v62, %v3296_v25  ;;  %v3443_v30 = vsel %vm3394_vm4, %v6899_v57, -inf }
 0x686   :  { %v3452_v63 = vsel %vm3394_vm4, %v6902_v22, -inf }
 0x687   :  { %7674 = vst [vmem:[#allocation20_spill] sm:$0xff] %v6907_v52  ;;  %3453 = vmax.xlane.f32.xlu1 %v3452_v63  ;;  %v3446_v45 = vsel %vm3394_vm4, %v6907_v52, -inf }
 0x689   :  { %3444 = vmax.xlane.f32.xlu0 %v3443_v30  ;;  %v4484_v32 = vpop.f32.mrb[52].mxu1 }
 0x68a   :  { %v6914_v4 = vadd.f32 %v4484_v32, %v6813_v62  ;;  %v3309_v1 = vpop.f32.mrb[53].mxu1 }
 0x68b   :  { %3447 = vmax.xlane.f32.xlu1 %v3446_v45  ;;  %v4485_v39 = vpop.f32.mrb[54].mxu1  ;;  %v6919_v46 = vadd.f32 %v6813_v62, %v3309_v1 }
 0x68c   :  { %7675 = vst [vmem:[#allocation30_spill] sm:$0xff] %v6914_v4  ;;  %v6922_v31 = vadd.f32 %v4485_v39, %v6813_v62  ;;  %v3312_v51 = vpop.f32.mrb[55].mxu1  ;;  %v3461_v12 = vsel %vm3394_vm4, %v6914_v4, -inf }
 0x68d   :  { %7676 = vst [vmem:[#allocation3_spill] sm:$0xff] %v6919_v46  ;;  %3462 = vmax.xlane.f32.xlu0 %v3461_v12  ;;  %v6927_v56 = vadd.f32 %v6813_v62, %v3312_v51  ;;  %v3455_v8 = vsel %vm3394_vm4, %v6919_v46, -inf }
 0x68e   :  { %7677 = vst [vmem:[#allocation8_spill] sm:$0xff] %v6922_v31  ;;  %v3464_v11 = vsel %vm3394_vm4, %v6922_v31, -inf }
 0x68f   :  { %7678 = vst [vmem:[#allocation21_spill] sm:$0xff] %v6927_v56  ;;  %3465 = vmax.xlane.f32.xlu1 %v3464_v11  ;;  %v3458_v47 = vsel %vm3394_vm4, %v6927_v56, -inf }
 0x691   :  { %3456 = vmax.xlane.f32.xlu0 %v3455_v8  ;;  %v4488_v53 = vpop.f32.mrb[56].mxu1 }
 0x692   :  { %v6934_v41 = vadd.f32 %v4488_v53, %v6813_v62  ;;  %v3325_v0 = vpop.f32.mrb[57].mxu1 }
 0x693   :  { %3459 = vmax.xlane.f32.xlu1 %v3458_v47  ;;  %v4489_v55 = vpop.f32.mrb[58].mxu1  ;;  %v6939_v17 = vadd.f32 %v6813_v62, %v3325_v0 }
 0x694   :  { %7679 = vst [vmem:[#allocation11_spill] sm:$0xff] %v6934_v41  ;;  %v6942_v23 = vadd.f32 %v4489_v55, %v6813_v62  ;;  %v3328_v13 = vpop.f32.mrb[59].mxu1  ;;  %v3473_v18 = vsel %vm3394_vm4, %v6934_v41, -inf }
 0x695   :  { %7680 = vst [vmem:[#allocation26_spill] sm:$0xff] %v6939_v17  ;;  %3474 = vmax.xlane.f32.xlu0 %v3473_v18  ;;  %v6947_v14 = vadd.f32 %v6813_v62, %v3328_v13  ;;  %v3467_v49 = vsel %vm3394_vm4, %v6939_v17, -inf }
 0x696   :  { %7681 = vst [vmem:[#allocation9_spill] sm:$0xff] %v6942_v23  ;;  %v3476_v59 = vsel %vm3394_vm4, %v6942_v23, -inf }
 0x697   :  { %3477 = vmax.xlane.f32.xlu1 %v3476_v59  ;;  %v3470_v3 = vsel %vm3394_vm4, %v6947_v14, -inf }
 0x699   :  { %3468 = vmax.xlane.f32.xlu0 %v3467_v49  ;;  %v4492_v58 = vpop.f32.mrb[60].mxu1 }
 0x69a   :  { %v3341_v50 = vpop.f32.mrb[61].mxu1  ;;  %v6962_v36 = vadd.f32 %v4492_v58, %v6813_v62 }
 0x69b   :  { %v6956_v38 = vadd.f32 %v6813_v62, %v3341_v50  ;;  %3471 = vmax.xlane.f32.xlu1 %v3470_v3  ;;  %v4493_v10 = vpop.f32.mrb[62].mxu1 }
 0x69c   :  { %v6959_v19 = vadd.f32 %v4493_v10, %v6813_v62  ;;  %v3344_v9 = vpop.f32.mrb[63].mxu1  ;;  %7684 = vst [vmem:[#allocation24_spill] sm:$0xff] %v6962_v36  ;;  %v3485_v21 = vsel %vm3394_vm4, %v6962_v36, -inf }
 0x69d   :  { %7682 = vst [vmem:[#allocation29_spill] sm:$0xff] %v6956_v38  ;;  %v6965_v48 = vadd.f32 %v6813_v62, %v3344_v9  ;;  %v3479_v29 = vsel %vm3394_vm4, %v6956_v38, -inf }
 0x69e   :  { %7683 = vst [vmem:[#allocation15_spill] sm:$0xff] %v6959_v19  ;;  %3480 = vmax.xlane.f32.xlu0 %v3479_v29  ;;  %v3488_v7 = vsel %vm3394_vm4, %v6959_v19, -inf }
 0x69f   :  { %7685 = vst [vmem:[#allocation32_spill] sm:$0xff] %v6965_v48  ;;  %v3482_v28 = vsel %vm3394_vm4, %v6965_v48, -inf }
 0x6a0   :  { %3483 = vmax.xlane.f32.xlu1 %v3482_v28 }
 0x6a2   :  { %3486 = vmax.xlane.f32.xlu0 %v3485_v21 }
 0x6a4   :  { %3489 = vmax.xlane.f32.xlu1 %v3488_v7 }
 0x6f2   :  { %v6975_v5 = vpop.xlane.xlu0 %3402 }
 0x6f3   :  { %v3493_v62 = vsub.f32 %v6816_v24, %v6975_v5 }
 0x6f4   :  { %v6979_v43 = vpop.xlane.xlu1 %3405 }
 0x6f5   :  { %v3527_v25 = vmul.f32 1.442695, %v3493_v62  ;;  %v3494_v54 = vsub.f32 %v6822_v44, %v6979_v43 }
 0x6f6   :  { %v6983_v63 = vpop.xlane.xlu0 %3396 }
 0x6f7   :  { %4603 = vpow2.f32 %v3527_v25  ;;  %v3529_v30 = vmul.f32 1.442695, %v3494_v54  ;;  %v3491_v32 = vsub.f32 %v6819_v42, %v6983_v63 }
 0x6f8   :  { %v6987_v1 = vpop.xlane.xlu1 %3399 }
 0x6f9   :  { %4605 = vpow2.f32 %v3529_v30  ;;  %v3523_v45 = vmul.f32 1.442695, %v3491_v32  ;;  %v3492_v39 = vsub.f32 %v6827_v61, %v6987_v1 }
 0x6fa   :  { %v6991_v51 = vpop.xlane.xlu0 %3414 }
 0x6fb   :  { %4607 = vpow2.f32 %v3523_v45  ;;  %v3525_v12 = vmul.f32 1.442695, %v3492_v39  ;;  %v3497_v11 = vsub.f32 %v6834_v20, %v6991_v51 }
 0x6fc   :  { %v6995_v8 = vpop.xlane.xlu1 %3417 }
 0x6fd   :  { %4609 = vpow2.f32 %v3525_v12  ;;  %v3535_v53 = vmul.f32 1.442695, %v3497_v11  ;;  %v3498_v0 = vsub.f32 %v6842_v35, %v6995_v8 }
 0x6fe   :  { %v6999_v47 = vpop.xlane.xlu0 %3408 }
 0x6ff   :  { %4611 = vpow2.f32 %v3535_v53  ;;  %v3537_v55 = vmul.f32 1.442695, %v3498_v0  ;;  %v3495_v13 = vsub.f32 %v6839_v60, %v6999_v47 }
 0x700   :  { %v7003_v18 = vpop.xlane.xlu1 %3411 }
 0x701   :  { %v4604_v59 = vpop.eup %4603  ;;  %4613 = vpow2.f32 %v3537_v55  ;;  %v3531_v49 = vmul.f32 1.442695, %v3495_v13  ;;  %v3496_v58 = vsub.f32 %v6847_v6, %v7003_v18 }
 0x702   :  { %v7007_v50 = vpop.xlane.xlu0 %3426  ;;  %v3593_v3 = vsel %vm3394_vm4, %v4604_v59, 0.0 }
 0x703   :  { %v4606_v10 = vpop.eup %4605  ;;  %4615 = vpow2.f32 %v3531_v49  ;;  %v3533_v9 = vmul.f32 1.442695, %v3496_v58  ;;  %v3501_v29 = vsub.f32 %v6854_v16, %v7007_v50  ;;  %3594 = vadd.xlane.f32.xlu0 %v3593_v3 }
 0x704   :  { %v7012_v28 = vpop.xlane.xlu1 %3429  ;;  %v3596_v21 = vsel %vm3394_vm4, %v4606_v10, 0.0 }
 0x705   :  { %v4608_v7 = vpop.eup %4607  ;;  %4617 = vpow2.f32 %v3533_v9  ;;  %v3543_v62 = vmul.f32 1.442695, %v3501_v29  ;;  %v3502_v25 = vsub.f32 %v6862_v27, %v7012_v28  ;;  %3597 = vadd.xlane.f32.xlu1 %v3596_v21 }
 0x706   :  { %v7017_v54 = vpop.xlane.xlu0 %3420  ;;  %v3587_v30 = vsel %vm3394_vm4, %v4608_v7, 0.0 }
 0x707   :  { %v4610_v32 = vpop.eup %4609  ;;  %4619 = vpow2.f32 %v3543_v62  ;;  %v3545_v45 = vmul.f32 1.442695, %v3502_v25  ;;  %v3499_v39 = vsub.f32 %v6859_v2, %v7017_v54  ;;  %3588 = vadd.xlane.f32.xlu0 %v3587_v30 }
 0x708   :  { %v7022_v12 = vpop.xlane.xlu1 %3423  ;;  %v3590_v11 = vsel %vm3394_vm4, %v4610_v32, 0.0 }
 0x709   :  { %v4612_v53 = vpop.eup %4611  ;;  %4621 = vpow2.f32 %v3545_v45  ;;  %v3539_v0 = vmul.f32 1.442695, %v3499_v39  ;;  %v3500_v55 = vsub.f32 %v6867_v33, %v7022_v12  ;;  %3591 = vadd.xlane.f32.xlu1 %v3590_v11 }
 0x70a   :  { %v7027_v13 = vpop.xlane.xlu0 %3438  ;;  %v3605_v59 = vsel %vm3394_vm4, %v4612_v53, 0.0 }
 0x70b   :  { %v4614_v49 = vpop.eup %4613  ;;  %4623 = vpow2.f32 %v3539_v0  ;;  %v3541_v58 = vmul.f32 1.442695, %v3500_v55  ;;  %v3505_v3 = vsub.f32 %v6874_v15, %v7027_v13  ;;  %3606 = vadd.xlane.f32.xlu0 %v3605_v59 }
 0x70c   :  { %v7032_v10 = vpop.xlane.xlu1 %3441  ;;  %v3608_v9 = vsel %vm3394_vm4, %v4614_v49, 0.0 }
 0x70d   :  { %v4616_v29 = vpop.eup %4615  ;;  %4625 = vpow2.f32 %v3541_v58  ;;  %v3551_v21 = vmul.f32 1.442695, %v3505_v3  ;;  %v3506_v7 = vsub.f32 %v6882_v26, %v7032_v10  ;;  %3609 = vadd.xlane.f32.xlu1 %v3608_v9 }
 0x70e   :  { %v7037_v62 = vpop.xlane.xlu0 %3432  ;;  %v3599_v25 = vsel %vm3394_vm4, %v4616_v29, 0.0 }
 0x70f   :  { %v4618_v30 = vpop.eup %4617  ;;  %4627 = vpow2.f32 %v3551_v21  ;;  %v3553_v32 = vmul.f32 1.442695, %v3506_v7  ;;  %v3503_v45 = vsub.f32 %v6879_v40, %v7037_v62  ;;  %3600 = vadd.xlane.f32.xlu0 %v3599_v25 }
 0x710   :  { %v7042_v39 = vpop.xlane.xlu1 %3435  ;;  %v3602_v11 = vsel %vm3394_vm4, %v4618_v30, 0.0 }
 0x711   :  { %v4620_v53 = vpop.eup %4619  ;;  %4629 = vpow2.f32 %v3553_v32  ;;  %v3547_v0 = vmul.f32 1.442695, %v3503_v45  ;;  %v3504_v55 = vsub.f32 %v6887_v34, %v7042_v39  ;;  %3603 = vadd.xlane.f32.xlu1 %v3602_v11 }
 0x712   :  { %v7047_v59 = vpop.xlane.xlu0 %3450  ;;  %v3617_v49 = vsel %vm3394_vm4, %v4620_v53, 0.0 }
 0x713   :  { %v4622_v58 = vpop.eup %4621  ;;  %4631 = vpow2.f32 %v3547_v0  ;;  %v3549_v3 = vmul.f32 1.442695, %v3504_v55  ;;  %v3509_v9 = vsub.f32 %v6894_v37, %v7047_v59  ;;  %3618 = vadd.xlane.f32.xlu0 %v3617_v49 }
 0x714   :  { %v7052_v29 = vpop.xlane.xlu1 %3453  ;;  %v3620_v21 = vsel %vm3394_vm4, %v4622_v58, 0.0 }
 0x715   :  { %v4624_v7 = vpop.eup %4623  ;;  %4633 = vpow2.f32 %v3549_v3  ;;  %v3559_v25 = vmul.f32 1.442695, %v3509_v9  ;;  %v3510_v30 = vsub.f32 %v6902_v22, %v7052_v29  ;;  %3621 = vadd.xlane.f32.xlu1 %v3620_v21 }
 0x716   :  { %v7057_v32 = vpop.xlane.xlu0 %3444  ;;  %v3611_v45 = vsel %vm3394_vm4, %v4624_v7, 0.0 }
 0x717   :  { %v4626_v11 = vpop.eup %4625  ;;  %4635 = vpow2.f32 %v3559_v25  ;;  %v3561_v53 = vmul.f32 1.442695, %v3510_v30  ;;  %v3507_v0 = vsub.f32 %v6899_v57, %v7057_v32  ;;  %3612 = vadd.xlane.f32.xlu0 %v3611_v45 }
 0x718   :  { %v7062_v55 = vpop.xlane.xlu1 %3447  ;;  %v3614_v49 = vsel %vm3394_vm4, %v4626_v11, 0.0 }
 0x719   :  { %v4628_v58 = vpop.eup %4627  ;;  %4637 = vpow2.f32 %v3561_v53  ;;  %v3555_v3 = vmul.f32 1.442695, %v3507_v0  ;;  %v3508_v9 = vsub.f32 %v6907_v52, %v7062_v55  ;;  %3615 = vadd.xlane.f32.xlu1 %v3614_v49 }
 0x71a   :  { %v7067_v21 = vpop.xlane.xlu0 %3462  ;;  %v3629_v7 = vsel %vm3394_vm4, %v4628_v58, 0.0 }
 0x71b   :  { %v4630_v25 = vpop.eup %4629  ;;  %4639 = vpow2.f32 %v3555_v3  ;;  %v3557_v30 = vmul.f32 1.442695, %v3508_v9  ;;  %v3513_v45 = vsub.f32 %v6914_v4, %v7067_v21  ;;  %3630 = vadd.xlane.f32.xlu0 %v3629_v7 }
 0x71c   :  { %v7072_v57 = vpop.xlane.xlu1 %3465  ;;  %v3632_v11 = vsel %vm3394_vm4, %v4630_v25, 0.0 }
 0x71d   :  { %v4632_v53 = vpop.eup %4631  ;;  %4641 = vpow2.f32 %v3557_v30  ;;  %v3567_v0 = vmul.f32 1.442695, %v3513_v45  ;;  %v3514_v49 = vsub.f32 %v6922_v31, %v7072_v57  ;;  %3633 = vadd.xlane.f32.xlu1 %v3632_v11 }
 0x71e   :  { %v7077_v52 = vpop.xlane.xlu0 %3456  ;;  %v3623_v58 = vsel %vm3394_vm4, %v4632_v53, 0.0 }
 0x71f   :  { %v4634_v3 = vpop.eup %4633  ;;  %4643 = vpow2.f32 %v3567_v0  ;;  %v3569_v9 = vmul.f32 1.442695, %v3514_v49  ;;  %v3511_v7 = vsub.f32 %v6919_v46, %v7077_v52  ;;  %3624 = vadd.xlane.f32.xlu0 %v3623_v58 }
 0x720   :  { %v7082_v4 = vpop.xlane.xlu1 %3459  ;;  %v3626_v25 = vsel %vm3394_vm4, %v4634_v3, 0.0 }
 0x721   :  { %v4636_v30 = vpop.eup %4635  ;;  %4645 = vpow2.f32 %v3569_v9  ;;  %v3563_v45 = vmul.f32 1.442695, %v3511_v7  ;;  %v3512_v11 = vsub.f32 %v6927_v56, %v7082_v4  ;;  %3627 = vadd.xlane.f32.xlu1 %v3626_v25 }
 0x722   :  { %v7087_v31 = vpop.xlane.xlu0 %3474  ;;  %v3641_v53 = vsel %vm3394_vm4, %v4636_v30, 0.0 }
 0x723   :  { %v4638_v0 = vpop.eup %4637  ;;  %4647 = vpow2.f32 %v3563_v45  ;;  %v3565_v49 = vmul.f32 1.442695, %v3512_v11  ;;  %v3517_v58 = vsub.f32 %v6934_v41, %v7087_v31  ;;  %3642 = vadd.xlane.f32.xlu0 %v3641_v53 }
 0x724   :  { %v7092_v46 = vpop.xlane.xlu1 %3477  ;;  %v3644_v3 = vsel %vm3394_vm4, %v4638_v0, 0.0 }
 0x725   :  { %v4640_v9 = vpop.eup %4639  ;;  %4649 = vpow2.f32 %v3565_v49  ;;  %v3575_v7 = vmul.f32 1.442695, %v3517_v58  ;;  %v3518_v25 = vsub.f32 %v6942_v23, %v7092_v46  ;;  %3645 = vadd.xlane.f32.xlu1 %v3644_v3 }
 0x726   :  { %v7097_v56 = vpop.xlane.xlu0 %3468  ;;  %v3635_v30 = vsel %vm3394_vm4, %v4640_v9, 0.0 }
 0x727   :  { %v4642_v45 = vpop.eup %4641  ;;  %4651 = vpow2.f32 %v3575_v7  ;;  %v3577_v11 = vmul.f32 1.442695, %v3518_v25  ;;  %v3515_v53 = vsub.f32 %v6939_v17, %v7097_v56  ;;  %3636 = vadd.xlane.f32.xlu0 %v3635_v30 }
 0x728   :  { %v7102_v41 = vpop.xlane.xlu1 %3471  ;;  %v3638_v0 = vsel %vm3394_vm4, %v4642_v45, 0.0 }
 0x729   :  { %v4644_v49 = vpop.eup %4643  ;;  %4653 = vpow2.f32 %v3577_v11  ;;  %v3571_v58 = vmul.f32 1.442695, %v3515_v53  ;;  %v3516_v3 = vsub.f32 %v6947_v14, %v7102_v41  ;;  %3639 = vadd.xlane.f32.xlu1 %v3638_v0 }
 0x72a   :  { %v3653_v9 = vsel %vm3394_vm4, %v4644_v49, 0.0 }
 0x72b   :  { %v4646_v23 = vpop.eup %4645  ;;  %4655 = vpow2.f32 %v3571_v58  ;;  %v3573_v7 = vmul.f32 1.442695, %v3516_v3  ;;  %3654 = vadd.xlane.f32.xlu0 %v3653_v9  ;;  %v7108_v25 = vpop.xlane.xlu0 %3480 }
 0x72c   :  { %v3519_v30 = vsub.f32 %v6956_v38, %v7108_v25  ;;  %v3656_v45 = vsel %vm3394_vm4, %v4646_v23, 0.0 }
 0x72d   :  { %v4648_v17 = vpop.eup %4647  ;;  %4657 = vpow2.f32 %v3573_v7  ;;  %3657 = vadd.xlane.f32.xlu1 %v3656_v45  ;;  %v7113_v11 = vpop.xlane.xlu1 %3483 }
 0x72e   :  { %v3579_v53 = vmul.f32 1.442695, %v3519_v30  ;;  %v3520_v0 = vsub.f32 %v6965_v48, %v7113_v11  ;;  %v3647_v49 = vsel %vm3394_vm4, %v4648_v17, 0.0 }
 0x72f   :  { %v4650_v58 = vpop.eup %4649  ;;  %3648 = vadd.xlane.f32.xlu0 %v3647_v49  ;;  %v7118_v3 = vpop.xlane.xlu0 %3486 }
 0x730   :  { %4659 = vpow2.f32 %v3579_v53  ;;  %v3581_v9 = vmul.f32 1.442695, %v3520_v0  ;;  %v3521_v23 = vsub.f32 %v6962_v36, %v7118_v3  ;;  %v3650_v7 = vsel %vm3394_vm4, %v4650_v58, 0.0 }
 0x731   :  { %v4652_v45 = vpop.eup %4651  ;;  %3651 = vadd.xlane.f32.xlu1 %v3650_v7  ;;  %v7123_v38 = vpop.xlane.xlu1 %3489 }
 0x732   :  { %7686 = vst [vmem:[#allocation19_spill] sm:$0xff] %v7123_v38  ;;  %4661 = vpow2.f32 %v3581_v9  ;;  %v3583_v30 = vmul.f32 1.442695, %v3521_v23  ;;  %v3522_v17 = vsub.f32 %v6959_v19, %v7123_v38  ;;  %v3665_v49 = vsel %vm3394_vm4, %v4652_v45, 0.0 }
 0x733   :  { %v4654_v48 = vpop.eup %4653  ;;  %3666 = vadd.xlane.f32.xlu0 %v3665_v49 }
 0x734   :  { %4663 = vpow2.f32 %v3583_v30  ;;  %v3585_v53 = vmul.f32 1.442695, %v3522_v17  ;;  %v3668_v0 = vsel %vm3394_vm4, %v4654_v48, 0.0 }
 0x735   :  { %v4656_v36 = vpop.eup %4655  ;;  %3669 = vadd.xlane.f32.xlu1 %v3668_v0 }
 0x736   :  { %4665 = vpow2.f32 %v3585_v53  ;;  %v3659_v58 = vsel %vm3394_vm4, %v4656_v36, 0.0 }
 0x737   :  { %v4658_v7 = vpop.eup %4657  ;;  %3660 = vadd.xlane.f32.xlu0 %v3659_v58 }
 0x738   :  { %v3662_v9 = vsel %vm3394_vm4, %v4658_v7, 0.0 }
 0x739   :  { %3663 = vadd.xlane.f32.xlu1 %v3662_v9 }
 0x73a   :  { %v4660_v23 = vpop.eup %4659 }
 0x73b   :  { %v3671_v19 = vsel %vm3394_vm4, %v4660_v23, 0.0 }
 0x73c   :  { %v4662_v45 = vpop.eup %4661  ;;  %3672 = vadd.xlane.f32.xlu0 %v3671_v19 }
 0x73d   :  { %v3674_v30 = vsel %vm3394_vm4, %v4662_v45, 0.0 }
 0x73e   :  { %v4664_v17 = vpop.eup %4663  ;;  %3675 = vadd.xlane.f32.xlu1 %v3674_v30 }
 0x73f   :  { %v3677_v48 = vsel %vm3394_vm4, %v4664_v17, 0.0 }
 0x740   :  { %v4666_v49 = vpop.eup %4665  ;;  %3678 = vadd.xlane.f32.xlu0 %v3677_v48 }
 0x741   :  { %v3680_v36 = vsel %vm3394_vm4, %v4666_v49, 0.0 }
 0x742   :  { %3681 = vadd.xlane.f32.xlu1 %v3680_v36 }
 0x790   :  { %v3595_v53 = vpop.xlane.xlu0 %3594 }
 0x791   :  { %4667 = vlog2.f32 %v3595_v53 }
 0x792   :  { %v3598_v0 = vpop.xlane.xlu1 %3597 }
 0x793   :  { %4669 = vlog2.f32 %v3598_v0 }
 0x794   :  { %v3589_v58 = vpop.xlane.xlu0 %3588 }
 0x795   :  { %4671 = vlog2.f32 %v3589_v58 }
 0x796   :  { %v3592_v7 = vpop.xlane.xlu1 %3591 }
 0x797   :  { %4673 = vlog2.f32 %v3592_v7 }
 0x798   :  { %v3607_v19 = vpop.xlane.xlu0 %3606 }
 0x799   :  { %4675 = vlog2.f32 %v3607_v19 }
 0x79a   :  { %v3610_v9 = vpop.xlane.xlu1 %3609 }
 0x79b   :  { %v4668_v23 = vpop.eup %4667  ;;  %4677 = vlog2.f32 %v3610_v9 }
 0x79c   :  { %v3688_v45 = vmul.f32 0.6931472, %v4668_v23  ;;  %v3601_v30 = vpop.xlane.xlu0 %3600 }
 0x79d   :  { %v4670_v17 = vpop.eup %4669  ;;  %4679 = vlog2.f32 %v3601_v30 }
 0x79e   :  { %v3749_v48 = vadd.f32 %v3688_v45, %v6975_v5  ;;  %v3690_v49 = vmul.f32 0.6931472, %v4670_v17  ;;  %v3604_v36 = vpop.xlane.xlu1 %3603 }
 0x79f   :  { %v4672_v53 = vpop.eup %4671  ;;  %4681 = vlog2.f32 %v3604_v36 }
 0x7a0   :  { %v3781_v0 = vsub.f32 %v6816_v24, %v3749_v48  ;;  %v3750_v58 = vadd.f32 %v3690_v49, %v6979_v43  ;;  %v3684_v7 = vmul.f32 0.6931472, %v4672_v53  ;;  %v3619_v38 = vpop.xlane.xlu0 %3618 }
 0x7a1   :  { %v4674_v19 = vpop.eup %4673  ;;  %4683 = vlog2.f32 %v3619_v38 }
 0x7a2   :  { %3813 = vst.msk [vmem:[%s7330_s3 + $0x10] sm:$0xff] %vm3394_vm4, %v3781_v0  ;;  %v3782_v9 = vsub.f32 %v6822_v44, %v3750_v58  ;;  %v3747_v5 = vadd.f32 %v3684_v7, %v6983_v63  ;;  %v3686_v23 = vmul.f32 0.6931472, %v4674_v19  ;;  %v3622_v45 = vpop.xlane.xlu1 %3621 }
 0x7a3   :  { %v4676_v30 = vpop.eup %4675  ;;  %4685 = vlog2.f32 %v3622_v45 }
 0x7a4   :  { %3814 = vst.msk [vmem:[%s7330_s3 + $0x18] sm:$0xff] %vm3394_vm4, %v3782_v9  ;;  %v3779_v24 = vsub.f32 %v6819_v42, %v3747_v5  ;;  %v3748_v38 = vadd.f32 %v3686_v23, %v6987_v1  ;;  %v3696_v43 = vmul.f32 0.6931472, %v4676_v30  ;;  %v3613_v17 = vpop.xlane.xlu0 %3612 }
 0x7a5   :  { %v4678_v48 = vpop.eup %4677  ;;  %4687 = vlog2.f32 %v3613_v17 }
 0x7a6   :  { %3811 = vst.msk [vmem:[%s7330_s3] sm:$0xff] %vm3394_vm4, %v3779_v24  ;;  %v3780_v44 = vsub.f32 %v6827_v61, %v3748_v38  ;;  %v3753_v63 = vadd.f32 %v3696_v43, %v6991_v51  ;;  %v3698_v49 = vmul.f32 0.6931472, %v4678_v48  ;;  %v3616_v36 = vpop.xlane.xlu1 %3615 }
 0x7a7   :  { %v4680_v53 = vpop.eup %4679  ;;  %4689 = vlog2.f32 %v3616_v36 }
 0x7a8   :  { %3812 = vst.msk [vmem:[%s7330_s3 + $0x8] sm:$0xff] %vm3394_vm4, %v3780_v44  ;;  %v3785_v42 = vsub.f32 %v6834_v20, %v3753_v63  ;;  %v3754_v1 = vadd.f32 %v3698_v49, %v6995_v8  ;;  %v3692_v0 = vmul.f32 0.6931472, %v4680_v53  ;;  %v3631_v58 = vpop.xlane.xlu0 %3630 }
 0x7a9   :  { %v4682_v7 = vpop.eup %4681  ;;  %4691 = vlog2.f32 %v3631_v58 }
 0x7aa   :  { %3817 = vst.msk [vmem:[%s7330_s3 + $0x30] sm:$0xff] %vm3394_vm4, %v3785_v42  ;;  %v3786_v61 = vsub.f32 %v6842_v35, %v3754_v1  ;;  %v3751_v51 = vadd.f32 %v3692_v0, %v6999_v47  ;;  %v3694_v19 = vmul.f32 0.6931472, %v4682_v7  ;;  %v3634_v9 = vpop.xlane.xlu1 %3633 }
 0x7ab   :  { %v4684_v5 = vpop.eup %4683  ;;  %4693 = vlog2.f32 %v3634_v9 }
 0x7ac   :  { %3818 = vst.msk [vmem:[%s7330_s3 + $0x38] sm:$0xff] %vm3394_vm4, %v3786_v61  ;;  %v3783_v20 = vsub.f32 %v6839_v60, %v3751_v51  ;;  %v3752_v8 = vadd.f32 %v3694_v19, %v7003_v18  ;;  %v3704_v23 = vmul.f32 0.6931472, %v4684_v5  ;;  %v3625_v45 = vpop.xlane.xlu0 %3624 }
 0x7ad   :  { %v4686_v30 = vpop.eup %4685  ;;  %4695 = vlog2.f32 %v3625_v45 }
 0x7ae   :  { %3815 = vst.msk [vmem:[%s7330_s3 + $0x20] sm:$0xff] %vm3394_vm4, %v3783_v20  ;;  %v3784_v35 = vsub.f32 %v6847_v6, %v3752_v8  ;;  %v3757_v47 = vadd.f32 %v3704_v23, %v7007_v50  ;;  %v3706_v24 = vmul.f32 0.6931472, %v4686_v30  ;;  %v3628_v38 = vpop.xlane.xlu1 %3627 }
 0x7af   :  { %v4688_v43 = vpop.eup %4687  ;;  %4697 = vlog2.f32 %v3628_v38 }
 0x7b0   :  { %3816 = vst.msk [vmem:[%s7330_s3 + $0x28] sm:$0xff] %vm3394_vm4, %v3784_v35  ;;  %v3789_v60 = vsub.f32 %v6854_v16, %v3757_v47  ;;  %v3758_v18 = vadd.f32 %v3706_v24, %v7012_v28  ;;  %v3700_v17 = vmul.f32 0.6931472, %v4688_v43  ;;  %v3643_v48 = vpop.xlane.xlu0 %3642 }
 0x7b1   :  { %v4690_v44 = vpop.eup %4689  ;;  %4699 = vlog2.f32 %v3643_v48 }
 0x7b2   :  { %3821 = vst.msk [vmem:[%s7330_s3 + $0x50] sm:$0xff] %vm3394_vm4, %v3789_v60  ;;  %v3790_v6 = vsub.f32 %v6862_v27, %v3758_v18  ;;  %v3755_v50 = vadd.f32 %v3700_v17, %v7017_v54  ;;  %v3702_v63 = vmul.f32 0.6931472, %v4690_v44  ;;  %v3646_v49 = vpop.xlane.xlu1 %3645 }
 0x7b3   :  { %v4692_v36 = vpop.eup %4691  ;;  %4701 = vlog2.f32 %v3646_v49 }
 0x7b4   :  { %3822 = vst.msk [vmem:[%s7330_s3 + $0x58] sm:$0xff] %vm3394_vm4, %v3790_v6  ;;  %v3787_v16 = vsub.f32 %v6859_v2, %v3755_v50  ;;  %v3756_v28 = vadd.f32 %v3702_v63, %v7022_v12  ;;  %v3712_v53 = vmul.f32 0.6931472, %v4692_v36  ;;  %v3637_v42 = vpop.xlane.xlu0 %3636 }
 0x7b5   :  { %v4694_v1 = vpop.eup %4693  ;;  %4703 = vlog2.f32 %v3637_v42 }
 0x7b6   :  { %3819 = vst.msk [vmem:[%s7330_s3 + $0x40] sm:$0xff] %vm3394_vm4, %v3787_v16  ;;  %v3788_v27 = vsub.f32 %v6867_v33, %v3756_v28  ;;  %v3761_v54 = vadd.f32 %v3712_v53, %v7027_v13  ;;  %v3714_v0 = vmul.f32 0.6931472, %v4694_v1  ;;  %v3640_v58 = vpop.xlane.xlu1 %3639 }
 0x7b7   :  { %v4696_v7 = vpop.eup %4695  ;;  %4705 = vlog2.f32 %v3640_v58 }
 0x7b8   :  { %3820 = vst.msk [vmem:[%s7330_s3 + $0x48] sm:$0xff] %vm3394_vm4, %v3788_v27  ;;  %v3793_v2 = vsub.f32 %v6874_v15, %v3761_v54  ;;  %v3762_v12 = vadd.f32 %v3714_v0, %v7032_v10  ;;  %v3708_v61 = vmul.f32 0.6931472, %v4696_v7  ;;  %v3655_v51 = vpop.xlane.xlu0 %3654 }
 0x7b9   :  { %v4698_v19 = vpop.eup %4697  ;;  %4707 = vlog2.f32 %v3655_v51 }
 0x7ba   :  { %3825 = vst.msk [vmem:[%s7330_s3 + $0x70] sm:$0xff] %vm3394_vm4, %v3793_v2  ;;  %v3794_v33 = vsub.f32 %v6882_v26, %v3762_v12  ;;  %v3759_v13 = vadd.f32 %v3708_v61, %v7037_v62  ;;  %v3710_v9 = vmul.f32 0.6931472, %v4698_v19  ;;  %v3658_v5 = vpop.xlane.xlu1 %3657 }
 0x7bb   :  { %v4700_v20 = vpop.eup %4699  ;;  %4709 = vlog2.f32 %v3658_v5 }
 0x7bc   :  { %3826 = vst.msk [vmem:[%s7330_s3 + $0x78] sm:$0xff] %vm3394_vm4, %v3794_v33  ;;  %v3791_v15 = vsub.f32 %v6879_v40, %v3759_v13  ;;  %v3760_v10 = vadd.f32 %v3710_v9, %v7042_v39  ;;  %v3720_v8 = vmul.f32 0.6931472, %v4700_v20  ;;  %v3649_v23 = vpop.xlane.xlu0 %3648 }
 0x7bd   :  { %v4702_v45 = vpop.eup %4701  ;;  %4711 = vlog2.f32 %v3649_v23 }
 0x7be   :  { %3823 = vst.msk [vmem:[%s7330_s3 + $0x60] sm:$0xff] %vm3394_vm4, %v3791_v15  ;;  %v3792_v26 = vsub.f32 %v6887_v34, %v3760_v10  ;;  %v3765_v62 = vadd.f32 %v3720_v8, %v7047_v59  ;;  %v3722_v30 = vmul.f32 0.6931472, %v4702_v45  ;;  %v3652_v35 = vpop.xlane.xlu1 %3651 }
 0x7bf   :  { %v4704_v47 = vpop.eup %4703  ;;  %4713 = vlog2.f32 %v3652_v35 }
 0x7c0   :  { %3824 = vst.msk [vmem:[%s7330_s3 + $0x68] sm:$0xff] %vm3394_vm4, %v3792_v26  ;;  %v3797_v40 = vsub.f32 %v6894_v37, %v3765_v62  ;;  %v3766_v39 = vadd.f32 %v3722_v30, %v7052_v29  ;;  %v3716_v24 = vmul.f32 0.6931472, %v4704_v47  ;;  %v3667_v38 = vpop.xlane.xlu0 %3666  ;;  %v7687_v37 = vld [vmem:[#allocation54_spill] sm:$0xff] }
 0x7c1   :  { %v4706_v43 = vpop.eup %4705  ;;  %4715 = vlog2.f32 %v3667_v38 }
 0x7c2   :  { %3829 = vst.msk [vmem:[%s7330_s3 + $0x90] sm:$0xff] %vm3394_vm4, %v3797_v40  ;;  %v3798_v34 = vsub.f32 %v6902_v22, %v3766_v39  ;;  %v3763_v59 = vadd.f32 %v3716_v24, %v7057_v32  ;;  %v3718_v60 = vmul.f32 0.6931472, %v4706_v43  ;;  %v3670_v18 = vpop.xlane.xlu1 %3669  ;;  %v7688_v22 = vld [vmem:[#allocation20_spill] sm:$0xff] }
 0x7c3   :  { %v4708_v17 = vpop.eup %4707  ;;  %4717 = vlog2.f32 %v3670_v18 }
 0x7c4   :  { %3830 = vst.msk [vmem:[%s7330_s3 + $0x98] sm:$0xff] %vm3394_vm4, %v3798_v34  ;;  %v3795_v29 = vsub.f32 %v7687_v37, %v3763_v59  ;;  %v3764_v48 = vadd.f32 %v3718_v60, %v7062_v55  ;;  %v3728_v44 = vmul.f32 0.6931472, %v4708_v17  ;;  %v3661_v6 = vpop.xlane.xlu0 %3660  ;;  %v7689_v55 = vld [vmem:[#allocation30_spill] sm:$0xff]  ;;  %v7696_v59 = vld [vmem:[#allocation29_spill] sm:$0xff] }
 0x7c5   :  { %v4710_v50 = vpop.eup %4709  ;;  %4719 = vlog2.f32 %v3661_v6 }
 0x7c6   :  { %3827 = vst.msk [vmem:[%s7330_s3 + $0x80] sm:$0xff] %vm3394_vm4, %v3795_v29  ;;  %v3796_v32 = vsub.f32 %v7688_v22, %v3764_v48  ;;  %v3769_v63 = vadd.f32 %v3728_v44, %v7067_v21  ;;  %v3730_v49 = vmul.f32 0.6931472, %v4710_v50  ;;  %v3664_v36 = vpop.xlane.xlu1 %3663  ;;  %v7690_v21 = vld [vmem:[#allocation8_spill] sm:$0xff]  ;;  %v7700_v50 = vld [vmem:[#allocation15_spill] sm:$0xff] }
 0x7c7   :  { %v4712_v16 = vpop.eup %4711  ;;  %4721 = vlog2.f32 %v3664_v36  ;;  %v7698_v48 = vld [vmem:[#allocation24_spill] sm:$0xff] }
 0x7c8   :  { %3828 = vst.msk [vmem:[%s7330_s3 + $0x88] sm:$0xff] %vm3394_vm4, %v3796_v32  ;;  %v3801_v28 = vsub.f32 %v7689_v55, %v3769_v63  ;;  %v3770_v53 = vadd.f32 %v3730_v49, %v7072_v57  ;;  %v3724_v42 = vmul.f32 0.6931472, %v4712_v16  ;;  %v7691_v57 = vld [vmem:[#allocation3_spill] sm:$0xff] }
 0x7c9   :  { %v4714_v1 = vpop.eup %4713  ;;  %v3673_v27 = vpop.xlane.xlu0 %3672 }
 0x7ca   :  { %3833 = vst.msk [vmem:[%s7330_s3 + $0xb0] sm:$0xff] %vm3394_vm4, %v3801_v28  ;;  %v3802_v54 = vsub.f32 %v7690_v21, %v3770_v53  ;;  %v3767_v0 = vadd.f32 %v3724_v42, %v7077_v52  ;;  %v3726_v58 = vmul.f32 0.6931472, %v4714_v1  ;;  %4723 = vlog2.f32 %v3673_v27  ;;  %v7692_v52 = vld [vmem:[#allocation21_spill] sm:$0xff] }
 0x7cb   :  { %v4716_v7 = vpop.eup %4715  ;;  %v3676_v2 = vpop.xlane.xlu1 %3675 }
 0x7cc   :  { %3834 = vst.msk [vmem:[%s7330_s3 + $0xb8] sm:$0xff] %vm3394_vm4, %v3802_v54  ;;  %v3799_v12 = vsub.f32 %v7691_v57, %v3767_v0  ;;  %v3768_v61 = vadd.f32 %v3726_v58, %v7082_v4  ;;  %v3736_v51 = vmul.f32 0.6931472, %v4716_v7  ;;  %4725 = vlog2.f32 %v3676_v2  ;;  %v7693_v4 = vld [vmem:[#allocation11_spill] sm:$0xff] }
 0x7cd   :  { %v4718_v19 = vpop.eup %4717  ;;  %v3679_v33 = vpop.xlane.xlu0 %3678 }
 0x7ce   :  { %3831 = vst.msk [vmem:[%s7330_s3 + $0xa0] sm:$0xff] %vm3394_vm4, %v3799_v12  ;;  %v3800_v13 = vsub.f32 %v7692_v52, %v3768_v61  ;;  %v3773_v9 = vadd.f32 %v3736_v51, %v7087_v31  ;;  %v3738_v5 = vmul.f32 0.6931472, %v4718_v19  ;;  %4727 = vlog2.f32 %v3679_v33  ;;  %v7694_v31 = vld [vmem:[#allocation9_spill] sm:$0xff] }
 0x7cf   :  { %v4720_v20 = vpop.eup %4719  ;;  %v3682_v15 = vpop.xlane.xlu1 %3681 }
 0x7d0   :  { %3832 = vst.msk [vmem:[%s7330_s3 + $0xa8] sm:$0xff] %vm3394_vm4, %v3800_v13  ;;  %v3805_v10 = vsub.f32 %v7693_v4, %v3773_v9  ;;  %v3774_v8 = vadd.f32 %v3738_v5, %v7092_v46  ;;  %v3732_v23 = vmul.f32 0.6931472, %v4720_v20  ;;  %4729 = vlog2.f32 %v3682_v15  ;;  %v7695_v46 = vld [vmem:[#allocation26_spill] sm:$0xff] }
 0x7d1   :  { %v4722_v45 = vpop.eup %4721 }
 0x7d2   :  { %3837 = vst.msk [vmem:[%s7330_s3 + $0xd0] sm:$0xff] %vm3394_vm4, %v3805_v10  ;;  %v3806_v26 = vsub.f32 %v7694_v31, %v3774_v8  ;;  %v3771_v62 = vadd.f32 %v3732_v23, %v7097_v56  ;;  %v3734_v30 = vmul.f32 0.6931472, %v4722_v45 }
 0x7d4   :  { %v4724_v35 = vpop.eup %4723  ;;  %3838 = vst.msk [vmem:[%s7330_s3 + $0xd8] sm:$0xff] %vm3394_vm4, %v3806_v26  ;;  %v3803_v47 = vsub.f32 %v7695_v46, %v3771_v62  ;;  %v3772_v40 = vadd.f32 %v3734_v30, %v7102_v41 }
 0x7d5   :  { %v3740_v39 = vmul.f32 0.6931472, %v4724_v35 }
 0x7d6   :  { %v4726_v24 = vpop.eup %4725  ;;  %3835 = vst.msk [vmem:[%s7330_s3 + $0xc0] sm:$0xff] %vm3394_vm4, %v3803_v47  ;;  %v3804_v56 = vsub.f32 %v6947_v14, %v3772_v40  ;;  %v7697_v14 = vld [vmem:[#allocation32_spill] sm:$0xff] }
 0x7d7   :  { %v3775_v38 = vadd.f32 %v3740_v39, %v7108_v25  ;;  %v3742_v43 = vmul.f32 0.6931472, %v4726_v24 }
 0x7d8   :  { %v4728_v34 = vpop.eup %4727  ;;  %3836 = vst.msk [vmem:[%s7330_s3 + $0xc8] sm:$0xff] %vm3394_vm4, %v3804_v56 }
 0x7d9   :  { %v3807_v41 = vsub.f32 %v7696_v59, %v3775_v38  ;;  %v3776_v60 = vadd.f32 %v3742_v43, %v7113_v11  ;;  %v3744_v18 = vmul.f32 0.6931472, %v4728_v34  ;;  %v7699_v11 = vld [vmem:[#allocation19_spill] sm:$0xff] }
 0x7da   :  { %v4730_v17 = vpop.eup %4729 }
 0x7db   :  { %3839 = vst.msk [vmem:[%s7330_s3 + $0xe0] sm:$0xff] %vm3394_vm4, %v3807_v41  ;;  %v3808_v25 = vsub.f32 %v7697_v14, %v3776_v60  ;;  %v3777_v37 = vadd.f32 %v3744_v18, %v7118_v3  ;;  %v3746_v29 = vmul.f32 0.6931472, %v4730_v17 }
 0x7dd   :  { %3840 = vst.msk [vmem:[%s7330_s3 + $0xe8] sm:$0xff] %vm3394_vm4, %v3808_v25  ;;  %v3809_v44 = vsub.f32 %v7698_v48, %v3777_v37  ;;  %v3778_v6 = vadd.f32 %v3746_v29, %v7699_v11 }
 0x7df   :  { %3841 = vst.msk [vmem:[%s7330_s3 + $0xf0] sm:$0xff] %vm3394_vm4, %v3809_v44  ;;  %v3810_v22 = vsub.f32 %v7700_v50, %v3778_v6 }
 0x7e1   :  { %3842 = vst.msk [vmem:[%s7330_s3 + $0xf8] sm:$0xff] %vm3394_vm4, %v3810_v22 }

</bundles_post_ra>
